<compile_context>
chip_gen: v7x
topology: tpu7x:2x2x1
jax: 0.10.0
libtpu: 0.0.40
codegen_flags: <defaults>
</compile_context>

<pallas_src>
import functools

import numpy as np
import jax
import jax.numpy as jnp
from jax import lax
from jax.experimental import pallas as pl
from jax.experimental.pallas import tpu as pltpu

IOU_GAMMA = 3.0  # cfg.TRAIN.IoU_Gamma (config constant, fixed in-script)

# Rows of the per-anchor scratch table (E1P/E2P and E1N/E2N kept adjacent so the
# kernel can read each pair as one 2-lane / 2-column slab).
_R_IOU, _R_P, _R_POS, _R_E1P, _R_E2P, _R_E1N, _R_E2N = range(7)
_N_ROWS = 8  # padded to 8 sublanes for a clean (8, N) <-> (N, 8) transpose


def _rank_igr_kernel(tgt_sref,                    # (B, 4)  f32, SMEM (scalar prefetch)
                     c_ref, lab_ref, bb_ref,      # VMEM, lane-dense row layouts
                     out_ref,                     # (1, 1, 3) packed [loss1, loss2, valid]
                     row_scr, col_scr, acc_scr,   # VMEM scratch
                     *, gamma, flagsigmoid, n_pad, tile_a):
    b = pl.program_id(0)
    ta = pl.program_id(1)
    n_tiles = pl.num_programs(1)

    # ------- tile 0: build per-anchor vectors once (lane-dense, O(N) EUP) -------
    @pl.when(ta == 0)
    def _init():
        # Target box corners: 4 scalars from SMEM, broadcast to (1, 1) tiles so all
        # arithmetic stays on the vector path.
        tx1 = jnp.full((1, 1), tgt_sref[b, 0], jnp.float32)
        ty1 = jnp.full((1, 1), tgt_sref[b, 1], jnp.float32)
        tx2 = jnp.full((1, 1), tgt_sref[b, 2], jnp.float32)
        ty2 = jnp.full((1, 1), tgt_sref[b, 3], jnp.float32)

        c = c_ref[0]                       # (1, N)  cls[..., 1]
        lab = lab_ref[0]                   # (1, N)
        bb = bb_ref[0]                     # (4, N)

        pos = lab > 0.0
        pos_f = pos.astype(jnp.float32)

        p = c if flagsigmoid else jnp.exp(c)

        # IoU of every anchor box against the single target box (lane-dense).
        x1, y1, x2, y2 = bb[0:1, :], bb[1:2, :], bb[2:3, :], bb[3:4, :]
        xx1 = jnp.maximum(tx1, x1)
        yy1 = jnp.maximum(ty1, y1)
        xx2 = jnp.minimum(tx2, x2)
        yy2 = jnp.minimum(ty2, y2)
        ww = jnp.maximum(xx2 - xx1, 0.0)
        hh = jnp.maximum(yy2 - yy1, 0.0)
        area = (x2 - x1) * (y2 - y1)
        target_a = (tx2 - tx1) * (ty2 - ty1)
        inter = ww * hh
        iou = inter / (area + target_a - inter)
        iou = jnp.where(pos, iou, 0.0)     # sanitize non-positive / padded anchors

        # Max-shift so the factored exponentials cannot overflow where the original
        # difference form would not (shift cancels exactly in the product).
        mp = jnp.max(jnp.where(pos, p, -jnp.inf), axis=1, keepdims=True)
        mp = jnp.maximum(mp, jnp.min(p, axis=1, keepdims=True))     # finite fallback
        mi = jnp.max(jnp.where(pos, iou, -jnp.inf), axis=1, keepdims=True)
        mi = jnp.maximum(mi, 0.0)

        # Fold the positive mask into the factors.  IMPORTANT: the where() clamps
        # the exponent BEFORE exp, so masked-out anchors are exactly 0 (never inf*0).
        dp = jnp.where(pos, p - mp, 0.0)
        di = jnp.where(pos, iou - mi, 0.0)

        row_scr[_R_IOU:_R_IOU + 1, :] = iou
        row_scr[_R_P:_R_P + 1, :] = p
        row_scr[_R_POS:_R_POS + 1, :] = pos_f
        row_scr[_R_E1P:_R_E1P + 1, :] = pos_f * jnp.exp(gamma * dp)    # "b" factor, loss1 (in [0,1])
        row_scr[_R_E2P:_R_E2P + 1, :] = pos_f * jnp.exp(gamma * di)    # "b" factor, loss2 (in [0,1])
        row_scr[_R_E1N:_R_E1N + 1, :] = pos_f * jnp.exp(-gamma * dp)   # "a" factor, loss1
        row_scr[_R_E2N:_R_E2N + 1, :] = pos_f * jnp.exp(-gamma * di)   # "a" factor, loss2
        row_scr[7:8, :] = jnp.zeros_like(iou)

        # Single lane->sublane transpose (XLU) for the column-broadcast side.
        col_scr[...] = jnp.transpose(row_scr[...])

        acc_scr[...] = jnp.zeros_like(acc_scr)

    # ------- every tile: (tile_a x n_pad) ordering masks (VPU) + pair-sum on MXU -------
    col_start = pl.multiple_of(ta * tile_a, tile_a)
    ct = col_scr[pl.ds(col_start, tile_a), :]          # (tile_a, 8)

    iou_a = ct[:, _R_IOU:_R_IOU + 1]                   # (tile_a, 1)
    p_a = ct[:, _R_P:_R_P + 1]                         # (tile_a, 1)
    en_a = ct[:, _R_E1N:_R_E2N + 1]                    # (tile_a, 2) = [e1n, e2n]

    iou_b = row_scr[_R_IOU:_R_IOU + 1, :]              # (1, n_pad)
    p_b = row_scr[_R_P:_R_P + 1, :]                    # (1, n_pad)
    ep_b = col_scr[:, _R_E1P:_R_E2P + 1]               # (n_pad, 2) = [e1p, e2p], values in [0, 1]

    # Stable-sort tie break: lower original index ranks first on ties.
    idx_a = col_start + lax.broadcasted_iota(jnp.int32, (tile_a, 1), 0)
    idx_b = lax.broadcasted_iota(jnp.int32, (1, n_pad), 1)
    tie = idx_a < idx_b

    # Ordering masks only (positivity already folded into the e* factors).
    m1f = ((iou_a > iou_b) | ((iou_a == iou_b) & tie)).astype(jnp.float32)  # rank by IoU
    m2f = ((p_a > p_b) | ((p_a == p_b) & tie)).astype(jnp.float32)          # rank by prob

    # Masked multiply-reduce over "b" on the MXU (idle otherwise).  Column 0 of rf1
    # and column 1 of rf2 are the partial sums we need; HIGHEST keeps f32 accuracy.
    rf1 = jnp.dot(m1f, ep_b, preferred_element_type=jnp.float32,
                  precision=lax.Precision.HIGHEST)     # (tile_a, 2)
    rf2 = jnp.dot(m2f, ep_b, preferred_element_type=jnp.float32,
                  precision=lax.Precision.HIGHEST)     # (tile_a, 2)
    lane2 = lax.broadcasted_iota(jnp.int32, (tile_a, 2), 1)
    r12 = jnp.where(lane2 == 0, rf1, rf2)              # (tile_a, 2) = [r1, r2]

    # Guard: if an anchor has no ranked-below positives (r==0), its (possibly huge)
    # "a" factor must contribute exactly 0 (avoids inf*0 in extreme-logit cases).
    part = jnp.where(r12 > 0.0, en_a * r12, 0.0)       # (tile_a, 2)
    acc_scr[...] = acc_scr[...] + part                 # single vreg add + store

    # ------- last tile: one sublane reduce, normalize, emit packed output -------
    @pl.when(ta == n_tiles - 1)
    def _finalize():
        num_pos = jnp.sum(row_scr[_R_POS:_R_POS + 1, :], axis=1, keepdims=True)  # (1,1)
        npairs = num_pos * (num_pos - 1.0) * 0.5
        denom = jnp.maximum(npairs, 1.0)               # guard; invalid samples masked on host
        sums = jnp.sum(acc_scr[...], axis=0, keepdims=True)                      # (1,2)
        out_ref[0, :, 0:2] = sums / denom
        out_ref[0, :, 2:3] = (num_pos >= 2.0).astype(jnp.float32)


def _vmem_capacity_bytes():
    try:
        return int(pltpu.get_tpu_info().vmem_capacity_bytes)
    except Exception:
        return 64 * 1024 * 1024   # conservative fallback (v7x-sized VMEM)


def rank_igr_loss(cls, label_cls, pred_bboxes, label_target,
                  flagsigmoid=False, gamma=IOU_GAMMA, max_col_tile=2048):
    B = label_cls.shape[0]
    label_cls = label_cls.reshape(B, -1).astype(jnp.float32)
    cls = cls.reshape(B, -1, 2).astype(jnp.float32)
    pred_bboxes = pred_bboxes.reshape(B, 4, -1).astype(jnp.float32)
    label_target = label_target.reshape(B, 4).astype(jnp.float32)
    N = label_cls.shape[1]

    # Lane-align N.
    n_pad = max(128, ((N + 127) // 128) * 128)

    # VMEM-budget-aware column ("a") tile: the per-tile (tile_a x n_pad) mask/compare
    # temporaries are ~5 f32 arrays (~20 B per pair element).  v7x has 64 MiB VMEM,
    # v5e/v6e have 128 MiB, so tile_a is derived per chip; it is always a 128-multiple
    # divisor of n_pad (no padding waste, just more grid steps when small).
    vmem_cap = _vmem_capacity_bytes()
    budget = int(vmem_cap * 0.45)
    tile_cap = max(128, budget // (20 * n_pad))
    tile_cap = min(tile_cap, max_col_tile, n_pad)
    m = n_pad // 128
    d_max = max(1, tile_cap // 128)
    d = max(dd for dd in range(1, d_max + 1) if m % dd == 0)
    tile_a = 128 * d
    n_tiles = n_pad // tile_a
    vmem_limit = min(int(vmem_cap * 0.75), 112 * 1024 * 1024)
    # NOTE(v5e): if bundle dumps show the single vst slot saturating from spilled
    # mask intermediates, lower max_col_tile (e.g. 256).
    # NOTE(v7x): only the batch axis is "parallel"; for B==1 consider splitting the
    # tile axis across the two TensorCores with per-core partial accumulators.

    pad = n_pad - N
    cls1 = cls[..., 1]                                  # (B, N)
    if pad:
        cls1 = jnp.pad(cls1, ((0, 0), (0, pad)))
        label_cls = jnp.pad(label_cls, ((0, 0), (0, pad)))      # padded anchors never positive
        pred_bboxes = jnp.pad(pred_bboxes, ((0, 0), (0, 0), (0, pad)))

    cls1 = cls1[:, None, :]                             # (B, 1, n_pad)
    lab = label_cls[:, None, :]                         # (B, 1, n_pad)

    kernel = functools.partial(_rank_igr_kernel, gamma=float(gamma),
                               flagsigmoid=bool(flagsigmoid),
                               n_pad=n_pad, tile_a=tile_a)

    out = pl.pallas_call(
        kernel,
        out_shape=jax.ShapeDtypeStruct((B, 1, 3), jnp.float32),
        grid_spec=pltpu.PrefetchScalarGridSpec(
            num_scalar_prefetch=1,                      # label_target -> SMEM scalars
            grid=(B, n_tiles),
            in_specs=[
                pl.BlockSpec((1, 1, n_pad), lambda i, t, tgt: (i, 0, 0)),  # cls[..., 1]
                pl.BlockSpec((1, 1, n_pad), lambda i, t, tgt: (i, 0, 0)),  # label_cls
                pl.BlockSpec((1, 4, n_pad), lambda i, t, tgt: (i, 0, 0)),  # pred_bboxes
            ],
            out_specs=pl.BlockSpec((1, 1, 3), lambda i, t, tgt: (i, 0, 0)),
            scratch_shapes=[
                pltpu.VMEM((_N_ROWS, n_pad), jnp.float32),   # row-layout per-anchor table
                pltpu.VMEM((n_pad, _N_ROWS), jnp.float32),   # transposed (column) table
                pltpu.VMEM((tile_a, 2), jnp.float32),        # [loss1, loss2] partials per "a"
            ]),
        compiler_params=pltpu.CompilerParams(
            dimension_semantics=("parallel", "arbitrary"),
            vmem_limit_bytes=vmem_limit),
    )(label_target, cls1, lab, pred_bboxes)

    # Host glue: per-sample skip logic (num_pos < 2 or NaN) and mean over kept samples.
    l1 = out[:, 0, 0]
    l2 = out[:, 0, 1]
    valid = out[:, 0, 2]
    keep = (valid > 0.5) & ~jnp.isnan(l1) & ~jnp.isnan(l2)
    cnt = jnp.sum(keep.astype(jnp.float32))
    safe_cnt = jnp.maximum(cnt, 1.0)
    final_loss1 = jnp.where(cnt > 0, jnp.sum(jnp.where(keep, l1, 0.0)) / safe_cnt, 0.0)
    final_loss2 = jnp.where(cnt > 0, jnp.sum(jnp.where(keep, l2, 0.0)) / safe_cnt, 0.0)
    return final_loss1, final_loss2


def _reference_loss(cls, label_cls, pred_bboxes, label_target, gamma):
    """NumPy float64 reference mirroring the PyTorch loops (stable descending sort)."""
    cls = np.asarray(cls, np.float64)
    label_cls = np.asarray(label_cls, np.float64)
    pred_bboxes = np.asarray(pred_bboxes, np.float64)
    label_target = np.asarray(label_target, np.float64)
    B = label_cls.shape[0]
    label_cls = label_cls.reshape(B, -1)
    cls = cls.reshape(B, -1, 2)
    l1s, l2s = [], []
    for i in range(B):
        pos = label_cls[i] > 0
        if pos.sum() == 0:
            continue
        pos_prob = np.exp(cls[i][pos][:, 1])
        bb = pred_bboxes[i][:, pos]
        t = label_target[i]
        xx1 = np.maximum(t[0], bb[0]); yy1 = np.maximum(t[1], bb[1])
        xx2 = np.minimum(t[2], bb[2]); yy2 = np.minimum(t[3], bb[3])
        ww = np.clip(xx2 - xx1, 0, None); hh = np.clip(yy2 - yy1, 0, None)
        area = (bb[2] - bb[0]) * (bb[3] - bb[1])
        ta = (t[2] - t[0]) * (t[3] - t[1])
        inter = ww * hh
        iou = inter / (area + ta - inter)
        n = iou.shape[0]
        if n < 2:
            continue  # empty-pair mean is NaN in torch -> skipped
        iou_idx = np.argsort(-iou, kind="stable")
        a, b = [], []
        for ii in range(n - 1):
            for jj in range(ii + 1, n):
                a.append(iou_idx[ii]); b.append(iou_idx[jj])
        a, b = np.array(a), np.array(b)
        loss1 = np.exp(-gamma * (pos_prob[a] - pos_prob[b])).mean()
        prob_idx = np.argsort(-pos_prob, kind="stable")
        a2, b2 = [], []
        for ii in range(n - 1):
            for jj in range(ii + 1, n):
                a2.append(prob_idx[ii]); b2.append(prob_idx[jj])
        a2, b2 = np.array(a2), np.array(b2)
        loss2 = np.exp(-gamma * (iou[a2] - iou[b2])).mean()
        if np.isnan(loss1) or np.isnan(loss2):
            continue
        l1s.append(loss1); l2s.append(loss2)
    f1 = float(np.mean(l1s)) if l1s else 0.0
    f2 = float(np.mean(l2s)) if l2s else 0.0
    return f1, f2


if __name__ == "__main__":
    B, H, W = 2, 16, 16
    N = H * W

    key = jax.random.PRNGKey(0)
    k_cls, k_lab, k_cx, k_cy, k_w, k_h, k_tgt = jax.random.split(key, 7)

    cls = 0.2 * jax.random.normal(k_cls, (B, N, 2), dtype=jnp.float32)
    label_cls = (jax.random.uniform(k_lab, (B, N)) < 0.08).astype(jnp.float32)

    cx = jax.random.uniform(k_cx, (B, N), minval=0.25, maxval=0.75)
    cy = jax.random.uniform(k_cy, (B, N), minval=0.25, maxval=0.75)
    bw = jax.random.uniform(k_w, (B, N), minval=0.15, maxval=0.45)
    bh = jax.random.uniform(k_h, (B, N), minval=0.15, maxval=0.45)
    pred_bboxes = jnp.stack([cx - bw / 2, cy - bh / 2, cx + bw / 2, cy + bh / 2],
                            axis=1).astype(jnp.float32)          # (B, 4, N)

    tgt_noise = 0.02 * jax.random.normal(k_tgt, (B, 4), dtype=jnp.float32)
    label_target = jnp.array([[0.3, 0.3, 0.7, 0.7]] * B, dtype=jnp.float32) + tgt_noise

    loss1, loss2 = jax.jit(rank_igr_loss)(cls, label_cls, pred_bboxes, label_target)
    loss1 = jax.block_until_ready(loss1)
    loss2 = jax.block_until_ready(loss2)

    ref1, ref2 = _reference_loss(cls, label_cls, pred_bboxes, label_target, IOU_GAMMA)
    assert np.allclose(float(loss1), ref1, rtol=2e-3, atol=1e-5), (float(loss1), ref1)
    assert np.allclose(float(loss2), ref2, rtol=2e-3, atol=1e-5), (float(loss2), ref2)

    print("KERNEL_OK")
</pallas_src>

<mosaic_0001>
module attributes {stable_mosaic.version = 11 : i64} {
  func.func @_rank_igr_kernel(%arg0: i32, %arg1: i32, %arg2: memref<2x4xf32, #tpu.memory_space<smem>>, %arg3: memref<1x1x256xf32, #tpu.memory_space<vmem>>, %arg4: memref<1x1x256xf32, #tpu.memory_space<vmem>>, %arg5: memref<1x4x256xf32, #tpu.memory_space<vmem>>, %arg6: memref<1x1x3xf32, #tpu.memory_space<vmem>>, %arg7: memref<8x256xf32, #tpu.memory_space<vmem>>, %arg8: memref<256x8xf32, #tpu.memory_space<vmem>>, %arg9: memref<256x2xf32, #tpu.memory_space<vmem>>) attributes {dimension_semantics = [#tpu.dimension_semantics<parallel>, #tpu.dimension_semantics<arbitrary>], iteration_bounds = array<i64: 2, 1>, scalar_prefetch = 1 : i64, scratch_operands = 3 : i64, tpu.core_type = #tpu.core_type<tc>, window_params = [{transform_indices = @transform_0, window_bounds = array<i64: 1, 1, 256>}, {transform_indices = @transform_1, window_bounds = array<i64: 1, 1, 256>}, {transform_indices = @transform_2, window_bounds = array<i64: 1, 4, 256>}, {transform_indices = @transform_3, window_bounds = array<i64: 1, 1, 3>}]} {
    %c0_i32 = arith.constant 0 : i32
    %0 = arith.cmpi eq, %arg1, %c0_i32 : i32
    %1 = arith.extui %0 : i1 to i32
    %c0_i32_0 = arith.constant 0 : i32
    %2 = arith.cmpi ne, %1, %c0_i32_0 : i32
    scf.if %2 {
      %57 = arith.index_cast %arg0 : i32 to index
      %c0_15 = arith.constant 0 : index
      %58 = memref.load %arg2[%57, %c0_15] : memref<2x4xf32, #tpu.memory_space<smem>>
      %59 = vector.broadcast %58 : f32 to vector<1x1xf32>
      %60 = arith.index_cast %arg0 : i32 to index
      %c1_16 = arith.constant 1 : index
      %61 = memref.load %arg2[%60, %c1_16] : memref<2x4xf32, #tpu.memory_space<smem>>
      %62 = vector.broadcast %61 : f32 to vector<1x1xf32>
      %63 = arith.index_cast %arg0 : i32 to index
      %c2 = arith.constant 2 : index
      %64 = memref.load %arg2[%63, %c2] : memref<2x4xf32, #tpu.memory_space<smem>>
      %65 = vector.broadcast %64 : f32 to vector<1x1xf32>
      %66 = arith.index_cast %arg0 : i32 to index
      %c3_17 = arith.constant 3 : index
      %67 = memref.load %arg2[%66, %c3_17] : memref<2x4xf32, #tpu.memory_space<smem>>
      %68 = vector.broadcast %67 : f32 to vector<1x1xf32>
      %c0_18 = arith.constant 0 : index
      %c0_19 = arith.constant 0 : index
      %c0_20 = arith.constant 0 : index
      %69 = vector.load %arg3[%c0_18, %c0_19, %c0_20] : memref<1x1x256xf32, #tpu.memory_space<vmem>>, vector<1x1x256xf32>
      %70 = vector.shape_cast %69 : vector<1x1x256xf32> to vector<1x256xf32>
      %c0_21 = arith.constant 0 : index
      %c0_22 = arith.constant 0 : index
      %c0_23 = arith.constant 0 : index
      %71 = vector.load %arg4[%c0_21, %c0_22, %c0_23] : memref<1x1x256xf32, #tpu.memory_space<vmem>>, vector<1x1x256xf32>
      %72 = vector.shape_cast %71 : vector<1x1x256xf32> to vector<1x256xf32>
      %c0_24 = arith.constant 0 : index
      %c0_25 = arith.constant 0 : index
      %c0_26 = arith.constant 0 : index
      %73 = vector.load %arg5[%c0_24, %c0_25, %c0_26] : memref<1x4x256xf32, #tpu.memory_space<vmem>>, vector<1x4x256xf32>
      %74 = vector.shape_cast %73 : vector<1x4x256xf32> to vector<4x256xf32>
      %cst_27 = arith.constant 0.000000e+00 : f32
      %75 = vector.broadcast %cst_27 : f32 to vector<1x256xf32>
      %76 = arith.cmpf ogt, %72, %75 : vector<1x256xf32>
      %77 = arith.extui %76 : vector<1x256xi1> to vector<1x256xi32>
      %78 = arith.sitofp %77 : vector<1x256xi32> to vector<1x256xf32>
      %79 = math.exp %70 : vector<1x256xf32>
      %80 = vector.extract_strided_slice %74 {offsets = [0, 0], sizes = [1, 256], strides = [1, 1]} : vector<4x256xf32> to vector<1x256xf32>
      %81 = vector.extract_strided_slice %74 {offsets = [1, 0], sizes = [1, 256], strides = [1, 1]} : vector<4x256xf32> to vector<1x256xf32>
      %82 = vector.extract_strided_slice %74 {offsets = [2, 0], sizes = [1, 256], strides = [1, 1]} : vector<4x256xf32> to vector<1x256xf32>
      %83 = vector.extract_strided_slice %74 {offsets = [3, 0], sizes = [1, 256], strides = [1, 1]} : vector<4x256xf32> to vector<1x256xf32>
      %84 = vector.broadcast %59 : vector<1x1xf32> to vector<1x256xf32>
      %85 = arith.maximumf %84, %80 : vector<1x256xf32>
      %86 = vector.broadcast %62 : vector<1x1xf32> to vector<1x256xf32>
      %87 = arith.maximumf %86, %81 : vector<1x256xf32>
      %88 = vector.broadcast %65 : vector<1x1xf32> to vector<1x256xf32>
      %89 = arith.minimumf %88, %82 : vector<1x256xf32>
      %90 = vector.broadcast %68 : vector<1x1xf32> to vector<1x256xf32>
      %91 = arith.minimumf %90, %83 : vector<1x256xf32>
      %92 = arith.subf %89, %85 : vector<1x256xf32>
      %cst_28 = arith.constant 0.000000e+00 : f32
      %93 = vector.broadcast %cst_28 : f32 to vector<1x256xf32>
      %94 = arith.maximumf %92, %93 : vector<1x256xf32>
      %95 = arith.subf %91, %87 : vector<1x256xf32>
      %cst_29 = arith.constant 0.000000e+00 : f32
      %96 = vector.broadcast %cst_29 : f32 to vector<1x256xf32>
      %97 = arith.maximumf %95, %96 : vector<1x256xf32>
      %98 = arith.subf %82, %80 : vector<1x256xf32>
      %99 = arith.subf %83, %81 : vector<1x256xf32>
      %100 = arith.mulf %98, %99 : vector<1x256xf32>
      %101 = arith.subf %65, %59 : vector<1x1xf32>
      %102 = arith.subf %68, %62 : vector<1x1xf32>
      %103 = arith.mulf %101, %102 : vector<1x1xf32>
      %104 = arith.mulf %94, %97 : vector<1x256xf32>
      %105 = vector.broadcast %103 : vector<1x1xf32> to vector<1x256xf32>
      %106 = arith.addf %100, %105 : vector<1x256xf32>
      %107 = arith.subf %106, %104 : vector<1x256xf32>
      %108 = arith.divf %104, %107 : vector<1x256xf32>
      %cst_30 = arith.constant 0.000000e+00 : f32
      %109 = vector.broadcast %cst_30 : f32 to vector<1x256xf32>
      %110 = arith.select %76, %108, %109 : vector<1x256xi1>, vector<1x256xf32>
      %cst_31 = arith.constant 0xFF800000 : f32
      %111 = vector.broadcast %cst_31 : f32 to vector<1x256xf32>
      %112 = arith.select %76, %79, %111 : vector<1x256xi1>, vector<1x256xf32>
      %cst_32 = arith.constant dense<0xFF800000> : vector<1xf32>
      %113 = vector.multi_reduction <maximumf>, %112, %cst_32 [1] : vector<1x256xf32> to vector<1xf32>
      %114 = vector.shape_cast %113 : vector<1xf32> to vector<1x1xf32>
      %cst_33 = arith.constant dense<0x7F800000> : vector<1xf32>
      %115 = vector.multi_reduction <minimumf>, %79, %cst_33 [1] : vector<1x256xf32> to vector<1xf32>
      %116 = vector.shape_cast %115 : vector<1xf32> to vector<1x1xf32>
      %117 = arith.maximumf %114, %116 : vector<1x1xf32>
      %cst_34 = arith.constant 0xFF800000 : f32
      %118 = vector.broadcast %cst_34 : f32 to vector<1x256xf32>
      %119 = arith.select %76, %110, %118 : vector<1x256xi1>, vector<1x256xf32>
      %cst_35 = arith.constant dense<0xFF800000> : vector<1xf32>
      %120 = vector.multi_reduction <maximumf>, %119, %cst_35 [1] : vector<1x256xf32> to vector<1xf32>
      %121 = vector.shape_cast %120 : vector<1xf32> to vector<1x1xf32>
      %cst_36 = arith.constant 0.000000e+00 : f32
      %122 = vector.broadcast %cst_36 : f32 to vector<1x1xf32>
      %123 = arith.maximumf %121, %122 : vector<1x1xf32>
      %124 = vector.broadcast %117 : vector<1x1xf32> to vector<1x256xf32>
      %125 = arith.subf %79, %124 : vector<1x256xf32>
      %cst_37 = arith.constant 0.000000e+00 : f32
      %126 = vector.broadcast %cst_37 : f32 to vector<1x256xf32>
      %127 = arith.select %76, %125, %126 : vector<1x256xi1>, vector<1x256xf32>
      %128 = vector.broadcast %123 : vector<1x1xf32> to vector<1x256xf32>
      %129 = arith.subf %110, %128 : vector<1x256xf32>
      %cst_38 = arith.constant 0.000000e+00 : f32
      %130 = vector.broadcast %cst_38 : f32 to vector<1x256xf32>
      %131 = arith.select %76, %129, %130 : vector<1x256xi1>, vector<1x256xf32>
      %c0_39 = arith.constant 0 : index
      %c0_40 = arith.constant 0 : index
      %132 = vector.load %arg7[%c0_39, %c0_40] : memref<8x256xf32, #tpu.memory_space<vmem>>, vector<1x256xf32>
      tpu.vector_store %arg7[%c0_39, %c0_40], %110 {strides = array<i32>} : memref<8x256xf32, #tpu.memory_space<vmem>>, vector<1x256xf32>,
      %c1_41 = arith.constant 1 : index
      %c0_42 = arith.constant 0 : index
      %133 = vector.load %arg7[%c1_41, %c0_42] : memref<8x256xf32, #tpu.memory_space<vmem>>, vector<1x256xf32>
      tpu.vector_store %arg7[%c1_41, %c0_42], %79 {strides = array<i32>} : memref<8x256xf32, #tpu.memory_space<vmem>>, vector<1x256xf32>,
      %c2_43 = arith.constant 2 : index
      %c0_44 = arith.constant 0 : index
      %134 = vector.load %arg7[%c2_43, %c0_44] : memref<8x256xf32, #tpu.memory_space<vmem>>, vector<1x256xf32>
      tpu.vector_store %arg7[%c2_43, %c0_44], %78 {strides = array<i32>} : memref<8x256xf32, #tpu.memory_space<vmem>>, vector<1x256xf32>,
      %cst_45 = arith.constant 3.000000e+00 : f32
      %135 = vector.broadcast %cst_45 : f32 to vector<1x256xf32>
      %136 = arith.mulf %135, %127 : vector<1x256xf32>
      %137 = math.exp %136 : vector<1x256xf32>
      %138 = arith.mulf %78, %137 : vector<1x256xf32>
      %c3_46 = arith.constant 3 : index
      %c0_47 = arith.constant 0 : index
      %139 = vector.load %arg7[%c3_46, %c0_47] : memref<8x256xf32, #tpu.memory_space<vmem>>, vector<1x256xf32>
      tpu.vector_store %arg7[%c3_46, %c0_47], %138 {strides = array<i32>} : memref<8x256xf32, #tpu.memory_space<vmem>>, vector<1x256xf32>,
      %cst_48 = arith.constant 3.000000e+00 : f32
      %140 = vector.broadcast %cst_48 : f32 to vector<1x256xf32>
      %141 = arith.mulf %140, %131 : vector<1x256xf32>
      %142 = math.exp %141 : vector<1x256xf32>
      %143 = arith.mulf %78, %142 : vector<1x256xf32>
      %c4 = arith.constant 4 : index
      %c0_49 = arith.constant 0 : index
      %144 = vector.load %arg7[%c4, %c0_49] : memref<8x256xf32, #tpu.memory_space<vmem>>, vector<1x256xf32>
      tpu.vector_store %arg7[%c4, %c0_49], %143 {strides = array<i32>} : memref<8x256xf32, #tpu.memory_space<vmem>>, vector<1x256xf32>,
      %cst_50 = arith.constant -3.000000e+00 : f32
      %145 = vector.broadcast %cst_50 : f32 to vector<1x256xf32>
      %146 = arith.mulf %145, %127 : vector<1x256xf32>
      %147 = math.exp %146 : vector<1x256xf32>
      %148 = arith.mulf %78, %147 : vector<1x256xf32>
      %c5 = arith.constant 5 : index
      %c0_51 = arith.constant 0 : index
      %149 = vector.load %arg7[%c5, %c0_51] : memref<8x256xf32, #tpu.memory_space<vmem>>, vector<1x256xf32>
      tpu.vector_store %arg7[%c5, %c0_51], %148 {strides = array<i32>} : memref<8x256xf32, #tpu.memory_space<vmem>>, vector<1x256xf32>,
      %cst_52 = arith.constant -3.000000e+00 : f32
      %150 = vector.broadcast %cst_52 : f32 to vector<1x256xf32>
      %151 = arith.mulf %150, %131 : vector<1x256xf32>
      %152 = math.exp %151 : vector<1x256xf32>
      %153 = arith.mulf %78, %152 : vector<1x256xf32>
      %c6 = arith.constant 6 : index
      %c0_53 = arith.constant 0 : index
      %154 = vector.load %arg7[%c6, %c0_53] : memref<8x256xf32, #tpu.memory_space<vmem>>, vector<1x256xf32>
      tpu.vector_store %arg7[%c6, %c0_53], %153 {strides = array<i32>} : memref<8x256xf32, #tpu.memory_space<vmem>>, vector<1x256xf32>,
      %cst_54 = arith.constant 0.000000e+00 : f32
      %155 = vector.broadcast %cst_54 : f32 to vector<1x256xf32>
      %c7 = arith.constant 7 : index
      %c0_55 = arith.constant 0 : index
      %156 = vector.load %arg7[%c7, %c0_55] : memref<8x256xf32, #tpu.memory_space<vmem>>, vector<1x256xf32>
      tpu.vector_store %arg7[%c7, %c0_55], %155 {strides = array<i32>} : memref<8x256xf32, #tpu.memory_space<vmem>>, vector<1x256xf32>,
      %c0_56 = arith.constant 0 : index
      %c0_57 = arith.constant 0 : index
      %157 = vector.load %arg7[%c0_56, %c0_57] : memref<8x256xf32, #tpu.memory_space<vmem>>, vector<8x256xf32>
      %158 = tpu.transpose %157, [1, 0] : vector<8x256xf32> -> vector<256x8xf32>
      %c0_58 = arith.constant 0 : index
      %c0_59 = arith.constant 0 : index
      %159 = vector.load %arg8[%c0_58, %c0_59] : memref<256x8xf32, #tpu.memory_space<vmem>>, vector<256x8xf32>
      tpu.vector_store %arg8[%c0_58, %c0_59], %158 {strides = array<i32>} : memref<256x8xf32, #tpu.memory_space<vmem>>, vector<256x8xf32>,
      %cst_60 = arith.constant 0.000000e+00 : f32
      %160 = vector.broadcast %cst_60 : f32 to vector<256x2xf32>
      %c0_61 = arith.constant 0 : index
      %c0_62 = arith.constant 0 : index
      %161 = vector.load %arg9[%c0_61, %c0_62] : memref<256x2xf32, #tpu.memory_space<vmem>>, vector<256x2xf32>
      tpu.vector_store %arg9[%c0_61, %c0_62], %160 {strides = array<i32>} : memref<256x2xf32, #tpu.memory_space<vmem>>, vector<256x2xf32>,
    } else {
    }
    %c256_i32 = arith.constant 256 : i32
    %3 = arith.muli %arg1, %c256_i32 : i32
    %4 = tpu.assume_multiple %3, 256 : i32
    %5 = arith.index_cast %4 : i32 to index
    %c0 = arith.constant 0 : index
    %6 = vector.load %arg8[%5, %c0] : memref<256x8xf32, #tpu.memory_space<vmem>>, vector<256x8xf32>
    %7 = vector.extract_strided_slice %6 {offsets = [0, 0], sizes = [256, 1], strides = [1, 1]} : vector<256x8xf32> to vector<256x1xf32>
    %8 = vector.extract_strided_slice %6 {offsets = [0, 1], sizes = [256, 1], strides = [1, 1]} : vector<256x8xf32> to vector<256x1xf32>
    %9 = vector.extract_strided_slice %6 {offsets = [0, 5], sizes = [256, 2], strides = [1, 1]} : vector<256x8xf32> to vector<256x2xf32>
    %c0_1 = arith.constant 0 : index
    %c0_2 = arith.constant 0 : index
    %10 = vector.load %arg7[%c0_1, %c0_2] : memref<8x256xf32, #tpu.memory_space<vmem>>, vector<1x256xf32>
    %c1 = arith.constant 1 : index
    %c0_3 = arith.constant 0 : index
    %11 = vector.load %arg7[%c1, %c0_3] : memref<8x256xf32, #tpu.memory_space<vmem>>, vector<1x256xf32>
    %c0_4 = arith.constant 0 : index
    %c3 = arith.constant 3 : index
    %12 = vector.load %arg8[%c0_4, %c3] : memref<256x8xf32, #tpu.memory_space<vmem>>, vector<256x2xf32>
    %13 = tpu.iota {dimensions = array<i32: 0>} : vector<256x1xi32>
    %14 = vector.broadcast %4 : i32 to vector<256x1xi32>
    %15 = arith.addi %14, %13 : vector<256x1xi32>
    %16 = tpu.iota {dimensions = array<i32: 1>} : vector<1x256xi32>
    %17 = vector.broadcast %15 : vector<256x1xi32> to vector<256x256xi32>
    %18 = vector.broadcast %16 : vector<1x256xi32> to vector<256x256xi32>
    %19 = arith.cmpi slt, %17, %18 : vector<256x256xi32>
    %20 = vector.broadcast %7 : vector<256x1xf32> to vector<256x256xf32>
    %21 = vector.broadcast %10 : vector<1x256xf32> to vector<256x256xf32>
    %22 = arith.cmpf ogt, %20, %21 : vector<256x256xf32>
    %23 = vector.broadcast %7 : vector<256x1xf32> to vector<256x256xf32>
    %24 = vector.broadcast %10 : vector<1x256xf32> to vector<256x256xf32>
    %25 = arith.cmpf oeq, %23, %24 : vector<256x256xf32>
    %26 = arith.andi %25, %19 : vector<256x256xi1>
    %27 = arith.ori %22, %26 : vector<256x256xi1>
    %28 = arith.extui %27 : vector<256x256xi1> to vector<256x256xi32>
    %29 = arith.sitofp %28 : vector<256x256xi32> to vector<256x256xf32>
    %30 = vector.broadcast %8 : vector<256x1xf32> to vector<256x256xf32>
    %31 = vector.broadcast %11 : vector<1x256xf32> to vector<256x256xf32>
    %32 = arith.cmpf ogt, %30, %31 : vector<256x256xf32>
    %33 = vector.broadcast %8 : vector<256x1xf32> to vector<256x256xf32>
    %34 = vector.broadcast %11 : vector<1x256xf32> to vector<256x256xf32>
    %35 = arith.cmpf oeq, %33, %34 : vector<256x256xf32>
    %36 = arith.andi %35, %19 : vector<256x256xi1>
    %37 = arith.ori %32, %36 : vector<256x256xi1>
    %38 = arith.extui %37 : vector<256x256xi1> to vector<256x256xi32>
    %39 = arith.sitofp %38 : vector<256x256xi32> to vector<256x256xf32>
    %cst = arith.constant dense<0.000000e+00> : vector<256x2xf32>
    %40 = tpu.matmul %29, %12, %cst {dimension_numbers = #tpu.dot_dimension_numbers<[1], [0], [0], [1], [0, 0, 1, 1], [], []>, precision = #tpu.contract_precision<fp32>} : vector<256x256xf32>, vector<256x2xf32>, vector<256x2xf32> -> vector<256x2xf32>
    %cst_5 = arith.constant dense<0.000000e+00> : vector<256x2xf32>
    %41 = tpu.matmul %39, %12, %cst_5 {dimension_numbers = #tpu.dot_dimension_numbers<[1], [0], [0], [1], [0, 0, 1, 1], [], []>, precision = #tpu.contract_precision<fp32>} : vector<256x256xf32>, vector<256x2xf32>, vector<256x2xf32> -> vector<256x2xf32>
    %42 = tpu.iota {dimensions = array<i32: 1>} : vector<256x2xi32>
    %c0_i32_6 = arith.constant 0 : i32
    %43 = vector.broadcast %c0_i32_6 : i32 to vector<256x2xi32>
    %44 = arith.cmpi eq, %42, %43 : vector<256x2xi32>
    %45 = arith.select %44, %40, %41 : vector<256x2xi1>, vector<256x2xf32>
    %cst_7 = arith.constant 0.000000e+00 : f32
    %46 = vector.broadcast %cst_7 : f32 to vector<256x2xf32>
    %47 = arith.cmpf ogt, %45, %46 : vector<256x2xf32>
    %48 = arith.mulf %9, %45 : vector<256x2xf32>
    %cst_8 = arith.constant 0.000000e+00 : f32
    %49 = vector.broadcast %cst_8 : f32 to vector<256x2xf32>
    %50 = arith.select %47, %48, %49 : vector<256x2xi1>, vector<256x2xf32>
    %c0_9 = arith.constant 0 : index
    %c0_10 = arith.constant 0 : index
    %51 = vector.load %arg9[%c0_9, %c0_10] : memref<256x2xf32, #tpu.memory_space<vmem>>, vector<256x2xf32>
    %52 = arith.addf %51, %50 : vector<256x2xf32>
    %c0_11 = arith.constant 0 : index
    %c0_12 = arith.constant 0 : index
    %53 = vector.load %arg9[%c0_11, %c0_12] : memref<256x2xf32, #tpu.memory_space<vmem>>, vector<256x2xf32>
    tpu.vector_store %arg9[%c0_11, %c0_12], %52 {strides = array<i32>} : memref<256x2xf32, #tpu.memory_space<vmem>>, vector<256x2xf32>,
    %c0_i32_13 = arith.constant 0 : i32
    %54 = arith.cmpi eq, %arg1, %c0_i32_13 : i32
    %55 = arith.extui %54 : i1 to i32
    %c0_i32_14 = arith.constant 0 : i32
    %56 = arith.cmpi ne, %55, %c0_i32_14 : i32
    scf.if %56 {
      %c2 = arith.constant 2 : index
      %c0_15 = arith.constant 0 : index
      %57 = vector.load %arg7[%c2, %c0_15] : memref<8x256xf32, #tpu.memory_space<vmem>>, vector<1x256xf32>
      %cst_16 = arith.constant dense<0.000000e+00> : vector<1xf32>
      %58 = vector.multi_reduction <add>, %57, %cst_16 [1] : vector<1x256xf32> to vector<1xf32>
      %59 = vector.shape_cast %58 : vector<1xf32> to vector<1x1xf32>
      %cst_17 = arith.constant 1.000000e+00 : f32
      %60 = vector.broadcast %cst_17 : f32 to vector<1x1xf32>
      %61 = arith.subf %59, %60 : vector<1x1xf32>
      %62 = arith.mulf %59, %61 : vector<1x1xf32>
      %cst_18 = arith.constant 5.000000e-01 : f32
      %63 = vector.broadcast %cst_18 : f32 to vector<1x1xf32>
      %64 = arith.mulf %62, %63 : vector<1x1xf32>
      %cst_19 = arith.constant 1.000000e+00 : f32
      %65 = vector.broadcast %cst_19 : f32 to vector<1x1xf32>
      %66 = arith.maximumf %64, %65 : vector<1x1xf32>
      %c0_20 = arith.constant 0 : index
      %c0_21 = arith.constant 0 : index
      %67 = vector.load %arg9[%c0_20, %c0_21] : memref<256x2xf32, #tpu.memory_space<vmem>>, vector<256x2xf32>
      %cst_22 = arith.constant dense<0.000000e+00> : vector<2xf32>
      %68 = vector.multi_reduction <add>, %67, %cst_22 [0] : vector<256x2xf32> to vector<2xf32>
      %69 = vector.shape_cast %68 : vector<2xf32> to vector<1x2xf32>
      %70 = vector.broadcast %66 : vector<1x1xf32> to vector<1x2xf32>
      %71 = arith.divf %69, %70 : vector<1x2xf32>
      %c0_23 = arith.constant 0 : index
      %c0_24 = arith.constant 0 : index
      %c0_25 = arith.constant 0 : index
      %72 = vector.load %arg6[%c0_23, %c0_24, %c0_25] : memref<1x1x3xf32, #tpu.memory_space<vmem>>, vector<1x1x2xf32>
      %73 = vector.shape_cast %72 : vector<1x1x2xf32> to vector<1x2xf32>
      %74 = vector.shape_cast %71 : vector<1x2xf32> to vector<1x1x2xf32>
      tpu.vector_store %arg6[%c0_23, %c0_24, %c0_25], %74 {strides = array<i32>} : memref<1x1x3xf32, #tpu.memory_space<vmem>>, vector<1x1x2xf32>,
      %cst_26 = arith.constant 2.000000e+00 : f32
      %75 = vector.broadcast %cst_26 : f32 to vector<1x1xf32>
      %76 = arith.cmpf oge, %59, %75 : vector<1x1xf32>
      %77 = arith.extui %76 : vector<1x1xi1> to vector<1x1xi32>
      %78 = arith.sitofp %77 : vector<1x1xi32> to vector<1x1xf32>
      %c0_27 = arith.constant 0 : index
      %c0_28 = arith.constant 0 : index
      %c2_29 = arith.constant 2 : index
      %79 = vector.load %arg6[%c0_27, %c0_28, %c2_29] : memref<1x1x3xf32, #tpu.memory_space<vmem>>, vector<1x1x1xf32>
      %80 = vector.shape_cast %79 : vector<1x1x1xf32> to vector<1x1xf32>
      %81 = vector.shape_cast %78 : vector<1x1xf32> to vector<1x1x1xf32>
      tpu.vector_store %arg6[%c0_27, %c0_28, %c2_29], %81 {strides = array<i32>} : memref<1x1x3xf32, #tpu.memory_space<vmem>>, vector<1x1x1xf32>,
    } else {
    }
    return
  }
  func.func @transform_0(%arg0: i32, %arg1: i32, %arg2: memref<2x4xf32, #tpu.memory_space<smem>>) -> (i32, i32, i32) {
    %c0_i32 = arith.constant 0 : i32
    %c0_i32_0 = arith.constant 0 : i32
    %c0_i32_1 = arith.constant 0 : i32
    return %arg0, %c0_i32, %c0_i32_0 : i32, i32, i32
  }
  func.func @transform_1(%arg0: i32, %arg1: i32, %arg2: memref<2x4xf32, #tpu.memory_space<smem>>) -> (i32, i32, i32) {
    %c0_i32 = arith.constant 0 : i32
    %c0_i32_0 = arith.constant 0 : i32
    %c0_i32_1 = arith.constant 0 : i32
    return %arg0, %c0_i32, %c0_i32_0 : i32, i32, i32
  }
  func.func @transform_2(%arg0: i32, %arg1: i32, %arg2: memref<2x4xf32, #tpu.memory_space<smem>>) -> (i32, i32, i32) {
    %c0_i32 = arith.constant 0 : i32
    %c0_i32_0 = arith.constant 0 : i32
    %c0_i32_1 = arith.constant 0 : i32
    return %arg0, %c0_i32, %c0_i32_0 : i32, i32, i32
  }
  func.func @transform_3(%arg0: i32, %arg1: i32, %arg2: memref<2x4xf32, #tpu.memory_space<smem>>) -> (i32, i32, i32) {
    %c0_i32 = arith.constant 0 : i32
    %c0_i32_0 = arith.constant 0 : i32
    %c0_i32_1 = arith.constant 0 : i32
    return %arg0, %c0_i32, %c0_i32_0 : i32, i32, i32
  }
}

</mosaic_0001>

<bundles_post_ra>
// kernel: rank_igr_loss.1
= control target key start
LH: loop header
LB: loop body
LE: loop exit
PB: predicated region body
PF: predicated region fallthrough
CT: control target
= control target key end

     0   :  { %s16236_s0 = inlined_call_operand.vmem [shape: f32[2,4], index: 0, kind: input, shape index: {}]   ;;  %s16237_s1 = inlined_call_operand.vmem [shape: f32[2,1,256], index: 1, kind: input, shape index: {}]   ;;  %s16238_s2 = inlined_call_operand.vmem [shape: f32[2,1,256], index: 2, kind: input, shape index: {}]   ;;  %s16239_s3 = inlined_call_operand.vmem [shape: f32[2,4,256], index: 3, kind: input, shape index: {}]   ;;  %s16240_s4 = inlined_call_operand.vmem [shape: f32[2,1,3], index: 4, kind: output, shape index: {}]  }
   0x1   :  { %s9_s17 = sshll.u32 %s16236_s0, 4  ;;  %s10_s17 = int_to_ptr.vmem [resolvable:$true] %s9_s17 }
   0x2   :  { %s9712_s18 = scalar_lea.vmem %s10_s17, 32  ;;  %p9717_p1 = scmp.lt.s32.totalorder %s10_s17, %s10_s17 }
   0x3   :  { %p9713_p0 = scmp.ne.s32.totalorder %s10_s17, %s9712_s18  ;;  %p9718_p2 = scmp.lt.s32.totalorder %s9712_s18, %s9712_s18 }
   0x5   :  { %p9719_p3 = por %p9718_p2, %p9717_p1 }
   0x7   :  { %p9720_p4 = pnand %p9719_p3, %p9713_p0 }
   0x9   :  { %9723 = shalt.err (!%p9720_p4)  }
   0xa   :  { %s9750_s19 = smov [#allocation6]  }
   0xb   :  { %12 = dma.vmem_to_smem %s10_s17, 32, %s9750_s19, [#allocation5] }
   0xc   :  { %9736 = dma.done.wait [#allocation5], 32 }
   0xd   :  { %9737 = vsyncadd [#allocation5], 4294967264 }
   0xe   :  { %14 = sfence }
   0xf   :  { %s9788_s20 = smov 0   ;;  %s9790_s21 = smov 0  }
  0x10   :  { %s9792_s22 = smov 0  }
  0x11 LB: > { %s32_s0 = sadd.s32 1, %s9744_s21  ;;  %p7848_p5 = scmp.ge.s32.totalorder %s9748_s22, 1  ;;  %s9748_s22 = sphi %s9792_s22, %s20_s22   ;;  %s9744_s21 = sphi %s9790_s21, %s19164_s21   ;;  %s9740_s20 = sphi %s9788_s20, %s19163_s20  }
  0x12   : > { %p34_p6 = scmp.ge.s32.totalorder %s32_s0, 2  ;;  %p174_p7 = scmp.lt.s32.totalorder %s9748_s22, 3 }
  0x14   : > { %s19166_s0 = smov (%p34_p6, %s32_s0), 0  ;;  %p175_p8 = pnand %p7848_p5, %p174_p7 }
  0x16   : > { %178 = sbr.rel (%p175_p8) target bundleno = 2037 (0x7f5), region = 32 }
  0x1d   : > { %p204_p9 = scmp.lt.s32.totalorder %s9740_s20, 1  ;;  %s7853_s23 = sshll.u32 %s9740_s20, 7  ;;  %v16251_v4 = vlaneseq  ;;  %vm16350_vm1 = vcmask 1040384   ;;  %v9751_v45 = vmov 1966171168   ;;  %v16249_v50 = vmov 0.0  }
  0x1e   : > { %s225_s24 = sld [smem:[#allocation6 + %s7853_s23]]  ;;  %s227_s25 = sadd.s32 1, %s7853_s23  ;;  %v281_v46 = vunpack.c.l.s4 %v9751_v45  ;;  %vm475_vm3 = vcmask 64512  }
  0x1f   : > { %s19168_s20 = smov (!%p204_p9, %s9740_s20), 1  ;;  %s9808_s26 = sld [smem:[#allocation6 + %s227_s25]]  ;;  %v9823_v11 = vshrl.u32 %v16251_v4, 7  ;;  %vm9849_vm2 = vcmp.lt.s32.totalorder %v16251_v4, 256 }
  0x20   : > { %s230_s27 = sadd.s32 2, %s7853_s23  ;;  %s7849_s28 = sshll.u32 %s19168_s20, 1  ;;  %v282_v47 = vunpack.c.0.s8 %v281_v46  ;;  %407 = vst.msk [vmem:[#allocation2 + $0x7] ss:$8 sm:$0x3] %vm9849_vm2, %v16249_v50 }
  0x21   : > { %s8373_s29 = sshll.u32 %s19168_s20, 3  ;;  %s207_s6 = scalar_lea.vmem %s16237_s1, %s7849_s28  ;;  %17169 = vst [vmem:[#allocation8_spill] sm:$0xff] %v9823_v11  ;;  %v9828_v22 = vsub.s32 0, %v9823_v11  ;;  %v9831_v23 = vsub.s32 1, %v9823_v11 }
  0x22   : > { %v236_v0 = vld [vmem:[%s207_s6] sm:$0x3]  ;;  %s216_s9 = scalar_lea.vmem %s16239_s3, %s8373_s29  ;;  %s231_s10 = sld [smem:[#allocation6 + %s230_s27]]  ;;  %v285_v48 = vsub.s32 %v282_v47, %v9823_v11 }
  0x23   : > { %v242_v1 = vmul.f32 1.442695, %v236_v0  ;;  %s233_s11 = sadd.s32 3, %s7853_s23  ;;  %v238_v3 = vld [vmem:[%s216_s9] sm:$0xff]  ;;  %s211_s15 = scalar_lea.vmem %s16238_s2, %s7849_s28  ;;  %17170 = vst [vmem:[#allocation9_spill] sm:$0xff] %v9828_v22  ;;  %17171 = vst [vmem:[#allocation10_spill] sm:$0xff] %v9831_v23 }
  0x24   : > { %v226_v2 = vstv %s225_s24  ;;  %s234_s12 = sld [smem:[#allocation6 + %s233_s11]]  ;;  %v259_v6 = vrot.slane %v238_v3, 6  ;;  %v9825_v17 = vld [vmem:[%s211_s15] sm:$0x3]  ;;  %s9754_s16 = smov 125  }
  0x25   : > { %v244_v5 = vmax.f32 %v226_v2, %v238_v3  ;;  %9661 = vpow2.f32 %v242_v1  ;;  %v229_v7 = vstv %s9808_s26  ;;  %vm239_vm0 = vcmp.gt.f32.partialorder %v9825_v17, 0.0  ;;  %s9758_s17 = smov 5   ;;  %s9759_s18 = smov 123  }
  0x26   : > { %v245_v8 = vmax.f32 %v229_v7, %v238_v3  ;;  %v261_v9 = vsub.f32 %v238_v3, %v259_v6  ;;  %v7854_v51 = vsel %vm239_vm0, 1.0, %v16249_v50  ;;  %v16264_v17 = vmov 0   ;;  %s219_s24 = scalar_lea.vmem %s16240_s4, %s19168_s20 }
  0x27   : > { %v249_v10 = vrot.slane %v244_v5, 6  ;;  %376 = vst.msk [vmem:[#allocation2 + $0x2] ss:$8 sm:$0x3] %vm9849_vm2, %v7854_v51 }
  0x28   : > { %v232_v12 = vstv %s231_s10  ;;  %v254_v14 = vrot.slane %v245_v8, 6  ;;  %v7855_v15 = vrot.slane %v261_v9, 9 }
  0x29   : > { %v246_v13 = vmin.f32 %v232_v12, %v238_v3  ;;  %v267_v16 = vsub.f32 %v232_v12, %v226_v2 }
  0x2a   : > { %v235_v18 = vstv %s234_s12  ;;  %v266_v25 = vmul.f32 %v7855_v15, %v261_v9 }
  0x2b   : > { %v247_v19 = vmin.f32 %v235_v18, %v238_v3  ;;  %v251_v20 = vsub.f32 %v246_v13, %v249_v10  ;;  %v268_v21 = vsub.f32 %v235_v18, %v229_v7 }
  0x2d   : > { %v256_v24 = vsub.f32 %v247_v19, %v254_v14  ;;  %v269_v26 = vmul.f32 %v268_v21, %v267_v16  ;;  %v252_v28 = vmax.f32 %v251_v20, 0.0 }
  0x2f   : > { %v9662_v27 = vpop.eup %9661  ;;  %v257_v29 = vmax.f32 %v256_v24, 0.0  ;;  %v275_v36 = vadd.f32 %v269_v26, %v266_v25 }
  0x30   : > { %v319_v30 = vrot.slane %v9662_v27, %v9828_v22  ;;  %v323_v31 = vrot.slane %v9662_v27, %v9831_v23  ;;  %v297_v32 = vsel %vm239_vm0, %v9662_v27, -inf  ;;  %373 = vst.msk [vmem:[#allocation2 + $0x1] ss:$8 sm:$0x3] %vm9849_vm2, %v9662_v27 }
  0x31   : > { %v302_v33 = vrot.slane %v297_v32, %v9828_v22  ;;  %v306_v34 = vrot.slane %v297_v32, %v9831_v23  ;;  %v7856_v35 = vrot.slane %v257_v29, 9 }
  0x32   : > { %v326_v37 = vsel %vm16350_vm1, %v319_v30, inf  ;;  %v327_v38 = vsel %vm16350_vm1, %v323_v31, inf }
  0x33   : > { %v328_v39 = vmin.f32 %v326_v37, %v327_v38  ;;  %v310_v40 = vsel %vm16350_vm1, %v302_v33, -inf  ;;  %v311_v41 = vsel %vm16350_vm1, %v306_v34, -inf  ;;  %v274_v42 = vmul.f32 %v7856_v35, %v252_v28 }
  0x34   : > { %v312_v43 = vmax.f32 %v310_v40, %v311_v41 }
  0x35   : > { %329 = vmin.xlane.f32.xlu0 %v328_v39  ;;  %v276_v44 = vsub.f32 %v275_v36, %v274_v42 }
  0x37   : > { %9663 = vrcp.f32 %v276_v44 }
  0x39   : > { %313 = vmax.xlane.f32.xlu0 %v312_v43 }
  0x41   : > { %v9664_v49 = vpop.eup %9663 }
  0x42   : > { %v278_v52 = vmul.f32 %v9664_v49, %v274_v42  ;;  %v16254_v49 = vmov 1  }
  0x44   : > { %v286_v54 = vrot.slane %v278_v52, %v285_v48 }
  0x46   : > { %v293_v55 = vrot.slane %v286_v54, %v285_v48  ;;  %v16262_v54 = vmov 0.0|0.0  }
  0x47   : > { %8374 = vmatprep.subr.bf16.mxu0 %v16262_v54  ;;  %8662 = vmatprep.subr.bf16.mxu1 %v16262_v54 }
  0x48   : > { %v294_v56 = vcombine.high %v293_v55, %v293_v55 }
  0x4a   : > { %v332_v57 = vsel %vm239_vm0, %v294_v56, -inf  ;;  %v296_v63 = vsel %vm239_vm0, %v294_v56, 0.0 }
  0x4b   : > { %v337_v58 = vrot.slane %v332_v57, %v9828_v22  ;;  %v341_v59 = vrot.slane %v332_v57, %v9831_v23  ;;  %370 = vst.msk [vmem:[#allocation2] ss:$8 sm:$0x3] %vm9849_vm2, %v296_v63 }
  0x4d   : > { %v344_v60 = vsel %vm16350_vm1, %v337_v58, -inf  ;;  %v345_v61 = vsel %vm16350_vm1, %v341_v59, -inf }
  0x4e   : > { %v346_v62 = vmax.f32 %v344_v60, %v345_v61 }
  0x50   : > { %347 = vmax.xlane.f32.xlu1 %v346_v62 }
  0xc2   : > { %v330_v0 = vpop.xlane.xlu0 %329 }
  0xc6   : > { %v314_v1 = vpop.xlane.xlu0 %313 }
  0xc7   : > { %v331_v2 = vmax.f32 %v314_v1, %v330_v0 }
  0xc9   : > { %v354_v3 = vrot.slane %v331_v2, %v9828_v22 }
  0xcb   : > { %v356_v5 = vsub.f32 %v9662_v27, %v354_v3 }
  0xcd   : > { %v357_v6 = vsel %vm239_vm0, %v356_v5, 0.0 }
  0xce   : > { %v378_v7 = vmul.f32 3.0, %v357_v6  ;;  %v392_v8 = vmul.f32 -3.0, %v357_v6 }
  0xd0   : > { %v379_v9 = vmul.f32 1.442695, %v378_v7  ;;  %v393_v10 = vmul.f32 1.442695, %v392_v8 }
  0xd2   : > { %9665 = vpow2.f32 %v379_v9 }
  0xd3   : > { %9667 = vpow2.f32 %v393_v10 }
  0xdc   : > { %v9666_v12 = vpop.eup %9665 }
  0xdd   : > { %v9668_v13 = vpop.eup %9667  ;;  %v381_v14 = vmul.f32 %v9666_v12, %v7854_v51  ;;  %v348_v15 = vpop.xlane.xlu1 %347 }
  0xde   : > { %v395_v16 = vmul.f32 %v9668_v13, %v7854_v51  ;;  %v349_v18 = vmax.f32 %v348_v15, 0.0 }
  0xdf   : > { %383 = vst.msk [vmem:[#allocation2 + $0x3] ss:$8 sm:$0x3] %vm9849_vm2, %v381_v14 }
  0xe0   : > { %397 = vst.msk [vmem:[#allocation2 + $0x5] ss:$8 sm:$0x3] %vm9849_vm2, %v395_v16  ;;  %v362_v19 = vrot.slane %v349_v18, %v9828_v22 }
  0xe2   : > { %v364_v20 = vsub.f32 %v296_v63, %v362_v19 }
  0xe4   : > { %v365_v21 = vsel %vm239_vm0, %v364_v20, 0.0 }
  0xe5   : > { %v385_v24 = vmul.f32 3.0, %v365_v21  ;;  %v399_v25 = vmul.f32 -3.0, %v365_v21 }
  0xe7   : > { %v386_v26 = vmul.f32 1.442695, %v385_v24  ;;  %v400_v27 = vmul.f32 1.442695, %v399_v25 }
  0xe9   : > { %9669 = vpow2.f32 %v386_v26 }
  0xea   : > { %9671 = vpow2.f32 %v400_v27 }
  0xf3   : > { %v9670_v28 = vpop.eup %9669 }
  0xf4   : > { %v9672_v29 = vpop.eup %9671  ;;  %v388_v30 = vmul.f32 %v9670_v28, %v7854_v51 }
  0xf5   : > { %v402_v31 = vmul.f32 %v9672_v29, %v7854_v51 }
  0xf6   : > { %390 = vst.msk [vmem:[#allocation2 + $0x4] ss:$8 sm:$0x3] %vm9849_vm2, %v388_v30 }
  0xf7   : > { %404 = vst.msk [vmem:[#allocation2 + $0x6] ss:$8 sm:$0x3] %vm9849_vm2, %v402_v31 }
  0xfe   : > { %v410_v32 = vld [vmem:[#allocation2 + $0x8] sm:$0xff]  ;;  %v409_v33 = vld [vmem:[#allocation2] sm:$0xff] }
  0xff   : > { %443 = vxpose.xlu0.b32.start.end [1/1] (short) %v410_v32, 128  ;;  %411 = vxpose.xlu1.b32.start.end [1/1] (short) %v409_v33, 128 }
 0x11d   : > { %9624 = vset.pattern.permute.xlu1 %v16264_v17 }
 0x128   : > { %9625 = vset.pattern.permute.xlu0 %v16264_v17 }
 0x17f   : > { %v459_v34 = vpop.trf.xlu0  ;;  %v427_v35 = vpop.trf.xlu1 }
 0x180   : > { %492 = vst.msk [vmem:[#allocation3 + $0x80] sm:$0xff] %vm475_vm3, %v459_v34  ;;  %476 = vst.msk [vmem:[#allocation3] sm:$0xff] %vm475_vm3, %v427_v35 }
 0x183   : > { %v460_v36 = vpop.trf.xlu0  ;;  %v428_v37 = vpop.trf.xlu1 }
 0x184   : > { %493 = vst.msk [vmem:[#allocation3 + $0x88] sm:$0xff] %vm475_vm3, %v460_v36  ;;  %477 = vst.msk [vmem:[#allocation3 + $0x8] sm:$0xff] %vm475_vm3, %v428_v37 }
 0x187   : > { %v429_v38 = vpop.trf.xlu1  ;;  %v9890_v39 = vld [vmem:[#allocation3 + $0x80] sm:$0xff]  ;;  %v461_v41 = vpop.trf.xlu0 }
 0x188   : > { %v9892_v40 = vld [vmem:[#allocation3] sm:$0xff]  ;;  %478 = vst.msk [vmem:[#allocation3 + $0x10] sm:$0xff] %vm475_vm3, %v429_v38  ;;  %1885 = vrot.lane.b32.xlu1 %v9890_v39, %s9754_s16  ;;  %494 = vst.msk [vmem:[#allocation3 + $0x90] sm:$0xff] %vm475_vm3, %v461_v41 }
 0x189   : > { %1853 = vrot.lane.b32.xlu0 %v9892_v40, %s9754_s16 }
 0x18b   : > { %v430_v42 = vpop.trf.xlu1  ;;  %v9900_v43 = vld [vmem:[#allocation3 + $0x88] sm:$0xff]  ;;  %v462_v44 = vpop.trf.xlu0 }
 0x18c   : > { %479 = vst.msk [vmem:[#allocation3 + $0x18] sm:$0xff] %vm475_vm3, %v430_v42  ;;  %745 = vperm.xlu1 %9624, %v9892_v40   ;;  %495 = vst.msk [vmem:[#allocation3 + $0x98] sm:$0xff] %vm475_vm3, %v462_v44  ;;  %v9907_v45 = vld [vmem:[#allocation3 + $0x8] sm:$0xff] }
 0x18d   : > { %1887 = vrot.lane.b32.xlu0 %v9900_v43, %s9754_s16 }
 0x18f   : > { %v431_v46 = vpop.trf.xlu1  ;;  %v463_v47 = vpop.trf.xlu0  ;;  %v9913_v48 = vld [vmem:[#allocation3 + $0x10] sm:$0xff] }
 0x190   : > { %480 = vst.msk [vmem:[#allocation3 + $0x20] sm:$0xff] %vm475_vm3, %v431_v46  ;;  %1855 = vrot.lane.b32.xlu1 %v9907_v45, %s9754_s16  ;;  %496 = vst.msk [vmem:[#allocation3 + $0xa0] sm:$0xff] %vm475_vm3, %v463_v47  ;;  %v9926_v55 = vld [vmem:[#allocation3 + $0x90] sm:$0xff] }
 0x191   : > { %9626 = vset.pattern.permute.xlu1 %v16254_v49 }
 0x193   : > { %v432_v51 = vpop.trf.xlu1  ;;  %v464_v52 = vpop.trf.xlu0  ;;  %v9916_v53 = vld [vmem:[#allocation3 + $0x98] sm:$0xff] }
 0x194   : > { %481 = vst.msk [vmem:[#allocation3 + $0x28] sm:$0xff] %vm475_vm3, %v432_v51  ;;  %1857 = vrot.lane.b32.xlu1 %v9913_v48, %s9754_s16  ;;  %497 = vst.msk [vmem:[#allocation3 + $0xa8] sm:$0xff] %vm475_vm3, %v464_v52  ;;  %1891 = vrot.lane.b32.xlu0 %v9916_v53, %s9754_s16  ;;  %v9932_v59 = vld [vmem:[#allocation3 + $0x18] sm:$0xff] }
 0x197   : > { %v433_v56 = vpop.trf.xlu1  ;;  %v465_v57 = vpop.trf.xlu0  ;;  %v9944_v0 = vld [vmem:[#allocation3 + $0x20] sm:$0xff] }
 0x198   : > { %482 = vst.msk [vmem:[#allocation3 + $0x30] sm:$0xff] %vm475_vm3, %v433_v56  ;;  %1889 = vrot.lane.b32.xlu1 %v9926_v55, %s9754_s16  ;;  %498 = vst.msk [vmem:[#allocation3 + $0xb0] sm:$0xff] %vm475_vm3, %v465_v57  ;;  %v9952_v2 = vld [vmem:[#allocation3 + $0xa0] sm:$0xff]  ;;  %v10098_v57 = vld [vmem:[#allocation2] ss:$8 sm:$0x3] }
 0x19b   : > { %v434_v58 = vpop.trf.xlu1  ;;  %v9934_v60 = vld [vmem:[#allocation3 + $0x28] sm:$0xff]  ;;  %v466_v61 = vpop.trf.xlu0 }
 0x19c   : > { %483 = vst.msk [vmem:[#allocation3 + $0x38] sm:$0xff] %vm475_vm3, %v434_v58  ;;  %1859 = vrot.lane.b32.xlu1 %v9932_v59, %s9754_s16  ;;  %1863 = vrot.lane.b32.xlu0 %v9934_v60, %s9754_s16  ;;  %499 = vst.msk [vmem:[#allocation3 + $0xb8] sm:$0xff] %vm475_vm3, %v466_v61  ;;  %v9942_v62 = vld [vmem:[#allocation3 + $0xa8] sm:$0xff]  ;;  %v10103_v58 = vrot.slane %v10098_v57, %v9831_v23 }
 0x19f   : > { %v435_v63 = vpop.trf.xlu1  ;;  %v467_v1 = vpop.trf.xlu0  ;;  %v9964_v9 = vld [vmem:[#allocation3 + $0x30] sm:$0xff] }
 0x1a0   : > { %484 = vst.msk [vmem:[#allocation3 + $0x40] sm:$0xff] %vm475_vm3, %v435_v63  ;;  %1861 = vrot.lane.b32.xlu1 %v9944_v0, %s9754_s16  ;;  %1895 = vrot.lane.b32.xlu0 %v9942_v62, %s9754_s16  ;;  %500 = vst.msk [vmem:[#allocation3 + $0xc0] sm:$0xff] %vm475_vm3, %v467_v1  ;;  %v9972_v12 = vld [vmem:[#allocation3 + $0xb0] sm:$0xff] }
 0x1a3   : > { %v436_v3 = vpop.trf.xlu1  ;;  %v9954_v5 = vld [vmem:[#allocation3 + $0x38] sm:$0xff]  ;;  %v468_v6 = vpop.trf.xlu0 }
 0x1a4   : > { %485 = vst.msk [vmem:[#allocation3 + $0x48] sm:$0xff] %vm475_vm3, %v436_v3  ;;  %1893 = vrot.lane.b32.xlu1 %v9952_v2, %s9754_s16  ;;  %1867 = vrot.lane.b32.xlu0 %v9954_v5, %s9754_s16  ;;  %501 = vst.msk [vmem:[#allocation3 + $0xc8] sm:$0xff] %vm475_vm3, %v468_v6  ;;  %v9962_v7 = vld [vmem:[#allocation3 + $0xb8] sm:$0xff]  ;;  %v17178_v3 = vmov 0 }
 0x1a7   : > { %v437_v8 = vpop.trf.xlu1  ;;  %v469_v10 = vpop.trf.xlu0  ;;  %v9982_v18 = vld [vmem:[#allocation3 + $0x40] sm:$0xff] }
 0x1a8   : > { %486 = vst.msk [vmem:[#allocation3 + $0x50] sm:$0xff] %vm475_vm3, %v437_v8  ;;  %1865 = vrot.lane.b32.xlu1 %v9964_v9, %s9754_s16  ;;  %1899 = vrot.lane.b32.xlu0 %v9962_v7, %s9754_s16  ;;  %502 = vst.msk [vmem:[#allocation3 + $0xd0] sm:$0xff] %vm475_vm3, %v469_v10  ;;  %v9988_v20 = vld [vmem:[#allocation3 + $0xc0] sm:$0xff] }
 0x1ab   : > { %v438_v13 = vpop.trf.xlu1  ;;  %v9974_v14 = vld [vmem:[#allocation3 + $0x48] sm:$0xff]  ;;  %v470_v15 = vpop.trf.xlu0 }
 0x1ac   : > { %487 = vst.msk [vmem:[#allocation3 + $0x58] sm:$0xff] %vm475_vm3, %v438_v13  ;;  %1897 = vrot.lane.b32.xlu1 %v9972_v12, %s9754_s16  ;;  %1871 = vrot.lane.b32.xlu0 %v9974_v14, %s9754_s16  ;;  %503 = vst.msk [vmem:[#allocation3 + $0xd8] sm:$0xff] %vm475_vm3, %v470_v15  ;;  %v9998_v26 = vld [vmem:[#allocation3 + $0xc8] sm:$0xff] }
 0x1af   : > { %v439_v16 = vpop.trf.xlu1  ;;  %v471_v19 = vpop.trf.xlu0  ;;  %v10004_v30 = vld [vmem:[#allocation3 + $0x50] sm:$0xff] }
 0x1b0   : > { %488 = vst.msk [vmem:[#allocation3 + $0x60] sm:$0xff] %vm475_vm3, %v439_v16  ;;  %1869 = vrot.lane.b32.xlu1 %v9982_v18, %s9754_s16  ;;  %504 = vst.msk [vmem:[#allocation3 + $0xe0] sm:$0xff] %vm475_vm3, %v471_v19  ;;  %v604_v36 = vld [vmem:[#allocation3 + $0xd0] sm:$0xff] }
 0x1b3   : > { %v440_v21 = vpop.trf.xlu1  ;;  %v9990_v24 = vld [vmem:[#allocation3 + $0x58] sm:$0xff]  ;;  %v472_v25 = vpop.trf.xlu0 }
 0x1b4   : > { %489 = vst.msk [vmem:[#allocation3 + $0x68] sm:$0xff] %vm475_vm3, %v440_v21  ;;  %1901 = vrot.lane.b32.xlu1 %v9988_v20, %s9754_s16  ;;  %1875 = vrot.lane.b32.xlu0 %v9990_v24, %s9754_s16  ;;  %505 = vst.msk [vmem:[#allocation3 + $0xe8] sm:$0xff] %vm475_vm3, %v472_v25  ;;  %v10028_v37 = vld [vmem:[#allocation3 + $0xd8] sm:$0xff] }
 0x1b7   : > { %v441_v27 = vpop.trf.xlu1  ;;  %v473_v28 = vpop.trf.xlu0  ;;  %v10014_v33 = vld [vmem:[#allocation3 + $0x60] sm:$0xff] }
 0x1b8   : > { %490 = vst.msk [vmem:[#allocation3 + $0x70] sm:$0xff] %vm475_vm3, %v441_v27  ;;  %1903 = vrot.lane.b32.xlu1 %v9998_v26, %s9754_s16  ;;  %506 = vst.msk [vmem:[#allocation3 + $0xf0] sm:$0xff] %vm475_vm3, %v473_v28  ;;  %v10036_v38 = vld [vmem:[#allocation3 + $0xe0] sm:$0xff] }
 0x1bb   : > { %v442_v29 = vpop.trf.xlu1  ;;  %v10006_v31 = vld [vmem:[#allocation3 + $0x68] sm:$0xff]  ;;  %v474_v32 = vpop.trf.xlu0 }
 0x1bc   : > { %491 = vst.msk [vmem:[#allocation3 + $0x78] sm:$0xff] %vm475_vm3, %v442_v29  ;;  %1873 = vrot.lane.b32.xlu1 %v10004_v30, %s9754_s16  ;;  %1879 = vrot.lane.b32.xlu0 %v10006_v31, %s9754_s16  ;;  %507 = vst.msk [vmem:[#allocation3 + $0xf8] sm:$0xff] %vm475_vm3, %v474_v32  ;;  %v607_v41 = vld [vmem:[#allocation3 + $0xe8] sm:$0xff] }
 0x1bf   : > { %v10018_v34 = vld [vmem:[#allocation3 + $0x70] sm:$0xff] }
 0x1c0   : > { %1877 = vrot.lane.b32.xlu1 %v10014_v33, %s9754_s16  ;;  %v10047_v42 = vld [vmem:[#allocation3 + $0xf0] sm:$0xff] }
 0x1c3   : > { %v10020_v35 = vld [vmem:[#allocation3 + $0x78] sm:$0xff] }
 0x1c4   : > { %1881 = vrot.lane.b32.xlu1 %v10018_v34, %s9754_s16  ;;  %1883 = vrot.lane.b32.xlu0 %v10020_v35, %s9754_s16  ;;  %v10049_v44 = vld [vmem:[#allocation3 + $0xf8] sm:$0xff] }
 0x1c8   : > { %1303 = vperm.xlu1 %9626, %v9907_v45   ;;  %750 = vperm.xlu0 %9625, %v9907_v45  }
 0x1cc   : > { %1905 = vrot.lane.b32.xlu1 %v604_v36, %s9754_s16  ;;  %1907 = vrot.lane.b32.xlu0 %v10028_v37, %s9754_s16 }
 0x1cd   : > { %9627 = vset.pattern.permute.xlu1 %v16264_v17 }
 0x1d0   : > { %755 = vperm.xlu1 %9627, %v9913_v48   ;;  %760 = vperm.xlu0 %9625, %v9932_v59  }
 0x1d4   : > { %1909 = vrot.lane.b32.xlu1 %v10036_v38, %s9754_s16  ;;  %9628 = vset.pattern.permute.xlu0 %v16254_v49 }
 0x1d5   : > { %1299 = vperm.xlu0 %9628, %v9892_v40   ;;  %9629 = vset.pattern.permute.xlu1 %v16254_v49 }
 0x1d8   : > { %1911 = vrot.lane.b32.xlu1 %v607_v41, %s9754_s16 }
 0x1d9   : > { %1307 = vperm.xlu0 %9628, %v9913_v48  }
 0x1dc   : > { %1311 = vperm.xlu1 %9629, %v9932_v59  }
 0x1dd   : > { %1315 = vperm.xlu0 %9628, %v9944_v0  }
 0x1e0   : > { %1913 = vrot.lane.b32.xlu1 %v10047_v42, %s9754_s16 }
 0x1e1   : > { %1915 = vrot.lane.b32.xlu0 %v10049_v44, %s9754_s16  ;;  %9630 = vset.pattern.permute.xlu1 %v16264_v17 }
 0x1e4   : > { %765 = vperm.xlu1 %9630, %v9944_v0  }
 0x1e5   : > { %1327 = vperm.xlu0 %9628, %v9954_v5  }
 0x1e8   : > { %770 = vperm.xlu1 %9630, %v9934_v60  }
 0x1e9   : > { %9633 = vset.pattern.permute.xlu0 %v16264_v17 }
 0x1ea   : > { %775 = vperm.xlu0 %9633, %v9964_v9  }
 0x1ec   : > { %9631 = vset.pattern.permute.xlu1 %v16254_v49 }
 0x1ed   : > { %1319 = vperm.xlu1 %9631, %v9934_v60  }
 0x1ee   : > { %790 = vperm.xlu0 %9633, %v9974_v14  }
 0x1f1   : > { %1323 = vperm.xlu1 %9631, %v9964_v9  }
 0x1f2   : > { %805 = vperm.xlu0 %9633, %v10014_v33  }
 0x1f5   : > { %9632 = vset.pattern.permute.xlu1 %v16264_v17 }
 0x1f6   : > { %780 = vperm.xlu1 %9632, %v9954_v5   ;;  %9637 = vset.pattern.permute.xlu0 %v16254_v49 }
 0x1f7   : > { %1339 = vperm.xlu0 %9637, %v10004_v30  }
 0x1fa   : > { %785 = vperm.xlu1 %9632, %v9982_v18   ;;  %v10071_v45 = vpop.permute.xlu1 %1885 }
 0x1fb   : > { %v1854_v40 = vpop.permute.xlu0 %1853  ;;  %1351 = vperm.xlu0 %9637, %v10006_v31   ;;  %v16248_v46 = vand.u32 4294901760, %v10071_v45 }
 0x1fc   : > { %v1950_v59 = vand.u32 4294901760, %v1854_v40 }
 0x1fd   : > { %v10084_v51 = vsub.f32 %v10071_v45, %v16248_v46 }
 0x1fe   : > { %9634 = vset.pattern.permute.xlu1 %v16254_v49  ;;  %v10112_v63 = vsub.f32 %v1854_v40, %v1950_v59 }
 0x1ff   : > { %v10075_v47 = vpop.permute.xlu0 %1887  ;;  %1331 = vperm.xlu1 %9634, %v9982_v18   ;;  %1363 = vperm.xlu0 %9637, %v9890_v39   ;;  %17174 = vst [vmem:[#allocation11_spill] sm:$0xff] %v10084_v51 }
 0x200   : > { %v16247_v48 = vand.u32 4294901760, %v10075_v47  ;;  %17177 = vst [vmem:[#allocation14_spill] sm:$0xff] %v10112_v63  ;;  %v16242_v5 = vand.u32 4294901760, %v10112_v63 }
 0x202   : > { %v10089_v52 = vsub.f32 %v10075_v47, %v16247_v48  ;;  %v2530_v18 = vsub.f32 %v10112_v63, %v16242_v5 }
 0x203   : > { %1335 = vperm.xlu1 %9634, %v9974_v14   ;;  %9643 = vset.pattern.permute.xlu0 %v16264_v17 }
 0x204   : > { %17175 = vst [vmem:[#allocation12_spill] sm:$0xff] %v10089_v52  ;;  %v10095_v56 = vpack.c.bf16 %v10089_v52, %v10084_v51  ;;  %820 = vperm.xlu0 %9643, %v10020_v35   ;;  %v2531_v36 = vand.u32 4294901760, %v2530_v18 }
 0x206   : > { %17176 = vst [vmem:[#allocation13_spill] sm:$0xff] %v10095_v56  ;;  %v10107_v60 = vpop.permute.xlu0 %1891 }
 0x207   : > { %9635 = vset.pattern.permute.xlu1 %v16264_v17  ;;  %v16245_v27 = vand.u32 4294901760, %v10107_v60 }
 0x208   : > { %795 = vperm.xlu1 %9635, %v10004_v30   ;;  %9644 = vset.pattern.permute.xlu0 %v16254_v49 }
 0x209   : > { %1375 = vperm.xlu0 %9644, %v9916_v53  }
 0x20b   : > { %v10110_v61 = vpop.permute.xlu1 %745 }
 0x20c   : > { %vm915_vm4 = vcmp.gt.f32.partialorder %v10110_v61, %v10103_v58  ;;  %vm979_vm5 = vcmp.eq.f32.partialorder %v10110_v61, %v10103_v58  ;;  %800 = vperm.xlu1 %9635, %v9990_v24  }
 0x20d   : > { %9645 = vset.pattern.permute.xlu0 %v16264_v17  ;;  %vm10123_vm6 = vmor %vm915_vm4, %vm979_vm5 }
 0x20e   : > { %v10120_v0 = vpop.permute.xlu0 %1863  ;;  %835 = vperm.xlu0 %9645, %v9926_v55   ;;  %v17179_v3 = vsel %vm10123_vm6, 4294967295, %v17178_v3  ;;  %v7858_v8 = vsel %vm10123_vm6, 1.0, %v16249_v50 }
 0x20f   : > { %v1856_v1 = vpop.permute.xlu1 %1855  ;;  %17180 = vst [vmem:[#allocation15_spill] sm:$0xff] %v17179_v3  ;;  %v10133_v9 = vsub.f32 %v7858_v8, %v7858_v8  ;;  %v1965_v29 = vand.u32 4294901760, %v10120_v0 }
 0x210   : > { %v1953_v6 = vand.u32 4294901760, %v1856_v1  ;;  %9636 = vset.pattern.permute.xlu1 %v16254_v49 }
 0x211   : > { %1343 = vperm.xlu1 %9636, %v9990_v24   ;;  %17181 = vst [vmem:[#allocation16_spill] sm:$0xff] %v10133_v9  ;;  %v16243_v16 = vand.u32 4294901760, %v10133_v9 }
 0x212   : > { %v10135_v10 = vpack.c.bf16 %v1953_v6, %v1950_v59  ;;  %v10137_v13 = vsub.f32 %v1856_v1, %v1953_v6  ;;  %850 = vperm.xlu0 %9645, %v9942_v62   ;;  %v10140_v14 = vpop.permute.xlu0 %1895  ;;  %v10177_v1 = vsub.f32 %v10107_v60, %v16245_v27 }
 0x213   : > { %v1858_v15 = vpop.permute.xlu1 %1857  ;;  %v2048_v25 = vsub.f32 %v10133_v9, %v16243_v16 }
 0x214   : > { %17182 = vst [vmem:[#allocation17_spill] sm:$0xff] %v10135_v10  ;;  %17183 = vst [vmem:[#allocation18_spill] sm:$0xff] %v10137_v13  ;;  %v16241_v19 = vand.u32 4294901760, %v10137_v13  ;;  %v1956_v21 = vand.u32 4294901760, %v1858_v15  ;;  %8376 = vmatpush1.bf16.msra.mxu0 %v10135_v10  ;;  %8664 = vmatpush1.bf16.msra.mxu1 %v10135_v10  ;;  %v10151_v24 = vpack.c.bf16 %v10137_v13, %v10112_v63  ;;  %v10396_v10 = vadd.s32 56, %v9823_v11 }
 0x215   : > { %1347 = vperm.xlu1 %9636, %v10014_v33   ;;  %8377 = vmatprep.subr.bf16.mxu0 %v16262_v54  ;;  %v2049_v32 = vand.u32 4294901760, %v2048_v25  ;;  %17186 = vst [vmem:[#allocation21_spill] sm:$0xff] %v10177_v1 }
 0x216   : > { %17184 = vst [vmem:[#allocation19_spill] sm:$0xff] %v10151_v24  ;;  %v2537_v28 = vsub.f32 %v10137_v13, %v16241_v19  ;;  %9650 = vset.pattern.permute.xlu0 %v16254_v49  ;;  %8665 = vmatprep.subr.bf16.mxu1 %v16262_v54  ;;  %v10165_v30 = vsub.f32 %v1858_v15, %v1956_v21  ;;  %v10171_v59 = vpop.permute.xlu0 %1867  ;;  %v10431_v24 = vadd.s32 96, %v9823_v11 }
 0x217   : > { %1387 = vperm.xlu0 %9650, %v9972_v12   ;;  %v10168_v33 = vpop.permute.xlu1 %1889  ;;  %2050 = vmatprep.mubr.f32.mxu0 %v2049_v32  ;;  %v10188_v15 = vsub.f32 %v10120_v0, %v1965_v29 }
 0x218   : > { %17185 = vst [vmem:[#allocation20_spill] sm:$0xff] %v10165_v30  ;;  %v2538_v41 = vand.u32 4294901760, %v2537_v28  ;;  %v16246_v40 = vand.u32 4294901760, %v10168_v33  ;;  %v16244_v18 = vand.u32 4294901760, %v10165_v30  ;;  %17230 = vst [vmem:[#allocation54_spill] sm:$0xff] %v10431_v24  ;;  %v10449_v24 = vadd.s32 64, %v9823_v11 }
 0x219   : > { %9638 = vset.pattern.permute.xlu1 %v16264_v17  ;;  %17188 = vst [vmem:[#allocation23_spill] sm:$0xff] %v10188_v15 }
 0x21a   : > { %v10182_v6 = vsub.f32 %v10168_v33, %v16246_v40  ;;  %810 = vperm.xlu1 %9638, %v10006_v31   ;;  %v10185_v8 = vpack.c.bf16 %v2538_v41, %v2531_v36  ;;  %v16252_v31 = vand.u32 4294901760, %v10188_v15  ;;  %v2544_v0 = vsub.f32 %v10165_v30, %v16244_v18  ;;  %v10206_v36 = vpop.permute.xlu0 %1899  ;;  %17236 = vst [vmem:[#allocation58_spill] sm:$0xff] %v10449_v24 }
 0x21b   : > { %1399 = vperm.xlu0 %9650, %v9998_v26   ;;  %v1860_v25 = vpop.permute.xlu1 %1859  ;;  %v1971_v26 = vand.u32 4294901760, %v10171_v59 }
 0x21c   : > { %17187 = vst [vmem:[#allocation22_spill] sm:$0xff] %v10182_v6  ;;  %v1959_v28 = vand.u32 4294901760, %v1860_v25  ;;  %v10194_v32 = vpack.c.bf16 %v10177_v1, %v10182_v6  ;;  %v2565_v48 = vsub.f32 %v10188_v15, %v16252_v31  ;;  %v2545_v46 = vand.u32 4294901760, %v2544_v0 }
 0x21d   : > { %v10232_v50 = vsub.f32 %v10171_v59, %v1971_v26 }
 0x21e   : > { %17189 = vst [vmem:[#allocation24_spill] sm:$0xff] %v10194_v32  ;;  %v10196_v19 = vpack.c.bf16 %v1959_v28, %v1956_v21  ;;  %v10198_v5 = vsub.f32 %v1860_v25, %v1959_v28  ;;  %815 = vperm.xlu1 %9638, %v10018_v34   ;;  %v16256_v28 = vand.u32 4294901760, %v10140_v14  ;;  %v1872_v0 = vpop.permute.xlu0 %1871 }
 0x21f   : > { %9653 = vset.pattern.permute.xlu0 %v16264_v17  ;;  %v1862_v41 = vpop.permute.xlu1 %1861  ;;  %17195 = vst [vmem:[#allocation30_spill] sm:$0xff] %v10232_v50 }
 0x220   : > { %17190 = vst [vmem:[#allocation25_spill] sm:$0xff] %v10196_v19  ;;  %17191 = vst [vmem:[#allocation26_spill] sm:$0xff] %v10198_v5  ;;  %v16253_v21 = vand.u32 4294901760, %v10198_v5  ;;  %v1962_v16 = vand.u32 4294901760, %v1862_v41  ;;  %865 = vperm.xlu0 %9653, %v9988_v20   ;;  %8379 = vmatpush1.bf16.msra.mxu0 %v10196_v19  ;;  %v10216_v25 = vpack.c.bf16 %v10198_v5, %v10165_v30 }
 0x221   : > { %8667 = vmatpush1.bf16.msra.mxu1 %v10196_v19  ;;  %8380 = vmatprep.subr.bf16.mxu0 %v16262_v54 }
 0x222   : > { %17192 = vst [vmem:[#allocation27_spill] sm:$0xff] %v10216_v25  ;;  %v2551_v18 = vsub.f32 %v10198_v5, %v16253_v21  ;;  %v10222_v27 = vpack.c.bf16 %v1965_v29, %v1962_v16  ;;  %v10224_v40 = vsub.f32 %v1862_v41, %v1962_v16  ;;  %9639 = vset.pattern.permute.xlu1 %v16254_v49  ;;  %v2566_v21 = vand.u32 4294901760, %v2565_v48 }
 0x223   : > { %8668 = vmatprep.subr.bf16.mxu1 %v16262_v54  ;;  %1355 = vperm.xlu1 %9639, %v10018_v34   ;;  %v10235_v4 = vpop.permute.xlu1 %1893  ;;  %v10250_v34 = vsub.f32 %v10140_v14, %v16256_v28  ;;  %v16268_v49 = vand.u32 4294901760, %v10232_v50  ;;  %v17202_v48 = vlaneseq }
 0x224   : > { %17193 = vst [vmem:[#allocation28_spill] sm:$0xff] %v10222_v27  ;;  %17194 = vst [vmem:[#allocation29_spill] sm:$0xff] %v10224_v40  ;;  %v2552_v29 = vand.u32 4294901760, %v2551_v18  ;;  %v16260_v16 = vand.u32 4294901760, %v10224_v40  ;;  %v16261_v41 = vand.u32 4294901760, %v10235_v4  ;;  %880 = vperm.xlu0 %9653, %v10028_v37   ;;  %8382 = vmatpush1.bf16.msra.mxu0 %v10222_v27  ;;  %v10243_v31 = vpack.c.bf16 %v10188_v15, %v10224_v40 }
 0x225   : > { %8670 = vmatpush1.bf16.msra.mxu1 %v10222_v27  ;;  %8383 = vmatprep.subr.bf16.mxu0 %v16262_v54  ;;  %17197 = vst [vmem:[#allocation32_spill] sm:$0xff] %v10250_v34  ;;  %v1977_v15 = vand.u32 4294901760, %v1872_v0  ;;  %v17249_v3 = vand.u32 4294901760, %v10250_v34 }
 0x226   : > { %17196 = vst [vmem:[#allocation31_spill] sm:$0xff] %v10243_v31  ;;  %v2558_v37 = vsub.f32 %v10224_v40, %v16260_v16  ;;  %v10258_v59 = vsub.f32 %v10235_v4, %v16261_v41  ;;  %8671 = vmatprep.subr.bf16.mxu1 %v16262_v54  ;;  %v10261_v18 = vpack.c.bf16 %v2552_v29, %v2545_v46  ;;  %v17199_v16 = vmov 1  }
 0x227   : > { %9640 = vset.pattern.permute.xlu1 %v16264_v17  ;;  %v1866_v28 = vpop.permute.xlu1 %1865  ;;  %v10273_v46 = vrot.slane %v10098_v57, %v9828_v22  ;;  %v10276_v29 = vand.u32 127, %v17202_v48  ;;  %v2579_v17 = vsub.f32 %v10232_v50, %v16268_v49  ;;  %v16272_v40 = vand.u32 4294901760, %v10206_v36 }
 0x228   : > { %17198 = vst [vmem:[#allocation33_spill] sm:$0xff] %v10258_v59  ;;  %v2559_v5 = vand.u32 4294901760, %v2558_v37  ;;  %v1968_v30 = vand.u32 4294901760, %v1866_v28  ;;  %825 = vperm.xlu1 %9640, %v9890_v39   ;;  %9656 = vset.pattern.permute.xlu0 %v17199_v16  ;;  %v10269_v41 = vpack.c.bf16 %v10250_v34, %v10258_v59  ;;  %v10291_v57 = vsub.f32 %v1872_v0, %v1977_v15 }
 0x229   : > { %17201 = vst [vmem:[#allocation35_spill] sm:$0xff] %v10273_v46  ;;  %17203 = vst [vmem:[#allocation36_spill] sm:$0xff] %v10276_v29  ;;  %1411 = vperm.xlu0 %9656, %v10036_v38   ;;  %vm679_vm7 = vcmp.lt.s32.totalorder %v9823_v11, %v10276_v29  ;;  %vm978_vm8 = vcmp.eq.f32.partialorder %v10110_v61, %v10273_v46  ;;  %vm914_vm9 = vcmp.gt.f32.partialorder %v10110_v61, %v10273_v46 }
 0x22a   : > { %17200 = vst [vmem:[#allocation34_spill] sm:$0xff] %v10269_v41  ;;  %v10279_v54 = vpack.c.bf16 %v1971_v26, %v1968_v30  ;;  %v10281_v37 = vsub.f32 %v1866_v28, %v1968_v30  ;;  %v10283_v39 = vpack.c.bf16 %v2566_v21, %v2559_v5  ;;  %17206 = vst [vmem:[#allocation39_spill] sm:$0xff] %v10291_v57  ;;  %v17208_v30 = vmov 0  }
 0x22b   : > { %v10289_v13 = vpop.permute.xlu1 %1897  ;;  %v17210_v28 = vmov 0.0|0.0   ;;  %v10322_v0 = vsub.f32 %v10206_v36, %v16272_v40  ;;  %vm1042_vm10 = vmand %vm978_vm8, %vm679_vm7  ;;  %v10406_v41 = vadd.s32 48, %v9823_v11 }
 0x22c   : > { %17204 = vst [vmem:[#allocation37_spill] sm:$0xff] %v10279_v54  ;;  %17205 = vst [vmem:[#allocation38_spill] sm:$0xff] %v10281_v37  ;;  %v16269_v48 = vand.u32 4294901760, %v10281_v37  ;;  %v16270_v38 = vand.u32 4294901760, %v10289_v13  ;;  %830 = vperm.xlu1 %9640, %v9900_v43   ;;  %8385 = vmatpush1.bf16.msra.mxu0 %v10279_v54  ;;  %v10299_v5 = vpack.c.bf16 %v10232_v50, %v10281_v37 }
 0x22d   : > { %8673 = vmatpush1.bf16.msra.mxu1 %v10279_v54  ;;  %9658 = vset.pattern.permute.xlu0 %v17208_v30  ;;  %17211 = vst [vmem:[#allocation42_spill] sm:$0xff] %v10322_v0  ;;  %vm10345_vm11 = vmor %vm914_vm9, %vm1042_vm10 }
 0x22e   : > { %17207 = vst [vmem:[#allocation40_spill] sm:$0xff] %v10299_v5  ;;  %v2572_v26 = vsub.f32 %v10281_v37, %v16269_v48  ;;  %v10313_v21 = vsub.f32 %v10289_v13, %v16270_v38  ;;  %895 = vperm.xlu0 %9658, %v10047_v42   ;;  %8386 = vmatprep.subr.bf16.mxu0 %v17210_v28  ;;  %v2580_v48 = vand.u32 4294901760, %v2579_v17  ;;  %v16277_v42 = vand.u32 4294901760, %v10291_v57  ;;  %v577_v37 = vld [vmem:[#allocation2 + $0x1] ss:$8 sm:$0x3] }
 0x22f   : > { %v1870_v49 = vpop.permute.xlu1 %1869  ;;  %8674 = vmatprep.subr.bf16.mxu1 %v17210_v28 }
 0x230   : > { %17209 = vst [vmem:[#allocation41_spill] sm:$0xff] %v10313_v21  ;;  %v2573_v38 = vand.u32 4294901760, %v2572_v26  ;;  %v1974_v50 = vand.u32 4294901760, %v1870_v49  ;;  %9641 = vset.pattern.permute.xlu1 %v17199_v16  ;;  %v10333_v40 = vpack.c.bf16 %v10322_v0, %v10313_v21  ;;  %v17215_v26 = vmov 0 }
 0x231   : > { %1367 = vperm.xlu1 %9641, %v9900_v43   ;;  %v17216_v26 = vsel %vm10345_vm11, 4294967295, %v17215_v26 }
 0x232   : > { %17212 = vst [vmem:[#allocation43_spill] sm:$0xff] %v10333_v40  ;;  %v10335_v63 = vpack.c.bf16 %v1977_v15, %v1974_v50  ;;  %v10337_v54 = vsub.f32 %v1870_v49, %v1974_v50  ;;  %9660 = vset.pattern.permute.xlu0 %v17199_v16  ;;  %v10340_v17 = vpack.c.bf16 %v2580_v48, %v2573_v38  ;;  %17217 = vst [vmem:[#allocation46_spill] sm:$0xff] %v17216_v26 }
 0x233   : > { %1423 = vperm.xlu0 %9660, %v10049_v44   ;;  %v10350_v43 = vpop.permute.xlu1 %1901  ;;  %v2593_v50 = vsub.f32 %v10291_v57, %v16277_v42  ;;  %v10363_v15 = vrot.slane %v577_v37, %v9828_v22  ;;  %v10366_v44 = vrot.slane %v577_v37, %v9831_v23  ;;  %v10377_v22 = vadd.s32 8, %v9823_v11 }
 0x234   : > { %17213 = vst [vmem:[#allocation44_spill] sm:$0xff] %v10335_v63  ;;  %17214 = vst [vmem:[#allocation45_spill] sm:$0xff] %v10337_v54  ;;  %v16283_v49 = vand.u32 4294901760, %v10337_v54  ;;  %8388 = vmatpush1.bf16.msra.mxu0 %v10335_v63  ;;  %8676 = vmatpush1.bf16.msra.mxu1 %v10335_v63  ;;  %v10360_v61 = vpack.c.bf16 %v10291_v57, %v10337_v54  ;;  %v17220_v57 = vmov 0.0   ;;  %v10386_v63 = vadd.s32 24, %v9823_v11 }
 0x235   : > { %17219 = vst [vmem:[#allocation48_spill] sm:$0xff] %v10363_v15  ;;  %1371 = vperm.xlu1 %9641, %v9926_v55   ;;  %8389 = vmatprep.subr.bf16.mxu0 %v17210_v28  ;;  %v7857_v37 = vsel %vm10345_vm11, 1.0, %v17220_v57  ;;  %v1876_v55 = vpop.permute.xlu0 %1875  ;;  %v10392_v42 = vadd.s32 32, %v9823_v11  ;;  %v17221_v48 = vand.u32 4294901760, %v10084_v51  ;;  %v10403_v40 = vadd.s32 40, %v9823_v11 }
 0x236   : > { %17218 = vst [vmem:[#allocation47_spill] sm:$0xff] %v10360_v61  ;;  %v2586_v38 = vsub.f32 %v10337_v54, %v16283_v49  ;;  %8677 = vmatprep.subr.bf16.mxu1 %v17210_v28  ;;  %v10389_v49 = vadd.s32 16, %v9823_v11  ;;  %v2594_v54 = vand.u32 4294901760, %v2593_v50  ;;  %v10408_v32 = vsub.f32 %v7857_v37, %v7857_v37 }
 0x237   : > { %v10383_v23 = vpop.permute.xlu1 %1903  ;;  %v2642_v9 = vsub.f32 %v10084_v51, %v17221_v48  ;;  %v1983_v50 = vand.u32 4294901760, %v1876_v55  ;;  %v17228_v61 = vand.u32 4294901760, %v10089_v52  ;;  %v10440_v26 = vadd.s32 80, %v9823_v11 }
 0x238   : > { %v2587_v27 = vand.u32 4294901760, %v2586_v38  ;;  %17222 = vst [vmem:[#allocation49_spill] sm:$0xff] %v10408_v32  ;;  %v17223_v38 = vand.u32 4294901760, %v10350_v43  ;;  %v17225_v56 = vand.u32 4294901760, %v10383_v23  ;;  %vm681_vm12 = vcmp.lt.s32.totalorder %v10377_v22, %v10276_v29 }
 0x239   : > { %9642 = vset.pattern.permute.xlu1 %v17208_v30  ;;  %v2649_v37 = vsub.f32 %v10089_v52, %v17228_v61  ;;  %v1880_v31 = vpop.permute.xlu0 %1879  ;;  %17234 = vst [vmem:[#allocation56_spill] sm:$0xff] %v10440_v26  ;;  %v2643_v5 = vand.u32 4294901760, %v2642_v9  ;;  %vm16353_vm4 = vcmp.lt.s32.totalorder %v10389_v49, %v10276_v29 }
 0x23a   : > { %v10413_v19 = vsub.f32 %v10350_v43, %v17223_v38  ;;  %v10418_v48 = vsub.f32 %v10383_v23, %v17225_v56  ;;  %840 = vperm.xlu1 %9642, %v9916_v53   ;;  %v10421_v51 = vpack.c.bf16 %v2594_v54, %v2587_v27  ;;  %v10428_v38 = vadd.s32 72, %v9823_v11 }
 0x23b   : > { %v1874_v25 = vpop.permute.xlu1 %1873  ;;  %v17231_v56 = vand.u32 4294901760, %v10071_v45  ;;  %v17232_v53 = vand.u32 4294901760, %v10075_v47  ;;  %v10451_v45 = vsub.f32 %v1876_v55, %v1983_v50  ;;  %v1989_v47 = vand.u32 4294901760, %v1880_v31 }
 0x23c   : > { %17224 = vst [vmem:[#allocation50_spill] sm:$0xff] %v10413_v19  ;;  %17226 = vst [vmem:[#allocation51_spill] sm:$0xff] %v10418_v48  ;;  %v1980_v27 = vand.u32 4294901760, %v1874_v25  ;;  %v10444_v61 = vpack.c.bf16 %v10418_v48, %v10413_v19  ;;  %v2650_v26 = vand.u32 4294901760, %v2649_v37  ;;  %v10474_v37 = vadd.s32 128, %v9823_v11 }
 0x23d   : > { %17227 = vst [vmem:[#allocation52_spill] sm:$0xff] %v10421_v51  ;;  %17229 = vst [vmem:[#allocation53_spill] sm:$0xff] %v10428_v38  ;;  %v10437_v54 = vpack.c.bf16 %v17232_v53, %v17231_v56  ;;  %v1884_v55 = vpop.permute.xlu0 %1883  ;;  %v10466_v38 = vadd.s32 104, %v9823_v11  ;;  %v10504_v51 = vadd.s32 128, %v10276_v29 }
 0x23e   : > { %17235 = vst [vmem:[#allocation57_spill] sm:$0xff] %v10444_v61  ;;  %17237 = vst [vmem:[#allocation59_spill] sm:$0xff] %v10451_v45  ;;  %v10453_v56 = vpack.c.bf16 %v1983_v50, %v1980_v27  ;;  %v10455_v53 = vsub.f32 %v1874_v25, %v1980_v27  ;;  %9646 = vset.pattern.permute.xlu1 %v17199_v16  ;;  %v17240_v61 = vand.u32 4294901760, %v10177_v1  ;;  %v17244_v27 = vand.u32 4294901760, %v10182_v6 }
 0x23f   : > { %17233 = vst [vmem:[#allocation55_spill] sm:$0xff] %v10437_v54  ;;  %1359 = vperm.xlu1 %9646, %v10020_v35   ;;  %v1878_v52 = vpop.permute.xlu1 %1877  ;;  %17241 = vst [vmem:[#allocation62_spill] sm:$0xff] %v10466_v38  ;;  %v10492_v38 = vsub.f32 %v1880_v31, %v1989_v47  ;;  %v17251_v31 = vand.u32 4294901760, %v10322_v0 }
 0x240   : > { %17238 = vst [vmem:[#allocation60_spill] sm:$0xff] %v10453_v56  ;;  %17239 = vst [vmem:[#allocation61_spill] sm:$0xff] %v10455_v53  ;;  %v10461_v9 = vsub.f32 %v10177_v1, %v17240_v61  ;;  %v1986_v50 = vand.u32 4294901760, %v1878_v52  ;;  %8391 = vmatpush1.bf16.msra.mxu0 %v10453_v56  ;;  %8679 = vmatpush1.bf16.msra.mxu1 %v10453_v56  ;;  %v10478_v35 = vpack.c.bf16 %v10451_v45, %v10455_v53 }
 0x241   : > { %17242 = vst [vmem:[#allocation63_spill] sm:$0xff] %v10474_v37  ;;  %v2656_v61 = vsub.f32 %v10182_v6, %v17244_v27  ;;  %8392 = vmatprep.subr.bf16.mxu0 %v17210_v28  ;;  %8680 = vmatprep.subr.bf16.mxu1 %v17210_v28  ;;  %v17245_v1 = vand.u32 4294901760, %v10408_v32  ;;  %17246 = vst [vmem:[#allocation65_spill] sm:$0xff] %v10492_v38  ;;  %v1995_v27 = vand.u32 4294901760, %v1884_v55 }
 0x242   : > { %17243 = vst [vmem:[#allocation64_spill] sm:$0xff] %v10478_v35  ;;  %v10494_v35 = vpack.c.bf16 %v1989_v47, %v1986_v50  ;;  %v10496_v24 = vsub.f32 %v1878_v52, %v1986_v50  ;;  %v2664_v25 = vand.u32 4294901760, %v10461_v9  ;;  %v2677_v6 = vsub.f32 %v10250_v34, %v17249_v3 }
 0x243   : > { %v10490_v56 = vsub.f32 %v10408_v32, %v17245_v1  ;;  %9647 = vset.pattern.permute.xlu1 %v17208_v30  ;;  %v1882_v37 = vpop.permute.xlu1 %1881  ;;  %v10506_v1 = vpack.c.bf16 %v2650_v26, %v2643_v5  ;;  %v10511_v52 = vsub.f32 %v10322_v0, %v17251_v31  ;;  %v10516_v3 = vadd.s32 120, %v9823_v11 }
 0x244   : > { %17247 = vst [vmem:[#allocation66_spill] sm:$0xff] %v10494_v35  ;;  %17248 = vst [vmem:[#allocation67_spill] sm:$0xff] %v10496_v24  ;;  %v1992_v47 = vand.u32 4294901760, %v1882_v37  ;;  %845 = vperm.xlu1 %9647, %v9952_v2   ;;  %8394 = vmatpush1.bf16.msra.mxu0 %v10494_v35  ;;  %v10520_v9 = vpack.c.bf16 %v10492_v38, %v10496_v24  ;;  %v2657_v50 = vand.u32 4294901760, %v2656_v61  ;;  %v17254_v5 = vand.u32 4294901760, %v10258_v59 }
 0x245   : > { %17250 = vst [vmem:[#allocation68_spill] sm:$0xff] %v10506_v1  ;;  %17252 = vst [vmem:[#allocation69_spill] sm:$0xff] %v10516_v3  ;;  %8682 = vmatpush1.bf16.msra.mxu1 %v10494_v35  ;;  %8395 = vmatprep.subr.bf16.mxu0 %v17210_v28  ;;  %v17255_v34 = vand.u32 4294901760, %v10168_v33  ;;  %v17256_v32 = vand.u32 4294901760, %v10107_v60  ;;  %v17258_v61 = vand.u32 4294901760, %v10313_v21  ;;  %v2678_v31 = vand.u32 4294901760, %v2677_v6 }
 0x246   : > { %17253 = vst [vmem:[#allocation70_spill] sm:$0xff] %v10520_v9  ;;  %v2670_v26 = vsub.f32 %v10258_v59, %v17254_v5  ;;  %v10538_v1 = vpack.c.bf16 %v1995_v27, %v1992_v47  ;;  %8683 = vmatprep.subr.bf16.mxu1 %v17210_v28  ;;  %v10542_v5 = vadd.s32 152, %v9823_v11  ;;  %v10544_v59 = vsub.f32 %v1884_v55, %v1995_v27 }
 0x247   : > { %v10533_v3 = vpack.c.bf16 %v17256_v32, %v17255_v34  ;;  %v2684_v9 = vsub.f32 %v10313_v21, %v17258_v61  ;;  %v10546_v0 = vsub.f32 %v1882_v37, %v1992_v47  ;;  %v10548_v33 = vpop.permute.xlu0 %750  ;;  %v10550_v60 = vpop.permute.xlu1 %1303  ;;  %v10553_v32 = vadd.s32 88, %v9823_v11 }
 0x248   : > { %17259 = vst [vmem:[#allocation72_spill] sm:$0xff] %v10538_v1  ;;  %17260 = vst [vmem:[#allocation73_spill] sm:$0xff] %v10544_v59  ;;  %v2692_v34 = vand.u32 4294901760, %v10511_v52  ;;  %9648 = vset.pattern.permute.xlu1 %v17199_v16  ;;  %8397 = vmatpush1.bf16.msra.mxu0 %v10538_v1  ;;  %v10561_v6 = vadd.s32 144, %v9823_v11  ;;  %v2671_v55 = vand.u32 4294901760, %v2670_v26  ;;  %v17263_v37 = vand.u32 4294901760, %v10451_v45 }
 0x249   : > { %17257 = vst [vmem:[#allocation71_spill] sm:$0xff] %v10533_v3  ;;  %17261 = vst [vmem:[#allocation74_spill] sm:$0xff] %v10546_v0  ;;  %vm980_vm13 = vcmp.eq.f32.partialorder %v10548_v33, %v10273_v46  ;;  %8685 = vmatpush1.bf16.msra.mxu1 %v10538_v1  ;;  %v10571_v52 = vpack.c.bf16 %v2664_v25, %v2657_v50  ;;  %v17264_v47 = vand.u32 4294901760, %v10235_v4  ;;  %v17265_v21 = vand.u32 4294901760, %v10140_v14 }
 0x24a   : > { %17262 = vst [vmem:[#allocation75_spill] sm:$0xff] %v10553_v32  ;;  %v10566_v27 = vsub.f32 %v10451_v45, %v17263_v37  ;;  %v2685_v35 = vand.u32 4294901760, %v2684_v9  ;;  %1379 = vperm.xlu1 %9648, %v9952_v2   ;;  %8398 = vmatprep.subr.bf16.mxu0 %v17210_v28  ;;  %vm916_vm14 = vcmp.gt.f32.partialorder %v10548_v33, %v10273_v46  ;;  %vm10589_vm15 = vmand %vm980_vm13, %vm681_vm12  ;;  %v10599_v2 = vadd.s32 168, %v9823_v11 }
 0x24b   : > { %v10577_v61 = vpack.c.bf16 %v17265_v21, %v17264_v47  ;;  %v10593_v14 = vpop.permute.xlu0 %1907  ;;  %8686 = vmatprep.subr.bf16.mxu1 %v17210_v28  ;;  %v10596_v21 = vpop.permute.xlu1 %1905  ;;  %v10603_v25 = vpack.c.bf16 %v10544_v59, %v10546_v0  ;;  %v17270_v9 = vand.u32 4294901760, %v10289_v13  ;;  %v17271_v50 = vand.u32 4294901760, %v10206_v36  ;;  %vm10644_vm0 = vmor %vm916_vm14, %vm10589_vm15 }
 0x24c   : > { %v17273_v37 = vand.u32 4294901760, %v10492_v38  ;;  %v17274_v26 = vand.u32 4294901760, %v10418_v48  ;;  %8400 = vmatpush1.bf16.msra.mxu0 %v10437_v54  ;;  %v10624_v13 = vpack.c.bf16 %v2678_v31, %v2671_v55  ;;  %v10627_v36 = vadd.s32 176, %v9823_v11 }
 0x24d   : > { %17266 = vst [vmem:[#allocation76_spill] sm:$0xff] %v10577_v61  ;;  %17269 = vst [vmem:[#allocation77_spill] sm:$0xff] %v10603_v25  ;;  %v10609_v47 = vpack.c.bf16 %v17271_v50, %v17270_v9  ;;  %v2608_v25 = vand.u32 4294901760, %v10566_v27  ;;  %8688 = vmatpush1.bf16.msra.mxu1 %v10437_v54  ;;  %8401 = vmatprep.subr.bf16.mxu0 %v17210_v28  ;;  %v17277_v50 = vand.u32 4294901760, %v10455_v53  ;;  %v17278_v31 = vmov 0 }
 0x24e   : > { %v10614_v32 = vsub.f32 %v10492_v38, %v17273_v37  ;;  %v2705_v45 = vsub.f32 %v10418_v48, %v17274_v26  ;;  %v10630_v37 = vadd.s32 200, %v9823_v11  ;;  %v17276_v26 = vand.u32 4294901760, %v10413_v19  ;;  %1383 = vperm.xlu1 %9648, %v9942_v62   ;;  %8689 = vmatprep.subr.bf16.mxu1 %v17210_v28 }
 0x24f   : > { %17272 = vst [vmem:[#allocation78_spill] sm:$0xff] %v10609_v47  ;;  %v2600_v27 = vsub.f32 %v10455_v53, %v17277_v50  ;;  %v17279_v31 = vsel %vm10644_vm0, 4294967295, %v17278_v31  ;;  %v10650_v55 = vpack.c.bf16 %v2692_v34, %v2685_v35  ;;  %vm917_vm2 = vcmp.gt.f32.partialorder %v10548_v33, %v10103_v58  ;;  %v10660_v1 = vpop.permute.xlu0 %760  ;;  %v10664_v62 = vpop.permute.xlu1 %755 }
 0x250   : > { %17275 = vst [vmem:[#allocation79_spill] sm:$0xff] %v10630_v37  ;;  %v2698_v9 = vsub.f32 %v10413_v19, %v17276_v26  ;;  %17280 = vst [vmem:[#allocation80_spill] sm:$0xff] %v17279_v31  ;;  %v17281_v26 = vand.u32 4294901760, %v10496_v24  ;;  %vm981_vm3 = vcmp.eq.f32.partialorder %v10548_v33, %v10103_v58  ;;  %v2031_v4 = vand.u32 4294901760, %v10593_v14  ;;  %8403 = vmatpush1.bf16.msra.mxu0 %v10533_v3 }
 0x251   : > { %v2622_v35 = vand.u32 4294901760, %v10614_v32  ;;  %v17282_v34 = vand.u32 4294901760, %v10350_v43  ;;  %v2706_v19 = vand.u32 4294901760, %v2705_v45  ;;  %v17285_v38 = vand.u32 4294901760, %v10544_v59  ;;  %8691 = vmatpush1.bf16.msra.mxu1 %v10533_v3  ;;  %vm10698_vm8 = vmor %vm917_vm2, %vm981_vm3  ;;  %8404 = vmatprep.subr.bf16.mxu0 %v17210_v28 }
 0x252   : > { %v2614_v50 = vsub.f32 %v10496_v24, %v17281_v26  ;;  %v17283_v26 = vand.u32 4294901760, %v10383_v23  ;;  %vm1503_vm5 = vcmp.eq.f32.partialorder %v10550_v60, %v10363_v15  ;;  %v2028_v53 = vand.u32 4294901760, %v10596_v21  ;;  %9649 = vset.pattern.permute.xlu1 %v17208_v30  ;;  %8692 = vmatprep.subr.bf16.mxu1 %v17210_v28 }
 0x253   : > { %v10676_v24 = vsub.f32 %v10544_v59, %v17285_v38  ;;  %v7859_v23 = vsel %vm10644_vm0, 1.0, %v17220_v57  ;;  %v10687_v43 = vadd.s32 112, %v9823_v11  ;;  %v2699_v45 = vand.u32 4294901760, %v2698_v9  ;;  %855 = vperm.xlu1 %9649, %v9972_v12   ;;  %v10715_v33 = vpop.permute.xlu1 %1909  ;;  %vm10726_vm14 = vmand %vm1503_vm5, %vm681_vm12 }
 0x254   : > { %v10671_v48 = vpack.c.bf16 %v17283_v26, %v17282_v34  ;;  %v2601_v32 = vand.u32 4294901760, %v2600_v27  ;;  %v17287_v38 = vand.u32 4294901760, %v10546_v0  ;;  %v17288_v26 = vmov 0  ;;  %v10731_v12 = vpop.permute.xlu0 %1299  ;;  %8406 = vmatpush1.bf16.msra.mxu0 %v10577_v61 }
 0x255   : > { %17286 = vst [vmem:[#allocation82_spill] sm:$0xff] %v10687_v43  ;;  %v17289_v26 = vsel %vm10698_vm8, 4294967295, %v17288_v26  ;;  %v10704_v59 = vadd.s32 192, %v9823_v11  ;;  %v2615_v9 = vand.u32 4294901760, %v2614_v50  ;;  %vm1440_vm9 = vcmp.gt.f32.partialorder %v10550_v60, %v10366_v44  ;;  %8694 = vmatpush1.bf16.msra.mxu1 %v10577_v61  ;;  %8407 = vmatprep.subr.bf16.mxu0 %v17210_v28  ;;  %v9675_v43 = vld [vmem:[#allocation3 + $0xc8] sm:$0xff] }
 0x256   : > { %17284 = vst [vmem:[#allocation81_spill] sm:$0xff] %v10671_v48  ;;  %v2628_v34 = vsub.f32 %v10546_v0, %v17287_v38  ;;  %17290 = vst [vmem:[#allocation83_spill] sm:$0xff] %v17289_v26  ;;  %vm1504_vm10 = vcmp.eq.f32.partialorder %v10550_v60, %v10366_v44  ;;  %v10711_v27 = vsub.f32 %v10593_v14, %v2031_v4  ;;  %v2636_v38 = vand.u32 4294901760, %v10676_v24 }
 0x257   : > { %17291 = vst [vmem:[#allocation84_spill] sm:$0xff] %v10704_v59  ;;  %vm1439_vm13 = vcmp.gt.f32.partialorder %v10550_v60, %v10363_v15  ;;  %v10734_v24 = vsub.f32 %v7859_v23, %v7859_v23  ;;  %v10736_v50 = vpack.c.bf16 %v2706_v19, %v2699_v45  ;;  %v10739_v0 = vsub.f32 %v10596_v21, %v2028_v53  ;;  %vm10756_vm12 = vmor %vm1440_vm9, %vm1504_vm10 }
 0x258   : > { %17292 = vst [vmem:[#allocation85_spill] sm:$0xff] %v10711_v27  ;;  %vm1501_vm15 = vcmp.eq.f32.partialorder %v10731_v12, %v10363_v15  ;;  %v7860_v22 = vsel %vm10698_vm8, 1.0, %v17220_v57  ;;  %v10748_v3 = vadd.s32 216, %v9823_v11  ;;  %v2629_v54 = vand.u32 4294901760, %v2628_v34  ;;  %8695 = vmatprep.subr.bf16.mxu1 %v17210_v28  ;;  %vm10774_vm3 = vmor %vm1439_vm13, %vm10726_vm14  ;;  %860 = vperm.xlu1 %9649, %v9962_v7  }
 0x259   : > { %17295 = vst [vmem:[#allocation86_spill] sm:$0xff] %v10734_v24  ;;  %17296 = vst [vmem:[#allocation87_spill] sm:$0xff] %v10739_v0  ;;  %v17298_v19 = vmov 0  ;;  %vm1437_vm2 = vcmp.gt.f32.partialorder %v10731_v12, %v10363_v15  ;;  %v10764_v21 = vpack.c.bf16 %v2608_v25, %v2601_v32  ;;  %v10767_v23 = vadd.s32 224, %v9823_v11  ;;  %v10786_v25 = vpop.permute.xlu1 %1911  ;;  %8409 = vmatpush1.bf16.msra.mxu0 %v10609_v47  ;;  %8697 = vmatpush1.bf16.msra.mxu1 %v10609_v47 }
 0x25a   : > { %17297 = vst [vmem:[#allocation88_spill] sm:$0xff] %v10748_v3  ;;  %v17299_v19 = vsel %vm10756_vm12, 4294967295, %v17298_v19  ;;  %v17302_v45 = vmov 0  ;;  %v16354_v34 = vand.u32 4294901760, %v10711_v27  ;;  %v10779_v61 = vpack.c.bf16 %v2031_v4, %v2028_v53  ;;  %vm1565_vm14 = vmand %vm1501_vm15, %vm679_vm7  ;;  %v10800_v53 = vpop.permute.xlu0 %1307  ;;  %8410 = vmatprep.subr.bf16.mxu0 %v17210_v28  ;;  %8698 = vmatprep.subr.bf16.mxu1 %v17210_v28 }
 0x25b   : > { %17300 = vst [vmem:[#allocation89_spill] sm:$0xff] %v17299_v19  ;;  %17301 = vst [vmem:[#allocation90_spill] sm:$0xff] %v10767_v23  ;;  %v17303_v45 = vsel %vm10774_vm3, 4294967295, %v17302_v45  ;;  %vm982_vm9 = vcmp.eq.f32.partialorder %v10664_v62, %v10273_v46  ;;  %v10788_v32 = vpack.c.bf16 %v2622_v35, %v2615_v9  ;;  %vm919_vm10 = vcmp.gt.f32.partialorder %v10664_v62, %v10103_v58 }
 0x25c   : > { %17304 = vst [vmem:[#allocation91_spill] sm:$0xff] %v17303_v45  ;;  %17305 = vst [vmem:[#allocation92_spill] sm:$0xff] %v10779_v61  ;;  %vm983_vm13 = vcmp.eq.f32.partialorder %v10664_v62, %v10103_v58  ;;  %v10803_v60 = vsub.f32 %v7860_v22, %v7860_v22  ;;  %v17307_v9 = vmov 0  ;;  %vm1442_vm7 = vcmp.gt.f32.partialorder %v10800_v53, %v10366_v44  ;;  %9651 = vset.pattern.permute.xlu1 %v17199_v16 }
 0x25d   : > { %vm10810_vm1 = vmor %vm1437_vm2, %vm1565_vm14  ;;  %vm1506_vm15 = vcmp.eq.f32.partialorder %v10800_v53, %v10366_v44  ;;  %v7924_v14 = vsel %vm10756_vm12, 1.0, %v17220_v57  ;;  %vm1502_vm5 = vcmp.eq.f32.partialorder %v10731_v12, %v10366_v44  ;;  %v7923_v4 = vsel %vm10774_vm3, 1.0, %v17220_v57  ;;  %1391 = vperm.xlu1 %9651, %v9962_v7   ;;  %8412 = vmatpush1.bf16.msra.mxu0 %v10671_v48 }
 0x25e   : > { %17306 = vst [vmem:[#allocation93_spill] sm:$0xff] %v10803_v60  ;;  %v17308_v9 = vsel %vm10810_vm1, 4294967295, %v17307_v9  ;;  %vm10828_vm2 = vmand %vm982_vm9, %vm16353_vm4  ;;  %v10841_v35 = vpack.c.bf16 %v2636_v38, %v2629_v54  ;;  %v10846_v47 = vsub.f32 %v10711_v27, %v16354_v34  ;;  %v17313_v54 = vmov 0  ;;  %v10864_v34 = vpop.permute.xlu1 %1311  ;;  %v10884_v31 = vpop.permute.xlu0 %1315  ;;  %8700 = vmatpush1.bf16.msra.mxu1 %v10671_v48  ;;  %8413 = vmatprep.subr.bf16.mxu0 %v17210_v28 }
 0x25f   : > { %17309 = vst [vmem:[#allocation94_spill] sm:$0xff] %v17308_v9  ;;  %vm10858_vm14 = vmor %vm919_vm10, %vm983_vm13  ;;  %v2034_v38 = vand.u32 4294901760, %v10715_v33  ;;  %v7921_v27 = vsel %vm10810_vm1, 1.0, %v17220_v57  ;;  %vm984_vm9 = vcmp.eq.f32.partialorder %v10660_v1, %v10273_v46  ;;  %v17316_v45 = vmov 0  ;;  %8701 = vmatprep.subr.bf16.mxu1 %v17210_v28 }
 0x260   : > { %17312 = vst [vmem:[#allocation95_spill] sm:$0xff] %v10846_v47  ;;  %v17314_v54 = vsel %vm10858_vm14, 4294967295, %v17313_v54  ;;  %vm10879_vm10 = vmor %vm1442_vm7, %vm1506_vm15  ;;  %v10888_v9 = vsub.f32 %v7924_v14, %v7924_v14  ;;  %v17320_v26 = vand.u32 4294901760, %v10739_v0  ;;  %vm918_vm13 = vcmp.gt.f32.partialorder %v10664_v62, %v10273_v46 }
 0x261   : > { %17315 = vst [vmem:[#allocation96_spill] sm:$0xff] %v17314_v54  ;;  %v17317_v45 = vsel %vm10879_vm10, 4294967295, %v17316_v45  ;;  %vm17322_vm7 = vcmp.gt.f32.partialorder %v10731_v12, %v10366_v44  ;;  %v17323_v7 = vmov 0  ;;  %vm1505_vm4 = vcmp.eq.f32.partialorder %v10800_v53, %v10363_v15  ;;  %1395 = vperm.xlu1 %9651, %v9988_v20   ;;  %8415 = vmatpush1.bf16.msra.mxu0 %v10779_v61 }
 0x262   : > { %17318 = vst [vmem:[#allocation97_spill] sm:$0xff] %v17317_v45  ;;  %17319 = vst [vmem:[#allocation98_spill] sm:$0xff] %v10888_v9  ;;  %v10893_v11 = vsub.f32 %v10739_v0, %v17320_v26  ;;  %v17326_v26 = vand.u32 4294901760, %v10734_v24  ;;  %v10921_v23 = vsub.f32 %v7921_v27, %v7921_v27  ;;  %v10923_v19 = vsub.f32 %v7923_v4, %v7923_v4  ;;  %v1916_v4 = vpop.permute.xlu0 %1915 }
 0x263   : > { %vm10905_vm15 = vmor %vm17322_vm7, %vm1502_vm5  ;;  %v7862_v3 = vsel %vm10858_vm14, 1.0, %v17220_v57  ;;  %v17331_v27 = vmov 0  ;;  %v7926_v62 = vsel %vm10879_vm10, 1.0, %v17220_v57  ;;  %v17335_v54 = vand.u32 4294901760, %v10786_v25  ;;  %8703 = vmatpush1.bf16.msra.mxu1 %v10779_v61  ;;  %8416 = vmatprep.subr.bf16.mxu0 %v17210_v28 }
 0x264   : > { %17321 = vst [vmem:[#allocation99_spill] sm:$0xff] %v10893_v11  ;;  %v17324_v7 = vsel %vm10905_vm15, 4294967295, %v17323_v7  ;;  %v10912_v14 = vsub.f32 %v10734_v24, %v17326_v26  ;;  %v7922_v12 = vsel %vm10905_vm15, 1.0, %v17220_v57  ;;  %17327 = vst [vmem:[#allocation101_spill] sm:$0xff] %v10921_v23  ;;  %v10927_v26 = vsub.f32 %v10715_v33, %v2034_v38  ;;  %v1914_v24 = vpop.permute.xlu1 %1913  ;;  %8704 = vmatprep.subr.bf16.mxu1 %v17210_v28 }
 0x265   : > { %17325 = vst [vmem:[#allocation100_spill] sm:$0xff] %v17324_v7  ;;  %17328 = vst [vmem:[#allocation102_spill] sm:$0xff] %v10923_v19  ;;  %v10929_v0 = vsub.f32 %v7922_v12, %v7922_v12  ;;  %v2040_v33 = vand.u32 4294901760, %v1914_v24  ;;  %v17334_v12 = vand.u32 4294901760, %v10803_v60  ;;  %v10956_v7 = vpack.c.bf16 %v17335_v54, %v2034_v38  ;;  %9652 = vset.pattern.permute.xlu1 %v17208_v30 }
 0x266   : > { %17329 = vst [vmem:[#allocation103_spill] sm:$0xff] %v10927_v26  ;;  %vm10939_vm5 = vmor %vm918_vm13, %vm10828_vm2  ;;  %vm17337_vm13 = vcmp.lt.s32.totalorder %v10389_v49, %v10276_v29  ;;  %v2043_v22 = vand.u32 4294901760, %v1916_v4  ;;  %vm17340_vm2 = vcmp.lt.s32.totalorder %v10386_v63, %v10276_v29  ;;  %v17347_v61 = vmov 0  ;;  %870 = vperm.xlu1 %9652, %v9675_v43  }
 0x267   : > { %17330 = vst [vmem:[#allocation104_spill] sm:$0xff] %v10929_v0  ;;  %v17332_v27 = vsel %vm10939_vm5, 4294967295, %v17331_v27  ;;  %v10948_v48 = vsub.f32 %v10803_v60, %v17334_v12  ;;  %17336 = vst [vmem:[#allocation106_spill] sm:$0xff] %v10956_v7  ;;  %v10985_v54 = vsub.f32 %v1914_v24, %v2040_v33  ;;  %v10989_v12 = vsub.f32 %v7862_v3, %v7862_v3 }
 0x268   : > { %17333 = vst [vmem:[#allocation105_spill] sm:$0xff] %v17332_v27  ;;  %vm10966_vm7 = vmand %vm1505_vm4, %vm17337_vm13  ;;  %vm17345_vm13 = vcmp.eq.f32.partialorder %v10660_v1, %v10103_v58  ;;  %v17350_v60 = vand.u32 4294901760, %v10929_v0  ;;  %v11004_v45 = vsub.f32 %v1916_v4, %v2043_v22  ;;  %v11006_v47 = vpop.permute.xlu1 %765  ;;  %v11008_v3 = vsub.f32 %v7926_v62, %v7926_v62  ;;  %8418 = vmatpush1.bf16.msra.mxu0 %v10956_v7 }
 0x269   : > { %vm10979_vm10 = vmand %vm984_vm9, %vm17340_vm2  ;;  %17343 = vst [vmem:[#allocation107_spill] sm:$0xff] %v10985_v54  ;;  %vm17346_vm9 = vcmp.gt.f32.partialorder %v10660_v1, %v10103_v58  ;;  %v7861_v38 = vsel %vm10939_vm5, 1.0, %v17220_v57  ;;  %v17354_v59 = vmov 0  ;;  %v17357_v4 = vand.u32 4294901760, %v10888_v9  ;;  %8706 = vmatpush1.bf16.msra.mxu1 %v10956_v7  ;;  %8419 = vmatprep.subr.bf16.mxu0 %v17210_v28 }
 0x26a   : > { %17344 = vst [vmem:[#allocation108_spill] sm:$0xff] %v10989_v12  ;;  %vm10997_vm2 = vmor %vm17346_vm9, %vm17345_vm13  ;;  %v4646_v24 = vsub.f32 %v10929_v0, %v17350_v60  ;;  %vm17353_vm13 = vcmp.gt.f32.partialorder %v10800_v53, %v10363_v15  ;;  %v11026_v60 = vpop.permute.xlu0 %1327  ;;  %vm17358_vm4 = vcmp.lt.s32.totalorder %v10386_v63, %v10276_v29  ;;  %vm17359_vm5 = vcmp.eq.f32.partialorder %v10864_v34, %v10363_v15 }
 0x26b   : > { %v17348_v61 = vsel %vm10997_vm2, 4294967295, %v17347_v61  ;;  %17351 = vst [vmem:[#allocation110_spill] sm:$0xff] %v11004_v45  ;;  %17352 = vst [vmem:[#allocation111_spill] sm:$0xff] %v11008_v3  ;;  %v11032_v62 = vsub.f32 %v10888_v9, %v17357_v4  ;;  %v11051_v53 = vpack.c.bf16 %v11004_v45, %v10985_v54  ;;  %v17364_v63 = vmov 0  ;;  %8707 = vmatprep.subr.bf16.mxu1 %v17210_v28 }
 0x26c   : > { %17349 = vst [vmem:[#allocation109_spill] sm:$0xff] %v17348_v61  ;;  %vm11019_vm9 = vmor %vm17353_vm13, %vm10966_vm7  ;;  %v4647_v4 = vand.u32 4294901760, %v4646_v24  ;;  %vm17363_vm7 = vcmp.gt.f32.partialorder %v10660_v1, %v10273_v46  ;;  %v11063_v9 = vpack.c.bf16 %v2043_v22, %v2040_v33  ;;  %v17368_v24 = vand.u32 4294901760, %v10921_v23  ;;  %v11084_v33 = vpop.permute.xlu1 %770 }
 0x26d   : > { %v17355_v59 = vsel %vm11019_vm9, 4294967295, %v17354_v59  ;;  %vm11045_vm3 = vmand %vm17359_vm5, %vm17358_vm4  ;;  %17362 = vst [vmem:[#allocation113_spill] sm:$0xff] %v11051_v53  ;;  %v11070_v7 = vsub.f32 %v7861_v38, %v7861_v38  ;;  %v17370_v49 = vand.u32 4294901760, %v10786_v25  ;;  %vm987_vm4 = vcmp.eq.f32.partialorder %v11006_v47, %v10103_v58 }
 0x26e   : > { %17356 = vst [vmem:[#allocation112_spill] sm:$0xff] %v17355_v59  ;;  %vm11059_vm13 = vmor %vm17363_vm7, %vm10979_vm10  ;;  %v4652_v0 = vsub.f32 %v10921_v23, %v17368_v24  ;;  %4648 = vmatprep.mubr.f32.mxu1 %v4647_v4  ;;  %vm17372_vm7 = vcmp.gt.f32.partialorder %v10864_v34, %v10363_v15  ;;  %v569_v4 = vld [vmem:[#allocation3 + $0xd0] sm:$0xff]  ;;  %8421 = vmatpush1.bf16.msra.mxu0 %v11063_v9  ;;  %v2070_v24 = vand.u32 4294901760, %v10912_v14  ;;  %v7864_v20 = vsel %vm10997_vm2, 1.0, %v17220_v57  ;;  %v11121_v43 = vpop.permute.xlu0 %775 }
 0x26f   : > { %v17365_v63 = vsel %vm11059_vm13, 4294967295, %v17364_v63  ;;  %17367 = vst [vmem:[#allocation115_spill] sm:$0xff] %v11063_v9  ;;  %17369 = vst [vmem:[#allocation116_spill] sm:$0xff] %v11070_v7  ;;  %v11075_v1 = vsub.f32 %v10786_v25, %v17370_v49  ;;  %v17373_v25 = vmov 0  ;;  %v7925_v49 = vsel %vm11019_vm9, 1.0, %v17220_v57  ;;  %875 = vperm.xlu1 %9652, %v569_v4   ;;  %8709 = vmatpush1.bf16.msra.mxu1 %v11063_v9 }
 0x270   : > { %17366 = vst [vmem:[#allocation114_spill] sm:$0xff] %v17365_v63  ;;  %vm11093_vm10 = vmor %vm17372_vm7, %vm11045_vm3  ;;  %v17376_v38 = vand.u32 4294901760, %v10927_v26  ;;  %vm17377_vm3 = vcmp.eq.f32.partialorder %v10864_v34, %v10366_v44  ;;  %vm17378_vm7 = vcmp.gt.f32.partialorder %v10864_v34, %v10366_v44  ;;  %v17379_v14 = vmov 0  ;;  %8422 = vmatprep.subr.bf16.mxu0 %v17210_v28  ;;  %8710 = vmatprep.subr.bf16.mxu1 %v17210_v28 }
 0x271   : > { %17371 = vst [vmem:[#allocation117_spill] sm:$0xff] %v11075_v1  ;;  %v17374_v25 = vsel %vm11093_vm10, 4294967295, %v17373_v25  ;;  %vm11116_vm5 = vmor %vm17378_vm7, %vm17377_vm3  ;;  %v2064_v23 = vand.u32 4294901760, %v10948_v48  ;;  %v7863_v53 = vsel %vm11059_vm13, 1.0, %v17220_v57  ;;  %vm17382_vm3 = vcmp.gt.f32.partialorder %v11006_v47, %v10103_v58 }
 0x272   : > { %17375 = vst [vmem:[#allocation118_spill] sm:$0xff] %v17374_v25  ;;  %v11108_v22 = vsub.f32 %v10927_v26, %v17376_v38  ;;  %v17380_v14 = vsel %vm11116_vm5, 4294967295, %v17379_v14  ;;  %v4662_v38 = vand.u32 4294901760, %v11032_v62  ;;  %vm11134_vm7 = vmor %vm17382_vm3, %vm987_vm4  ;;  %v17383_v34 = vmov 0 }
 0x273   : > { %17381 = vst [vmem:[#allocation119_spill] sm:$0xff] %v17380_v14  ;;  %v17384_v34 = vsel %vm11134_vm7, 4294967295, %v17383_v34  ;;  %v4653_v9 = vand.u32 4294901760, %v4652_v0  ;;  %v17386_v48 = vand.u32 4294901760, %v10923_v19  ;;  %v17387_v26 = vand.u32 4294901760, %v10989_v12  ;;  %9654 = vset.pattern.permute.xlu1 %v17199_v16 }
 0x274   : > { %17385 = vst [vmem:[#allocation120_spill] sm:$0xff] %v17384_v34  ;;  %v16429_v59 = vand.u32 4294901760, %v11070_v7  ;;  %v17388_v27 = vand.u32 4294901760, %v10490_v56  ;;  %v17389_v11 = vand.u32 4294901760, %v11008_v3  ;;  %v11153_v37 = vsub.f32 %v7925_v49, %v7925_v49  ;;  %v11161_v56 = vpop.permute.xlu1 %1319  ;;  %1403 = vperm.xlu1 %9654, %v569_v4  }
 0x275   : > { %v4667_v62 = vsub.f32 %v10923_v19, %v17386_v48  ;;  %v2078_v63 = vsub.f32 %v10989_v12, %v17387_v26  ;;  %v11155_v48 = vsub.f32 %v7864_v20, %v7864_v20  ;;  %4654 = vmatmul.mubr.f32.vlgmr.msra.gmra.mrb[0].mxu1 %v4653_v9  ;;  %v7928_v26 = vsel %vm11116_vm5, 1.0, %v17220_v57 }
 0x276   : > { %2056 = vmatmul.mubr.f32.vlgmr.msra.gmra.mrb[0].mxu0 %v17388_v27  ;;  %v4676_v0 = vsub.f32 %v11008_v3, %v17389_v11  ;;  %17390 = vst [vmem:[#allocation121_spill] sm:$0xff] %v11153_v37  ;;  %v11166_v27 = vsub.f32 %v7863_v53, %v7863_v53  ;;  %vm1510_vm13 = vcmp.eq.f32.partialorder %v10884_v31, %v10366_v44  ;;  %v11176_v11 = vpop.permute.xlu0 %790  ;;  %v7866_v9 = vsel %vm11134_vm7, 1.0, %v17220_v57 }
 0x277   : > { %17391 = vst [vmem:[#allocation122_spill] sm:$0xff] %v11155_v48  ;;  %2065 = vmatprep.mubr.f32.mxu0 %v2064_v23  ;;  %vm986_vm9 = vcmp.eq.f32.partialorder %v11006_v47, %v10273_v46  ;;  %8424 = vmatpush1.bf16.msra.mxu0 %v10185_v8  ;;  %v7927_v23 = vsel %vm11093_vm10, 1.0, %v17220_v57  ;;  %v4668_v53 = vand.u32 4294901760, %v4667_v62  ;;  %v2084_v49 = vsub.f32 %v11070_v7, %v16429_v59 }
 0x278   : > { %17392 = vst [vmem:[#allocation123_spill] sm:$0xff] %v11166_v27  ;;  %4663 = vmatprep.mubr.f32.mxu1 %v4662_v38  ;;  %8712 = vmatpush1.bf16.msra.mxu1 %v10185_v8  ;;  %v16436_v20 = vand.u32 4294901760, %v11153_v37  ;;  %v2079_v61 = vand.u32 4294901760, %v2078_v63  ;;  %v4677_v3 = vand.u32 4294901760, %v4676_v0  ;;  %v16439_v19 = vand.u32 4294901760, %v11155_v48  ;;  %v11205_v4 = vpop.permute.xlu1 %1323  ;;  %v9676_v0 = vld [vmem:[#allocation3 + $0xd8] sm:$0xff] }
 0x279   : > { %v11192_v12 = vsub.f32 %v7928_v26, %v7928_v26  ;;  %vm17394_vm4 = vcmp.lt.s32.totalorder %v10392_v42, %v10276_v29  ;;  %8425 = vmatprep.subr.bf16.mxu0 %v17210_v28  ;;  %4669 = vmatmul.mubr.f32.gmra.mrb[2].mxu1 %v4668_v53  ;;  %v11211_v38 = vsub.f32 %v7927_v23, %v7927_v23  ;;  %v17399_v26 = vand.u32 4294901760, %v11075_v1 }
 0x27a   : > { %2071 = vmatmul.mubr.f32.gmra.mrb[2].mxu0 %v2070_v24  ;;  %vm11200_vm3 = vmand %vm986_vm9, %vm17394_vm4  ;;  %v4682_v63 = vsub.f32 %v11153_v37, %v16436_v20  ;;  %v16437_v24 = vand.u32 4294901760, %v11166_v27  ;;  %v11213_v62 = vsub.f32 %v7866_v9, %v7866_v9  ;;  %vm17400_vm4 = vcmp.gt.f32.partialorder %v10884_v31, %v10366_v44  ;;  %8713 = vmatprep.subr.bf16.mxu1 %v17210_v28  ;;  %v11234_v9 = vpop.permute.xlu0 %805  ;;  %v17462_v37 = vld [vmem:[#allocation63_spill] sm:$0xff] }
 0x27b   : > { %17393 = vst [vmem:[#allocation124_spill] sm:$0xff] %v11192_v12  ;;  %17397 = vst [vmem:[#allocation125_spill] sm:$0xff] %v11211_v38  ;;  %v11219_v59 = vsub.f32 %v11075_v1, %v17399_v26  ;;  %v17401_v23 = vmov 0  ;;  %2080 = vmatprep.mubr.f32.mxu0 %v2079_v61  ;;  %v16438_v53 = vand.u32 4294901760, %v11192_v12  ;;  %vm17404_vm9 = vcmp.lt.s32.totalorder %v10392_v42, %v10276_v29  ;;  %8427 = vmatpush1.bf16.msra.mxu0 %v10261_v18 }
 0x27c   : > { %17398 = vst [vmem:[#allocation126_spill] sm:$0xff] %v11213_v62  ;;  %vm11229_vm10 = vmor %vm17400_vm4, %vm1510_vm13  ;;  %vm17405_vm7 = vcmp.eq.f32.partialorder %v10884_v31, %v10363_v15  ;;  %4678 = vmatprep.mubr.f32.mxu1 %v4677_v3  ;;  %v2085_v61 = vand.u32 4294901760, %v2084_v49  ;;  %vm17408_vm4 = vcmp.gt.f32.partialorder %v11006_v47, %v10273_v46  ;;  %v17409_v42 = vmov 0  ;;  %8715 = vmatpush1.bf16.msra.mxu1 %v10261_v18 }
 0x27d   : > { %v17402_v23 = vsel %vm11229_vm10, 4294967295, %v17401_v23  ;;  %vm11243_vm5 = vmand %vm17405_vm7, %vm17404_vm9  ;;  %1407 = vperm.xlu1 %9654, %v9676_v0   ;;  %v4683_v20 = vand.u32 4294901760, %v4682_v63  ;;  %v2093_v3 = vsub.f32 %v11155_v48, %v16439_v19  ;;  %v16440_v49 = vand.u32 4294901760, %v11211_v38  ;;  %8428 = vmatprep.subr.bf16.mxu0 %v17210_v28  ;;  %v17468_v48 = vld [vmem:[#allocation53_spill] sm:$0xff] }
 0x27e   : > { %17403 = vst [vmem:[#allocation127_spill] sm:$0xff] %v17402_v23  ;;  %vm11257_vm7 = vmor %vm17408_vm4, %vm11200_vm3  ;;  %2086 = vmatmul.mubr.f32.gmra.mrb[4].mxu0 %v2085_v61  ;;  %v4691_v47 = vsub.f32 %v11192_v12, %v16438_v53  ;;  %v2099_v18 = vsub.f32 %v11166_v27, %v16437_v24  ;;  %v7930_v63 = vsel %vm11229_vm10, 1.0, %v17220_v57  ;;  %8716 = vmatprep.subr.bf16.mxu1 %v17210_v28  ;;  %v11284_v61 = vpop.permute.xlu1 %780  ;;  %v17414_v19 = vmov 0 }
 0x27f   : > { %v17410_v42 = vsel %vm11257_vm7, 4294967295, %v17409_v42  ;;  %4684 = vmatmul.mubr.f32.gmra.mrb[4].mxu1 %v4683_v20  ;;  %v2094_v0 = vand.u32 4294901760, %v2093_v3  ;;  %v4697_v24 = vsub.f32 %v11211_v38, %v16440_v49  ;;  %v11289_v53 = vsub.f32 %v7930_v63, %v7930_v63  ;;  %8430 = vmatpush1.bf16.msra.mxu0 %v10283_v39  ;;  %v11305_v3 = vpop.permute.xlu0 %1339 }
 0x280   : > { %17411 = vst [vmem:[#allocation128_spill] sm:$0xff] %v17410_v42  ;;  %vm17413_vm3 = vcmp.gt.f32.partialorder %v10884_v31, %v10363_v15  ;;  %v4692_v20 = vand.u32 4294901760, %v4691_v47  ;;  %v7865_v26 = vsel %vm11257_vm7, 1.0, %v17220_v57  ;;  %v17417_v63 = vand.u32 4294901760, %v10985_v54  ;;  %8718 = vmatpush1.bf16.msra.mxu1 %v10283_v39  ;;  %8431 = vmatprep.subr.bf16.mxu0 %v17210_v28 }
 0x281   : > { %17412 = vst [vmem:[#allocation129_spill] sm:$0xff] %v11289_v53  ;;  %vm11296_vm13 = vmor %vm17413_vm3, %vm11243_vm5  ;;  %vm17418_vm3 = vcmp.eq.f32.partialorder %v11084_v33, %v10103_v58  ;;  %vm17419_vm4 = vcmp.gt.f32.partialorder %v11084_v33, %v10103_v58  ;;  %v17420_v47 = vmov 0  ;;  %2095 = vmatprep.mubr.f32.mxu0 %v2094_v0  ;;  %v17423_v31 = vand.u32 4294901760, %v11004_v45  ;;  %9655 = vset.pattern.permute.xlu1 %v17208_v30 }
 0x282   : > { %v17415_v19 = vsel %vm11296_vm13, 4294967295, %v17414_v19  ;;  %v11314_v49 = vsub.f32 %v10985_v54, %v17417_v63  ;;  %vm11324_vm9 = vmor %vm17419_vm4, %vm17418_vm3  ;;  %v2100_v63 = vand.u32 4294901760, %v2099_v18  ;;  %vm17424_vm4 = vcmp.lt.s32.totalorder %v10403_v40, %v10276_v29  ;;  %4693 = vmatprep.mubr.f32.mxu1 %v4692_v20  ;;  %8719 = vmatprep.subr.bf16.mxu1 %v17210_v28 }
 0x283   : > { %17416 = vst [vmem:[#allocation130_spill] sm:$0xff] %v17415_v19  ;;  %v17421_v47 = vsel %vm11324_vm9, 4294967295, %v17420_v47  ;;  %v11334_v8 = vsub.f32 %v11004_v45, %v17423_v31  ;;  %vm17425_vm3 = vcmp.eq.f32.partialorder %v11084_v33, %v10273_v46  ;;  %v4698_v39 = vand.u32 4294901760, %v4697_v24  ;;  %v9677_v24 = vld [vmem:[#allocation3 + $0xe0] sm:$0xff]  ;;  %8433 = vmatpush1.bf16.msra.mxu0 %v10340_v17 }
 0x284   : > { %17422 = vst [vmem:[#allocation131_spill] sm:$0xff] %v17421_v47  ;;  %vm11344_vm10 = vmand %vm17425_vm3, %vm17424_vm4  ;;  %v17428_v18 = vand.u32 4294901760, %v11213_v62  ;;  %vm17429_vm4 = vcmp.eq.f32.partialorder %v11161_v56, %v10366_v44  ;;  %vm17430_vm3 = vcmp.gt.f32.partialorder %v11161_v56, %v10366_v44  ;;  %v17431_v20 = vmov 0  ;;  %885 = vperm.xlu1 %9655, %v9677_v24   ;;  %2101 = vmatmul.mubr.f32.gmra.mrb[6].mxu0 %v2100_v63  ;;  %v17778_v47 = vld [vmem:[#allocation95_spill] sm:$0xff] }
 0x285   : > { %vm11362_vm2 = vmor %vm17430_vm3, %vm17429_vm4  ;;  %v16457_v31 = vand.u32 4294901760, %v11289_v53  ;;  %v11369_v45 = vsub.f32 %v7865_v26, %v7865_v26  ;;  %vm17435_vm7 = vcmp.lt.s32.totalorder %v10403_v40, %v10276_v29  ;;  %vm17436_vm4 = vcmp.eq.f32.partialorder %v11161_v56, %v10363_v15  ;;  %4699 = vmatmul.mubr.f32.gmra.mrb[6].mxu1 %v4698_v39  ;;  %8434 = vmatprep.subr.bf16.mxu0 %v17210_v28 }
 0x286   : > { %v2108_v0 = vsub.f32 %v11213_v62, %v17428_v18  ;;  %v17432_v20 = vsel %vm11362_vm2, 4294967295, %v17431_v20  ;;  %v11367_v18 = vpop.permute.xlu1 %785  ;;  %vm11379_vm3 = vmand %vm17436_vm4, %vm17435_vm7  ;;  %v7929_v26 = vsel %vm11296_vm13, 1.0, %v17220_v57  ;;  %v7868_v24 = vsel %vm11324_vm9, 1.0, %v17220_v57  ;;  %8721 = vmatpush1.bf16.msra.mxu1 %v10340_v17 }
 0x287   : > { %17433 = vst [vmem:[#allocation132_spill] sm:$0xff] %v17432_v20  ;;  %17434 = vst [vmem:[#allocation133_spill] sm:$0xff] %v11369_v45  ;;  %vm17439_vm7 = vcmp.gt.f32.partialorder %v11084_v33, %v10273_v46  ;;  %v17440_v40 = vmov 0  ;;  %v4706_v54 = vsub.f32 %v11289_v53, %v16457_v31  ;;  %vm17443_vm14 = vcmp.eq.f32.partialorder %v11121_v43, %v10103_v58  ;;  %v572_v31 = vld [vmem:[#allocation3 + $0xe8] sm:$0xff]  ;;  %8722 = vmatprep.subr.bf16.mxu1 %v17210_v28 }
 0x288   : > { %v2109_v63 = vand.u32 4294901760, %v2108_v0  ;;  %vm11395_vm4 = vmor %vm17439_vm7, %vm11344_vm10  ;;  %vm17444_vm13 = vcmp.gt.f32.partialorder %v11121_v43, %v10103_v58  ;;  %v17445_v39 = vmov 0  ;;  %v11426_v0 = vpop.permute.xlu0 %1351  ;;  %v7932_v33 = vsel %vm11362_vm2, 1.0, %v17220_v57  ;;  %890 = vperm.xlu1 %9655, %v572_v31  }
 0x289   : > { %v17441_v40 = vsel %vm11395_vm4, 4294967295, %v17440_v40  ;;  %vm11421_vm9 = vmor %vm17444_vm13, %vm17443_vm14  ;;  %vm17448_vm14 = vcmp.gt.f32.partialorder %v11161_v56, %v10363_v15  ;;  %v17449_v17 = vmov 0  ;;  %v17452_v53 = vand.u32 4294901760, %v11369_v45 }
 0x28a   : > { %17442 = vst [vmem:[#allocation134_spill] sm:$0xff] %v17441_v40  ;;  %v17446_v39 = vsel %vm11421_vm9, 4294967295, %v17445_v39  ;;  %2110 = vmatprep.mubr.f32.mxu0 %v2109_v63  ;;  %vm11440_vm13 = vmor %vm17448_vm14, %vm11379_vm3  ;;  %v4707_v63 = vand.u32 4294901760, %v4706_v54  ;;  %v11448_v27 = vsub.f32 %v7929_v26, %v7929_v26  ;;  %v11450_v12 = vsub.f32 %v7868_v24, %v7868_v24  ;;  %v11469_v24 = vpop.permute.xlu1 %1331 }
 0x28b   : > { %17447 = vst [vmem:[#allocation135_spill] sm:$0xff] %v17446_v39  ;;  %v17450_v17 = vsel %vm11440_vm13, 4294967295, %v17449_v17  ;;  %v2114_v62 = vsub.f32 %v11369_v45, %v17452_v53  ;;  %vm17455_vm14 = vcmp.eq.f32.partialorder %v11205_v4, %v10366_v44  ;;  %vm17456_vm10 = vcmp.gt.f32.partialorder %v11205_v4, %v10366_v44  ;;  %v17461_v45 = vld [vmem:[#allocation52_spill] sm:$0xff] }
 0x28c   : > { %17451 = vst [vmem:[#allocation136_spill] sm:$0xff] %v17450_v17  ;;  %17453 = vst [vmem:[#allocation137_spill] sm:$0xff] %v11448_v27  ;;  %v17457_v53 = vmov 0  ;;  %v11467_v26 = vsub.f32 %v7932_v33, %v7932_v33  ;;  %4708 = vmatprep.mubr.f32.mxu1 %v4707_v63  ;;  %8436 = vmatpush1.bf16.msra.mxu0 %v17461_v45  ;;  %vm17464_vm3 = vcmp.eq.f32.partialorder %v11121_v43, %v10273_v46  ;;  %v7867_v38 = vsel %vm11395_vm4, 1.0, %v17220_v57 }
 0x28d   : > { %17454 = vst [vmem:[#allocation138_spill] sm:$0xff] %v11450_v12  ;;  %vm11462_vm7 = vmor %vm17456_vm10, %vm17455_vm14  ;;  %v2115_v54 = vand.u32 4294901760, %v2114_v62  ;;  %vm17463_vm14 = vcmp.lt.s32.totalorder %v10406_v41, %v10276_v29  ;;  %v17467_v62 = vld [vmem:[#allocation58_spill] sm:$0xff]  ;;  %8724 = vmatpush1.bf16.msra.mxu1 %v17461_v45  ;;  %8437 = vmatprep.subr.bf16.mxu0 %v17210_v28  ;;  %v7931_v56 = vsel %vm11440_vm13, 1.0, %v17220_v57  ;;  %vm17470_vm10 = vcmp.eq.f32.partialorder %v11205_v4, %v10363_v15 }
 0x28e   : > { %v17458_v53 = vsel %vm11462_vm7, 4294967295, %v17457_v53  ;;  %17460 = vst [vmem:[#allocation140_spill] sm:$0xff] %v11467_v26  ;;  %vm11484_vm2 = vmand %vm17464_vm3, %vm17463_vm14  ;;  %v17473_v63 = vand.u32 4294901760, %v11448_v27  ;;  %v17474_v1 = vand.u32 4294901760, %v11450_v12  ;;  %9657 = vset.pattern.permute.xlu1 %v17199_v16  ;;  %v7870_v41 = vsel %vm11421_vm9, 1.0, %v17220_v57  ;;  %8725 = vmatprep.subr.bf16.mxu1 %v17210_v28 }
 0x28f   : > { %17459 = vst [vmem:[#allocation139_spill] sm:$0xff] %v17458_v53  ;;  %vm17469_vm0 = vmmov %vm17463_vm14  ;;  %2116 = vmatmul.mubr.f32.gmra.mrb[8].mxu0 %v2115_v54  ;;  %v7934_v40 = vsel %vm11462_vm7, 1.0, %v17220_v57  ;;  %vm992_vm9 = vcmp.eq.f32.partialorder %v11284_v61, %v10273_v46  ;;  %v17479_v16 = vand.u32 4294901760, %v11467_v26  ;;  %1415 = vperm.xlu1 %9657, %v572_v31   ;;  %vm17486_vm13 = vcmp.gt.f32.partialorder %v11205_v4, %v10363_v15 }
 0x290   : > { %vm11511_vm5 = vmand %vm17470_vm10, %vm17469_vm0  ;;  %v4712_v7 = vsub.f32 %v11448_v27, %v17473_v63  ;;  %v2123_v17 = vsub.f32 %v11450_v12, %v17474_v1  ;;  %vm17475_vm0 = vcmp.lt.s32.totalorder %v10396_v10, %v10276_v29  ;;  %vm17476_vm10 = vcmp.eq.f32.partialorder %v11026_v60, %v10363_v15  ;;  %v11547_v63 = vpop.permute.xlu0 %1363  ;;  %v11549_v27 = vpop.permute.xlu1 %1335  ;;  %8439 = vmatpush1.bf16.msra.mxu0 %v10764_v21 }
 0x291   : > { %vm11534_vm14 = vmand %vm17476_vm10, %vm17475_vm0  ;;  %v4721_v1 = vsub.f32 %v11467_v26, %v17479_v16  ;;  %17480 = vst [vmem:[#allocation52_spill] sm:$0xff] %v11547_v63  ;;  %vm17481_vm0 = vcmp.gt.f32.partialorder %v11121_v43, %v10273_v46  ;;  %v17482_v12 = vmov 0  ;;  %v11562_v16 = vsub.f32 %v7867_v38, %v7867_v38  ;;  %8727 = vmatpush1.bf16.msra.mxu1 %v10764_v21  ;;  %v9679_v26 = vld [vmem:[#allocation3 + $0xf8] sm:$0xff] }
 0x292   : > { %vm11556_vm10 = vmor %vm17481_vm0, %vm11484_vm2  ;;  %v4713_v53 = vand.u32 4294901760, %v4712_v7  ;;  %v2124_v39 = vand.u32 4294901760, %v2123_v17  ;;  %v17487_v43 = vmov 0  ;;  %v11575_v33 = vsub.f32 %v7931_v56, %v7931_v56  ;;  %8440 = vmatprep.subr.bf16.mxu0 %v17210_v28  ;;  %v9678_v56 = vld [vmem:[#allocation3 + $0xf0] sm:$0xff]  ;;  %8728 = vmatprep.subr.bf16.mxu1 %v17210_v28 }
 0x293   : > { %v17483_v12 = vsel %vm11556_vm10, 4294967295, %v17482_v12  ;;  %17485 = vst [vmem:[#allocation58_spill] sm:$0xff] %v11562_v16  ;;  %vm11571_vm2 = vmor %vm17486_vm13, %vm11511_vm5  ;;  %v4722_v31 = vand.u32 4294901760, %v4721_v1  ;;  %v11577_v7 = vsub.f32 %v7870_v41, %v7870_v41  ;;  %v11579_v17 = vsub.f32 %v7934_v40, %v7934_v40  ;;  %1419 = vperm.xlu1 %9657, %v9678_v56  }
 0x294   : > { %17484 = vst [vmem:[#allocation63_spill] sm:$0xff] %v17483_v12  ;;  %v17488_v43 = vsel %vm11571_vm2, 4294967295, %v17487_v43  ;;  %17490 = vst [vmem:[#allocation141_spill] sm:$0xff] %v11575_v33  ;;  %vm17493_vm0 = vcmp.lt.s32.totalorder %v10396_v10, %v10276_v29  ;;  %4714 = vmatmul.mubr.f32.gmra.mrb[8].mxu1 %v4713_v53  ;;  %2125 = vmatprep.mubr.f32.mxu0 %v2124_v39  ;;  %v16503_v10 = vand.u32 4294901760, %v11562_v16  ;;  %v17498_v21 = vmov 0  ;;  %v11634_v41 = vpop.permute.xlu1 %795 }
 0x295   : > { %17489 = vst [vmem:[#allocation53_spill] sm:$0xff] %v17488_v43  ;;  %17491 = vst [vmem:[#allocation142_spill] sm:$0xff] %v11577_v7  ;;  %vm17496_vm4 = vcmp.eq.f32.partialorder %v11284_v61, %v10103_v58  ;;  %4723 = vmatprep.mubr.f32.mxu1 %v4722_v31  ;;  %v16500_v40 = vand.u32 4294901760, %v11575_v33  ;;  %v16501_v39 = vand.u32 4294901760, %v11577_v7  ;;  %v16502_v38 = vand.u32 4294901760, %v11579_v17  ;;  %8442 = vmatpush1.bf16.msra.mxu0 %v10788_v32 }
 0x296   : > { %17492 = vst [vmem:[#allocation143_spill] sm:$0xff] %v11579_v17  ;;  %vm11589_vm5 = vmand %vm992_vm9, %vm17493_vm0  ;;  %vm17497_vm9 = vcmp.gt.f32.partialorder %v11284_v61, %v10103_v58  ;;  %v17502_v53 = vmov 0  ;;  %v2129_v45 = vsub.f32 %v11562_v16, %v16503_v10  ;;  %v17507_v54 = vmov 0  ;;  %8730 = vmatpush1.bf16.msra.mxu1 %v10788_v32  ;;  %8443 = vmatprep.subr.bf16.mxu0 %v17210_v28 }
 0x297   : > { %vm11606_vm0 = vmor %vm17497_vm9, %vm17496_vm4  ;;  %vm17501_vm4 = vcmp.gt.f32.partialorder %v11026_v60, %v10363_v15  ;;  %vm17510_vm7 = vcmp.gt.f32.partialorder %v11547_v63, %v10363_v15  ;;  %v4727_v31 = vsub.f32 %v11575_v33, %v16500_v40  ;;  %v4736_v56 = vsub.f32 %v11579_v17, %v16502_v38  ;;  %9659 = vset.pattern.permute.xlu1 %v17208_v30 }
 0x298   : > { %v17499_v21 = vsel %vm11606_vm0, 4294967295, %v17498_v21  ;;  %vm11620_vm9 = vmor %vm17501_vm4, %vm11534_vm14  ;;  %vm17505_vm14 = vcmp.eq.f32.partialorder %v11026_v60, %v10366_v44  ;;  %vm17506_vm4 = vcmp.gt.f32.partialorder %v11026_v60, %v10366_v44  ;;  %v11652_v1 = vsel %vm17510_vm7, 1.0, %v17220_v57  ;;  %8731 = vmatprep.subr.bf16.mxu1 %v17210_v28  ;;  %900 = vperm.xlu1 %9659, %v9679_v26   ;;  %v11731_v43 = vpop.permute.xlu1 %800 }
 0x299   : > { %17500 = vst [vmem:[#allocation144_spill] sm:$0xff] %v17499_v21  ;;  %v17503_v53 = vsel %vm11620_vm9, 4294967295, %v17502_v53  ;;  %vm11642_vm13 = vmor %vm17506_vm4, %vm17505_vm14  ;;  %v2138_v60 = vsub.f32 %v11577_v7, %v16501_v39  ;;  %vm17511_vm4 = vcmp.gt.f32.partialorder %v11284_v61, %v10273_v46  ;;  %v17512_v40 = vmov 0  ;;  %v17515_v61 = vld [vmem:[#allocation56_spill] sm:$0xff]  ;;  %8445 = vmatpush1.bf16.msra.mxu0 %v10841_v35 }
 0x29a   : > { %17504 = vst [vmem:[#allocation145_spill] sm:$0xff] %v17503_v53  ;;  %v17508_v54 = vsel %vm11642_vm13, 4294967295, %v17507_v54  ;;  %vm11673_vm3 = vmor %vm17511_vm4, %vm11589_vm5  ;;  %v2130_v39 = vand.u32 4294901760, %v2129_v45  ;;  %v7869_v38 = vsel %vm11556_vm10, 1.0, %v17220_v57  ;;  %v7933_v10 = vsel %vm11571_vm2, 1.0, %v17220_v57  ;;  %8733 = vmatpush1.bf16.msra.mxu1 %v10841_v35  ;;  %8446 = vmatprep.subr.bf16.mxu0 %v17210_v28 }
 0x29b   : > { %17509 = vst [vmem:[#allocation146_spill] sm:$0xff] %v17508_v54  ;;  %v17513_v40 = vsel %vm11673_vm3, 4294967295, %v17512_v40  ;;  %v7872_v4 = vsel %vm11606_vm0, 1.0, %v17220_v57  ;;  %vm17516_vm14 = vcmp.lt.s32.totalorder %v17462_v37, %v10504_v51  ;;  %vm17517_vm7 = vcmp.eq.f32.partialorder %v11547_v63, %v10366_v44  ;;  %8734 = vmatprep.subr.bf16.mxu1 %v17210_v28 }
 0x29c   : > { %17514 = vst [vmem:[#allocation147_spill] sm:$0xff] %v17513_v40  ;;  %vm11698_vm2 = vmand %vm17517_vm7, %vm17516_vm14  ;;  %v4728_v32 = vand.u32 4294901760, %v4727_v31  ;;  %v2139_v17 = vand.u32 4294901760, %v2138_v60  ;;  %v11704_v33 = vsub.f32 %v7869_v38, %v7869_v38  ;;  %vm17521_vm7 = vcmp.lt.s32.totalorder %v17467_v62, %v10276_v29  ;;  %2131 = vmatmul.mubr.f32.gmra.mrb[10].mxu0 %v2130_v39  ;;  %v11722_v38 = vpop.permute.xlu0 %820  ;;  %v17579_v31 = vld [vmem:[#allocation54_spill] sm:$0xff] }
 0x29d   : > { %vm17522_vm5 = vcmp.eq.f32.partialorder %v11367_v18, %v10273_v46  ;;  %v4737_v30 = vand.u32 4294901760, %v4736_v56  ;;  %v11724_v60 = vsub.f32 %v7933_v10, %v7933_v10  ;;  %v11726_v7 = vsub.f32 %v7872_v4, %v7872_v4 }
 0x29e   : > { %17520 = vst [vmem:[#allocation56_spill] sm:$0xff] %v11704_v33  ;;  %vm11718_vm0 = vmand %vm17522_vm5, %vm17521_vm7  ;;  %v7936_v16 = vsel %vm11642_vm13, 1.0, %v17220_v57  ;;  %vm17527_vm5 = vcmp.lt.s32.totalorder %v17468_v48, %v10276_v29  ;;  %vm17528_vm7 = vcmp.eq.f32.partialorder %v11176_v11, %v10273_v46  ;;  %4729 = vmatmul.mubr.f32.gmra.mrb[10].mxu1 %v4728_v32  ;;  %2140 = vmatprep.mubr.f32.mxu0 %v2139_v17  ;;  %v7871_v56 = vsel %vm11673_vm3, 1.0, %v17220_v57 }
 0x29f   : > { %17525 = vst [vmem:[#allocation148_spill] sm:$0xff] %v11724_v60  ;;  %17526 = vst [vmem:[#allocation149_spill] sm:$0xff] %v11726_v7  ;;  %v11746_v26 = vsub.f32 %v7936_v16, %v7936_v16  ;;  %v17533_v4 = vmov 0  ;;  %4738 = vmatprep.mubr.f32.mxu1 %v4737_v30  ;;  %v11762_v16 = vsub.f32 %v7871_v56, %v7871_v56  ;;  %v7935_v10 = vsel %vm11620_vm9, 1.0, %v17220_v57 }
 0x2a0   : > { %vm11739_vm4 = vmand %vm17528_vm7, %vm17527_vm5  ;;  %vm17532_vm5 = vcmp.gt.f32.partialorder %v11547_v63, %v10366_v44  ;;  %v17538_v45 = vmov 0  ;;  %v17541_v30 = vand.u32 4294901760, %v11704_v33  ;;  %v11783_v17 = vsub.f32 %v7935_v10, %v7935_v10  ;;  %v11826_v63 = vpop.permute.xlu1 %1343  ;;  %v11845_v53 = vpop.permute.xlu0 %1375 }
 0x2a1   : > { %17531 = vst [vmem:[#allocation150_spill] sm:$0xff] %v11746_v26  ;;  %vm11756_vm7 = vmor %vm17532_vm5, %vm11698_vm2  ;;  %vm17537_vm2 = vcmp.gt.f32.partialorder %v11367_v18, %v10273_v46  ;;  %vm17544_vm14 = vcmp.eq.f32.partialorder %v11469_v24, %v10363_v15  ;;  %v17547_v10 = vand.u32 4294901760, %v11724_v60  ;;  %v17548_v35 = vand.u32 4294901760, %v11726_v7 }
 0x2a2   : > { %v17534_v4 = vsel %vm11756_vm7, 4294967295, %v17533_v4  ;;  %17536 = vst [vmem:[#allocation152_spill] sm:$0xff] %v11762_v16  ;;  %vm11773_vm5 = vmor %vm17537_vm2, %vm11718_vm0  ;;  %v2144_v56 = vsub.f32 %v11704_v33, %v17541_v30  ;;  %vm17543_vm2 = vcmp.lt.s32.totalorder %v17467_v62, %v10276_v29  ;;  %vm17549_vm9 = vcmp.eq.f32.partialorder %v11367_v18, %v10103_v58 }
 0x2a3   : > { %17535 = vst [vmem:[#allocation151_spill] sm:$0xff] %v17534_v4  ;;  %v17539_v45 = vsel %vm11773_vm5, 4294967295, %v17538_v45  ;;  %17542 = vst [vmem:[#allocation154_spill] sm:$0xff] %v11783_v17  ;;  %v4742_v30 = vsub.f32 %v11724_v60, %v17547_v10  ;;  %v2153_v32 = vsub.f32 %v11726_v7, %v17548_v35  ;;  %v17551_v62 = vmov 0 }
 0x2a4   : > { %17540 = vst [vmem:[#allocation153_spill] sm:$0xff] %v17539_v45  ;;  %vm11797_vm3 = vmand %vm17544_vm14, %vm17543_vm2  ;;  %vm17550_vm14 = vcmp.gt.f32.partialorder %v11367_v18, %v10103_v58  ;;  %v7954_v10 = vsel %vm11756_vm7, 1.0, %v17220_v57  ;;  %v2145_v60 = vand.u32 4294901760, %v2144_v56  ;;  %v17554_v35 = vand.u32 4294901760, %v11746_v26 }
 0x2a5   : > { %vm11815_vm2 = vmor %vm17550_vm14, %vm17549_vm9  ;;  %v11830_v18 = vsub.f32 %v11652_v1, %v11652_v1  ;;  %vm17556_vm9 = vcmp.eq.f32.partialorder %v11469_v24, %v10366_v44  ;;  %vm17557_vm14 = vcmp.gt.f32.partialorder %v11469_v24, %v10366_v44  ;;  %v17558_v56 = vmov 0  ;;  %17562 = vst [vmem:[#allocation158_spill] sm:$0xff] %v11845_v53  ;;  %v17563_v1 = vld [vmem:[#allocation68_spill] sm:$0xff] }
 0x2a6   : > { %v17552_v62 = vsel %vm11815_vm2, 4294967295, %v17551_v62  ;;  %v4751_v33 = vsub.f32 %v11746_v26, %v17554_v35  ;;  %vm11838_vm0 = vmor %vm17557_vm14, %vm17556_vm9  ;;  %v4743_v4 = vand.u32 4294901760, %v4742_v30  ;;  %v2154_v35 = vand.u32 4294901760, %v2153_v32  ;;  %8448 = vmatpush1.bf16.msra.mxu0 %v17563_v1  ;;  %8736 = vmatpush1.bf16.msra.mxu1 %v17563_v1 }
 0x2a7   : > { %17553 = vst [vmem:[#allocation155_spill] sm:$0xff] %v17552_v62  ;;  %17555 = vst [vmem:[#allocation156_spill] sm:$0xff] %v11830_v18  ;;  %v17559_v56 = vsel %vm11838_vm0, 4294967295, %v17558_v56  ;;  %v17561_v7 = vand.u32 4294901760, %v11762_v16  ;;  %vm17564_vm7 = vcmp.gt.f32.partialorder %v11469_v24, %v10363_v15  ;;  %v17565_v40 = vmov 0  ;;  %2146 = vmatmul.mubr.f32.gmra.mrb[12].mxu0 %v2145_v60  ;;  %8449 = vmatprep.subr.bf16.mxu0 %v17210_v28 }
 0x2a8   : > { %17560 = vst [vmem:[#allocation157_spill] sm:$0xff] %v17559_v56  ;;  %vm11853_vm13 = vmor %vm17564_vm7, %vm11797_vm3  ;;  %v17568_v32 = vand.u32 4294901760, %v11783_v17  ;;  %vm17569_vm3 = vcmp.gt.f32.partialorder %v11176_v11, %v10273_v46  ;;  %v17570_v24 = vmov 0  ;;  %v11876_v60 = vsub.f32 %v7954_v10, %v7954_v10  ;;  %4744 = vmatmul.mubr.f32.gmra.mrb[12].mxu1 %v4743_v4  ;;  %2155 = vmatprep.mubr.f32.mxu0 %v2154_v35  ;;  %v11907_v35 = vpop.permute.xlu1 %1347 }
 0x2a9   : > { %v2159_v26 = vsub.f32 %v11762_v16, %v17561_v7  ;;  %v17566_v40 = vsel %vm11853_vm13, 4294967295, %v17565_v40  ;;  %v4752_v7 = vand.u32 4294901760, %v4751_v33  ;;  %vm11870_vm7 = vmor %vm17569_vm3, %vm11739_vm4  ;;  %v7874_v33 = vsel %vm11815_vm2, 1.0, %v17220_v57  ;;  %8737 = vmatprep.subr.bf16.mxu1 %v17210_v28 }
 0x2aa   : > { %17567 = vst [vmem:[#allocation68_spill] sm:$0xff] %v17566_v40  ;;  %v4757_v30 = vsub.f32 %v11783_v17, %v17568_v32  ;;  %v17571_v24 = vsel %vm11870_vm7, 4294967295, %v17570_v24  ;;  %17573 = vst [vmem:[#allocation160_spill] sm:$0xff] %v11876_v60  ;;  %vm17574_vm4 = vcmp.eq.f32.partialorder %v11176_v11, %v10103_v58  ;;  %vm17575_vm3 = vcmp.gt.f32.partialorder %v11176_v11, %v10103_v58 }
 0x2ab   : > { %17572 = vst [vmem:[#allocation159_spill] sm:$0xff] %v17571_v24  ;;  %vm11891_vm9 = vmor %vm17575_vm3, %vm17574_vm4  ;;  %v17576_v39 = vmov 0  ;;  %4753 = vmatprep.mubr.f32.mxu1 %v4752_v7  ;;  %v2160_v4 = vand.u32 4294901760, %v2159_v26  ;;  %v11901_v10 = vsub.f32 %v7874_v33, %v7874_v33  ;;  %v7938_v11 = vsel %vm11838_vm0, 1.0, %v17220_v57  ;;  %8451 = vmatpush1.bf16.msra.mxu0 %v10571_v52 }
 0x2ac   : > { %v17577_v39 = vsel %vm11891_vm9, 4294967295, %v17576_v39  ;;  %vm17581_vm4 = vcmp.lt.s32.totalorder %v17515_v61, %v10276_v29  ;;  %vm17582_vm3 = vcmp.eq.f32.partialorder %v11305_v3, %v10363_v15  ;;  %v4758_v1 = vand.u32 4294901760, %v4757_v30  ;;  %8739 = vmatpush1.bf16.msra.mxu1 %v10571_v52  ;;  %8452 = vmatprep.subr.bf16.mxu0 %v17210_v28  ;;  %v12009_v52 = vpop.permute.xlu0 %835 }
 0x2ad   : > { %17578 = vst [vmem:[#allocation161_spill] sm:$0xff] %v17577_v39  ;;  %17580 = vst [vmem:[#allocation54_spill] sm:$0xff] %v11901_v10  ;;  %v11919_v7 = vsub.f32 %v7938_v11, %v7938_v11  ;;  %v7873_v32 = vsel %vm11773_vm5, 1.0, %v17220_v57  ;;  %v7937_v33 = vsel %vm11853_vm13, 1.0, %v17220_v57  ;;  %v17588_v30 = vmov 0  ;;  %2161 = vmatmul.mubr.f32.gmra.mrb[14].mxu0 %v2160_v4  ;;  %8740 = vmatprep.subr.bf16.mxu1 %v17210_v28 }
 0x2ae   : > { %vm11915_vm10 = vmand %vm17582_vm3, %vm17581_vm4  ;;  %vm17586_vm4 = vcmp.eq.f32.partialorder %v11305_v3, %v10366_v44  ;;  %vm17587_vm3 = vcmp.gt.f32.partialorder %v11305_v3, %v10366_v44  ;;  %v16568_v11 = vand.u32 4294901760, %v11901_v10  ;;  %v11944_v17 = vsub.f32 %v7873_v32, %v7873_v32  ;;  %4759 = vmatmul.mubr.f32.gmra.mrb[14].mxu1 %v4758_v1  ;;  %17610 = vst [vmem:[#allocation167_spill] sm:$0xff] %v12009_v52 }
 0x2af   : > { %17585 = vst [vmem:[#allocation162_spill] sm:$0xff] %v11919_v7  ;;  %vm11937_vm2 = vmor %vm17587_vm3, %vm17586_vm4  ;;  %v11946_v16 = vsub.f32 %v7937_v33, %v7937_v33  ;;  %vm17593_vm14 = vcmp.lt.s32.totalorder %v17468_v48, %v10276_v29  ;;  %vm17594_vm4 = vcmp.eq.f32.partialorder %v11549_v27, %v10363_v15  ;;  %vm17597_vm5 = vcmp.gt.f32.partialorder %v11845_v53, %v10363_v15  ;;  %v17598_v48 = vld [vmem:[#allocation75_spill] sm:$0xff] }
 0x2b0   : > { %v17589_v30 = vsel %vm11937_vm2, 4294967295, %v17588_v30  ;;  %17591 = vst [vmem:[#allocation164_spill] sm:$0xff] %v11944_v17  ;;  %vm11955_vm3 = vmand %vm17594_vm4, %vm17593_vm14  ;;  %v7959_v4 = vsel %vm17597_vm5, 1.0, %v17220_v57  ;;  %v7876_v32 = vsel %vm11891_vm9, 1.0, %v17220_v57  ;;  %vm17599_vm14 = vcmp.eq.f32.partialorder %v11549_v27, %v10366_v44  ;;  %8454 = vmatpush1.bf16.msra.mxu0 %v10624_v13  ;;  %8742 = vmatpush1.bf16.msra.mxu1 %v10624_v13 }
 0x2b1   : > { %17590 = vst [vmem:[#allocation163_spill] sm:$0xff] %v17589_v30  ;;  %17592 = vst [vmem:[#allocation165_spill] sm:$0xff] %v11946_v16  ;;  %vm17600_vm4 = vcmp.gt.f32.partialorder %v11549_v27, %v10366_v44  ;;  %v17601_v1 = vmov 0  ;;  %v2168_v33 = vsub.f32 %v11901_v10, %v16568_v11  ;;  %v11987_v45 = vsub.f32 %v7876_v32, %v7876_v32  ;;  %v12012_v10 = vpop.permute.xlu1 %810  ;;  %8455 = vmatprep.subr.bf16.mxu0 %v17210_v28 }
 0x2b2   : > { %vm11978_vm13 = vmor %vm17600_vm4, %vm17599_vm14  ;;  %vm17605_vm0 = vcmp.lt.s32.totalorder %v10542_v5, %v10504_v51  ;;  %vm17606_vm9 = vcmp.eq.f32.partialorder %v11845_v53, %v10366_v44  ;;  %v17609_v11 = vand.u32 4294901760, %v11919_v7  ;;  %vm17611_vm14 = vcmp.gt.f32.partialorder %v11549_v27, %v10363_v15  ;;  %8743 = vmatprep.subr.bf16.mxu1 %v17210_v28 }
 0x2b3   : > { %v17602_v1 = vsel %vm11978_vm13, 4294967295, %v17601_v1  ;;  %17604 = vst [vmem:[#allocation166_spill] sm:$0xff] %v11987_v45  ;;  %vm12002_vm12 = vmand %vm17606_vm9, %vm17605_vm0  ;;  %v17612_v56 = vmov 0  ;;  %v2169_v62 = vand.u32 4294901760, %v2168_v33  ;;  %v17616_v54 = vand.u32 4294901760, %v11946_v16 }
 0x2b4   : > { %17603 = vst [vmem:[#allocation75_spill] sm:$0xff] %v17602_v1  ;;  %v4766_v39 = vsub.f32 %v11919_v7, %v17609_v11  ;;  %vm12019_vm5 = vmor %vm17611_vm14, %vm11955_vm3  ;;  %v17615_v11 = vand.u32 4294901760, %v11944_v17  ;;  %vm17617_vm3 = vcmp.lt.s32.totalorder %v17515_v61, %v10276_v29  ;;  %vm17618_vm14 = vcmp.eq.f32.partialorder %v11634_v41, %v10273_v46  ;;  %8457 = vmatpush1.bf16.msra.mxu0 %v10650_v55  ;;  %v17756_v1 = vld [vmem:[#allocation88_spill] sm:$0xff] }
 0x2b5   : > { %v17613_v56 = vsel %vm12019_vm5, 4294967295, %v17612_v56  ;;  %v4772_v21 = vsub.f32 %v11946_v16, %v17616_v54  ;;  %vm12041_vm0 = vmand %vm17618_vm14, %vm17617_vm3  ;;  %v12045_v40 = vsub.f32 %v7959_v4, %v7959_v4  ;;  %v16583_v13 = vand.u32 4294901760, %v11987_v45  ;;  %2170 = vmatprep.mubr.f32.mxu0 %v2169_v62  ;;  %8745 = vmatpush1.bf16.msra.mxu1 %v10650_v55 }
 0x2b6   : > { %17614 = vst [vmem:[#allocation168_spill] sm:$0xff] %v17613_v56  ;;  %v2174_v7 = vsub.f32 %v11944_v17, %v17615_v11  ;;  %v4767_v54 = vand.u32 4294901760, %v4766_v39  ;;  %vm17622_vm3 = vcmp.gt.f32.partialorder %v11845_v53, %v10366_v44  ;;  %v17623_v61 = vmov 0  ;;  %8458 = vmatprep.subr.bf16.mxu0 %v17210_v28  ;;  %8746 = vmatprep.subr.bf16.mxu1 %v17210_v28 }
 0x2b7   : > { %17621 = vst [vmem:[#allocation169_spill] sm:$0xff] %v12045_v40  ;;  %vm12060_vm14 = vmor %vm17622_vm3, %vm12002_vm12  ;;  %v4773_v4 = vand.u32 4294901760, %v4772_v21  ;;  %v7940_v33 = vsel %vm11978_vm13, 1.0, %v17220_v57  ;;  %v2183_v32 = vsub.f32 %v11987_v45, %v16583_v13  ;;  %v7875_v62 = vsel %vm11870_vm7, 1.0, %v17220_v57 }
 0x2b8   : > { %v17624_v61 = vsel %vm12060_vm14, 4294967295, %v17623_v61  ;;  %v2175_v39 = vand.u32 4294901760, %v2174_v7  ;;  %4768 = vmatprep.mubr.f32.mxu1 %v4767_v54  ;;  %v12072_v11 = vsub.f32 %v7940_v33, %v7940_v33  ;;  %v7939_v21 = vsel %vm12019_vm5, 1.0, %v17220_v57  ;;  %v12081_v7 = vpop.permute.xlu1 %815  ;;  %8460 = vmatpush1.bf16.msra.mxu0 %v10736_v50 }
 0x2b9   : > { %17625 = vst [vmem:[#allocation170_spill] sm:$0xff] %v17624_v61  ;;  %vm17627_vm12 = vcmp.gt.f32.partialorder %v11305_v3, %v10363_v15  ;;  %v17628_v54 = vmov 0  ;;  %4774 = vmatmul.mubr.f32.gmra.mrb[16].mxu1 %v4773_v4  ;;  %v12094_v33 = vsub.f32 %v7875_v62, %v7875_v62  ;;  %v12096_v13 = vsub.f32 %v7939_v21, %v7939_v21 }
 0x2ba   : > { %17626 = vst [vmem:[#allocation171_spill] sm:$0xff] %v12072_v11  ;;  %vm12088_vm3 = vmor %vm17627_vm12, %vm11915_vm10  ;;  %2176 = vmatmul.mubr.f32.gmra.mrb[16].mxu0 %v2175_v39  ;;  %v7942_v26 = vsel %vm11937_vm2, 1.0, %v17220_v57  ;;  %vm17633_vm10 = vcmp.lt.s32.totalorder %v17579_v31, %v10276_v29  ;;  %vm17634_vm12 = vcmp.eq.f32.partialorder %v11234_v9, %v10273_v46  ;;  %vm17637_vm4 = vcmp.gt.f32.partialorder %v11634_v41, %v10273_v46 }
 0x2bb   : > { %v17629_v54 = vsel %vm12088_vm3, 4294967295, %v17628_v54  ;;  %17631 = vst [vmem:[#allocation173_spill] sm:$0xff] %v12094_v33  ;;  %17632 = vst [vmem:[#allocation174_spill] sm:$0xff] %v12096_v13  ;;  %v17638_v39 = vmov 0  ;;  %v7960_v4 = vsel %vm12060_vm14, 1.0, %v17220_v57  ;;  %v2184_v62 = vand.u32 4294901760, %v2183_v32  ;;  %8461 = vmatprep.subr.bf16.mxu0 %v17210_v28  ;;  %8748 = vmatpush1.bf16.msra.mxu1 %v10736_v50 }
 0x2bc   : > { %17630 = vst [vmem:[#allocation172_spill] sm:$0xff] %v17629_v54  ;;  %vm12109_vm9 = vmand %vm17634_vm12, %vm17633_vm10  ;;  %v12126_v16 = vsub.f32 %v7942_v26, %v7942_v26  ;;  %vm17643_vm12 = vcmp.eq.f32.partialorder %v12009_v52, %v10103_v58  ;;  %v12146_v26 = vpop.permute.xlu0 %850  ;;  %v17649_v21 = vmov 0  ;;  %vm17652_vm10 = vcmp.gt.f32.partialorder %v12009_v52, %v10273_v46  ;;  %v12193_v53 = vpop.permute.xlu1 %1355  ;;  %8749 = vmatprep.subr.bf16.mxu1 %v17210_v28  ;;  %v17672_v50 = vld [vmem:[#allocation62_spill] sm:$0xff] }
 0x2bd   : > { %vm12118_vm5 = vmor %vm17637_vm4, %vm12041_vm0  ;;  %vm17642_vm0 = vcmp.lt.s32.totalorder %v10561_v6, %v10504_v51  ;;  %17646 = vst [vmem:[#allocation177_spill] sm:$0xff] %v12146_v26  ;;  %vm17647_vm4 = vcmp.eq.f32.partialorder %v11634_v41, %v10103_v58  ;;  %2185 = vmatprep.mubr.f32.mxu0 %v2184_v62  ;;  %v7893_v32 = vsel %vm17652_vm10, 1.0, %v17220_v57  ;;  %v17653_v55 = vand.u32 4294901760, %v12072_v11 }
 0x2be   : > { %v17639_v39 = vsel %vm12118_vm5, 4294967295, %v17638_v39  ;;  %17641 = vst [vmem:[#allocation176_spill] sm:$0xff] %v12126_v16  ;;  %vm12140_vm1 = vmand %vm17643_vm12, %vm17642_vm0  ;;  %vm17648_vm0 = vcmp.gt.f32.partialorder %v11634_v41, %v10103_v58  ;;  %v12172_v41 = vsub.f32 %v7960_v4, %v7960_v4  ;;  %vm17656_vm14 = vcmp.eq.f32.partialorder %v11731_v43, %v10273_v46 }
 0x2bf   : > { %17640 = vst [vmem:[#allocation175_spill] sm:$0xff] %v17639_v39  ;;  %vm12157_vm12 = vmor %vm17648_vm0, %vm17647_vm4  ;;  %v4781_v45 = vsub.f32 %v12072_v11, %v17653_v55  ;;  %vm17655_vm0 = vcmp.lt.s32.totalorder %v17598_v48, %v10276_v29  ;;  %v17659_v55 = vand.u32 4294901760, %v12094_v33  ;;  %v17660_v4 = vand.u32 4294901760, %v12096_v13 }
 0x2c0   : > { %v17650_v21 = vsel %vm12157_vm12, 4294967295, %v17649_v21  ;;  %17654 = vst [vmem:[#allocation179_spill] sm:$0xff] %v12172_v41  ;;  %vm12182_vm10 = vmand %vm17656_vm14, %vm17655_vm0  ;;  %vm17661_vm14 = vcmp.gt.f32.partialorder %v12009_v52, %v10103_v58  ;;  %v17662_v61 = vmov 0  ;;  %vm1021_vm2 = vcmp.eq.f32.partialorder %v12146_v26, %v10103_v58  ;;  %v12259_v54 = vpop.permute.xlu0 %1387 }
 0x2c1   : > { %17651 = vst [vmem:[#allocation178_spill] sm:$0xff] %v17650_v21  ;;  %v2189_v17 = vsub.f32 %v12094_v33, %v17659_v55  ;;  %v4787_v11 = vsub.f32 %v12096_v13, %v17660_v4  ;;  %vm12200_vm0 = vmor %vm17661_vm14, %vm12140_vm1  ;;  %v4782_v30 = vand.u32 4294901760, %v4781_v45  ;;  %v17665_v55 = vand.u32 4294901760, %v12126_v16 }
 0x2c2   : > { %v17663_v61 = vsel %vm12200_vm0, 4294967295, %v17662_v61  ;;  %vm17666_vm7 = vcmp.eq.f32.partialorder %v11731_v43, %v10103_v58  ;;  %vm17667_vm1 = vcmp.gt.f32.partialorder %v11731_v43, %v10103_v58  ;;  %v17668_v45 = vmov 0  ;;  %17681 = vst [vmem:[#allocation186_spill] sm:$0xff] %v12259_v54 }
 0x2c3   : > { %17664 = vst [vmem:[#allocation180_spill] sm:$0xff] %v17663_v61  ;;  %v4796_v33 = vsub.f32 %v12126_v16, %v17665_v55  ;;  %vm12218_vm14 = vmor %vm17667_vm1, %vm17666_vm7  ;;  %v12222_v27 = vsub.f32 %v7893_v32, %v7893_v32  ;;  %v2190_v4 = vand.u32 4294901760, %v2189_v17  ;;  %v4788_v55 = vand.u32 4294901760, %v4787_v11  ;;  %4783 = vmatprep.mubr.f32.mxu1 %v4782_v30  ;;  %v12281_v61 = vpop.permute.xlu1 %825 }
 0x2c4   : > { %v17669_v45 = vsel %vm12218_vm14, 4294967295, %v17668_v45  ;;  %v7878_v16 = vsel %vm12157_vm12, 1.0, %v17220_v57  ;;  %vm17673_vm7 = vcmp.lt.s32.totalorder %v10599_v2, %v10504_v51  ;;  %v7941_v11 = vsel %vm12088_vm3, 1.0, %v17220_v57 }
 0x2c5   : > { %17670 = vst [vmem:[#allocation181_spill] sm:$0xff] %v17669_v45  ;;  %17671 = vst [vmem:[#allocation182_spill] sm:$0xff] %v12222_v27  ;;  %v4797_v13 = vand.u32 4294901760, %v4796_v33  ;;  %v12235_v17 = vsub.f32 %v7878_v16, %v7878_v16  ;;  %v7877_v32 = vsel %vm12118_vm5, 1.0, %v17220_v57  ;;  %v7894_v52 = vsel %vm12200_vm0, 1.0, %v17220_v57  ;;  %2191 = vmatmul.mubr.f32.gmra.mrb[18].mxu0 %v2190_v4  ;;  %4789 = vmatmul.mubr.f32.gmra.mrb[18].mxu1 %v4788_v55 }
 0x2c6   : > { %vm1085_vm1 = vmand %vm1021_vm2, %vm17673_vm7  ;;  %vm17675_vm2 = vcmp.gt.f32.partialorder %v12146_v26, %v10103_v58  ;;  %v17676_v16 = vmov 0  ;;  %v12255_v30 = vsub.f32 %v7941_v11, %v7941_v11  ;;  %v12257_v33 = vsub.f32 %v7877_v32, %v7877_v32  ;;  %v17687_v32 = vld [vmem:[#allocation79_spill] sm:$0xff] }
 0x2c7   : > { %17674 = vst [vmem:[#allocation62_spill] sm:$0xff] %v12235_v17  ;;  %vm12251_vm7 = vmor %vm17675_vm2, %vm1085_vm1  ;;  %vm17682_vm4 = vcmp.eq.f32.partialorder %v11234_v9, %v10103_v58  ;;  %vm17683_vm0 = vcmp.gt.f32.partialorder %v11234_v9, %v10103_v58  ;;  %v17684_v4 = vmov 0  ;;  %4798 = vmatprep.mubr.f32.mxu1 %v4797_v13  ;;  %v7880_v11 = vsel %vm12218_vm14, 1.0, %v17220_v57 }
 0x2c8   : > { %v17677_v16 = vsel %vm12251_vm7, 4294967295, %v17676_v16  ;;  %17679 = vst [vmem:[#allocation184_spill] sm:$0xff] %v12255_v30  ;;  %17680 = vst [vmem:[#allocation185_spill] sm:$0xff] %v12257_v33  ;;  %v17690_v13 = vmov 0  ;;  %v16634_v55 = vand.u32 4294901760, %v12255_v30  ;;  %vm17693_vm3 = vcmp.gt.f32.partialorder %v12146_v26, %v10273_v46 }
 0x2c9   : > { %17678 = vst [vmem:[#allocation183_spill] sm:$0xff] %v17677_v16  ;;  %vm12267_vm13 = vmor %vm17683_vm0, %vm17682_vm4  ;;  %vm17689_vm4 = vcmp.gt.f32.partialorder %v11731_v43, %v10273_v46  ;;  %v7899_v62 = vsel %vm17693_vm3, 1.0, %v17220_v57  ;;  %v7900_v43 = vsel %vm12251_vm7, 1.0, %v17220_v57  ;;  %v17694_v39 = vand.u32 4294901760, %v12235_v17 }
 0x2ca   : > { %v17685_v4 = vsel %vm12267_vm13, 4294967295, %v17684_v4  ;;  %17688 = vst [vmem:[#allocation79_spill] sm:$0xff] %v12281_v61  ;;  %vm12288_vm0 = vmor %vm17689_vm4, %vm12182_vm10  ;;  %vm1546_vm10 = vcmp.eq.f32.partialorder %v12259_v54, %v10366_v44  ;;  %vm17695_vm4 = vcmp.gt.f32.partialorder %v11234_v9, %v10273_v46  ;;  %v17696_v45 = vmov 0 }
 0x2cb   : > { %17686 = vst [vmem:[#allocation187_spill] sm:$0xff] %v17685_v4  ;;  %v17691_v13 = vsel %vm12288_vm0, 4294967295, %v17690_v13  ;;  %v2198_v56 = vsub.f32 %v12235_v17, %v17694_v39  ;;  %vm12315_vm2 = vmor %vm17695_vm4, %vm12109_vm9  ;;  %v4802_v39 = vsub.f32 %v12255_v30, %v16634_v55  ;;  %v17699_v17 = vand.u32 4294901760, %v12257_v33  ;;  %v12344_v30 = vpop.permute.xlu1 %830 }
 0x2cc   : > { %17692 = vst [vmem:[#allocation188_spill] sm:$0xff] %v17691_v13  ;;  %v17697_v45 = vsel %vm12315_vm2, 4294967295, %v17696_v45  ;;  %v12331_v9 = vsub.f32 %v7880_v11, %v7880_v11  ;;  %vm17701_vm3 = vcmp.lt.s32.totalorder %v10627_v36, %v10504_v51  ;;  %v7879_v55 = vsel %vm12288_vm0, 1.0, %v17220_v57  ;;  %17702 = vst [vmem:[#allocation191_spill] sm:$0xff] %v12344_v30 }
 0x2cd   : > { %17698 = vst [vmem:[#allocation189_spill] sm:$0xff] %v17697_v45  ;;  %v2204_v3 = vsub.f32 %v12257_v33, %v17699_v17  ;;  %v2199_v26 = vand.u32 4294901760, %v2198_v56  ;;  %vm1610_vm1 = vmand %vm1546_vm10, %vm17701_vm3  ;;  %v7882_v17 = vsel %vm12267_vm13, 1.0, %v17220_v57  ;;  %vm17703_vm9 = vcmp.lt.s32.totalorder %v17598_v48, %v10276_v29 }
 0x2ce   : > { %17700 = vst [vmem:[#allocation190_spill] sm:$0xff] %v12331_v9  ;;  %vm17704_vm4 = vcmp.eq.f32.partialorder %v11826_v63, %v10363_v15  ;;  %v4803_v11 = vand.u32 4294901760, %v4802_v39  ;;  %v16653_v16 = vand.u32 4294901760, %v12331_v9  ;;  %v12357_v13 = vsub.f32 %v7879_v55, %v7879_v55 }
 0x2cf   : > { %vm12352_vm7 = vmand %vm17704_vm4, %vm17703_vm9  ;;  %v2205_v33 = vand.u32 4294901760, %v2204_v3  ;;  %v12359_v4 = vsub.f32 %v7894_v52, %v7894_v52  ;;  %v12361_v21 = vsub.f32 %v7899_v62, %v7899_v62  ;;  %2200 = vmatprep.mubr.f32.mxu0 %v2199_v26  ;;  %vm17710_vm3 = vcmp.gt.f32.partialorder %v12259_v54, %v10366_v44  ;;  %v12374_v3 = vpop.permute.xlu0 %1399  ;;  %v17716_v52 = vld [vmem:[#allocation84_spill] sm:$0xff]  ;;  %v12438_v62 = vpop.permute.xlu1 %1367 }
 0x2d0   : > { %17707 = vst [vmem:[#allocation192_spill] sm:$0xff] %v12357_v13  ;;  %vm12368_vm9 = vmor %vm17710_vm3, %vm1610_vm1  ;;  %v17711_v48 = vmov 0  ;;  %v12372_v39 = vsub.f32 %v7882_v17, %v7882_v17  ;;  %vm17717_vm10 = vcmp.eq.f32.partialorder %v11826_v63, %v10366_v44  ;;  %vm17718_vm0 = vcmp.gt.f32.partialorder %v11826_v63, %v10366_v44  ;;  %4804 = vmatmul.mubr.f32.gmra.mrb[20].mxu1 %v4803_v11  ;;  %v17722_v17 = vld [vmem:[#allocation69_spill] sm:$0xff] }
 0x2d1   : > { %17708 = vst [vmem:[#allocation193_spill] sm:$0xff] %v12359_v4  ;;  %17709 = vst [vmem:[#allocation194_spill] sm:$0xff] %v12361_v21  ;;  %v17712_v48 = vsel %vm12368_vm9, 4294967295, %v17711_v48  ;;  %v17719_v26 = vmov 0  ;;  %2206 = vmatmul.mubr.f32.gmra.mrb[20].mxu0 %v2205_v33  ;;  %v2213_v55 = vsub.f32 %v12331_v9, %v16653_v16  ;;  %vm17723_vm13 = vcmp.gt.f32.partialorder %v11826_v63, %v10363_v15 }
 0x2d2   : > { %17713 = vst [vmem:[#allocation195_spill] sm:$0xff] %v17712_v48  ;;  %17714 = vst [vmem:[#allocation196_spill] sm:$0xff] %v12372_v39  ;;  %v17724_v33 = vmov 0  ;;  %v12411_v11 = vsub.f32 %v7900_v43, %v7900_v43  ;;  %v7966_v43 = vsel %vm12368_vm9, 1.0, %v17220_v57  ;;  %v17733_v9 = vand.u32 4294901760, %v12357_v13 }
 0x2d3   : > { %17715 = vst [vmem:[#allocation197_spill] sm:$0xff] %v12374_v3  ;;  %vm12386_vm1 = vmor %vm17718_vm0, %vm17717_vm10  ;;  %vm17728_vm0 = vcmp.gt.f32.partialorder %v12259_v54, %v10363_v15  ;;  %vm17729_vm10 = vcmp.lt.s32.totalorder %v17672_v50, %v10276_v29  ;;  %v2214_v56 = vand.u32 4294901760, %v2213_v55  ;;  %v17739_v55 = vand.u32 4294901760, %v12372_v39 }
 0x2d4   : > { %v17720_v26 = vsel %vm12386_vm1, 4294967295, %v17719_v26  ;;  %vm12407_vm3 = vmor %vm17723_vm13, %vm12352_vm7  ;;  %17727 = vst [vmem:[#allocation198_spill] sm:$0xff] %v12411_v11  ;;  %v7965_v16 = vsel %vm17728_vm0, 1.0, %v17220_v57  ;;  %vm17730_vm13 = vcmp.eq.f32.partialorder %v11426_v0, %v10363_v15  ;;  %v2219_v54 = vsub.f32 %v12357_v13, %v17733_v9 }
 0x2d5   : > { %17721 = vst [vmem:[#allocation84_spill] sm:$0xff] %v17720_v26  ;;  %v17725_v33 = vsel %vm12407_vm3, 4294967295, %v17724_v33  ;;  %vm12426_vm7 = vmand %vm17730_vm13, %vm17729_vm10  ;;  %vm1552_vm0 = vcmp.eq.f32.partialorder %v12374_v3, %v10366_v44  ;;  %vm17735_vm10 = vcmp.lt.s32.totalorder %v17579_v31, %v10276_v29  ;;  %vm17736_vm13 = vcmp.eq.f32.partialorder %v11907_v35, %v10363_v15  ;;  %2215 = vmatprep.mubr.f32.mxu0 %v2214_v56  ;;  %v12493_v26 = vpop.permute.xlu0 %865 }
 0x2d6   : > { %17726 = vst [vmem:[#allocation69_spill] sm:$0xff] %v17725_v33  ;;  %17734 = vst [vmem:[#allocation199_spill] sm:$0xff] %v12438_v62  ;;  %v2228_v48 = vsub.f32 %v12372_v39, %v17739_v55  ;;  %v7881_v9 = vsel %vm12315_vm2, 1.0, %v17220_v57  ;;  %v7944_v31 = vsel %vm12386_vm1, 1.0, %v17220_v57  ;;  %v2220_v13 = vand.u32 4294901760, %v2219_v54  ;;  %v17750_v33 = vld [vmem:[#allocation82_spill] sm:$0xff] }
 0x2d7   : > { %vm12446_vm4 = vmand %vm17736_vm13, %vm17735_vm10  ;;  %vm17740_vm14 = vcmp.lt.s32.totalorder %v17687_v32, %v10504_v51  ;;  %v12468_v55 = vsub.f32 %v7881_v9, %v7881_v9  ;;  %v12470_v39 = vsub.f32 %v7944_v31, %v7944_v31  ;;  %v7943_v45 = vsel %vm12407_vm3, 1.0, %v17220_v57  ;;  %17751 = vst [vmem:[#allocation82_spill] sm:$0xff] %v12493_v26 }
 0x2d8   : > { %vm1616_vm9 = vmand %vm1552_vm0, %vm17740_vm14  ;;  %vm17743_vm10 = vcmp.eq.f32.partialorder %v11907_v35, %v10366_v44  ;;  %vm17744_vm13 = vcmp.gt.f32.partialorder %v11907_v35, %v10366_v44  ;;  %v17745_v54 = vmov 0  ;;  %v12485_v56 = vsub.f32 %v7965_v16, %v7965_v16  ;;  %2221 = vmatmul.mubr.f32.gmra.mrb[22].mxu0 %v2220_v13  ;;  %v12510_v13 = vpop.permute.xlu1 %1371 }
 0x2d9   : > { %17741 = vst [vmem:[#allocation200_spill] sm:$0xff] %v12468_v55  ;;  %17742 = vst [vmem:[#allocation201_spill] sm:$0xff] %v12470_v39  ;;  %v2229_v9 = vand.u32 4294901760, %v2228_v48  ;;  %v12489_v31 = vsub.f32 %v7943_v45, %v7943_v45  ;;  %vm17752_vm3 = vcmp.gt.f32.partialorder %v12374_v3, %v10366_v44  ;;  %v17753_v16 = vmov 0 }
 0x2da   : > { %vm12481_vm2 = vmor %vm17744_vm13, %vm17743_vm10  ;;  %17748 = vst [vmem:[#allocation203_spill] sm:$0xff] %v12485_v56  ;;  %vm17758_vm10 = vcmp.eq.f32.partialorder %v11426_v0, %v10366_v44  ;;  %vm17759_vm13 = vcmp.gt.f32.partialorder %v11426_v0, %v10366_v44  ;;  %v17760_v12 = vmov 0  ;;  %v12522_v20 = vsub.f32 %v7966_v43, %v7966_v43 }
 0x2db   : > { %v17746_v54 = vsel %vm12481_vm2, 4294967295, %v17745_v54  ;;  %17749 = vst [vmem:[#allocation204_spill] sm:$0xff] %v12489_v31  ;;  %vm12502_vm1 = vmor %vm17752_vm3, %vm1616_vm9  ;;  %2230 = vmatprep.mubr.f32.mxu0 %v2229_v9  ;;  %vm17764_vm0 = vcmp.gt.f32.partialorder %v11907_v35, %v10363_v15  ;;  %v17765_v45 = vmov 0  ;;  %v17769_v9 = vand.u32 4294901760, %v12468_v55 }
 0x2dc   : > { %17747 = vst [vmem:[#allocation202_spill] sm:$0xff] %v17746_v54  ;;  %v17754_v16 = vsel %vm12502_vm1, 4294967295, %v17753_v16  ;;  %17757 = vst [vmem:[#allocation88_spill] sm:$0xff] %v12510_v13  ;;  %v17770_v48 = vand.u32 4294901760, %v12470_v39  ;;  %vm1027_vm9 = vcmp.eq.f32.partialorder %v12493_v26, %v10103_v58  ;;  %v17779_v42 = vand.u32 4294901760, %v17778_v47 }
 0x2dd   : > { %17755 = vst [vmem:[#allocation205_spill] sm:$0xff] %v17754_v16  ;;  %vm12518_vm14 = vmor %vm17759_vm13, %vm17758_vm10  ;;  %vm17768_vm13 = vcmp.gt.f32.partialorder %v12374_v3, %v10363_v15  ;;  %v2234_v19 = vsub.f32 %v12468_v55, %v17769_v9  ;;  %v7972_v9 = vsel %vm12502_vm1, 1.0, %v17220_v57  ;;  %v17775_v55 = vand.u32 4294901760, %v12489_v31 }
 0x2de   : > { %v17761_v12 = vsel %vm12518_vm14, 4294967295, %v17760_v12  ;;  %17763 = vst [vmem:[#allocation207_spill] sm:$0xff] %v12522_v20  ;;  %vm12534_vm10 = vmor %vm17764_vm0, %vm12446_vm4  ;;  %v7971_v43 = vsel %vm17768_vm13, 1.0, %v17220_v57  ;;  %v4811_v24 = vsub.f32 %v12470_v39, %v17770_v48  ;;  %vm17771_vm4 = vcmp.lt.s32.totalorder %v17672_v50, %v10276_v29  ;;  %v17776_v39 = vld [vmem:[#allocation99_spill] sm:$0xff] }
 0x2df   : > { %17762 = vst [vmem:[#allocation206_spill] sm:$0xff] %v17761_v12  ;;  %v17766_v45 = vsel %vm12534_vm10, 4294967295, %v17765_v45  ;;  %vm17772_vm0 = vcmp.eq.f32.partialorder %v12012_v10, %v10273_v46  ;;  %v4817_v48 = vsub.f32 %v12489_v31, %v17775_v55  ;;  %v17777_v3 = vand.u32 4294901760, %v17776_v39  ;;  %v12631_v31 = vpop.permute.xlu0 %880 }
 0x2e0   : > { %17767 = vst [vmem:[#allocation208_spill] sm:$0xff] %v17766_v45  ;;  %vm12556_vm3 = vmand %vm17772_vm0, %vm17771_vm4  ;;  %v7946_v23 = vsel %vm12481_vm2, 1.0, %v17220_v57  ;;  %v2235_v25 = vand.u32 4294901760, %v2234_v19  ;;  %v4812_v34 = vand.u32 4294901760, %v4811_v24  ;;  %vm17780_vm4 = vcmp.lt.s32.totalorder %v17716_v52, %v10504_v51 }
 0x2e1   : > { %v8462_v50 = vpack.c.bf16 %v17779_v42, %v17777_v3  ;;  %vm12578_vm0 = vmand %vm1027_vm9, %vm17780_vm4  ;;  %v12582_v39 = vsub.f32 %v7946_v23, %v7946_v23  ;;  %vm17784_vm1 = vcmp.gt.f32.partialorder %v11426_v0, %v10363_v15  ;;  %v17785_v19 = vmov 0  ;;  %v12601_v3 = vpop.permute.xlu1 %840  ;;  %17800 = vst [vmem:[#allocation214_spill] sm:$0xff] %v12631_v31 }
 0x2e2   : > { %vm12589_vm2 = vmor %vm17784_vm1, %vm12426_vm7  ;;  %v4818_v42 = vand.u32 4294901760, %v4817_v48  ;;  %v7945_v23 = vsel %vm12534_vm10, 1.0, %v17220_v57  ;;  %v7948_v47 = vsel %vm12518_vm14, 1.0, %v17220_v57  ;;  %17788 = vst [vmem:[#allocation209_spill] sm:$0xff] %v12601_v3  ;;  %vm17789_vm7 = vcmp.lt.s32.totalorder %v17722_v17, %v10276_v29  ;;  %2236 = vmatmul.mubr.f32.gmra.mrb[24].mxu0 %v2235_v25  ;;  %4813 = vmatprep.mubr.f32.mxu1 %v4812_v34 }
 0x2e3   : > { %17783 = vst [vmem:[#allocation99_spill] sm:$0xff] %v12582_v39  ;;  %v17786_v19 = vsel %vm12589_vm2, 4294967295, %v17785_v19  ;;  %8463 = vmatpush1.bf16.msra.mxu0 %v8462_v50  ;;  %8751 = vmatpush1.bf16.msra.mxu1 %v8462_v50  ;;  %vm17790_vm9 = vcmp.eq.f32.partialorder %v11722_v38, %v10273_v46  ;;  %vm17793_vm13 = vcmp.gt.f32.partialorder %v12012_v10, %v10273_v46  ;;  %v17794_v63 = vmov 0 }
 0x2e4   : > { %17787 = vst [vmem:[#allocation95_spill] sm:$0xff] %v17786_v19  ;;  %vm12611_vm4 = vmand %vm17790_vm9, %vm17789_vm7  ;;  %v12624_v55 = vsub.f32 %v7971_v43, %v7971_v43  ;;  %v16720_v24 = vand.u32 4294901760, %v12582_v39  ;;  %v12627_v48 = vsub.f32 %v7945_v23, %v7945_v23  ;;  %v12629_v50 = vsub.f32 %v7948_v47, %v7948_v47  ;;  %4819 = vmatmul.mubr.f32.gmra.mrb[22].mxu1 %v4818_v42  ;;  %v17819_v42 = vld [vmem:[#allocation90_spill] sm:$0xff] }
 0x2e5   : > { %vm12620_vm14 = vmor %vm17793_vm13, %vm12556_vm3  ;;  %v12633_v35 = vsub.f32 %v7972_v9, %v7972_v9  ;;  %vm17802_vm9 = vcmp.gt.f32.partialorder %v12493_v26, %v10103_v58  ;;  %v17803_v25 = vmov 0  ;;  %vm17806_vm10 = vcmp.eq.f32.partialorder %v12012_v10, %v10103_v58  ;;  %8464 = vmatprep.subr.bf16.mxu0 %v17210_v28  ;;  %8752 = vmatprep.subr.bf16.mxu1 %v17210_v28  ;;  %v12712_v12 = vpop.permute.xlu1 %1359 }
 0x2e6   : > { %v17795_v63 = vsel %vm12620_vm14, 4294967295, %v17794_v63  ;;  %17797 = vst [vmem:[#allocation211_spill] sm:$0xff] %v12624_v55  ;;  %17798 = vst [vmem:[#allocation212_spill] sm:$0xff] %v12627_v48  ;;  %vm17807_vm3 = vcmp.gt.f32.partialorder %v12012_v10, %v10103_v58  ;;  %v17808_v34 = vmov 0  ;;  %vm17811_vm13 = vcmp.gt.f32.partialorder %v12493_v26, %v10273_v46 }
 0x2e7   : > { %17796 = vst [vmem:[#allocation210_spill] sm:$0xff] %v17795_v63  ;;  %17799 = vst [vmem:[#allocation213_spill] sm:$0xff] %v12629_v50  ;;  %v7905_v16 = vsel %vm17811_vm13, 1.0, %v17220_v57  ;;  %v4826_v43 = vsub.f32 %v12582_v39, %v16720_v24  ;;  %v17814_v10 = vmov 0  ;;  %vm1033_vm7 = vcmp.eq.f32.partialorder %v12631_v31, %v10103_v58 }
 0x2e8   : > { %17801 = vst [vmem:[#allocation215_spill] sm:$0xff] %v12633_v35  ;;  %vm12646_vm1 = vmor %vm17802_vm9, %vm12578_vm0  ;;  %vm17813_vm0 = vcmp.gt.f32.partialorder %v11722_v38, %v10103_v58  ;;  %vm969_vm9 = vcmp.gt.f32.partialorder %v12631_v31, %v10103_v58  ;;  %v17817_v23 = vand.u32 4294901760, %v11108_v22  ;;  %v17818_v47 = vand.u32 4294901760, %v11219_v59 }
 0x2e9   : > { %v17804_v25 = vsel %vm12646_vm1, 4294967295, %v17803_v25  ;;  %vm12656_vm5 = vmor %vm17807_vm3, %vm17806_vm10  ;;  %vm17812_vm10 = vcmp.eq.f32.partialorder %v11722_v38, %v10103_v58  ;;  %vm17821_vm13 = vcmp.eq.f32.partialorder %v12081_v7, %v10273_v46  ;;  %v7906_v22 = vsel %vm12646_vm1, 1.0, %v17220_v57 }
 0x2ea   : > { %17805 = vst [vmem:[#allocation216_spill] sm:$0xff] %v17804_v25  ;;  %v17809_v34 = vsel %vm12656_vm5, 4294967295, %v17808_v34  ;;  %vm12677_vm3 = vmor %vm17813_vm0, %vm17812_vm10  ;;  %v8465_v24 = vpack.c.bf16 %v17818_v47, %v17817_v23  ;;  %vm17820_vm0 = vcmp.lt.s32.totalorder %v17750_v33, %v10276_v29  ;;  %v4827_v39 = vand.u32 4294901760, %v4826_v43 }
 0x2eb   : > { %17810 = vst [vmem:[#allocation217_spill] sm:$0xff] %v17809_v34  ;;  %v17815_v10 = vsel %vm12677_vm3, 4294967295, %v17814_v10  ;;  %vm12699_vm12 = vmand %vm17821_vm13, %vm17820_vm0  ;;  %v17824_v59 = vand.u32 4294901760, %v12627_v48  ;;  %v17825_v47 = vand.u32 4294901760, %v12629_v50  ;;  %v12714_v45 = vsub.f32 %v7905_v16, %v7905_v16 }
 0x2ec   : > { %17816 = vst [vmem:[#allocation218_spill] sm:$0xff] %v17815_v10  ;;  %vm17827_vm13 = vcmp.lt.s32.totalorder %v17756_v1, %v10504_v51  ;;  %8466 = vmatpush1.bf16.msra.mxu0 %v8465_v24  ;;  %8754 = vmatpush1.bf16.msra.mxu1 %v8465_v24  ;;  %v7884_v43 = vsel %vm12656_vm5, 1.0, %v17220_v57  ;;  %v17828_v24 = vmov 0  ;;  %v17842_v9 = vmov 0 }
 0x2ed   : > { %v4832_v23 = vsub.f32 %v12627_v48, %v17824_v59  ;;  %v4841_v26 = vsub.f32 %v12629_v50, %v17825_v47  ;;  %17826 = vst [vmem:[#allocation90_spill] sm:$0xff] %v12714_v45  ;;  %vm1097_vm0 = vmand %vm1033_vm7, %vm17827_vm13  ;;  %v7947_v59 = vsel %vm12589_vm2, 1.0, %v17220_v57  ;;  %v7883_v47 = vsel %vm12620_vm14, 1.0, %v17220_v57  ;;  %4828 = vmatprep.mubr.f32.mxu1 %v4827_v39  ;;  %8467 = vmatprep.subr.bf16.mxu0 %v17210_v28 }
 0x2ee   : > { %vm12733_vm7 = vmor %vm969_vm9, %vm1097_vm0  ;;  %v12737_v50 = vsub.f32 %v7884_v43, %v7884_v43  ;;  %v12739_v48 = vsub.f32 %v7947_v59, %v7947_v59  ;;  %vm17833_vm13 = vcmp.gt.f32.partialorder %v12081_v7, %v10273_v46  ;;  %v17834_v39 = vmov 0  ;;  %8755 = vmatprep.subr.bf16.mxu1 %v17210_v28  ;;  %v12758_v59 = vpop.permute.xlu0 %1411 }
 0x2ef   : > { %v4833_v16 = vand.u32 4294901760, %v4832_v23  ;;  %v17829_v24 = vsel %vm12733_vm7, 4294967295, %v17828_v24  ;;  %vm12747_vm1 = vmor %vm17833_vm13, %vm12699_vm12  ;;  %v12751_v23 = vsub.f32 %v7906_v22, %v7906_v22  ;;  %v4842_v25 = vand.u32 4294901760, %v4841_v26  ;;  %17839 = vst [vmem:[#allocation225_spill] sm:$0xff] %v12758_v59 }
 0x2f0   : > { %17830 = vst [vmem:[#allocation219_spill] sm:$0xff] %v17829_v24  ;;  %17831 = vst [vmem:[#allocation220_spill] sm:$0xff] %v12737_v50  ;;  %v17835_v39 = vsel %vm12747_vm1, 4294967295, %v17834_v39  ;;  %v12755_v43 = vsub.f32 %v7883_v47, %v7883_v47  ;;  %vm17840_vm0 = vcmp.eq.f32.partialorder %v12081_v7, %v10103_v58  ;;  %vm17841_vm12 = vcmp.gt.f32.partialorder %v12081_v7, %v10103_v58  ;;  %v12798_v24 = vpop.permute.xlu1 %845 }
 0x2f1   : > { %17832 = vst [vmem:[#allocation221_spill] sm:$0xff] %v12739_v48  ;;  %17836 = vst [vmem:[#allocation222_spill] sm:$0xff] %v17835_v39  ;;  %4834 = vmatmul.mubr.f32.gmra.mrb[24].mxu1 %v4833_v16  ;;  %vm1529_vm10 = vcmp.eq.f32.partialorder %v12193_v53, %v10363_v15  ;;  %v16751_v26 = vand.u32 4294901760, %v12737_v50  ;;  %v16752_v22 = vand.u32 4294901760, %v12739_v48  ;;  %vm1530_vm2 = vcmp.eq.f32.partialorder %v12193_v53, %v10366_v44 }
 0x2f2   : > { %17837 = vst [vmem:[#allocation223_spill] sm:$0xff] %v12751_v23  ;;  %17838 = vst [vmem:[#allocation224_spill] sm:$0xff] %v12755_v43  ;;  %4843 = vmatprep.mubr.f32.mxu1 %v4842_v25  ;;  %v7912_v47 = vsel %vm12733_vm7, 1.0, %v17220_v57  ;;  %v16753_v16 = vand.u32 4294901760, %v12755_v43  ;;  %v17847_v63 = vand.u32 4294901760, %v11334_v8  ;;  %v7885_v8 = vsel %vm12747_vm1, 1.0, %v17220_v57 }
 0x2f3   : > { %vm12766_vm13 = vmor %vm17841_vm12, %vm17840_vm0  ;;  %vm17845_vm0 = vcmp.gt.f32.partialorder %v12631_v31, %v10273_v46  ;;  %v2243_v19 = vsub.f32 %v12737_v50, %v16751_v26  ;;  %v4847_v25 = vsub.f32 %v12739_v48, %v16752_v22  ;;  %v17846_v31 = vand.u32 4294901760, %v11314_v49  ;;  %17848 = vst [vmem:[#allocation227_spill] sm:$0xff] %v12798_v24 }
 0x2f4   : > { %v17843_v9 = vsel %vm12766_vm13, 4294967295, %v17842_v9  ;;  %v7911_v7 = vsel %vm17845_vm0, 1.0, %v17220_v57  ;;  %vm17849_vm0 = vcmp.gt.f32.partialorder %v11722_v38, %v10273_v46  ;;  %v17850_v26 = vmov 0 }
 0x2f5   : > { %17844 = vst [vmem:[#allocation226_spill] sm:$0xff] %v17843_v9  ;;  %v8468_v34 = vpack.c.bf16 %v17847_v63, %v17846_v31  ;;  %vm12805_vm9 = vmor %vm17849_vm0, %vm12611_vm4  ;;  %v2249_v22 = vsub.f32 %v12755_v43, %v16753_v16  ;;  %v7886_v49 = vsel %vm12766_vm13, 1.0, %v17220_v57  ;;  %v7888_v38 = vsel %vm12677_vm3, 1.0, %v17220_v57 }
 0x2f6   : > { %v17851_v26 = vsel %vm12805_vm9, 4294967295, %v17850_v26  ;;  %vm17853_vm4 = vcmp.lt.s32.totalorder %v17750_v33, %v10276_v29  ;;  %v2244_v0 = vand.u32 4294901760, %v2243_v19  ;;  %v4848_v63 = vand.u32 4294901760, %v4847_v25 }
 0x2f7   : > { %17852 = vst [vmem:[#allocation228_spill] sm:$0xff] %v17851_v26  ;;  %vm12827_vm0 = vmand %vm1529_vm10, %vm17853_vm4  ;;  %8469 = vmatpush1.bf16.msra.mxu0 %v8468_v34  ;;  %8757 = vmatpush1.bf16.msra.mxu1 %v8468_v34  ;;  %v12833_v16 = vsub.f32 %v7886_v49, %v7886_v49  ;;  %vm17857_vm7 = vcmp.gt.f32.partialorder %v12193_v53, %v10366_v44  ;;  %v17858_v33 = vmov 0  ;;  %v2250_v19 = vand.u32 4294901760, %v2249_v22  ;;  %v12851_v34 = vpop.permute.xlu0 %895  ;;  %v17869_v49 = vld [vmem:[#allocation8_spill] sm:$0xff] }
 0x2f8   : > { %vm12841_vm3 = vmor %vm17857_vm7, %vm1530_vm2  ;;  %v12845_v48 = vsub.f32 %v7911_v7, %v7911_v7  ;;  %v12847_v25 = vsub.f32 %v7885_v8, %v7885_v8  ;;  %v12849_v43 = vsub.f32 %v7888_v38, %v7888_v38  ;;  %17864 = vst [vmem:[#allocation234_spill] sm:$0xff] %v12851_v34  ;;  %8758 = vmatprep.subr.bf16.mxu1 %v17210_v28  ;;  %v12871_v8 = vadd.s32 136, %v17869_v49 }
 0x2f9   : > { %17856 = vst [vmem:[#allocation229_spill] sm:$0xff] %v12833_v16  ;;  %v17859_v33 = vsel %vm12841_vm3, 4294967295, %v17858_v33  ;;  %8470 = vmatprep.subr.bf16.mxu0 %v17210_v28  ;;  %2245 = vmatprep.mubr.f32.mxu0 %v2244_v0  ;;  %vm17865_vm7 = vcmp.lt.s32.totalorder %v17819_v42, %v10504_v51  ;;  %vm17866_vm4 = vcmp.eq.f32.partialorder %v12758_v59, %v10366_v44  ;;  %v12888_v50 = vadd.s32 240, %v17869_v49 }
 0x2fa   : > { %17860 = vst [vmem:[#allocation230_spill] sm:$0xff] %v17859_v33  ;;  %17861 = vst [vmem:[#allocation231_spill] sm:$0xff] %v12845_v48  ;;  %4849 = vmatmul.mubr.f32.gmra.mrb[26].mxu1 %v4848_v63  ;;  %v12873_v38 = vsub.f32 %v7912_v47, %v7912_v47  ;;  %2251 = vmatmul.mubr.f32.gmra.mrb[26].mxu0 %v2250_v19  ;;  %vm17871_vm2 = vcmp.lt.s32.totalorder %v17462_v37, %v10504_v51  ;;  %v16772_v63 = vand.u32 4294901760, %v12847_v25  ;;  %v17876_v37 = vmov 0 }
 0x2fb   : > { %17862 = vst [vmem:[#allocation232_spill] sm:$0xff] %v12847_v25  ;;  %17863 = vst [vmem:[#allocation233_spill] sm:$0xff] %v12849_v43  ;;  %vm17872_vm10 = vcmp.eq.f32.partialorder %v12281_v61, %v10103_v58  ;;  %v16773_v7 = vand.u32 4294901760, %v12849_v43  ;;  %v17879_v47 = vand.u32 4294901760, %v12833_v16  ;;  %v17882_v31 = vmov 0  ;;  %v12959_v26 = vpop.permute.xlu0 %1423 }
 0x2fc   : > { %vm12865_vm12 = vmand %vm17866_vm4, %vm17865_vm7  ;;  %17870 = vst [vmem:[#allocation8_spill] sm:$0xff] %v12873_v38  ;;  %vm17875_vm7 = vcmp.gt.f32.partialorder %v12193_v53, %v10363_v15  ;;  %v12910_v53 = vpop.permute.xlu1 %1379  ;;  %vm1039_vm14 = vcmp.eq.f32.partialorder %v12851_v34, %v10103_v58  ;;  %v17886_v22 = vmov 0 }
 0x2fd   : > { %vm12881_vm1 = vmand %vm17872_vm10, %vm17871_vm2  ;;  %vm16784_vm10 = vcmp.gt.f32.partialorder %v12758_v59, %v10363_v15  ;;  %v2258_v19 = vsub.f32 %v12833_v16, %v17879_v47  ;;  %17880 = vst [vmem:[#allocation236_spill] sm:$0xff] %v12910_v53  ;;  %v2264_v47 = vsub.f32 %v12847_v25, %v16772_v63  ;;  %v2273_v16 = vsub.f32 %v12849_v43, %v16773_v7 }
 0x2fe   : > { %vm12895_vm4 = vmor %vm17875_vm7, %vm12827_vm0  ;;  %vm17881_vm0 = vcmp.gt.f32.partialorder %v12758_v59, %v10366_v44  ;;  %vm16787_vm2 = vcmp.lt.s32.totalorder %v12888_v50, %v10504_v51  ;;  %v7887_v7 = vsel %vm12805_vm9, 1.0, %v17220_v57  ;;  %v7950_v43 = vsel %vm12841_vm3, 1.0, %v17220_v57  ;;  %17890 = vst [vmem:[#allocation240_spill] sm:$0xff] %v12959_v26 }
 0x2ff   : > { %v17877_v37 = vsel %vm12895_vm4, 4294967295, %v17876_v37  ;;  %vm12917_vm7 = vmor %vm17881_vm0, %vm12865_vm12  ;;  %vm17885_vm12 = vcmp.gt.f32.partialorder %v12281_v61, %v10103_v58  ;;  %v2259_v63 = vand.u32 4294901760, %v2258_v19  ;;  %v7977_v0 = vsel %vm16784_vm10, 1.0, %v17220_v57 }
 0x300   : > { %17878 = vst [vmem:[#allocation235_spill] sm:$0xff] %v17877_v37  ;;  %v17883_v31 = vsel %vm12917_vm7, 4294967295, %v17882_v31  ;;  %vm12936_vm0 = vmor %vm17885_vm12, %vm12881_vm1  ;;  %v2265_v25 = vand.u32 4294901760, %v2264_v47  ;;  %v12957_v19 = vsub.f32 %v7887_v7, %v7887_v7  ;;  %v7978_v10 = vsel %vm12917_vm7, 1.0, %v17220_v57  ;;  %v13003_v33 = vpop.permute.xlu1 %1383 }
 0x301   : > { %17884 = vst [vmem:[#allocation237_spill] sm:$0xff] %v17883_v31  ;;  %v17887_v22 = vsel %vm12936_vm0, 4294967295, %v17886_v22  ;;  %vm1103_vm12 = vmand %vm1039_vm14, %vm16787_vm2  ;;  %2260 = vmatprep.mubr.f32.mxu0 %v2259_v63  ;;  %v2274_v39 = vand.u32 4294901760, %v2273_v16  ;;  %vm17891_vm10 = vcmp.lt.s32.totalorder %v12871_v8, %v10504_v51  ;;  %vm17892_vm1 = vcmp.eq.f32.partialorder %v12344_v30, %v10103_v58 }
 0x302   : > { %17888 = vst [vmem:[#allocation238_spill] sm:$0xff] %v17887_v22  ;;  %17889 = vst [vmem:[#allocation239_spill] sm:$0xff] %v12957_v19  ;;  %v12974_v7 = vsub.f32 %v7950_v43, %v7950_v43  ;;  %v7949_v59 = vsel %vm12895_vm4, 1.0, %v17220_v57  ;;  %2266 = vmatmul.mubr.f32.gmra.mrb[28].mxu0 %v2265_v25  ;;  %vm949_vm2 = vcmp.gt.f32.partialorder %v12344_v30, %v10103_v58  ;;  %v17897_v16 = vmov 0 }
 0x303   : > { %vm12970_vm13 = vmand %vm17892_vm1, %vm17891_vm10  ;;  %vm17896_vm7 = vcmp.gt.f32.partialorder %v12851_v34, %v10103_v58  ;;  %v16798_v43 = vand.u32 4294901760, %v12957_v19  ;;  %v12991_v63 = vsub.f32 %v7949_v59, %v7949_v59  ;;  %2275 = vmatprep.mubr.f32.mxu0 %v2274_v39  ;;  %vm17901_vm1 = vcmp.gt.f32.partialorder %v12851_v34, %v10273_v46  ;;  %17902 = vst [vmem:[#allocation244_spill] sm:$0xff] %v13003_v33 }
 0x304   : > { %17895 = vst [vmem:[#allocation241_spill] sm:$0xff] %v12974_v7  ;;  %vm12986_vm10 = vmor %vm17896_vm7, %vm1103_vm12  ;;  %v7917_v25 = vsel %vm17901_vm1, 1.0, %v17220_v57  ;;  %v12999_v37 = vadd.s32 248, %v17869_v49  ;;  %vm16826_vm7 = vcmp.gt.f32.partialorder %v12959_v26, %v10363_v15  ;;  %vm1564_vm1 = vcmp.eq.f32.partialorder %v12959_v26, %v10366_v44 }
 0x305   : > { %v17898_v16 = vsel %vm12986_vm10, 4294967295, %v17897_v16  ;;  %17900 = vst [vmem:[#allocation243_spill] sm:$0xff] %v12991_v63  ;;  %v2279_v59 = vsub.f32 %v12957_v19, %v16798_v43  ;;  %vm13015_vm14 = vmor %vm949_vm2, %vm12970_vm13  ;;  %v17903_v31 = vmov 0  ;;  %v7918_v34 = vsel %vm12986_vm10, 1.0, %v17220_v57 }
 0x306   : > { %17899 = vst [vmem:[#allocation242_spill] sm:$0xff] %v17898_v16  ;;  %v17904_v31 = vsel %vm13015_vm14, 4294967295, %v17903_v31  ;;  %v17906_v43 = vand.u32 4294901760, %v12974_v7  ;;  %vm16827_vm12 = vcmp.lt.s32.totalorder %v12999_v37, %v10504_v51  ;;  %v7890_v19 = vsel %vm12936_vm0, 1.0, %v17220_v57 }
 0x307   : > { %17905 = vst [vmem:[#allocation245_spill] sm:$0xff] %v17904_v31  ;;  %v2280_v47 = vand.u32 4294901760, %v2279_v59  ;;  %v17907_v9 = vand.u32 4294901760, %v12991_v63  ;;  %vm1628_vm13 = vmand %vm1564_vm1, %vm16827_vm12  ;;  %v13042_v16 = vsub.f32 %v7978_v10, %v7978_v10  ;;  %v13044_v22 = vsub.f32 %v7977_v0, %v7977_v0 }
 0x308   : > { %v4856_v39 = vsub.f32 %v12974_v7, %v17906_v43  ;;  %v7983_v43 = vsel %vm16826_vm7, 1.0, %v17220_v57  ;;  %v13040_v7 = vsub.f32 %v7890_v19, %v7890_v19  ;;  %v13046_v59 = vsub.f32 %v7917_v25, %v7917_v25 }
 0x309   : > { %v4862_v54 = vsub.f32 %v12991_v63, %v17907_v9  ;;  %17909 = vst [vmem:[#allocation247_spill] sm:$0xff] %v13042_v16  ;;  %17910 = vst [vmem:[#allocation248_spill] sm:$0xff] %v13044_v22  ;;  %vm17912_vm2 = vcmp.gt.f32.partialorder %v12959_v26, %v10366_v44  ;;  %v17913_v9 = vmov 0  ;;  %v13055_v63 = vsub.f32 %v7918_v34, %v7918_v34  ;;  %2281 = vmatmul.mubr.f32.gmra.mrb[30].mxu0 %v2280_v47  ;;  %v13073_v34 = vpop.permute.xlu1 %855 }
 0x30a   : > { %17908 = vst [vmem:[#allocation246_spill] sm:$0xff] %v13040_v7  ;;  %17911 = vst [vmem:[#allocation249_spill] sm:$0xff] %v13046_v59  ;;  %v4857_v14 = vand.u32 4294901760, %v4856_v39  ;;  %v16830_v19 = vand.u32 4294901760, %v13040_v7  ;;  %vm17917_vm1 = vcmp.gt.f32.partialorder %v12281_v61, %v10273_v46  ;;  %v13062_v0 = vsub.f32 %v7983_v43, %v7983_v43 }
 0x30b   : > { %vm13051_vm10 = vmor %vm17912_vm2, %vm1628_vm13  ;;  %17916 = vst [vmem:[#allocation251_spill] sm:$0xff] %v13055_v63  ;;  %v4863_v28 = vand.u32 4294901760, %v4862_v54  ;;  %v7889_v10 = vsel %vm17917_vm1, 1.0, %v17220_v57  ;;  %v7892_v39 = vsel %vm13015_vm14, 1.0, %v17220_v57  ;;  %vm17919_vm13 = vcmp.gt.f32.partialorder %v12344_v30, %v10273_v46 }
 0x30c   : > { %v17914_v9 = vsel %vm13051_vm10, 4294967295, %v17913_v9  ;;  %4858 = vmatprep.mubr.f32.mxu1 %v4857_v14  ;;  %v13064_v25 = vsub.f32 %v7889_v10, %v7889_v10  ;;  %v7891_v54 = vsel %vm17919_vm13, 1.0, %v17220_v57  ;;  %17920 = vst [vmem:[#allocation253_spill] sm:$0xff] %v13073_v34  ;;  %v7984_v14 = vsel %vm13051_vm10, 1.0, %v17220_v57 }
 0x30d   : > { %17915 = vst [vmem:[#allocation250_spill] sm:$0xff] %v17914_v9  ;;  %4864 = vmatmul.mubr.f32.gmra.mrb[28].mxu1 %v4863_v28  ;;  %v2288_v47 = vsub.f32 %v13040_v7, %v16830_v19  ;;  %v13083_v43 = vsub.f32 %v7892_v39, %v7892_v39  ;;  %v13085_v10 = vsub.f32 %v7891_v54, %v7891_v54  ;;  %v16831_v28 = vand.u32 4294901760, %v12359_v4 }
 0x30e   : > { %17918 = vst [vmem:[#allocation252_spill] sm:$0xff] %v13064_v25  ;;  %v16832_v26 = vand.u32 4294901760, %v13064_v25  ;;  %vm1017_vm13 = vcmp.eq.f32.partialorder %v12601_v3, %v10103_v58  ;;  %vm17923_vm7 = vcmp.lt.s32.totalorder %v10542_v5, %v10504_v51  ;;  %v16835_v39 = vand.u32 4294901760, %v12222_v27 }
 0x30f   : > { %17921 = vst [vmem:[#allocation254_spill] sm:$0xff] %v13083_v43  ;;  %17922 = vst [vmem:[#allocation255_spill] sm:$0xff] %v13085_v10  ;;  %v2289_v9 = vand.u32 4294901760, %v2288_v47  ;;  %v16834_v30 = vand.u32 4294901760, %v13083_v43  ;;  %v16833_v31 = vand.u32 4294901760, %v13085_v10  ;;  %v2318_v47 = vsub.f32 %v12359_v4, %v16831_v28 }
 0x310   : > { %vm1081_vm12 = vmand %vm1017_vm13, %vm17923_vm7  ;;  %v2294_v54 = vsub.f32 %v13064_v25, %v16832_v26  ;;  %vm17924_vm7 = vcmp.gt.f32.partialorder %v12601_v3, %v10103_v58  ;;  %v17925_v28 = vmov 0  ;;  %v2324_v26 = vsub.f32 %v12222_v27, %v16835_v39 }
 0x311   : > { %2290 = vmatprep.mubr.f32.mxu0 %v2289_v9  ;;  %v2303_v5 = vsub.f32 %v13083_v43, %v16834_v30  ;;  %v2309_v19 = vsub.f32 %v13085_v10, %v16833_v31  ;;  %vm13120_vm13 = vmor %vm17924_vm7, %vm1081_vm12  ;;  %vm1531_vm2 = vcmp.eq.f32.partialorder %v12712_v12, %v10363_v15  ;;  %vm1532_vm1 = vcmp.eq.f32.partialorder %v12712_v12, %v10366_v44  ;;  %v13139_v30 = vpop.permute.xlu1 %860 }
 0x312   : > { %v17926_v28 = vsel %vm13120_vm13, 4294967295, %v17925_v28  ;;  %v2295_v9 = vand.u32 4294901760, %v2294_v54  ;;  %vm17928_vm12 = vcmp.lt.s32.totalorder %v17722_v17, %v10276_v29  ;;  %v13137_v31 = vadd.s32 160, %v17869_v49  ;;  %17929 = vst [vmem:[#allocation257_spill] sm:$0xff] %v13139_v30 }
 0x313   : > { %17927 = vst [vmem:[#allocation256_spill] sm:$0xff] %v17926_v28  ;;  %vm1595_vm7 = vmand %vm1531_vm2, %vm17928_vm12  ;;  %v13141_v39 = vsub.f32 %v7984_v14, %v7984_v14  ;;  %v2304_v54 = vand.u32 4294901760, %v2303_v5  ;;  %v2319_v27 = vand.u32 4294901760, %v2318_v47  ;;  %vm17931_vm10 = vcmp.gt.f32.partialorder %v12712_v12, %v10363_v15 }
 0x314   : > { %vm13148_vm0 = vmor %vm17931_vm10, %vm1595_vm7  ;;  %v17932_v4 = vmov 0  ;;  %2296 = vmatmul.mubr.f32.gmra.mrb[32].mxu0 %v2295_v9  ;;  %vm17935_vm12 = vcmp.gt.f32.partialorder %v12712_v12, %v10366_v44  ;;  %v17936_v17 = vmov 0  ;;  %vm16854_vm14 = vcmp.lt.s32.totalorder %v13137_v31, %v10504_v51 }
 0x315   : > { %17930 = vst [vmem:[#allocation258_spill] sm:$0xff] %v13141_v39  ;;  %v17933_v4 = vsel %vm13148_vm0, 4294967295, %v17932_v4  ;;  %vm13157_vm9 = vmor %vm17935_vm12, %vm1532_vm1  ;;  %vm955_vm10 = vcmp.gt.f32.partialorder %v12798_v24, %v10103_v58  ;;  %vm1019_vm7 = vcmp.eq.f32.partialorder %v12798_v24, %v10103_v58  ;;  %v7896_v14 = vsel %vm13120_vm13, 1.0, %v17220_v57  ;;  %2305 = vmatprep.mubr.f32.mxu0 %v2304_v54 }
 0x316   : > { %17934 = vst [vmem:[#allocation259_spill] sm:$0xff] %v17933_v4  ;;  %v17937_v17 = vsel %vm13157_vm9, 4294967295, %v17936_v17  ;;  %v2310_v12 = vand.u32 4294901760, %v2309_v19  ;;  %v2325_v47 = vand.u32 4294901760, %v2324_v26  ;;  %vm1083_vm1 = vmand %vm1019_vm7, %vm16854_vm14  ;;  %v13175_v5 = vsub.f32 %v7896_v14, %v7896_v14 }
 0x317   : > { %17938 = vst [vmem:[#allocation260_spill] sm:$0xff] %v17937_v17  ;;  %vm17940_vm12 = vcmp.gt.f32.partialorder %v12601_v3, %v10273_v46  ;;  %v7952_v26 = vsel %vm13157_vm9, 1.0, %v17220_v57  ;;  %v7951_v19 = vsel %vm13148_vm0, 1.0, %v17220_v57  ;;  %vm13191_vm7 = vmor %vm955_vm10, %vm1083_vm1  ;;  %v17942_v54 = vmov 0  ;;  %v18355_v17 = vld [vmem:[#allocation148_spill] sm:$0xff] }
 0x318   : > { %17939 = vst [vmem:[#allocation261_spill] sm:$0xff] %v13175_v5  ;;  %v7895_v9 = vsel %vm17940_vm12, 1.0, %v17220_v57  ;;  %v17943_v54 = vsel %vm13191_vm7, 4294967295, %v17942_v54  ;;  %v16863_v14 = vand.u32 4294901760, %v13175_v5  ;;  %v13196_v10 = vsub.f32 %v7952_v26, %v7952_v26  ;;  %2311 = vmatmul.mubr.f32.gmra.mrb[34].mxu0 %v2310_v12 }
 0x319   : > { %v13183_v29 = vsub.f32 %v7895_v9, %v7895_v9  ;;  %17944 = vst [vmem:[#allocation263_spill] sm:$0xff] %v17943_v54  ;;  %v13198_v43 = vsub.f32 %v7951_v19, %v7951_v19  ;;  %v16864_v9 = vand.u32 4294901760, %v11876_v60  ;;  %vm17947_vm12 = vcmp.lt.s32.totalorder %v12871_v8, %v10504_v51  ;;  %v13218_v8 = vpop.permute.xlu1 %1391  ;;  %2320 = vmatprep.mubr.f32.mxu0 %v2319_v27 }
 0x31a   : > { %17945 = vst [vmem:[#allocation264_spill] sm:$0xff] %v13196_v10  ;;  %vm17948_vm14 = vcmp.eq.f32.partialorder %v12438_v62, %v10366_v44  ;;  %vm1480_vm1 = vcmp.gt.f32.partialorder %v13003_v33, %v10366_v44  ;;  %vm1544_vm13 = vcmp.eq.f32.partialorder %v13003_v33, %v10366_v44  ;;  %17951 = vst [vmem:[#allocation266_spill] sm:$0xff] %v13218_v8 }
 0x31b   : > { %17941 = vst [vmem:[#allocation262_spill] sm:$0xff] %v13183_v29  ;;  %17946 = vst [vmem:[#allocation265_spill] sm:$0xff] %v13198_v43  ;;  %v2333_v26 = vsub.f32 %v13175_v5, %v16863_v14  ;;  %v4886_v7 = vsub.f32 %v11876_v60, %v16864_v9  ;;  %v17953_v27 = vand.u32 4294901760, %v13183_v29  ;;  %v17954_v14 = vmov 0 }
 0x31c   : > { %vm13207_vm2 = vmand %vm17948_vm14, %vm17947_vm12  ;;  %vm17952_vm12 = vcmp.lt.s32.totalorder %v10599_v2, %v10504_v51  ;;  %vm17957_vm14 = vcmp.gt.f32.partialorder %v13003_v33, %v10363_v15  ;;  %v7898_v2 = vsel %vm13191_vm7, 1.0, %v17220_v57  ;;  %v17963_v12 = vand.u32 4294901760, %v13198_v43  ;;  %2326 = vmatmul.mubr.f32.gmra.mrb[36].mxu0 %v2325_v47 }
 0x31d   : > { %vm1608_vm10 = vmand %vm1544_vm13, %vm17952_vm12  ;;  %v2339_v3 = vsub.f32 %v13183_v29, %v17953_v27  ;;  %v7963_v19 = vsel %vm17957_vm14, 1.0, %v17220_v57  ;;  %vm17958_vm13 = vcmp.gt.f32.partialorder %v12438_v62, %v10366_v44  ;;  %v17959_v27 = vmov 0 }
 0x31e   : > { %vm13236_vm0 = vmor %vm1480_vm1, %vm1608_vm10  ;;  %v2334_v9 = vand.u32 4294901760, %v2333_v26  ;;  %v17962_v29 = vand.u32 4294901760, %v13196_v10  ;;  %v4877_v60 = vsub.f32 %v13198_v43, %v17963_v12  ;;  %v4887_v33 = vand.u32 4294901760, %v4886_v7 }
 0x31f   : > { %v17955_v14 = vsel %vm13236_vm0, 4294967295, %v17954_v14  ;;  %vm13253_vm10 = vmor %vm17958_vm13, %vm13207_vm2  ;;  %vm17964_vm1 = vcmp.lt.s32.totalorder %v10561_v6, %v10504_v51  ;;  %vm17965_vm14 = vcmp.eq.f32.partialorder %v12510_v13, %v10366_v44  ;;  %v2340_v26 = vand.u32 4294901760, %v2339_v3 }
 0x320   : > { %17956 = vst [vmem:[#allocation267_spill] sm:$0xff] %v17955_v14  ;;  %v17960_v27 = vsel %vm13253_vm10, 4294967295, %v17959_v27  ;;  %v4871_v5 = vsub.f32 %v13196_v10, %v17962_v29  ;;  %vm13269_vm2 = vmand %vm17965_vm14, %vm17964_vm1  ;;  %v7964_v29 = vsel %vm13236_vm0, 1.0, %v17220_v57  ;;  %v13278_v7 = vsub.f32 %v7963_v19, %v7963_v19  ;;  %2335 = vmatprep.mubr.f32.mxu0 %v2334_v9  ;;  %v13298_v9 = vpop.permute.xlu1 %1395 }
 0x321   : > { %17961 = vst [vmem:[#allocation268_spill] sm:$0xff] %v17960_v27  ;;  %v17968_v6 = vand.u32 4294901760, %v11830_v18  ;;  %v4878_v47 = vand.u32 4294901760, %v4877_v60  ;;  %v13285_v3 = vsub.f32 %v7964_v29, %v7964_v29  ;;  %v13287_v10 = vsub.f32 %v7898_v2, %v7898_v2  ;;  %17972 = vst [vmem:[#allocation271_spill] sm:$0xff] %v13298_v9  ;;  %2341 = vmatmul.mubr.f32.gmra.mrb[38].mxu0 %v2340_v26 }
 0x322   : > { %v4872_v43 = vand.u32 4294901760, %v4871_v5  ;;  %v7956_v19 = vsel %vm13253_vm10, 1.0, %v17220_v57  ;;  %vm17971_vm1 = vcmp.gt.f32.partialorder %v12798_v24, %v10273_v46  ;;  %vm17973_vm13 = vcmp.gt.f32.partialorder %v12510_v13, %v10366_v44 }
 0x323   : > { %v4892_v12 = vsub.f32 %v11830_v18, %v17968_v6  ;;  %17969 = vst [vmem:[#allocation269_spill] sm:$0xff] %v13285_v3  ;;  %17970 = vst [vmem:[#allocation270_spill] sm:$0xff] %v13287_v10  ;;  %v7897_v6 = vsel %vm17971_vm1, 1.0, %v17220_v57  ;;  %v17974_v60 = vmov 0  ;;  %v16887_v5 = vand.u32 4294901760, %v13287_v10 }
 0x324   : > { %vm13305_vm12 = vmor %vm17973_vm13, %vm13269_vm2  ;;  %4873 = vmatprep.mubr.f32.mxu1 %v4872_v43  ;;  %v13310_v2 = vsub.f32 %v7956_v19, %v7956_v19  ;;  %v13312_v29 = vsub.f32 %v7897_v6, %v7897_v6  ;;  %vm959_vm1 = vcmp.gt.f32.partialorder %v13073_v34, %v10103_v58  ;;  %vm1023_vm14 = vcmp.eq.f32.partialorder %v13073_v34, %v10103_v58 }
 0x325   : > { %v4893_v54 = vand.u32 4294901760, %v4892_v12  ;;  %v17975_v60 = vsel %vm13305_vm12, 4294967295, %v17974_v60  ;;  %4879 = vmatmul.mubr.f32.gmra.mrb[30].mxu1 %v4878_v47  ;;  %vm17979_vm2 = vcmp.gt.f32.partialorder %v13073_v34, %v10273_v46  ;;  %vm17980_vm13 = vcmp.gt.f32.partialorder %v12438_v62, %v10363_v15 }
 0x326   : > { %17976 = vst [vmem:[#allocation272_spill] sm:$0xff] %v17975_v60  ;;  %17977 = vst [vmem:[#allocation273_spill] sm:$0xff] %v13310_v2  ;;  %v7901_v25 = vsel %vm17979_vm2, 1.0, %v17220_v57  ;;  %v7955_v12 = vsel %vm17980_vm13, 1.0, %v17220_v57  ;;  %4888 = vmatprep.mubr.f32.mxu1 %v4887_v33  ;;  %v2348_v26 = vsub.f32 %v13287_v10, %v16887_v5  ;;  %v16892_v47 = vand.u32 4294901760, %v13310_v2 }
 0x327   : > { %17978 = vst [vmem:[#allocation274_spill] sm:$0xff] %v13312_v29  ;;  %vm17981_vm0 = vcmp.lt.s32.totalorder %v10627_v36, %v10504_v51  ;;  %v13335_v6 = vsub.f32 %v7901_v25, %v7901_v25  ;;  %v17983_v43 = vmov 0  ;;  %v17986_v33 = vand.u32 4294901760, %v12411_v11 }
 0x328   : > { %vm1087_vm2 = vmand %vm1023_vm14, %vm17981_vm0  ;;  %v13344_v34 = vsub.f32 %v7955_v12, %v7955_v12  ;;  %v7958_v5 = vsel %vm13305_vm12, 1.0, %v17220_v57  ;;  %v2349_v36 = vand.u32 4294901760, %v2348_v26  ;;  %v4901_v25 = vsub.f32 %v13310_v2, %v16892_v47 }
 0x329   : > { %17982 = vst [vmem:[#allocation275_spill] sm:$0xff] %v13335_v6  ;;  %vm13337_vm7 = vmor %vm959_vm1, %vm1087_vm2  ;;  %v2363_v18 = vsub.f32 %v12411_v11, %v17986_v33  ;;  %v17988_v10 = vand.u32 4294901760, %v13312_v29  ;;  %vm17989_vm0 = vcmp.lt.s32.totalorder %v13137_v31, %v10504_v51  ;;  %vm17990_vm14 = vcmp.eq.f32.partialorder %v12910_v53, %v10366_v44  ;;  %4894 = vmatmul.mubr.f32.gmra.mrb[32].mxu1 %v4893_v54  ;;  %v13374_v11 = vpop.permute.xlu1 %870 }
 0x32a   : > { %v17984_v43 = vsel %vm13337_vm7, 4294967295, %v17983_v43  ;;  %17987 = vst [vmem:[#allocation277_spill] sm:$0xff] %v13344_v34  ;;  %v7902_v12 = vsel %vm13337_vm7, 1.0, %v17220_v57  ;;  %vm13365_vm1 = vmand %vm17990_vm14, %vm17989_vm0  ;;  %v13372_v19 = vsub.f32 %v7958_v5, %v7958_v5  ;;  %2350 = vmatprep.mubr.f32.mxu0 %v2349_v36  ;;  %v17996_v2 = vand.u32 4294901760, %v12361_v21 }
 0x32b   : > { %17985 = vst [vmem:[#allocation276_spill] sm:$0xff] %v17984_v43  ;;  %v2354_v14 = vsub.f32 %v13312_v29, %v17988_v10  ;;  %v13369_v33 = vsub.f32 %v7902_v12, %v7902_v12  ;;  %v2364_v47 = vand.u32 4294901760, %v2363_v18  ;;  %v16910_v10 = vand.u32 4294901760, %v13344_v34  ;;  %17995 = vst [vmem:[#allocation280_spill] sm:$0xff] %v13374_v11 }
 0x32c   : > { %17994 = vst [vmem:[#allocation279_spill] sm:$0xff] %v13372_v19  ;;  %v4902_v29 = vand.u32 4294901760, %v4901_v25  ;;  %v2369_v43 = vsub.f32 %v12361_v21, %v17996_v2  ;;  %v634_v24 = vadd.s32 184, %v17869_v49  ;;  %v16909_v54 = vand.u32 4294901760, %v13372_v19 }
 0x32d   : > { %17993 = vst [vmem:[#allocation278_spill] sm:$0xff] %v13369_v33  ;;  %v2355_v31 = vand.u32 4294901760, %v2354_v14  ;;  %v4907_v18 = vsub.f32 %v13344_v34, %v16910_v10  ;;  %vm961_vm0 = vcmp.gt.f32.partialorder %v13139_v30, %v10103_v58  ;;  %vm17997_vm14 = vcmp.gt.f32.partialorder %v12910_v53, %v10366_v44 }
 0x32e   : > { %vm13395_vm7 = vmor %vm17997_vm14, %vm13365_vm1  ;;  %v17998_v14 = vmov 0  ;;  %4903 = vmatprep.mubr.f32.mxu1 %v4902_v29  ;;  %v2370_v5 = vand.u32 4294901760, %v2369_v43  ;;  %vm726_vm13 = vcmp.lt.s32.totalorder %v634_v24, %v10504_v51  ;;  %vm1025_vm2 = vcmp.eq.f32.partialorder %v13139_v30, %v10103_v58 }
 0x32f   : > { %v17999_v14 = vsel %vm13395_vm7, 4294967295, %v17998_v14  ;;  %2356 = vmatmul.mubr.f32.gmra.mrb[40].mxu0 %v2355_v31  ;;  %vm18001_vm12 = vcmp.gt.f32.partialorder %v13139_v30, %v10273_v46  ;;  %v4908_v36 = vand.u32 4294901760, %v4907_v18  ;;  %v4916_v25 = vsub.f32 %v13372_v19, %v16909_v54  ;;  %vm1089_vm1 = vmand %vm1025_vm2, %vm726_vm13 }
 0x330   : > { %18000 = vst [vmem:[#allocation281_spill] sm:$0xff] %v17999_v14  ;;  %v7903_v2 = vsel %vm18001_vm12, 1.0, %v17220_v57  ;;  %2365 = vmatprep.mubr.f32.mxu0 %v2364_v47  ;;  %vm18003_vm14 = vcmp.gt.f32.partialorder %v12510_v13, %v10363_v15  ;;  %vm13417_vm10 = vmor %vm961_vm0, %vm1089_vm1  ;;  %v18004_v12 = vmov 0  ;;  %v16914_v26 = vand.u32 4294901760, %v12172_v41  ;;  %v18257_v14 = vld [vmem:[#allocation177_spill] sm:$0xff] }
 0x331   : > { %v13411_v29 = vsub.f32 %v7903_v2, %v7903_v2  ;;  %v7957_v43 = vsel %vm18003_vm14, 1.0, %v17220_v57  ;;  %v18005_v12 = vsel %vm13417_vm10, 4294967295, %v18004_v12  ;;  %vm16913_vm12 = vcmp.gt.f32.partialorder %v13218_v8, %v10363_v15  ;;  %4909 = vmatmul.mubr.f32.gmra.mrb[34].mxu1 %v4908_v36 }
 0x332   : > { %18006 = vst [vmem:[#allocation283_spill] sm:$0xff] %v18005_v12  ;;  %v13421_v47 = vsub.f32 %v7957_v43, %v7957_v43  ;;  %vm1484_vm2 = vcmp.gt.f32.partialorder %v13218_v8, %v10366_v44  ;;  %v4917_v31 = vand.u32 4294901760, %v4916_v25  ;;  %v7904_v18 = vsel %vm13417_vm10, 1.0, %v17220_v57  ;;  %v13437_v43 = vpop.permute.xlu1 %875  ;;  %v18275_v12 = vld [vmem:[#allocation266_spill] sm:$0xff] }
 0x333   : > { %18002 = vst [vmem:[#allocation282_spill] sm:$0xff] %v13411_v29  ;;  %vm1548_vm0 = vcmp.eq.f32.partialorder %v13218_v8, %v10366_v44  ;;  %v7967_v2 = vsel %vm16913_vm12, 1.0, %v17220_v57  ;;  %18008 = vst [vmem:[#allocation285_spill] sm:$0xff] %v13437_v43  ;;  %2371 = vmatmul.mubr.f32.gmra.mrb[42].mxu0 %v2370_v5  ;;  %v13439_v54 = vsub.f32 %v7904_v18, %v7904_v18  ;;  %v18011_v21 = vmov 0 }
 0x334   : > { %18007 = vst [vmem:[#allocation284_spill] sm:$0xff] %v13421_v47  ;;  %v4931_v25 = vsub.f32 %v12172_v41, %v16914_v26  ;;  %vm1612_vm1 = vmand %vm1548_vm0, %vm726_vm13  ;;  %v13447_v10 = vsub.f32 %v7967_v2, %v7967_v2  ;;  %4918 = vmatprep.mubr.f32.mxu1 %v4917_v31  ;;  %v7962_v18 = vsel %vm13395_vm7, 1.0, %v17220_v57  ;;  %vm16931_vm12 = vcmp.gt.f32.partialorder %v13298_v9, %v10363_v15 }
 0x335   : > { %18009 = vst [vmem:[#allocation286_spill] sm:$0xff] %v13439_v54  ;;  %vm13449_vm14 = vmor %vm1484_vm2, %vm1612_vm1  ;;  %v18014_v24 = vand.u32 4294901760, %v13421_v47  ;;  %v13466_v41 = vsub.f32 %v7962_v18, %v7962_v18  ;;  %v18017_v19 = vand.u32 4294901760, %v12045_v40  ;;  %v18018_v34 = vand.u32 4294901760, %v13369_v33 }
 0x336   : > { %18010 = vst [vmem:[#allocation287_spill] sm:$0xff] %v13447_v10  ;;  %v18012_v21 = vsel %vm13449_vm14, 4294967295, %v18011_v21  ;;  %v4932_v31 = vand.u32 4294901760, %v4931_v25  ;;  %v7968_v26 = vsel %vm13449_vm14, 1.0, %v17220_v57  ;;  %vm1486_vm13 = vcmp.gt.f32.partialorder %v13298_v9, %v10366_v44 }
 0x337   : > { %18013 = vst [vmem:[#allocation288_spill] sm:$0xff] %v18012_v21  ;;  %v4922_v2 = vsub.f32 %v13421_v47, %v18014_v24  ;;  %18015 = vst [vmem:[#allocation289_spill] sm:$0xff] %v13466_v41  ;;  %v13468_v5 = vsub.f32 %v7968_v26, %v7968_v26  ;;  %v4937_v36 = vsub.f32 %v12045_v40, %v18017_v19  ;;  %v16932_v24 = vand.u32 4294901760, %v13466_v41 }
 0x338   : > { %v2378_v8 = vsub.f32 %v13369_v33, %v18018_v34  ;;  %vm1550_vm2 = vcmp.eq.f32.partialorder %v13298_v9, %v10366_v44  ;;  %v7969_v26 = vsel %vm16931_vm12, 1.0, %v17220_v57  ;;  %vm18019_vm0 = vcmp.lt.s32.totalorder %v17716_v52, %v10504_v51  ;;  %v13491_v33 = vpop.permute.xlu1 %1403 }
 0x339   : > { %18016 = vst [vmem:[#allocation290_spill] sm:$0xff] %v13468_v5  ;;  %v4923_v25 = vand.u32 4294901760, %v4922_v2  ;;  %v4938_v18 = vand.u32 4294901760, %v4937_v36  ;;  %vm1614_vm1 = vmand %vm1550_vm2, %vm18019_vm0  ;;  %v13488_v34 = vsub.f32 %v7969_v26, %v7969_v26  ;;  %v16943_v2 = vand.u32 4294901760, %v13335_v6 }
 0x33a   : > { %v2379_v19 = vand.u32 4294901760, %v2378_v8  ;;  %18021 = vst [vmem:[#allocation292_spill] sm:$0xff] %v13491_v33  ;;  %v4946_v40 = vsub.f32 %v13466_v41, %v16932_v24  ;;  %vm13496_vm14 = vmor %vm1486_vm13, %vm1614_vm1  ;;  %v18022_v47 = vmov 0  ;;  %vm18025_vm12 = vcmp.gt.f32.partialorder %v12910_v53, %v10363_v15 }
 0x33b   : > { %18020 = vst [vmem:[#allocation291_spill] sm:$0xff] %v13488_v34  ;;  %4924 = vmatmul.mubr.f32.gmra.mrb[36].mxu1 %v4923_v25  ;;  %v18023_v47 = vsel %vm13496_vm14, 4294967295, %v18022_v47  ;;  %v7961_v52 = vsel %vm18025_vm12, 1.0, %v17220_v57  ;;  %v16949_v8 = vand.u32 4294901760, %v13285_v3  ;;  %v16944_v36 = vand.u32 4294901760, %v13439_v54 }
 0x33c   : > { %18024 = vst [vmem:[#allocation293_spill] sm:$0xff] %v18023_v47  ;;  %4933 = vmatprep.mubr.f32.mxu1 %v4932_v31  ;;  %2380 = vmatprep.mubr.f32.mxu0 %v2379_v19  ;;  %v7970_v25 = vsel %vm13496_vm14, 1.0, %v17220_v57  ;;  %v2384_v26 = vsub.f32 %v13335_v6, %v16943_v2  ;;  %v13512_v24 = vsub.f32 %v7961_v52, %v7961_v52  ;;  %v16945_v41 = vand.u32 4294901760, %v13411_v29 }
 0x33d   : > { %v4947_v9 = vand.u32 4294901760, %v4946_v40  ;;  %v13515_v30 = vsub.f32 %v7970_v25, %v7970_v25  ;;  %v4961_v31 = vsub.f32 %v13285_v3, %v16949_v8  ;;  %v2393_v19 = vsub.f32 %v13439_v54, %v16944_v36 }
 0x33e   : > { %18026 = vst [vmem:[#allocation294_spill] sm:$0xff] %v13512_v24  ;;  %v2385_v47 = vand.u32 4294901760, %v2384_v26  ;;  %v16950_v21 = vand.u32 4294901760, %v13512_v24  ;;  %v2399_v52 = vsub.f32 %v13411_v29, %v16945_v41  ;;  %v16946_v2 = vand.u32 4294901760, %v13278_v7 }
 0x33f   : > { %18027 = vst [vmem:[#allocation295_spill] sm:$0xff] %v13515_v30  ;;  %4939 = vmatmul.mubr.f32.gmra.mrb[38].mxu1 %v4938_v18  ;;  %v4962_v40 = vand.u32 4294901760, %v4961_v31  ;;  %v2394_v25 = vand.u32 4294901760, %v2393_v19  ;;  %vm16961_vm12 = vcmp.gt.f32.partialorder %v13374_v11, %v10273_v46  ;;  %vm965_vm13 = vcmp.gt.f32.partialorder %v13374_v11, %v10103_v58  ;;  %v13540_v18 = vpop.permute.xlu1 %1407 }
 0x340   : > { %4948 = vmatprep.mubr.f32.mxu1 %v4947_v9  ;;  %2386 = vmatmul.mubr.f32.gmra.mrb[44].mxu0 %v2385_v47  ;;  %v4952_v26 = vsub.f32 %v13512_v24, %v16950_v21  ;;  %v2400_v36 = vand.u32 4294901760, %v2399_v52  ;;  %v4967_v41 = vsub.f32 %v13278_v7, %v16946_v2  ;;  %vm1029_vm2 = vcmp.eq.f32.partialorder %v13374_v11, %v10103_v58 }
 0x341   : > { %18028 = vst [vmem:[#allocation296_spill] sm:$0xff] %v13540_v18  ;;  %2395 = vmatprep.mubr.f32.mxu0 %v2394_v25  ;;  %vm18029_vm0 = vcmp.lt.s32.totalorder %v17687_v32, %v10504_v51  ;;  %v7907_v9 = vsel %vm16961_vm12, 1.0, %v17220_v57  ;;  %v16957_v47 = vand.u32 4294901760, %v12751_v23  ;;  %v16958_v31 = vand.u32 4294901760, %v12522_v20 }
 0x342   : > { %vm1093_vm1 = vmand %vm1029_vm2, %vm18029_vm0  ;;  %v16966_v19 = vand.u32 4294901760, %v12714_v45  ;;  %v4953_v52 = vand.u32 4294901760, %v4952_v26  ;;  %v4968_v2 = vand.u32 4294901760, %v4967_v41  ;;  %v18030_v25 = vmov 0 }
 0x343   : > { %vm13555_vm14 = vmor %vm965_vm13, %vm1093_vm1  ;;  %v13559_v32 = vsub.f32 %v7907_v9, %v7907_v9  ;;  %v16967_v8 = vand.u32 4294901760, %v12485_v56  ;;  %v2408_v26 = vsub.f32 %v12751_v23, %v16957_v47  ;;  %v4976_v41 = vsub.f32 %v12522_v20, %v16958_v31 }
 0x344   : > { %v18031_v25 = vsel %vm13555_vm14, 4294967295, %v18030_v25  ;;  %v7908_v21 = vsel %vm13555_vm14, 1.0, %v17220_v57  ;;  %v2414_v29 = vsub.f32 %v12714_v45, %v16966_v19  ;;  %4954 = vmatmul.mubr.f32.gmra.mrb[40].mxu1 %v4953_v52  ;;  %2401 = vmatmul.mubr.f32.gmra.mrb[46].mxu0 %v2400_v36  ;;  %v637_v6 = vadd.s32 208, %v17869_v49  ;;  %v13591_v36 = vpop.permute.xlu1 %885 }
 0x345   : > { %18032 = vst [vmem:[#allocation297_spill] sm:$0xff] %v18031_v25  ;;  %18033 = vst [vmem:[#allocation298_spill] sm:$0xff] %v13559_v32  ;;  %v13574_v9 = vsub.f32 %v7908_v21, %v7908_v21  ;;  %v4982_v54 = vsub.f32 %v12485_v56, %v16967_v8  ;;  %vm16964_vm13 = vcmp.gt.f32.partialorder %v13437_v43, %v10273_v46  ;;  %4963 = vmatprep.mubr.f32.mxu1 %v4962_v40  ;;  %v18041_v8 = vmov 0 }
 0x346   : > { %v2409_v47 = vand.u32 4294901760, %v2408_v26  ;;  %v4977_v31 = vand.u32 4294901760, %v4976_v41  ;;  %v2415_v23 = vand.u32 4294901760, %v2414_v29  ;;  %vm967_vm2 = vcmp.gt.f32.partialorder %v13437_v43, %v10103_v58  ;;  %18035 = vst [vmem:[#allocation300_spill] sm:$0xff] %v13591_v36 }
 0x347   : > { %18034 = vst [vmem:[#allocation299_spill] sm:$0xff] %v13574_v9  ;;  %v4983_v52 = vand.u32 4294901760, %v4982_v54  ;;  %vm16965_vm0 = vcmp.lt.s32.totalorder %v637_v6, %v10504_v51  ;;  %vm1031_vm1 = vcmp.eq.f32.partialorder %v13437_v43, %v10103_v58  ;;  %v7909_v21 = vsel %vm16964_vm13, 1.0, %v17220_v57 }
 0x348   : > { %2410 = vmatprep.mubr.f32.mxu0 %v2409_v47  ;;  %vm1095_vm12 = vmand %vm1031_vm1, %vm16965_vm0  ;;  %v13595_v29 = vsub.f32 %v7909_v21, %v7909_v21  ;;  %v16970_v54 = vand.u32 4294901760, %v13468_v5  ;;  %v16971_v40 = vand.u32 4294901760, %v13447_v10  ;;  %v16972_v26 = vand.u32 4294901760, %v13515_v30  ;;  %4969 = vmatmul.mubr.f32.gmra.mrb[42].mxu1 %v4968_v2 }
 0x349   : > { %2416 = vmatmul.mubr.f32.gmra.mrb[48].mxu0 %v2415_v23  ;;  %vm13600_vm14 = vmor %vm967_vm2, %vm1095_vm12  ;;  %v18037_v41 = vmov 0  ;;  %vm1490_vm1 = vcmp.gt.f32.partialorder %v13491_v33, %v10366_v44  ;;  %vm1554_vm0 = vcmp.eq.f32.partialorder %v13491_v33, %v10366_v44  ;;  %v16985_v47 = vand.u32 4294901760, %v13488_v34  ;;  %4978 = vmatprep.mubr.f32.mxu1 %v4977_v31 }
 0x34a   : > { %18036 = vst [vmem:[#allocation301_spill] sm:$0xff] %v13595_v29  ;;  %v18038_v41 = vsel %vm13600_vm14, 4294967295, %v18037_v41  ;;  %v7910_v23 = vsel %vm13600_vm14, 1.0, %v17220_v57  ;;  %v4991_v2 = vsub.f32 %v13468_v5, %v16970_v54  ;;  %v4997_v21 = vsub.f32 %v13447_v10, %v16971_v40 }
 0x34b   : > { %18039 = vst [vmem:[#allocation302_spill] sm:$0xff] %v18038_v41  ;;  %v5006_v19 = vsub.f32 %v13515_v30, %v16972_v26  ;;  %vm18040_vm12 = vcmp.lt.s32.totalorder %v637_v6, %v10504_v51  ;;  %v13625_v31 = vsub.f32 %v7910_v23, %v7910_v23  ;;  %vm18044_vm14 = vcmp.gt.f32.partialorder %v13491_v33, %v10363_v15 }
 0x34c   : > { %vm1618_vm2 = vmand %vm1554_vm0, %vm18040_vm12  ;;  %v7973_v54 = vsel %vm18044_vm14, 1.0, %v17220_v57  ;;  %v5012_v40 = vsub.f32 %v13488_v34, %v16985_v47  ;;  %v16988_v26 = vand.u32 4294901760, %v13574_v9  ;;  %v4992_v45 = vand.u32 4294901760, %v4991_v2  ;;  %4984 = vmatmul.mubr.f32.gmra.mrb[44].mxu1 %v4983_v52  ;;  %v13649_v47 = vpop.permute.xlu1 %890 }
 0x34d   : > { %vm13627_vm13 = vmor %vm1490_vm1, %vm1618_vm2  ;;  %v4998_v6 = vand.u32 4294901760, %v4997_v21  ;;  %v5007_v30 = vand.u32 4294901760, %v5006_v19  ;;  %v13644_v5 = vsub.f32 %v7973_v54, %v7973_v54  ;;  %18047 = vst [vmem:[#allocation306_spill] sm:$0xff] %v13649_v47  ;;  %v16989_v2 = vand.u32 4294901760, %v12633_v35 }
 0x34e   : > { %v18042_v8 = vsel %vm13627_vm13, 4294967295, %v18041_v8  ;;  %v7974_v23 = vsel %vm13627_vm13, 1.0, %v17220_v57  ;;  %v5013_v56 = vand.u32 4294901760, %v5012_v40  ;;  %v2423_v20 = vsub.f32 %v13574_v9, %v16988_v26  ;;  %4993 = vmatprep.mubr.f32.mxu1 %v4992_v45 }
 0x34f   : > { %18043 = vst [vmem:[#allocation303_spill] sm:$0xff] %v18042_v8  ;;  %v13642_v10 = vsub.f32 %v7974_v23, %v7974_v23  ;;  %18046 = vst [vmem:[#allocation305_spill] sm:$0xff] %v13644_v5  ;;  %vm16997_vm14 = vcmp.gt.f32.partialorder %v13540_v18, %v10363_v15  ;;  %vm1492_vm0 = vcmp.gt.f32.partialorder %v13540_v18, %v10366_v44  ;;  %v16994_v52 = vand.u32 4294901760, %v13559_v32 }
 0x350   : > { %vm1556_vm1 = vcmp.eq.f32.partialorder %v13540_v18, %v10366_v44  ;;  %v2424_v19 = vand.u32 4294901760, %v2423_v20  ;;  %vm18048_vm12 = vcmp.lt.s32.totalorder %v17756_v1, %v10504_v51  ;;  %v7975_v45 = vsel %vm16997_vm14, 1.0, %v17220_v57  ;;  %4999 = vmatmul.mubr.f32.gmra.mrb[46].mxu1 %v4998_v6 }
 0x351   : > { %18045 = vst [vmem:[#allocation304_spill] sm:$0xff] %v13642_v10  ;;  %vm1620_vm2 = vmand %vm1556_vm1, %vm18048_vm12  ;;  %v17000_v54 = vand.u32 4294901760, %v12624_v55  ;;  %v5021_v40 = vsub.f32 %v12633_v35, %v16989_v2  ;;  %v18049_v21 = vmov 0  ;;  %v13674_v20 = vsub.f32 %v7975_v45, %v7975_v45  ;;  %5008 = vmatprep.mubr.f32.mxu1 %v5007_v30  ;;  %v13701_v30 = vpop.permute.xlu1 %1415 }
 0x352   : > { %vm13670_vm13 = vmor %vm1492_vm0, %vm1620_vm2  ;;  %v17001_v1 = vand.u32 4294901760, %v13625_v31  ;;  %2425 = vmatprep.mubr.f32.mxu0 %v2424_v19  ;;  %v2429_v2 = vsub.f32 %v13559_v32, %v16994_v52  ;;  %vm17004_vm0 = vcmp.gt.f32.partialorder %v13591_v36, %v10273_v46  ;;  %v18053_v19 = vand.u32 4294901760, %v13595_v29  ;;  %18054 = vst [vmem:[#allocation309_spill] sm:$0xff] %v13701_v30 }
 0x353   : > { %v18050_v21 = vsel %vm13670_vm13, 4294967295, %v18049_v21  ;;  %v7976_v26 = vsel %vm13670_vm13, 1.0, %v17220_v57  ;;  %v5027_v35 = vsub.f32 %v12624_v55, %v17000_v54  ;;  %v5022_v45 = vand.u32 4294901760, %v5021_v40 }
 0x354   : > { %18051 = vst [vmem:[#allocation307_spill] sm:$0xff] %v18050_v21  ;;  %v13689_v23 = vsub.f32 %v7976_v26, %v7976_v26  ;;  %v2438_v6 = vsub.f32 %v13625_v31, %v17001_v1  ;;  %v2444_v34 = vsub.f32 %v13595_v29, %v18053_v19  ;;  %v2430_v52 = vand.u32 4294901760, %v2429_v2  ;;  %5014 = vmatmul.mubr.f32.gmra.mrb[48].mxu1 %v5013_v56 }
 0x355   : > { %v5028_v32 = vand.u32 4294901760, %v5027_v35  ;;  %vm971_vm1 = vcmp.gt.f32.partialorder %v13591_v36, %v10103_v58  ;;  %vm1035_vm12 = vcmp.eq.f32.partialorder %v13591_v36, %v10103_v58  ;;  %vm18055_vm2 = vcmp.lt.s32.totalorder %v17819_v42, %v10504_v51  ;;  %5023 = vmatprep.mubr.f32.mxu1 %v5022_v45 }
 0x356   : > { %18052 = vst [vmem:[#allocation308_spill] sm:$0xff] %v13689_v23  ;;  %v2439_v26 = vand.u32 4294901760, %v2438_v6  ;;  %v2445_v40 = vand.u32 4294901760, %v2444_v34  ;;  %vm1099_vm14 = vmand %vm1035_vm12, %vm18055_vm2  ;;  %v7913_v2 = vsel %vm17004_vm0, 1.0, %v17220_v57  ;;  %v17003_v35 = vand.u32 4294901760, %v12873_v38  ;;  %2431 = vmatmul.mubr.f32.gmra.mrb[50].mxu0 %v2430_v52 }
 0x357   : > { %vm13711_vm13 = vmor %vm971_vm1, %vm1099_vm14  ;;  %v18056_v19 = vmov 0  ;;  %v13715_v54 = vsub.f32 %v7913_v2, %v7913_v2  ;;  %v17002_v34 = vand.u32 4294901760, %v12845_v48  ;;  %v17005_v42 = vand.u32 4294901760, %v13642_v10 }
 0x358   : > { %v18057_v19 = vsel %vm13711_vm13, 4294967295, %v18056_v19  ;;  %v640_v6 = vadd.s32 232, %v17869_v49  ;;  %2440 = vmatprep.mubr.f32.mxu0 %v2439_v26  ;;  %v7914_v1 = vsel %vm13711_vm13, 1.0, %v17220_v57  ;;  %v2453_v56 = vsub.f32 %v12873_v38, %v17003_v35  ;;  %5029 = vmatmul.mubr.f32.gmra.mrb[50].mxu1 %v5028_v32 }
 0x359   : > { %18058 = vst [vmem:[#allocation310_spill] sm:$0xff] %v18057_v19  ;;  %vm17008_vm14 = vcmp.gt.f32.partialorder %v13649_v47, %v10273_v46  ;;  %vm973_vm1 = vcmp.gt.f32.partialorder %v13649_v47, %v10103_v58  ;;  %v13730_v52 = vsub.f32 %v7914_v1, %v7914_v1  ;;  %v2459_v49 = vsub.f32 %v12845_v48, %v17002_v34  ;;  %v13751_v48 = vpop.permute.xlu1 %1419 }
 0x35a   : > { %v5036_v45 = vsub.f32 %v13642_v10, %v17005_v42  ;;  %vm17011_vm12 = vcmp.lt.s32.totalorder %v640_v6, %v10504_v51  ;;  %v2454_v26 = vand.u32 4294901760, %v2453_v56  ;;  %vm1037_vm2 = vcmp.eq.f32.partialorder %v13649_v47, %v10103_v58  ;;  %2446 = vmatmul.mubr.f32.gmra.mrb[52].mxu0 %v2445_v40  ;;  %18061 = vst [vmem:[#allocation313_spill] sm:$0xff] %v13751_v48 }
 0x35b   : > { %18059 = vst [vmem:[#allocation311_spill] sm:$0xff] %v13730_v52  ;;  %v7915_v1 = vsel %vm17008_vm14, 1.0, %v17220_v57  ;;  %v17012_v2 = vand.u32 4294901760, %v13644_v5  ;;  %v2460_v34 = vand.u32 4294901760, %v2459_v49  ;;  %vm1101_vm0 = vmand %vm1037_vm2, %vm17011_vm12  ;;  %v17017_v56 = vand.u32 4294901760, %v13689_v23 }
 0x35c   : > { %v5037_v35 = vand.u32 4294901760, %v5036_v45  ;;  %v13748_v42 = vsub.f32 %v7915_v1, %v7915_v1  ;;  %2455 = vmatprep.mubr.f32.mxu0 %v2454_v26  ;;  %vm13756_vm14 = vmor %vm973_vm1, %vm1101_vm0  ;;  %v18062_v38 = vmov 0  ;;  %v17027_v40 = vand.u32 4294901760, %v13674_v20 }
 0x35d   : > { %v18063_v38 = vsel %vm13756_vm14, 4294967295, %v18062_v38  ;;  %v5042_v32 = vsub.f32 %v13644_v5, %v17012_v2  ;;  %vm17031_vm2 = vcmp.gt.f32.partialorder %v13701_v30, %v10363_v15  ;;  %vm1496_vm12 = vcmp.gt.f32.partialorder %v13701_v30, %v10366_v44 }
 0x35e   : > { %18060 = vst [vmem:[#allocation312_spill] sm:$0xff] %v13748_v42  ;;  %18064 = vst [vmem:[#allocation314_spill] sm:$0xff] %v18063_v38  ;;  %5038 = vmatprep.mubr.f32.mxu1 %v5037_v35  ;;  %v7916_v49 = vsel %vm13756_vm14, 1.0, %v17220_v57  ;;  %v5051_v45 = vsub.f32 %v13689_v23, %v17017_v56  ;;  %vm1560_vm0 = vcmp.eq.f32.partialorder %v13701_v30, %v10366_v44  ;;  %v7979_v26 = vsel %vm17031_vm2, 1.0, %v17220_v57 }
 0x35f   : > { %v13780_v1 = vsub.f32 %v7916_v49, %v7916_v49  ;;  %v5043_v2 = vand.u32 4294901760, %v5042_v32  ;;  %v5057_v35 = vsub.f32 %v13674_v20, %v17027_v40  ;;  %vm18066_vm1 = vcmp.lt.s32.totalorder %v640_v6, %v10504_v51  ;;  %2461 = vmatmul.mubr.f32.gmra.mrb[54].mxu0 %v2460_v34 }
 0x360   : > { %vm1624_vm14 = vmand %vm1560_vm0, %vm18066_vm1  ;;  %v13787_v5 = vsub.f32 %v7979_v26, %v7979_v26  ;;  %v5052_v56 = vand.u32 4294901760, %v5051_v45  ;;  %v18068_v23 = vmov 0  ;;  %v17026_v29 = vand.u32 4294901760, %v13042_v16 }
 0x361   : > { %18065 = vst [vmem:[#allocation315_spill] sm:$0xff] %v13780_v1  ;;  %vm13789_vm13 = vmor %vm1496_vm12, %vm1624_vm14  ;;  %v17028_v49 = vand.u32 4294901760, %v13730_v52  ;;  %v17032_v32 = vand.u32 4294901760, %v13044_v22  ;;  %5044 = vmatmul.mubr.f32.gmra.mrb[52].mxu1 %v5043_v2  ;;  %v5058_v10 = vand.u32 4294901760, %v5057_v35  ;;  %vm17037_vm0 = vcmp.gt.f32.partialorder %v13751_v48, %v10363_v15  ;;  %v13814_v35 = vpop.permute.xlu1 %900 }
 0x362   : > { %18067 = vst [vmem:[#allocation316_spill] sm:$0xff] %v13787_v5  ;;  %v18069_v23 = vsel %vm13789_vm13, 4294967295, %v18068_v23  ;;  %v7980_v6 = vsel %vm13789_vm13, 1.0, %v17220_v57  ;;  %vm1498_vm14 = vcmp.gt.f32.partialorder %v13751_v48, %v10366_v44  ;;  %5053 = vmatprep.mubr.f32.mxu1 %v5052_v56  ;;  %v5066_v45 = vsub.f32 %v13042_v16, %v17026_v29  ;;  %18072 = vst [vmem:[#allocation319_spill] sm:$0xff] %v13814_v35 }
 0x363   : > { %18070 = vst [vmem:[#allocation317_spill] sm:$0xff] %v18069_v23  ;;  %v13803_v34 = vsub.f32 %v7980_v6, %v7980_v6  ;;  %v2468_v2 = vsub.f32 %v13730_v52, %v17028_v49  ;;  %v5072_v26 = vsub.f32 %v13044_v22, %v17032_v32  ;;  %vm1562_vm12 = vcmp.eq.f32.partialorder %v13751_v48, %v10366_v44 }
 0x364   : > { %v7981_v56 = vsel %vm17037_vm0, 1.0, %v17220_v57  ;;  %v17041_v6 = vand.u32 4294901760, %v13715_v54  ;;  %v17040_v29 = vand.u32 4294901760, %v13780_v1  ;;  %v5067_v40 = vand.u32 4294901760, %v5066_v45 }
 0x365   : > { %18071 = vst [vmem:[#allocation318_spill] sm:$0xff] %v13803_v34  ;;  %v2469_v49 = vand.u32 4294901760, %v2468_v2  ;;  %v5073_v16 = vand.u32 4294901760, %v5072_v26  ;;  %vm18073_vm1 = vcmp.lt.s32.totalorder %v12888_v50, %v10504_v51  ;;  %v13827_v32 = vsub.f32 %v7981_v56, %v7981_v56  ;;  %5059 = vmatmul.mubr.f32.gmra.mrb[54].mxu1 %v5058_v10 }
 0x366   : > { %vm1626_vm2 = vmand %vm1562_vm12, %vm18073_vm1  ;;  %v18074_v22 = vmov 0  ;;  %v2474_v45 = vsub.f32 %v13715_v54, %v17041_v6  ;;  %v2483_v2 = vsub.f32 %v13780_v1, %v17040_v29  ;;  %v17042_v50 = vand.u32 4294901760, %v13748_v42  ;;  %5068 = vmatprep.mubr.f32.mxu1 %v5067_v40 }
 0x367   : > { %vm13832_vm13 = vmor %vm1498_vm14, %vm1626_vm2  ;;  %vm17058_vm12 = vcmp.gt.f32.partialorder %v13814_v35, %v10273_v46  ;;  %2470 = vmatprep.mubr.f32.mxu0 %v2469_v49  ;;  %vm977_vm2 = vcmp.gt.f32.partialorder %v13814_v35, %v10103_v58  ;;  %vm1041_vm14 = vcmp.eq.f32.partialorder %v13814_v35, %v10103_v58  ;;  %vm18078_vm1 = vcmp.lt.s32.totalorder %v12999_v37, %v10504_v51 }
 0x368   : > { %v18075_v22 = vsel %vm13832_vm13, 4294967295, %v18074_v22  ;;  %v7982_v44 = vsel %vm13832_vm13, 1.0, %v17220_v57  ;;  %v7919_v10 = vsel %vm17058_vm12, 1.0, %v17220_v57  ;;  %v2475_v56 = vand.u32 4294901760, %v2474_v45  ;;  %vm1105_vm0 = vmand %vm1041_vm14, %vm18078_vm1 }
 0x369   : > { %18076 = vst [vmem:[#allocation320_spill] sm:$0xff] %v18075_v22  ;;  %v13856_v26 = vsub.f32 %v7982_v44, %v7982_v44  ;;  %v2484_v40 = vand.u32 4294901760, %v2483_v2  ;;  %v2489_v49 = vsub.f32 %v13748_v42, %v17042_v50  ;;  %vm13864_vm13 = vmor %vm977_vm2, %vm1105_vm0  ;;  %v18079_v29 = vmov 0  ;;  %5074 = vmatmul.mubr.f32.gmra.mrb[56].mxu1 %v5073_v16 }
 0x36a   : > { %v18080_v29 = vsel %vm13864_vm13, 4294967295, %v18079_v29  ;;  %v13868_v58 = vsub.f32 %v7919_v10, %v7919_v10  ;;  %v17044_v6 = vand.u32 4294901760, %v13055_v63  ;;  %2476 = vmatmul.mubr.f32.gmra.mrb[56].mxu0 %v2475_v56  ;;  %v7920_v51 = vsel %vm13864_vm13, 1.0, %v17220_v57 }
 0x36b   : > { %18077 = vst [vmem:[#allocation321_spill] sm:$0xff] %v13856_v26  ;;  %18081 = vst [vmem:[#allocation322_spill] sm:$0xff] %v18080_v29  ;;  %v2490_v2 = vand.u32 4294901760, %v2489_v49  ;;  %v17057_v37 = vand.u32 4294901760, %v13787_v5  ;;  %v17053_v50 = vand.u32 4294901760, %v13856_v26  ;;  %2485 = vmatprep.mubr.f32.mxu0 %v2484_v40  ;;  %v13878_v10 = vsub.f32 %v7920_v51, %v7920_v51  ;;  %v18321_v29 = vld [vmem:[#allocation104_spill] sm:$0xff] }
 0x36c   : > { %v2498_v44 = vsub.f32 %v13055_v63, %v17044_v6  ;;  %v18083_v45 = vand.u32 4294901760, %v13046_v59  ;;  %v18084_v56 = vand.u32 4294901760, %v13803_v34  ;;  %v17055_v51 = vand.u32 4294901760, %v13827_v32 }
 0x36d   : > { %18082 = vst [vmem:[#allocation323_spill] sm:$0xff] %v13878_v10  ;;  %v5087_v57 = vsub.f32 %v13787_v5, %v17057_v37  ;;  %v5096_v40 = vsub.f32 %v13856_v26, %v17053_v50  ;;  %v17054_v6 = vand.u32 4294901760, %v13141_v39 }
 0x36e   : > { %v2504_v16 = vsub.f32 %v13046_v59, %v18083_v45  ;;  %v5081_v49 = vsub.f32 %v13803_v34, %v18084_v56  ;;  %v2499_v63 = vand.u32 4294901760, %v2498_v44  ;;  %v17056_v45 = vand.u32 4294901760, %v13878_v10  ;;  %2491 = vmatmul.mubr.f32.gmra.mrb[58].mxu0 %v2490_v2 }
 0x36f   : > { %v5088_v59 = vand.u32 4294901760, %v5087_v57  ;;  %v5097_v1 = vand.u32 4294901760, %v5096_v40  ;;  %v5102_v56 = vsub.f32 %v13827_v32, %v17055_v51  ;;  %v5111_v50 = vsub.f32 %v13141_v39, %v17054_v6 }
 0x370   : > { %v5082_v42 = vand.u32 4294901760, %v5081_v49  ;;  %2500 = vmatprep.mubr.f32.mxu0 %v2499_v63  ;;  %v2513_v44 = vsub.f32 %v13878_v10, %v17056_v45  ;;  %v17059_v49 = vand.u32 4294901760, %v13062_v0  ;;  %v17060_v2 = vand.u32 4294901760, %v13868_v58 }
 0x371   : > { %v2505_v57 = vand.u32 4294901760, %v2504_v16  ;;  %v5112_v51 = vand.u32 4294901760, %v5111_v50  ;;  %v18088_v50 = vld [vmem:[#allocation19_spill] sm:$0xff] }
 0x372   : > { %5083 = vmatprep.mubr.f32.mxu1 %v5082_v42  ;;  %v2514_v40 = vand.u32 4294901760, %v2513_v44  ;;  %v2519_v63 = vsub.f32 %v13868_v58, %v17060_v2  ;;  %v5103_v42 = vand.u32 4294901760, %v5102_v56  ;;  %v5117_v6 = vsub.f32 %v13062_v0, %v17059_v49  ;;  %v18095_v44 = vld [vmem:[#allocation80_spill] sm:$0xff]  ;;  %v18106_v49 = vld [vmem:[#allocation31_spill] sm:$0xff]  ;;  %v18107_v2 = vld [vmem:[#allocation109_spill] sm:$0xff] }
 0x373   : > { %5089 = vmatmul.mubr.f32.gmra.mrb[58].mxu1 %v5088_v59  ;;  %2506 = vmatmul.mubr.f32.gmra.mrb[60].mxu0 %v2505_v57  ;;  %v17117_v59 = vmov 1.0   ;;  %vm18096_vm14 = vnez %v18095_v44  ;;  %v18097_v57 = vld [vmem:[#allocation27_spill] sm:$0xff] }
 0x374   : > { %5098 = vmatprep.mubr.f32.mxu1 %v5097_v1  ;;  %2515 = vmatprep.mubr.f32.mxu0 %v2514_v40  ;;  %v2520_v45 = vand.u32 4294901760, %v2519_v63  ;;  %v5118_v37 = vand.u32 4294901760, %v5117_v6  ;;  %v18090_v6 = vld [vmem:[#allocation94_spill] sm:$0xff]  ;;  %v18098_v40 = vld [vmem:[#allocation96_spill] sm:$0xff]  ;;  %v18100_v63 = vld [vmem:[#allocation91_spill] sm:$0xff] }
 0x375   : > { %vm18091_vm0 = vnez %v18090_v6  ;;  %vm18099_vm1 = vnez %v18098_v40  ;;  %vm18101_vm12 = vnez %v18100_v63  ;;  %v18109_v63 = vld [vmem:[#allocation112_spill] sm:$0xff]  ;;  %v18211_v44 = vld [vmem:[#allocation103_spill] sm:$0xff]  ;;  %v18213_v6 = vld [vmem:[#allocation222_spill] sm:$0xff] }
 0x376   : > { %v18366_v56 = vld [vmem:[#allocation171_spill] sm:$0xff]  ;;  %v18369_v1 = vld [vmem:[#allocation62_spill] sm:$0xff] }
 0x377   : > { %5104 = vmatmul.mubr.f32.gmra.mrb[60].mxu1 %v5103_v42  ;;  %2521 = vmatmul.mubr.f32.gmra.mrb[62].mxu0 %v2520_v45  ;;  %v18092_v45 = vmov 0.0|0.0   ;;  %v18102_v42 = vld [vmem:[#allocation97_spill] sm:$0xff]  ;;  %v18368_v16 = vld [vmem:[#allocation71_spill] sm:$0xff] }
 0x378   : > { %5113 = vmatprep.mubr.f32.mxu1 %v5112_v51  ;;  %7985 = vmatprep.mubr.msk.f32.mxu0 %vm10123_vm6, %v17117_v59  ;;  %v18364_v51 = vld [vmem:[#allocation166_spill] sm:$0xff] }
 0x37b   : > { %5119 = vmatmul.mubr.f32.gmra.mrb[62].mxu1 %v5118_v37  ;;  %7986 = vmatmul.mubr.msk.f32.vlgmr.msra.gmra.mrb[0].mxu0 %vm10345_vm11, %v17117_v59  ;;  %v18093_v37 = vld [vmem:[#allocation89_spill] sm:$0xff] }
 0x37c   : > { %8177 = vmatprep.mubr.msk.f32.mxu1 %vm10905_vm15, %v17117_v59  ;;  %8472 = vmatpush1.bf16.msra.mxu0 %v18088_v50  ;;  %vm18094_vm2 = vnez %v18093_v37  ;;  %v18212_v37 = vld [vmem:[#allocation117_spill] sm:$0xff] }
 0x37d   : > { %7987 = vmatprep.mubr.msk.f32.mxu0 %vm10698_vm8, %v17117_v59  ;;  %8473 = vmatprep.subr.bf16.mxu0 %v18092_v45 }
 0x37f   : > { %8178 = vmatmul.mubr.msk.f32.vlgmr.msra.gmra.mrb[0].mxu1 %vm18091_vm0, %v17117_v59  ;;  %7988 = vmatmul.mubr.msk.f32.gmra.mrb[2].mxu0 %vm18096_vm14, %v17117_v59 }
 0x380   : > { %8760 = vmatpush1.bf16.msra.mxu1 %v18088_v50  ;;  %8179 = vmatprep.mubr.msk.f32.mxu1 %vm18094_vm2, %v17117_v59  ;;  %vm18103_vm2 = vnez %v18102_v42  ;;  %v18104_v50 = vld [vmem:[#allocation105_spill] sm:$0xff]  ;;  %v18116_v42 = vld [vmem:[#allocation120_spill] sm:$0xff] }
 0x381   : > { %8761 = vmatprep.subr.bf16.mxu1 %v18092_v45  ;;  %8475 = vmatpush1.bf16.msra.mxu0 %v18097_v57  ;;  %vm18105_vm14 = vnez %v18104_v50  ;;  %v18113_v50 = vld [vmem:[#allocation114_spill] sm:$0xff] }
 0x382   : > { %7989 = vmatprep.mubr.msk.f32.mxu0 %vm18099_vm1, %v17117_v59  ;;  %8476 = vmatprep.subr.bf16.mxu0 %v18092_v45  ;;  %vm18108_vm1 = vnez %v18107_v2  ;;  %v18115_v2 = vld [vmem:[#allocation40_spill] sm:$0xff] }
 0x383   : > { %8180 = vmatmul.mubr.msk.f32.gmra.mrb[2].mxu1 %vm18101_vm12, %v17117_v59  ;;  %7990 = vmatmul.mubr.msk.f32.gmra.mrb[4].mxu0 %vm18105_vm14, %v17117_v59  ;;  %vm18110_vm12 = vnez %v18109_v63  ;;  %vm18114_vm14 = vnez %v18113_v50  ;;  %v18118_v63 = vld [vmem:[#allocation118_spill] sm:$0xff]  ;;  %v18122_v50 = vld [vmem:[#allocation128_spill] sm:$0xff] }
 0x384   : > { %8763 = vmatpush1.bf16.msra.mxu1 %v18097_v57  ;;  %8181 = vmatprep.mubr.msk.f32.mxu1 %vm18103_vm2, %v17117_v59  ;;  %v18111_v57 = vld [vmem:[#allocation119_spill] sm:$0xff] }
 0x385   : > { %8764 = vmatprep.subr.bf16.mxu1 %v18092_v45  ;;  %8478 = vmatpush1.bf16.msra.mxu0 %v18106_v49  ;;  %vm18112_vm2 = vnez %v18111_v57  ;;  %v18125_v57 = vld [vmem:[#allocation131_spill] sm:$0xff] }
 0x386   : > { %7991 = vmatprep.mubr.msk.f32.mxu0 %vm18108_vm1, %v17117_v59  ;;  %8479 = vmatprep.subr.bf16.mxu0 %v18092_v45  ;;  %vm18117_vm1 = vnez %v18116_v42  ;;  %v18124_v42 = vld [vmem:[#allocation47_spill] sm:$0xff] }
 0x387   : > { %8182 = vmatmul.mubr.msk.f32.gmra.mrb[4].mxu1 %vm18110_vm12, %v17117_v59  ;;  %7992 = vmatmul.mubr.msk.f32.gmra.mrb[6].mxu0 %vm18114_vm14, %v17117_v59  ;;  %vm18119_vm12 = vnez %v18118_v63  ;;  %vm18123_vm14 = vnez %v18122_v50  ;;  %v18127_v63 = vld [vmem:[#allocation130_spill] sm:$0xff] }
 0x388   : > { %8766 = vmatpush1.bf16.msra.mxu1 %v18106_v49  ;;  %8183 = vmatprep.mubr.msk.f32.mxu1 %vm18112_vm2, %v17117_v59  ;;  %v18120_v49 = vld [vmem:[#allocation127_spill] sm:$0xff]  ;;  %v18131_v50 = vld [vmem:[#allocation134_spill] sm:$0xff] }
 0x389   : > { %8767 = vmatprep.subr.bf16.mxu1 %v18092_v45  ;;  %8481 = vmatpush1.bf16.msra.mxu0 %v18115_v2  ;;  %vm18121_vm2 = vnez %v18120_v49  ;;  %v18134_v49 = vld [vmem:[#allocation135_spill] sm:$0xff] }
 0x38a   : > { %7993 = vmatprep.mubr.msk.f32.mxu0 %vm18117_vm1, %v17117_v59  ;;  %8482 = vmatprep.subr.bf16.mxu0 %v18092_v45  ;;  %vm18126_vm1 = vnez %v18125_v57  ;;  %v18133_v57 = vld [vmem:[#allocation64_spill] sm:$0xff] }
 0x38b   : > { %8184 = vmatmul.mubr.msk.f32.gmra.mrb[6].mxu1 %vm18119_vm12, %v17117_v59  ;;  %7994 = vmatmul.mubr.msk.f32.gmra.mrb[8].mxu0 %vm18123_vm14, %v17117_v59  ;;  %vm18128_vm12 = vnez %v18127_v63  ;;  %vm18132_vm14 = vnez %v18131_v50  ;;  %v18136_v63 = vld [vmem:[#allocation136_spill] sm:$0xff]  ;;  %v18140_v50 = vld [vmem:[#allocation63_spill] sm:$0xff] }
 0x38c   : > { %8769 = vmatpush1.bf16.msra.mxu1 %v18115_v2  ;;  %8185 = vmatprep.mubr.msk.f32.mxu1 %vm18121_vm2, %v17117_v59  ;;  %v18129_v2 = vld [vmem:[#allocation132_spill] sm:$0xff] }
 0x38d   : > { %8770 = vmatprep.subr.bf16.mxu1 %v18092_v45  ;;  %8484 = vmatpush1.bf16.msra.mxu0 %v18124_v42  ;;  %vm18130_vm2 = vnez %v18129_v2  ;;  %v18143_v2 = vld [vmem:[#allocation144_spill] sm:$0xff] }
 0x38e   : > { %7995 = vmatprep.mubr.msk.f32.mxu0 %vm18126_vm1, %v17117_v59  ;;  %8485 = vmatprep.subr.bf16.mxu0 %v18092_v45  ;;  %vm18135_vm1 = vnez %v18134_v49  ;;  %v18142_v49 = vld [vmem:[#allocation70_spill] sm:$0xff] }
 0x38f   : > { %8186 = vmatmul.mubr.msk.f32.gmra.mrb[8].mxu1 %vm18128_vm12, %v17117_v59  ;;  %7996 = vmatmul.mubr.msk.f32.gmra.mrb[10].mxu0 %vm18132_vm14, %v17117_v59  ;;  %vm18137_vm12 = vnez %v18136_v63  ;;  %vm18141_vm14 = vnez %v18140_v50  ;;  %v18145_v63 = vld [vmem:[#allocation53_spill] sm:$0xff]  ;;  %v18149_v50 = vld [vmem:[#allocation147_spill] sm:$0xff] }
 0x390   : > { %8772 = vmatpush1.bf16.msra.mxu1 %v18124_v42  ;;  %8187 = vmatprep.mubr.msk.f32.mxu1 %vm18130_vm2, %v17117_v59  ;;  %v18138_v42 = vld [vmem:[#allocation139_spill] sm:$0xff] }
 0x391   : > { %8773 = vmatprep.subr.bf16.mxu1 %v18092_v45  ;;  %8487 = vmatpush1.bf16.msra.mxu0 %v18133_v57  ;;  %vm18139_vm2 = vnez %v18138_v42  ;;  %v18152_v42 = vld [vmem:[#allocation155_spill] sm:$0xff] }
 0x392   : > { %7997 = vmatprep.mubr.msk.f32.mxu0 %vm18135_vm1, %v17117_v59  ;;  %8488 = vmatprep.subr.bf16.mxu0 %v18092_v45  ;;  %vm18144_vm1 = vnez %v18143_v2  ;;  %v18151_v2 = vld [vmem:[#allocation77_spill] sm:$0xff] }
 0x393   : > { %8188 = vmatmul.mubr.msk.f32.gmra.mrb[10].mxu1 %vm18137_vm12, %v17117_v59  ;;  %7998 = vmatmul.mubr.msk.f32.gmra.mrb[12].mxu0 %vm18141_vm14, %v17117_v59  ;;  %vm18146_vm12 = vnez %v18145_v63  ;;  %vm18150_vm14 = vnez %v18149_v50  ;;  %v18154_v63 = vld [vmem:[#allocation145_spill] sm:$0xff] }
 0x394   : > { %8775 = vmatpush1.bf16.msra.mxu1 %v18133_v57  ;;  %8189 = vmatprep.mubr.msk.f32.mxu1 %vm18139_vm2, %v17117_v59  ;;  %v18147_v57 = vld [vmem:[#allocation146_spill] sm:$0xff]  ;;  %v18158_v50 = vld [vmem:[#allocation153_spill] sm:$0xff] }
 0x395   : > { %8776 = vmatprep.subr.bf16.mxu1 %v18092_v45  ;;  %8490 = vmatpush1.bf16.msra.mxu0 %v18142_v49  ;;  %vm18148_vm2 = vnez %v18147_v57  ;;  %v18161_v57 = vld [vmem:[#allocation161_spill] sm:$0xff] }
 0x396   : > { %7999 = vmatprep.mubr.msk.f32.mxu0 %vm18144_vm1, %v17117_v59  ;;  %8491 = vmatprep.subr.bf16.mxu0 %v18092_v45  ;;  %vm18153_vm1 = vnez %v18152_v42  ;;  %v18160_v42 = vld [vmem:[#allocation13_spill] sm:$0xff] }
 0x397   : > { %8190 = vmatmul.mubr.msk.f32.gmra.mrb[12].mxu1 %vm18146_vm12, %v17117_v59  ;;  %8000 = vmatmul.mubr.msk.f32.gmra.mrb[14].mxu0 %vm18150_vm14, %v17117_v59  ;;  %vm18155_vm12 = vnez %v18154_v63  ;;  %vm18159_vm14 = vnez %v18158_v50  ;;  %v18163_v63 = vld [vmem:[#allocation68_spill] sm:$0xff]  ;;  %v18167_v50 = vld [vmem:[#allocation159_spill] sm:$0xff] }
 0x398   : > { %8778 = vmatpush1.bf16.msra.mxu1 %v18142_v49  ;;  %8191 = vmatprep.mubr.msk.f32.mxu1 %vm18148_vm2, %v17117_v59  ;;  %v18156_v49 = vld [vmem:[#allocation157_spill] sm:$0xff] }
 0x399   : > { %8779 = vmatprep.subr.bf16.mxu1 %v18092_v45  ;;  %8493 = vmatpush1.bf16.msra.mxu0 %v18151_v2  ;;  %vm18157_vm2 = vnez %v18156_v49  ;;  %v18170_v49 = vld [vmem:[#allocation178_spill] sm:$0xff] }
 0x39a   : > { %8001 = vmatprep.mubr.msk.f32.mxu0 %vm18153_vm1, %v17117_v59  ;;  %8494 = vmatprep.subr.bf16.mxu0 %v18092_v45  ;;  %vm18162_vm1 = vnez %v18161_v57  ;;  %v18169_v57 = vld [vmem:[#allocation24_spill] sm:$0xff] }
 0x39b   : > { %8192 = vmatmul.mubr.msk.f32.gmra.mrb[14].mxu1 %vm18155_vm12, %v17117_v59  ;;  %8002 = vmatmul.mubr.msk.f32.gmra.mrb[16].mxu0 %vm18159_vm14, %v17117_v59  ;;  %vm18164_vm12 = vnez %v18163_v63  ;;  %vm18168_vm14 = vnez %v18167_v50  ;;  %v18172_v63 = vld [vmem:[#allocation168_spill] sm:$0xff]  ;;  %v18176_v50 = vld [vmem:[#allocation175_spill] sm:$0xff] }
 0x39c   : > { %8781 = vmatpush1.bf16.msra.mxu1 %v18151_v2  ;;  %8193 = vmatprep.mubr.msk.f32.mxu1 %vm18157_vm2, %v17117_v59  ;;  %v18165_v2 = vld [vmem:[#allocation75_spill] sm:$0xff] }
 0x39d   : > { %8782 = vmatprep.subr.bf16.mxu1 %v18092_v45  ;;  %8496 = vmatpush1.bf16.msra.mxu0 %v18160_v42  ;;  %vm18166_vm2 = vnez %v18165_v2  ;;  %v18179_v2 = vld [vmem:[#allocation181_spill] sm:$0xff] }
 0x39e   : > { %8003 = vmatprep.mubr.msk.f32.mxu0 %vm18162_vm1, %v17117_v59  ;;  %8497 = vmatprep.subr.bf16.mxu0 %v18092_v45  ;;  %vm18171_vm1 = vnez %v18170_v49  ;;  %v18178_v49 = vld [vmem:[#allocation34_spill] sm:$0xff] }
 0x39f   : > { %8194 = vmatmul.mubr.msk.f32.gmra.mrb[16].mxu1 %vm18164_vm12, %v17117_v59  ;;  %8004 = vmatmul.mubr.msk.f32.gmra.mrb[18].mxu0 %vm18168_vm14, %v17117_v59  ;;  %vm18173_vm12 = vnez %v18172_v63  ;;  %vm18177_vm14 = vnez %v18176_v50  ;;  %v18181_v63 = vld [vmem:[#allocation172_spill] sm:$0xff] }
 0x3a0   : > { %8784 = vmatpush1.bf16.msra.mxu1 %v18160_v42  ;;  %8195 = vmatprep.mubr.msk.f32.mxu1 %vm18166_vm2, %v17117_v59  ;;  %v18174_v42 = vld [vmem:[#allocation163_spill] sm:$0xff]  ;;  %v18185_v50 = vld [vmem:[#allocation188_spill] sm:$0xff] }
 0x3a1   : > { %8785 = vmatprep.subr.bf16.mxu1 %v18092_v45  ;;  %8499 = vmatpush1.bf16.msra.mxu0 %v18169_v57  ;;  %vm18175_vm2 = vnez %v18174_v42  ;;  %v18188_v42 = vld [vmem:[#allocation187_spill] sm:$0xff] }
 0x3a2   : > { %8005 = vmatprep.mubr.msk.f32.mxu0 %vm18171_vm1, %v17117_v59  ;;  %8500 = vmatprep.subr.bf16.mxu0 %v18092_v45  ;;  %vm18180_vm1 = vnez %v18179_v2  ;;  %v18187_v2 = vld [vmem:[#allocation43_spill] sm:$0xff] }
 0x3a3   : > { %8196 = vmatmul.mubr.msk.f32.gmra.mrb[18].mxu1 %vm18173_vm12, %v17117_v59  ;;  %8006 = vmatmul.mubr.msk.f32.gmra.mrb[20].mxu0 %vm18177_vm14, %v17117_v59  ;;  %vm18182_vm12 = vnez %v18181_v63  ;;  %vm18186_vm14 = vnez %v18185_v50  ;;  %v18190_v63 = vld [vmem:[#allocation69_spill] sm:$0xff] }
 0x3a4   : > { %8787 = vmatpush1.bf16.msra.mxu1 %v18169_v57  ;;  %8197 = vmatprep.mubr.msk.f32.mxu1 %vm18175_vm2, %v17117_v59  ;;  %v18183_v57 = vld [vmem:[#allocation84_spill] sm:$0xff]  ;;  %v18194_v50 = vld [vmem:[#allocation189_spill] sm:$0xff] }
 0x3a5   : > { %8788 = vmatprep.subr.bf16.mxu1 %v18092_v45  ;;  %8502 = vmatpush1.bf16.msra.mxu0 %v18178_v49  ;;  %vm18184_vm2 = vnez %v18183_v57  ;;  %v18204_v57 = vld [vmem:[#allocation210_spill] sm:$0xff] }
 0x3a6   : > { %8007 = vmatprep.mubr.msk.f32.mxu0 %vm18180_vm1, %v17117_v59  ;;  %8503 = vmatprep.subr.bf16.mxu0 %v18092_v45  ;;  %vm18189_vm1 = vnez %v18188_v42  ;;  %v18196_v42 = vld [vmem:[#allocation57_spill] sm:$0xff] }
 0x3a7   : > { %8198 = vmatmul.mubr.msk.f32.gmra.mrb[20].mxu1 %vm18182_vm12, %v17117_v59  ;;  %8008 = vmatmul.mubr.msk.f32.gmra.mrb[22].mxu0 %vm18186_vm14, %v17117_v59  ;;  %vm18191_vm12 = vnez %v18190_v63  ;;  %vm18195_vm14 = vnez %v18194_v50  ;;  %v18198_v63 = vld [vmem:[#allocation208_spill] sm:$0xff]  ;;  %v18202_v50 = vld [vmem:[#allocation87_spill] sm:$0xff] }
 0x3a8   : > { %8790 = vmatpush1.bf16.msra.mxu1 %v18178_v49  ;;  %8199 = vmatprep.mubr.msk.f32.mxu1 %vm18184_vm2, %v17117_v59  ;;  %v18192_v49 = vld [vmem:[#allocation202_spill] sm:$0xff] }
 0x3a9   : > { %8791 = vmatprep.subr.bf16.mxu1 %v18092_v45  ;;  %8505 = vmatpush1.bf16.msra.mxu0 %v18187_v2  ;;  %vm18193_vm2 = vnez %v18192_v49  ;;  %v18203_v49 = vld [vmem:[#allocation85_spill] sm:$0xff] }
 0x3aa   : > { %8009 = vmatprep.mubr.msk.f32.mxu0 %vm18189_vm1, %v17117_v59  ;;  %8506 = vmatprep.subr.bf16.mxu0 %v18092_v45  ;;  %v8510_v40 = vpack.c.bf16 %v18203_v49, %v18202_v50  ;;  %v18373_v49 = vld [vmem:[#allocation76_spill] sm:$0xff]  ;;  %v18374_v50 = vld [vmem:[#allocation190_spill] sm:$0xff] }
 0x3ab   : > { %8200 = vmatmul.mubr.msk.f32.gmra.mrb[22].mxu1 %vm18191_vm12, %v17117_v59  ;;  %8010 = vmatmul.mubr.msk.f32.gmra.mrb[24].mxu0 %vm18195_vm14, %v17117_v59  ;;  %vm18199_vm12 = vnez %v18198_v63  ;;  %v18206_v63 = vld [vmem:[#allocation226_spill] sm:$0xff] }
 0x3ac   : > { %8793 = vmatpush1.bf16.msra.mxu1 %v18187_v2  ;;  %8201 = vmatprep.mubr.msk.f32.mxu1 %vm18193_vm2, %v17117_v59  ;;  %v18200_v2 = vld [vmem:[#allocation206_spill] sm:$0xff] }
 0x3ad   : > { %8794 = vmatprep.subr.bf16.mxu1 %v18092_v45  ;;  %8508 = vmatpush1.bf16.msra.mxu0 %v18196_v42  ;;  %vm18201_vm2 = vnez %v18200_v2  ;;  %v18220_v2 = vld [vmem:[#allocation113_spill] sm:$0xff] }
 0x3ae   : > { %8011 = vmatprep.mubr.msk.f32.mxu0 %vm12656_vm5, %v17117_v59  ;;  %8509 = vmatprep.subr.bf16.mxu0 %v18092_v45  ;;  %vm18205_vm5 = vnez %v18204_v57  ;;  %v8513_v57 = vpack.c.bf16 %v18212_v37, %v18211_v44  ;;  %v18370_v37 = vld [vmem:[#allocation174_spill] sm:$0xff]  ;;  %v18371_v44 = vld [vmem:[#allocation176_spill] sm:$0xff] }
 0x3af   : > { %8202 = vmatmul.mubr.msk.f32.gmra.mrb[24].mxu1 %vm18199_vm12, %v17117_v59  ;;  %8012 = vmatmul.mubr.msk.f32.gmra.mrb[26].mxu0 %vm18205_vm5, %v17117_v59  ;;  %vm18207_vm12 = vnez %v18206_v63  ;;  %vm18214_vm5 = vnez %v18213_v6  ;;  %v18218_v6 = vld [vmem:[#allocation228_spill] sm:$0xff] }
 0x3b0   : > { %8796 = vmatpush1.bf16.msra.mxu1 %v18196_v42  ;;  %8203 = vmatprep.mubr.msk.f32.mxu1 %vm18201_vm2, %v17117_v59  ;;  %v18208_v42 = vld [vmem:[#allocation95_spill] sm:$0xff]  ;;  %v18357_v63 = vld [vmem:[#allocation152_spill] sm:$0xff] }
 0x3b1   : > { %8797 = vmatprep.subr.bf16.mxu1 %v18092_v45  ;;  %8511 = vmatpush1.bf16.msra.mxu0 %v8510_v40  ;;  %vm18209_vm14 = vnez %v18208_v42  ;;  %v18215_v42 = vld [vmem:[#allocation218_spill] sm:$0xff] }
 0x3b2   : > { %8013 = vmatprep.mubr.msk.f32.mxu0 %vm18207_vm12, %v17117_v59  ;;  %8512 = vmatprep.subr.bf16.mxu0 %v18092_v45 }
 0x3b3   : > { %8204 = vmatmul.mubr.msk.f32.gmra.mrb[26].mxu1 %vm18209_vm14, %v17117_v59  ;;  %8014 = vmatmul.mubr.msk.f32.gmra.mrb[28].mxu0 %vm18214_vm5, %v17117_v59  ;;  %vm18216_vm14 = vnez %v18215_v42  ;;  %vm18219_vm5 = vnez %v18218_v6  ;;  %v18221_v42 = vld [vmem:[#allocation238_spill] sm:$0xff]  ;;  %v18354_v6 = vld [vmem:[#allocation149_spill] sm:$0xff] }
 0x3b4   : > { %8799 = vmatpush1.bf16.msra.mxu1 %v8510_v40  ;;  %8205 = vmatprep.mubr.msk.f32.mxu1 %vm12841_vm3, %v17117_v59  ;;  %vm18231_vm3 = vnez %v17960_v27  ;;  %v18238_v27 = vld [vmem:[#allocation167_spill] sm:$0xff]  ;;  %v18356_v40 = vld [vmem:[#allocation150_spill] sm:$0xff] }
 0x3b5   : > { %8800 = vmatprep.subr.bf16.mxu1 %v18092_v45  ;;  %8514 = vmatpush1.bf16.msra.mxu0 %v8513_v57 }
 0x3b6   : > { %8015 = vmatprep.mubr.msk.f32.mxu0 %vm18216_vm14, %v17117_v59  ;;  %8515 = vmatprep.subr.bf16.mxu0 %v18092_v45  ;;  %vm18222_vm14 = vnez %v18221_v42  ;;  %v18227_v42 = vld [vmem:[#allocation245_spill] sm:$0xff] }
 0x3b7   : > { %8206 = vmatmul.mubr.msk.f32.gmra.mrb[28].mxu1 %vm12895_vm4, %v17117_v59  ;;  %8016 = vmatmul.mubr.msk.f32.gmra.mrb[30].mxu0 %vm18219_vm5, %v17117_v59  ;;  %vm18223_vm4 = vnez %v17933_v4  ;;  %vm18226_vm5 = vcmp.gt.f32.partialorder %v12281_v61, %v10273_v46  ;;  %v18229_v4 = vld [vmem:[#allocation52_spill] sm:$0xff] }
 0x3b8   : > { %8802 = vmatpush1.bf16.msra.mxu1 %v8513_v57  ;;  %8207 = vmatprep.mubr.msk.f32.mxu1 %vm13157_vm9, %v17117_v59  ;;  %v18224_v57 = vld [vmem:[#allocation151_spill] sm:$0xff]  ;;  %v18234_v61 = vld [vmem:[#allocation180_spill] sm:$0xff] }
 0x3b9   : > { %8803 = vmatprep.subr.bf16.mxu1 %v18092_v45  ;;  %8517 = vmatpush1.bf16.msra.mxu0 %v18220_v2  ;;  %vm18225_vm9 = vnez %v18224_v57  ;;  %v18353_v57 = vld [vmem:[#allocation66_spill] sm:$0xff] }
 0x3ba   : > { %8017 = vmatprep.mubr.msk.f32.mxu0 %vm18222_vm14, %v17117_v59  ;;  %8518 = vmatprep.subr.bf16.mxu0 %v18092_v45  ;;  %vm18228_vm14 = vnez %v18227_v42  ;;  %v18351_v42 = vld [vmem:[#allocation143_spill] sm:$0xff] }
 0x3bb   : > { %8208 = vmatmul.mubr.msk.f32.gmra.mrb[30].mxu1 %vm18223_vm4, %v17117_v59  ;;  %8018 = vmatmul.mubr.msk.f32.gmra.mrb[32].mxu0 %vm18226_vm5, %v17117_v59  ;;  %vm18230_vm4 = vcmp.gt.f32.partialorder %v18229_v4, %v10363_v15  ;;  %vm18235_vm5 = vnez %v18234_v61  ;;  %v18347_v61 = vld [vmem:[#allocation58_spill] sm:$0xff]  ;;  %v18350_v4 = vld [vmem:[#allocation141_spill] sm:$0xff] }
 0x3bc   : > { %8805 = vmatpush1.bf16.msra.mxu1 %v18220_v2  ;;  %8209 = vmatprep.mubr.msk.f32.mxu1 %vm18225_vm9, %v17117_v59  ;;  %v18232_v2 = vld [vmem:[#allocation191_spill] sm:$0xff] }
 0x3bd   : > { %8806 = vmatprep.subr.bf16.mxu1 %v18092_v45  ;;  %8019 = vmatprep.mubr.msk.f32.mxu0 %vm18228_vm14, %v17117_v59  ;;  %vm18233_vm9 = vcmp.gt.f32.partialorder %v18232_v2, %v10273_v46  ;;  %vm18236_vm14 = vcmp.gt.f32.partialorder %v12438_v62, %v10363_v15  ;;  %v18242_v62 = vld [vmem:[#allocation170_spill] sm:$0xff]  ;;  %v18348_v2 = vld [vmem:[#allocation60_spill] sm:$0xff] }
 0x3bf   : > { %8210 = vmatmul.mubr.msk.f32.gmra.mrb[32].mxu1 %vm18230_vm4, %v17117_v59  ;;  %8020 = vmatmul.mubr.msk.f32.gmra.mrb[34].mxu0 %vm18233_vm9, %v17117_v59  ;;  %vm18237_vm4 = vnez %v17975_v60  ;;  %vm18240_vm9 = vnez %v17926_v28  ;;  %v18244_v60 = vld [vmem:[#allocation209_spill] sm:$0xff]  ;;  %v18248_v28 = vld [vmem:[#allocation158_spill] sm:$0xff] }
 0x3c0   : > { %8211 = vmatprep.mubr.msk.f32.mxu1 %vm18231_vm3, %v17117_v59  ;;  %8021 = vmatprep.mubr.msk.f32.mxu0 %vm18235_vm5, %v17117_v59  ;;  %vm18239_vm3 = vcmp.gt.f32.partialorder %v18238_v27, %v10273_v46  ;;  %vm18241_vm5 = vcmp.gt.f32.partialorder %v12510_v13, %v10363_v15  ;;  %v18246_v27 = vld [vmem:[#allocation263_spill] sm:$0xff]  ;;  %v18346_v13 = vld [vmem:[#allocation140_spill] sm:$0xff] }
 0x3c3   : > { %8212 = vmatmul.mubr.msk.f32.gmra.mrb[34].mxu1 %vm18236_vm14, %v17117_v59  ;;  %8022 = vmatmul.mubr.msk.f32.gmra.mrb[36].mxu0 %vm18239_vm3, %v17117_v59  ;;  %vm18243_vm14 = vnez %v18242_v62  ;;  %vm18247_vm3 = vnez %v18246_v27  ;;  %v18250_v62 = vld [vmem:[#allocation227_spill] sm:$0xff]  ;;  %v18345_v27 = vld [vmem:[#allocation137_spill] sm:$0xff] }
 0x3c4   : > { %8213 = vmatprep.mubr.msk.f32.mxu1 %vm18237_vm4, %v17117_v59  ;;  %8023 = vmatprep.mubr.msk.f32.mxu0 %vm18240_vm9, %v17117_v59  ;;  %vm18245_vm4 = vcmp.gt.f32.partialorder %v18244_v60, %v10273_v46  ;;  %vm18249_vm9 = vcmp.gt.f32.partialorder %v18248_v28, %v10363_v15  ;;  %v18252_v60 = vld [vmem:[#allocation183_spill] sm:$0xff] }
 0x3c5   : > { %v18255_v28 = vld [vmem:[#allocation267_spill] sm:$0xff] }
 0x3c7   : > { %8214 = vmatmul.mubr.msk.f32.gmra.mrb[36].mxu1 %vm18241_vm5, %v17117_v59  ;;  %8024 = vmatmul.mubr.msk.f32.gmra.mrb[38].mxu0 %vm18245_vm4, %v17117_v59  ;;  %vm18251_vm5 = vcmp.gt.f32.partialorder %v18250_v62, %v10273_v46  ;;  %vm18253_vm4 = vnez %v18252_v60  ;;  %v18259_v62 = vld [vmem:[#allocation276_spill] sm:$0xff] }
 0x3c8   : > { %8215 = vmatprep.mubr.msk.f32.mxu1 %vm18243_vm14, %v17117_v59  ;;  %8025 = vmatprep.mubr.msk.f32.mxu0 %vm18247_vm3, %v17117_v59  ;;  %vm18254_vm3 = vcmp.gt.f32.partialorder %v12910_v53, %v10363_v15  ;;  %v18261_v60 = vld [vmem:[#allocation244_spill] sm:$0xff]  ;;  %v18263_v53 = vld [vmem:[#allocation195_spill] sm:$0xff] }
 0x3cb   : > { %8216 = vmatmul.mubr.msk.f32.gmra.mrb[38].mxu1 %vm18249_vm9, %v17117_v59  ;;  %8026 = vmatmul.mubr.msk.f32.gmra.mrb[40].mxu0 %vm18251_vm5, %v17117_v59  ;;  %vm18256_vm9 = vnez %v18255_v28  ;;  %vm18260_vm5 = vnez %v18259_v62  ;;  %v18265_v28 = vld [vmem:[#allocation253_spill] sm:$0xff]  ;;  %v18267_v62 = vld [vmem:[#allocation186_spill] sm:$0xff] }
 0x3cc   : > { %8217 = vmatprep.mubr.msk.f32.mxu1 %vm13395_vm7, %v17117_v59  ;;  %8027 = vmatprep.mubr.msk.f32.mxu0 %vm18253_vm4, %v17117_v59  ;;  %vm18258_vm7 = vcmp.gt.f32.partialorder %v18257_v14, %v10273_v46  ;;  %vm18262_vm4 = vcmp.gt.f32.partialorder %v18261_v60, %v10363_v15  ;;  %v18269_v60 = vld [vmem:[#allocation288_spill] sm:$0xff]  ;;  %v18344_v14 = vld [vmem:[#allocation138_spill] sm:$0xff] }
 0x3cf   : > { %8218 = vmatmul.mubr.msk.f32.gmra.mrb[40].mxu1 %vm18254_vm3, %v17117_v59  ;;  %8028 = vmatmul.mubr.msk.f32.gmra.mrb[42].mxu0 %vm18258_vm7, %v17117_v59  ;;  %vm18264_vm3 = vnez %v18263_v53  ;;  %vm18268_vm7 = vcmp.gt.f32.partialorder %v18267_v62, %v10363_v15  ;;  %v18271_v53 = vld [vmem:[#allocation257_spill] sm:$0xff] }
 0x3d0   : > { %8219 = vmatprep.mubr.msk.f32.mxu1 %vm18256_vm9, %v17117_v59  ;;  %8029 = vmatprep.mubr.msk.f32.mxu0 %vm18260_vm5, %v17117_v59  ;;  %vm18266_vm9 = vcmp.gt.f32.partialorder %v18265_v28, %v10273_v46  ;;  %v18273_v28 = vld [vmem:[#allocation216_spill] sm:$0xff]  ;;  %v18277_v62 = vld [vmem:[#allocation293_spill] sm:$0xff] }
 0x3d3   : > { %8220 = vmatmul.mubr.msk.f32.gmra.mrb[42].mxu1 %vm18262_vm4, %v17117_v59  ;;  %8030 = vmatmul.mubr.msk.f32.gmra.mrb[44].mxu0 %vm18266_vm9, %v17117_v59  ;;  %vm18270_vm4 = vnez %v18269_v60  ;;  %vm18274_vm9 = vnez %v18273_v28  ;;  %v18279_v60 = vld [vmem:[#allocation82_spill] sm:$0xff]  ;;  %v18282_v28 = vld [vmem:[#allocation271_spill] sm:$0xff] }
 0x3d4   : > { %8221 = vmatprep.mubr.msk.f32.mxu1 %vm18264_vm3, %v17117_v59  ;;  %8031 = vmatprep.mubr.msk.f32.mxu0 %vm13417_vm10, %v17117_v59  ;;  %vm18272_vm3 = vcmp.gt.f32.partialorder %v18271_v53, %v10273_v46  ;;  %vm18276_vm10 = vcmp.gt.f32.partialorder %v18275_v12, %v10363_v15  ;;  %v18284_v12 = vld [vmem:[#allocation205_spill] sm:$0xff]  ;;  %v18343_v53 = vld [vmem:[#allocation44_spill] sm:$0xff] }
 0x3d7   : > { %8222 = vmatmul.mubr.msk.f32.gmra.mrb[44].mxu1 %vm18268_vm7, %v17117_v59  ;;  %8032 = vmatmul.mubr.msk.f32.gmra.mrb[46].mxu0 %vm18272_vm3, %v17117_v59  ;;  %vm18278_vm7 = vnez %v18277_v62  ;;  %vm18281_vm3 = vnez %v18031_v25  ;;  %v18288_v25 = vld [vmem:[#allocation197_spill] sm:$0xff] }
 0x3d8   : > { %8223 = vmatprep.mubr.msk.f32.mxu1 %vm18270_vm4, %v17117_v59  ;;  %8033 = vmatprep.mubr.msk.f32.mxu0 %vm18274_vm9, %v17117_v59  ;;  %vm18280_vm4 = vcmp.gt.f32.partialorder %v18279_v60, %v10273_v46  ;;  %vm18283_vm9 = vcmp.gt.f32.partialorder %v18282_v28, %v10363_v15  ;;  %v18340_v28 = vld [vmem:[#allocation125_spill] sm:$0xff] }
 0x3d9   : > { %v18341_v60 = vld [vmem:[#allocation129_spill] sm:$0xff] }
 0x3da   : > { %v18342_v62 = vld [vmem:[#allocation133_spill] sm:$0xff] }
 0x3db   : > { %8224 = vmatmul.mubr.msk.f32.gmra.mrb[46].mxu1 %vm18276_vm10, %v17117_v59  ;;  %8034 = vmatmul.mubr.msk.f32.gmra.mrb[48].mxu0 %vm18280_vm4, %v17117_v59  ;;  %vm18285_vm10 = vnez %v18284_v12  ;;  %vm18287_vm4 = vnez %v18038_v41  ;;  %v18338_v41 = vld [vmem:[#allocation37_spill] sm:$0xff]  ;;  %v18339_v12 = vld [vmem:[#allocation126_spill] sm:$0xff] }
 0x3dc   : > { %8225 = vmatprep.mubr.msk.f32.mxu1 %vm18278_vm7, %v17117_v59  ;;  %8035 = vmatprep.mubr.msk.f32.mxu0 %vm18281_vm3, %v17117_v59  ;;  %vm18286_vm7 = vcmp.gt.f32.partialorder %v13374_v11, %v10273_v46  ;;  %vm18289_vm3 = vcmp.gt.f32.partialorder %v18288_v25, %v10363_v15  ;;  %v18292_v11 = vld [vmem:[#allocation219_spill] sm:$0xff] }
 0x3dd   : > { %v18337_v25 = vld [vmem:[#allocation123_spill] sm:$0xff] }
 0x3df   : > { %8226 = vmatmul.mubr.msk.f32.gmra.mrb[48].mxu1 %vm18283_vm9, %v17117_v59  ;;  %8036 = vmatmul.mubr.msk.f32.gmra.mrb[50].mxu0 %vm18286_vm7, %v17117_v59  ;;  %vm18290_vm9 = vnez %v18042_v8  ;;  %vm18293_vm7 = vnez %v18292_v11  ;;  %v18296_v8 = vld [vmem:[#allocation214_spill] sm:$0xff]  ;;  %v18335_v11 = vld [vmem:[#allocation121_spill] sm:$0xff] }
 0x3e0   : > { %8227 = vmatprep.mubr.msk.f32.mxu1 %vm18285_vm10, %v17117_v59  ;;  %8037 = vmatprep.mubr.msk.f32.mxu0 %vm18287_vm4, %v17117_v59  ;;  %vm18291_vm10 = vcmp.gt.f32.partialorder %v13437_v43, %v10273_v46  ;;  %vm18294_vm4 = vcmp.gt.f32.partialorder %v13491_v33, %v10363_v15  ;;  %v18300_v33 = vld [vmem:[#allocation237_spill] sm:$0xff]  ;;  %v18336_v43 = vld [vmem:[#allocation124_spill] sm:$0xff] }
 0x3e3   : > { %8228 = vmatmul.mubr.msk.f32.gmra.mrb[50].mxu1 %vm18289_vm3, %v17117_v59  ;;  %8038 = vmatmul.mubr.msk.f32.gmra.mrb[52].mxu0 %vm18291_vm10, %v17117_v59  ;;  %vm18295_vm3 = vnez %v18050_v21  ;;  %vm18298_vm10 = vnez %v18057_v19  ;;  %v18304_v19 = vld [vmem:[#allocation225_spill] sm:$0xff]  ;;  %v18334_v21 = vld [vmem:[#allocation122_spill] sm:$0xff] }
 0x3e4   : > { %8229 = vmatprep.mubr.msk.f32.mxu1 %vm18290_vm9, %v17117_v59  ;;  %8039 = vmatprep.mubr.msk.f32.mxu0 %vm18293_vm7, %v17117_v59  ;;  %vm18297_vm9 = vcmp.gt.f32.partialorder %v18296_v8, %v10273_v46  ;;  %vm18299_vm7 = vcmp.gt.f32.partialorder %v13540_v18, %v10363_v15  ;;  %v18332_v18 = vld [vmem:[#allocation116_spill] sm:$0xff] }
 0x3e5   : > { %v18333_v8 = vld [vmem:[#allocation28_spill] sm:$0xff] }
 0x3e7   : > { %8230 = vmatmul.mubr.msk.f32.gmra.mrb[52].mxu1 %vm18294_vm4, %v17117_v59  ;;  %8040 = vmatmul.mubr.msk.f32.gmra.mrb[54].mxu0 %vm18297_vm9, %v17117_v59  ;;  %vm18301_vm4 = vnez %v18300_v33  ;;  %vm18303_vm9 = vnez %v18063_v38  ;;  %v18330_v38 = vld [vmem:[#allocation102_spill] sm:$0xff]  ;;  %v18331_v33 = vld [vmem:[#allocation111_spill] sm:$0xff] }
 0x3e8   : > { %8231 = vmatprep.mubr.msk.f32.mxu1 %vm18295_vm3, %v17117_v59  ;;  %8041 = vmatprep.mubr.msk.f32.mxu0 %vm18298_vm10, %v17117_v59  ;;  %vm18302_vm3 = vcmp.gt.f32.partialorder %v13591_v36, %v10273_v46  ;;  %vm18305_vm10 = vcmp.gt.f32.partialorder %v18304_v19, %v10363_v15  ;;  %v18308_v36 = vld [vmem:[#allocation242_spill] sm:$0xff]  ;;  %v18329_v19 = vld [vmem:[#allocation108_spill] sm:$0xff] }
 0x3eb   : > { %8232 = vmatmul.mubr.msk.f32.gmra.mrb[54].mxu1 %vm18299_vm7, %v17117_v59  ;;  %8042 = vmatmul.mubr.msk.f32.gmra.mrb[56].mxu0 %vm18302_vm3, %v17117_v59  ;;  %vm18306_vm7 = vnez %v18069_v23  ;;  %vm18309_vm3 = vnez %v18308_v36  ;;  %v18312_v23 = vld [vmem:[#allocation234_spill] sm:$0xff]  ;;  %v18323_v36 = vld [vmem:[#allocation17_spill] sm:$0xff] }
 0x3ec   : > { %8233 = vmatprep.mubr.msk.f32.mxu1 %vm18301_vm4, %v17117_v59  ;;  %8043 = vmatprep.mubr.msk.f32.mxu0 %vm18303_vm9, %v17117_v59  ;;  %vm18307_vm4 = vcmp.gt.f32.partialorder %v13649_v47, %v10273_v46  ;;  %vm18310_vm9 = vcmp.gt.f32.partialorder %v13701_v30, %v10363_v15  ;;  %v18315_v30 = vld [vmem:[#allocation250_spill] sm:$0xff]  ;;  %v18325_v47 = vld [vmem:[#allocation101_spill] sm:$0xff] }
 0x3ef   : > { %8234 = vmatmul.mubr.msk.f32.gmra.mrb[56].mxu1 %vm18305_vm10, %v17117_v59  ;;  %8044 = vmatmul.mubr.msk.f32.gmra.mrb[58].mxu0 %vm18307_vm4, %v17117_v59  ;;  %vm18311_vm10 = vnez %v18075_v22  ;;  %vm18314_vm4 = vcmp.gt.f32.partialorder %v13751_v48, %v10363_v15  ;;  %v18319_v22 = vld [vmem:[#allocation240_spill] sm:$0xff]  ;;  %v18322_v48 = vld [vmem:[#allocation49_spill] sm:$0xff] }
 0x3f0   : > { %8235 = vmatprep.mubr.msk.f32.mxu1 %vm18306_vm7, %v17117_v59  ;;  %8045 = vmatprep.mubr.msk.f32.mxu0 %vm18309_vm3, %v17117_v59  ;;  %vm18313_vm7 = vcmp.gt.f32.partialorder %v18312_v23, %v10273_v46  ;;  %v18318_v23 = vld [vmem:[#allocation16_spill] sm:$0xff] }
 0x3f3   : > { %8236 = vmatmul.mubr.msk.f32.gmra.mrb[58].mxu1 %vm18310_vm9, %v17117_v59  ;;  %8046 = vmatmul.mubr.msk.f32.gmra.mrb[60].mxu0 %vm18313_vm7, %v17117_v59  ;;  %vm18316_vm9 = vnez %v18315_v30  ;;  %vm18320_vm7 = vcmp.gt.f32.partialorder %v18319_v22, %v10363_v15  ;;  %v18324_v30 = vld [vmem:[#allocation93_spill] sm:$0xff]  ;;  %v18327_v22 = vld [vmem:[#allocation86_spill] sm:$0xff] }
 0x3f4   : > { %8237 = vmatprep.mubr.msk.f32.mxu1 %vm18311_vm10, %v17117_v59  ;;  %8047 = vmatprep.mubr.msk.f32.mxu0 %vm13864_vm13, %v17117_v59  ;;  %vm18317_vm10 = vcmp.gt.f32.partialorder %v13814_v35, %v10273_v46  ;;  %v18326_v35 = vld [vmem:[#allocation98_spill] sm:$0xff]  ;;  %v18352_v46 = vld [vmem:[#allocation56_spill] sm:$0xff] }
 0x3f5   : > { %v18349_v15 = vld [vmem:[#allocation142_spill] sm:$0xff] }
 0x3f7   : > { %8238 = vmatmul.mubr.msk.f32.gmra.mrb[60].mxu1 %vm18314_vm4, %v17117_v59  ;;  %8048 = vmatmul.mubr.msk.f32.gmra.mrb[62].mxu0 %vm18317_vm10, %v17117_v59 }
 0x3f8   : > { %8239 = vmatprep.mubr.msk.f32.mxu1 %vm18316_vm9, %v17117_v59  ;;  %3105 = vmatprep.mubr.f32.mxu0 %v18318_v23 }
 0x3fb   : > { %8240 = vmatmul.mubr.msk.f32.gmra.mrb[62].mxu1 %vm18320_vm7, %v17117_v59  ;;  %3108 = vmatmul.mubr.f32.vlgmr.msra.gmra.mrb[0].mxu0 %v18322_v48  ;;  %v18328_v59 = vld [vmem:[#allocation25_spill] sm:$0xff] }
 0x3fc   : > { %5703 = vmatprep.mubr.f32.mxu1 %v18321_v29  ;;  %8520 = vmatpush1.bf16.msra.mxu0 %v18323_v36 }
 0x3fd   : > { %3114 = vmatprep.mubr.f32.mxu0 %v18324_v30  ;;  %8521 = vmatprep.subr.bf16.mxu0 %v18092_v45 }
 0x3ff   : > { %5706 = vmatmul.mubr.f32.vlgmr.msra.gmra.mrb[0].mxu1 %v18325_v47  ;;  %3117 = vmatmul.mubr.f32.gmra.mrb[2].mxu0 %v18327_v22 }
 0x400   : > { %8808 = vmatpush1.bf16.msra.mxu1 %v18323_v36  ;;  %5712 = vmatprep.mubr.f32.mxu1 %v18326_v35  ;;  %v18365_v36 = vld [vmem:[#allocation165_spill] sm:$0xff] }
 0x401   : > { %8809 = vmatprep.subr.bf16.mxu1 %v18092_v45  ;;  %8523 = vmatpush1.bf16.msra.mxu0 %v18328_v59 }
 0x402   : > { %3123 = vmatprep.mubr.f32.mxu0 %v18329_v19  ;;  %8524 = vmatprep.subr.bf16.mxu0 %v18092_v45 }
 0x403   : > { %5715 = vmatmul.mubr.f32.gmra.mrb[2].mxu1 %v18330_v38  ;;  %3126 = vmatmul.mubr.f32.gmra.mrb[4].mxu0 %v18332_v18 }
 0x404   : > { %8811 = vmatpush1.bf16.msra.mxu1 %v18328_v59  ;;  %5721 = vmatprep.mubr.f32.mxu1 %v18331_v33  ;;  %v18363_v59 = vld [vmem:[#allocation55_spill] sm:$0xff] }
 0x405   : > { %8812 = vmatprep.subr.bf16.mxu1 %v18092_v45  ;;  %8526 = vmatpush1.bf16.msra.mxu0 %v18333_v8 }
 0x406   : > { %3132 = vmatprep.mubr.f32.mxu0 %v18334_v21  ;;  %8527 = vmatprep.subr.bf16.mxu0 %v18092_v45 }
 0x407   : > { %5724 = vmatmul.mubr.f32.gmra.mrb[4].mxu1 %v18335_v11  ;;  %3135 = vmatmul.mubr.f32.gmra.mrb[6].mxu0 %v18337_v25 }
 0x408   : > { %8814 = vmatpush1.bf16.msra.mxu1 %v18333_v8  ;;  %5730 = vmatprep.mubr.f32.mxu1 %v18336_v43  ;;  %v18361_v8 = vld [vmem:[#allocation162_spill] sm:$0xff] }
 0x409   : > { %8815 = vmatprep.subr.bf16.mxu1 %v18092_v45  ;;  %8529 = vmatpush1.bf16.msra.mxu0 %v18338_v41 }
 0x40a   : > { %3141 = vmatprep.mubr.f32.mxu0 %v18339_v12  ;;  %8530 = vmatprep.subr.bf16.mxu0 %v18092_v45 }
 0x40b   : > { %5733 = vmatmul.mubr.f32.gmra.mrb[6].mxu1 %v18340_v28  ;;  %3144 = vmatmul.mubr.f32.gmra.mrb[8].mxu0 %v18342_v62 }
 0x40c   : > { %8817 = vmatpush1.bf16.msra.mxu1 %v18338_v41  ;;  %5739 = vmatprep.mubr.f32.mxu1 %v18341_v60  ;;  %v18360_v41 = vld [vmem:[#allocation154_spill] sm:$0xff] }
 0x40d   : > { %8818 = vmatprep.subr.bf16.mxu1 %v18092_v45  ;;  %8532 = vmatpush1.bf16.msra.mxu0 %v18343_v53 }
 0x40e   : > { %3150 = vmatprep.mubr.f32.mxu0 %v18344_v14  ;;  %8533 = vmatprep.subr.bf16.mxu0 %v18092_v45 }
 0x40f   : > { %5742 = vmatmul.mubr.f32.gmra.mrb[8].mxu1 %v18345_v27  ;;  %3153 = vmatmul.mubr.f32.gmra.mrb[10].mxu0 %v18347_v61 }
 0x410   : > { %8820 = vmatpush1.bf16.msra.mxu1 %v18343_v53  ;;  %5748 = vmatprep.mubr.f32.mxu1 %v18346_v13  ;;  %v18359_v53 = vld [vmem:[#allocation54_spill] sm:$0xff] }
 0x411   : > { %8821 = vmatprep.subr.bf16.mxu1 %v18092_v45  ;;  %8535 = vmatpush1.bf16.msra.mxu0 %v18348_v2 }
 0x412   : > { %3159 = vmatprep.mubr.f32.mxu0 %v18349_v15  ;;  %8536 = vmatprep.subr.bf16.mxu0 %v18092_v45 }
 0x413   : > { %5751 = vmatmul.mubr.f32.gmra.mrb[10].mxu1 %v18350_v4  ;;  %3162 = vmatmul.mubr.f32.gmra.mrb[12].mxu0 %v18352_v46 }
 0x414   : > { %8823 = vmatpush1.bf16.msra.mxu1 %v18348_v2  ;;  %5757 = vmatprep.mubr.f32.mxu1 %v18351_v42  ;;  %v18358_v2 = vld [vmem:[#allocation72_spill] sm:$0xff] }
 0x415   : > { %8824 = vmatprep.subr.bf16.mxu1 %v18092_v45  ;;  %8538 = vmatpush1.bf16.msra.mxu0 %v18353_v57 }
 0x416   : > { %3168 = vmatprep.mubr.f32.mxu0 %v18354_v6  ;;  %8539 = vmatprep.subr.bf16.mxu0 %v18092_v45 }
 0x417   : > { %5760 = vmatmul.mubr.f32.gmra.mrb[12].mxu1 %v18355_v17  ;;  %3171 = vmatmul.mubr.f32.gmra.mrb[14].mxu0 %v18357_v63 }
 0x418   : > { %8826 = vmatpush1.bf16.msra.mxu1 %v18353_v57  ;;  %5766 = vmatprep.mubr.f32.mxu1 %v18356_v40  ;;  %v18362_v57 = vld [vmem:[#allocation164_spill] sm:$0xff] }
 0x419   : > { %8827 = vmatprep.subr.bf16.mxu1 %v18092_v45  ;;  %8541 = vmatpush1.bf16.msra.mxu0 %v18358_v2 }
 0x41a   : > { %3177 = vmatprep.mubr.f32.mxu0 %v18359_v53  ;;  %8542 = vmatprep.subr.bf16.mxu0 %v18092_v45 }
 0x41b   : > { %5769 = vmatmul.mubr.f32.gmra.mrb[14].mxu1 %v18360_v41  ;;  %3180 = vmatmul.mubr.f32.gmra.mrb[16].mxu0 %v18362_v57 }
 0x41c   : > { %8829 = vmatpush1.bf16.msra.mxu1 %v18358_v2  ;;  %5775 = vmatprep.mubr.f32.mxu1 %v18361_v8  ;;  %v18367_v2 = vld [vmem:[#allocation173_spill] sm:$0xff] }
 0x41d   : > { %8830 = vmatprep.subr.bf16.mxu1 %v18092_v45  ;;  %8544 = vmatpush1.bf16.msra.mxu0 %v18363_v59 }
 0x41e   : > { %3186 = vmatprep.mubr.f32.mxu0 %v18364_v51  ;;  %8545 = vmatprep.subr.bf16.mxu0 %v18092_v45  ;;  %v18413_v51 = vld [vmem:[#allocation179_spill] sm:$0xff] }
 0x41f   : > { %5778 = vmatmul.mubr.f32.gmra.mrb[16].mxu1 %v18365_v36  ;;  %3189 = vmatmul.mubr.f32.gmra.mrb[18].mxu0 %v18367_v2  ;;  %v18375_v2 = vld [vmem:[#allocation184_spill] sm:$0xff]  ;;  %v18409_v36 = vld [vmem:[#allocation279_spill] sm:$0xff] }
 0x420   : > { %8832 = vmatpush1.bf16.msra.mxu1 %v18363_v59  ;;  %5784 = vmatprep.mubr.f32.mxu1 %v18366_v56  ;;  %v18372_v59 = vld [vmem:[#allocation185_spill] sm:$0xff]  ;;  %v18406_v56 = vld [vmem:[#allocation255_spill] sm:$0xff] }
 0x421   : > { %8833 = vmatprep.subr.bf16.mxu1 %v18092_v45  ;;  %8547 = vmatpush1.bf16.msra.mxu0 %v18368_v16 }
 0x422   : > { %3195 = vmatprep.mubr.f32.mxu0 %v18369_v1  ;;  %8548 = vmatprep.subr.bf16.mxu0 %v18092_v45  ;;  %v18379_v1 = vld [vmem:[#allocation196_spill] sm:$0xff] }
 0x423   : > { %5787 = vmatmul.mubr.f32.gmra.mrb[18].mxu1 %v18370_v37  ;;  %3198 = vmatmul.mubr.f32.gmra.mrb[20].mxu0 %v18372_v59  ;;  %v18376_v37 = vld [vmem:[#allocation201_spill] sm:$0xff]  ;;  %v18380_v59 = vld [vmem:[#allocation204_spill] sm:$0xff] }
 0x424   : > { %8835 = vmatpush1.bf16.msra.mxu1 %v18368_v16  ;;  %5793 = vmatprep.mubr.f32.mxu1 %v18371_v44  ;;  %v18377_v16 = vld [vmem:[#allocation192_spill] sm:$0xff]  ;;  %v18378_v44 = vld [vmem:[#allocation78_spill] sm:$0xff] }
 0x425   : > { %8836 = vmatprep.subr.bf16.mxu1 %v18092_v45  ;;  %8550 = vmatpush1.bf16.msra.mxu0 %v18373_v49 }
 0x426   : > { %3204 = vmatprep.mubr.f32.mxu0 %v18374_v50  ;;  %8551 = vmatprep.subr.bf16.mxu0 %v18092_v45  ;;  %v18384_v50 = vld [vmem:[#allocation220_spill] sm:$0xff] }
 0x427   : > { %5796 = vmatmul.mubr.f32.gmra.mrb[20].mxu1 %v18375_v2  ;;  %3207 = vmatmul.mubr.f32.gmra.mrb[22].mxu0 %v18377_v16  ;;  %v18381_v2 = vld [vmem:[#allocation99_spill] sm:$0xff]  ;;  %v18385_v16 = vld [vmem:[#allocation212_spill] sm:$0xff] }
 0x428   : > { %8838 = vmatpush1.bf16.msra.mxu1 %v18373_v49  ;;  %5802 = vmatprep.mubr.f32.mxu1 %v18376_v37  ;;  %v18382_v49 = vld [vmem:[#allocation200_spill] sm:$0xff]  ;;  %v18383_v37 = vld [vmem:[#allocation81_spill] sm:$0xff] }
 0x429   : > { %8839 = vmatprep.subr.bf16.mxu1 %v18092_v45  ;;  %8553 = vmatpush1.bf16.msra.mxu0 %v18378_v44 }
 0x42a   : > { %3213 = vmatprep.mubr.f32.mxu0 %v18379_v1  ;;  %8554 = vmatprep.subr.bf16.mxu0 %v18092_v45  ;;  %v18389_v1 = vld [vmem:[#allocation229_spill] sm:$0xff] }
 0x42b   : > { %5805 = vmatmul.mubr.f32.gmra.mrb[22].mxu1 %v18380_v59  ;;  %3216 = vmatmul.mubr.f32.gmra.mrb[24].mxu0 %v18382_v49  ;;  %v18386_v59 = vld [vmem:[#allocation213_spill] sm:$0xff] }
 0x42c   : > { %8841 = vmatpush1.bf16.msra.mxu1 %v18378_v44  ;;  %5811 = vmatprep.mubr.f32.mxu1 %v18381_v2  ;;  %v18387_v44 = vld [vmem:[#allocation224_spill] sm:$0xff]  ;;  %v18390_v49 = vld [vmem:[#allocation221_spill] sm:$0xff] }
 0x42d   : > { %8842 = vmatprep.subr.bf16.mxu1 %v18092_v45  ;;  %8556 = vmatpush1.bf16.msra.mxu0 %v18383_v37  ;;  %v18388_v2 = vld [vmem:[#allocation92_spill] sm:$0xff] }
 0x42e   : > { %3222 = vmatprep.mubr.f32.mxu0 %v18384_v50  ;;  %8557 = vmatprep.subr.bf16.mxu0 %v18092_v45  ;;  %v18394_v50 = vld [vmem:[#allocation233_spill] sm:$0xff] }
 0x42f   : > { %5814 = vmatmul.mubr.f32.gmra.mrb[24].mxu1 %v18385_v16  ;;  %3225 = vmatmul.mubr.f32.gmra.mrb[26].mxu0 %v18387_v44  ;;  %v18391_v16 = vld [vmem:[#allocation241_spill] sm:$0xff]  ;;  %v18395_v44 = vld [vmem:[#allocation243_spill] sm:$0xff] }
 0x430   : > { %8844 = vmatpush1.bf16.msra.mxu1 %v18383_v37  ;;  %5820 = vmatprep.mubr.f32.mxu1 %v18386_v59  ;;  %v18392_v37 = vld [vmem:[#allocation232_spill] sm:$0xff]  ;;  %v18393_v59 = vld [vmem:[#allocation106_spill] sm:$0xff] }
 0x431   : > { %8845 = vmatprep.subr.bf16.mxu1 %v18092_v45  ;;  %8559 = vmatpush1.bf16.msra.mxu0 %v18388_v2 }
 0x432   : > { %3231 = vmatprep.mubr.f32.mxu0 %v18389_v1  ;;  %8560 = vmatprep.subr.bf16.mxu0 %v18092_v45  ;;  %v18399_v1 = vld [vmem:[#allocation246_spill] sm:$0xff] }
 0x433   : > { %5823 = vmatmul.mubr.f32.gmra.mrb[26].mxu1 %v18390_v49  ;;  %3234 = vmatmul.mubr.f32.gmra.mrb[28].mxu0 %v18392_v37  ;;  %v18396_v49 = vld [vmem:[#allocation264_spill] sm:$0xff]  ;;  %v18400_v37 = vld [vmem:[#allocation265_spill] sm:$0xff] }
 0x434   : > { %8847 = vmatpush1.bf16.msra.mxu1 %v18388_v2  ;;  %5829 = vmatprep.mubr.f32.mxu1 %v18391_v16  ;;  %v18397_v2 = vld [vmem:[#allocation239_spill] sm:$0xff] }
 0x435   : > { %8848 = vmatprep.subr.bf16.mxu1 %v18092_v45  ;;  %8562 = vmatpush1.bf16.msra.mxu0 %v18393_v59  ;;  %v18398_v16 = vld [vmem:[#allocation115_spill] sm:$0xff] }
 0x436   : > { %3240 = vmatprep.mubr.f32.mxu0 %v18394_v50  ;;  %8563 = vmatprep.subr.bf16.mxu0 %v18092_v45  ;;  %v18402_v50 = vld [vmem:[#allocation252_spill] sm:$0xff] }
 0x437   : > { %5832 = vmatmul.mubr.f32.gmra.mrb[28].mxu1 %v18395_v44  ;;  %3243 = vmatmul.mubr.f32.gmra.mrb[30].mxu0 %v18397_v2  ;;  %v18401_v44 = vld [vmem:[#allocation160_spill] sm:$0xff]  ;;  %v18405_v2 = vld [vmem:[#allocation273_spill] sm:$0xff] }
 0x438   : > { %8850 = vmatpush1.bf16.msra.mxu1 %v18393_v59  ;;  %5838 = vmatprep.mubr.f32.mxu1 %v18396_v49  ;;  %v18403_v59 = vld [vmem:[#allocation254_spill] sm:$0xff]  ;;  %v18404_v49 = vld [vmem:[#allocation156_spill] sm:$0xff] }
 0x439   : > { %8851 = vmatprep.subr.bf16.mxu1 %v18092_v45  ;;  %8565 = vmatpush1.bf16.msra.mxu0 %v18398_v16 }
 0x43a   : > { %3249 = vmatprep.mubr.f32.mxu0 %v18399_v1  ;;  %8566 = vmatprep.subr.bf16.mxu0 %v18092_v45  ;;  %v18407_v1 = vld [vmem:[#allocation193_spill] sm:$0xff] }
 0x43b   : > { %5841 = vmatmul.mubr.f32.gmra.mrb[30].mxu1 %v18400_v37  ;;  %3252 = vmatmul.mubr.f32.gmra.mrb[32].mxu0 %v18402_v50  ;;  %v18408_v37 = vld [vmem:[#allocation277_spill] sm:$0xff]  ;;  %v18412_v50 = vld [vmem:[#allocation284_spill] sm:$0xff] }
 0x43c   : > { %8853 = vmatpush1.bf16.msra.mxu1 %v18398_v16  ;;  %5847 = vmatprep.mubr.f32.mxu1 %v18401_v44  ;;  %v18410_v16 = vld [vmem:[#allocation182_spill] sm:$0xff]  ;;  %v18411_v44 = vld [vmem:[#allocation261_spill] sm:$0xff] }
 0x43d   : > { %8854 = vmatprep.subr.bf16.mxu1 %v18092_v45  ;;  %3258 = vmatprep.mubr.f32.mxu0 %v18403_v59  ;;  %v18414_v59 = vld [vmem:[#allocation262_spill] sm:$0xff] }
 0x43f   : > { %5850 = vmatmul.mubr.f32.gmra.mrb[32].mxu1 %v18404_v49  ;;  %3261 = vmatmul.mubr.f32.gmra.mrb[34].mxu0 %v18406_v56  ;;  %v18415_v49 = vld [vmem:[#allocation270_spill] sm:$0xff]  ;;  %v18417_v56 = vld [vmem:[#allocation289_spill] sm:$0xff] }
 0x440   : > { %5856 = vmatprep.mubr.f32.mxu1 %v18405_v2  ;;  %3267 = vmatprep.mubr.f32.mxu0 %v18407_v1  ;;  %v18416_v2 = vld [vmem:[#allocation169_spill] sm:$0xff]  ;;  %v18418_v1 = vld [vmem:[#allocation274_spill] sm:$0xff] }
 0x443   : > { %5859 = vmatmul.mubr.f32.gmra.mrb[34].mxu1 %v18408_v37  ;;  %3270 = vmatmul.mubr.f32.gmra.mrb[36].mxu0 %v18410_v16  ;;  %v18419_v37 = vld [vmem:[#allocation198_spill] sm:$0xff] }
 0x444   : > { %5865 = vmatprep.mubr.f32.mxu1 %v18409_v36  ;;  %3276 = vmatprep.mubr.f32.mxu0 %v18411_v44  ;;  %v18420_v44 = vld [vmem:[#allocation194_spill] sm:$0xff] }
 0x447   : > { %5868 = vmatmul.mubr.f32.gmra.mrb[36].mxu1 %v18412_v50  ;;  %3279 = vmatmul.mubr.f32.gmra.mrb[38].mxu0 %v18414_v59  ;;  %v18421_v50 = vld [vmem:[#allocation278_spill] sm:$0xff]  ;;  %v18422_v59 = vld [vmem:[#allocation207_spill] sm:$0xff] }
 0x448   : > { %5874 = vmatprep.mubr.f32.mxu1 %v18413_v51  ;;  %3285 = vmatprep.mubr.f32.mxu0 %v18415_v49  ;;  %v18423_v49 = vld [vmem:[#allocation275_spill] sm:$0xff] }
 0x44b   : > { %5877 = vmatmul.mubr.f32.gmra.mrb[38].mxu1 %v18416_v2  ;;  %3288 = vmatmul.mubr.f32.gmra.mrb[40].mxu0 %v18418_v1  ;;  %v18424_v2 = vld [vmem:[#allocation286_spill] sm:$0xff] }
 0x44c   : > { %5883 = vmatprep.mubr.f32.mxu1 %v18417_v56  ;;  %3294 = vmatprep.mubr.f32.mxu0 %v18419_v37  ;;  %v18425_v56 = vld [vmem:[#allocation203_spill] sm:$0xff]  ;;  %v18426_v1 = vld [vmem:[#allocation290_spill] sm:$0xff] }
 0x44d   : > { %v18427_v37 = vld [vmem:[#allocation282_spill] sm:$0xff] }
 0x44f   : > { %5886 = vmatmul.mubr.f32.gmra.mrb[40].mxu1 %v13512_v24  ;;  %3297 = vmatmul.mubr.f32.gmra.mrb[42].mxu0 %v18420_v44  ;;  %v18428_v24 = vld [vmem:[#allocation223_spill] sm:$0xff] }
 0x450   : > { %5892 = vmatprep.mubr.f32.mxu1 %v13285_v3  ;;  %3303 = vmatprep.mubr.f32.mxu0 %v18421_v50  ;;  %v18429_v3 = vld [vmem:[#allocation287_spill] sm:$0xff]  ;;  %v18431_v50 = vld [vmem:[#allocation90_spill] sm:$0xff] }
 0x451   : > { %v18430_v44 = vld [vmem:[#allocation295_spill] sm:$0xff] }
 0x453   : > { %5895 = vmatmul.mubr.f32.gmra.mrb[42].mxu1 %v13278_v7  ;;  %3306 = vmatmul.mubr.f32.gmra.mrb[44].mxu0 %v18423_v49  ;;  %v18433_v49 = vld [vmem:[#allocation215_spill] sm:$0xff] }
 0x454   : > { %5901 = vmatprep.mubr.f32.mxu1 %v18422_v59  ;;  %3312 = vmatprep.mubr.f32.mxu0 %v18424_v2  ;;  %v18432_v59 = vld [vmem:[#allocation291_spill] sm:$0xff]  ;;  %v18434_v2 = vld [vmem:[#allocation298_spill] sm:$0xff] }
 0x457   : > { %5904 = vmatmul.mubr.f32.gmra.mrb[44].mxu1 %v18425_v56  ;;  %3315 = vmatmul.mubr.f32.gmra.mrb[46].mxu0 %v18427_v37  ;;  %v18435_v37 = vld [vmem:[#allocation304_spill] sm:$0xff] }
 0x458   : > { %5910 = vmatprep.mubr.f32.mxu1 %v18426_v1  ;;  %3321 = vmatprep.mubr.f32.mxu0 %v18428_v24  ;;  %v18436_v24 = vld [vmem:[#allocation301_spill] sm:$0xff] }
 0x45b   : > { %5913 = vmatmul.mubr.f32.gmra.mrb[46].mxu1 %v18429_v3  ;;  %3324 = vmatmul.mubr.f32.gmra.mrb[48].mxu0 %v18431_v50  ;;  %v18437_v3 = vld [vmem:[#allocation8_spill] sm:$0xff] }
 0x45c   : > { %5919 = vmatprep.mubr.f32.mxu1 %v18430_v44  ;;  %3330 = vmatprep.mubr.f32.mxu0 %v13574_v9  ;;  %v18438_v44 = vld [vmem:[#allocation305_spill] sm:$0xff]  ;;  %v18439_v50 = vld [vmem:[#allocation308_spill] sm:$0xff]  ;;  %v18440_v9 = vld [vmem:[#allocation231_spill] sm:$0xff] }
 0x45f   : > { %5922 = vmatmul.mubr.f32.gmra.mrb[48].mxu1 %v18432_v59  ;;  %3333 = vmatmul.mubr.f32.gmra.mrb[50].mxu0 %v18434_v2  ;;  %v18441_v2 = vld [vmem:[#allocation247_spill] sm:$0xff] }
 0x460   : > { %5928 = vmatprep.mubr.f32.mxu1 %v18433_v49  ;;  %3339 = vmatprep.mubr.f32.mxu0 %v13625_v31 }
 0x463   : > { %5931 = vmatmul.mubr.f32.gmra.mrb[50].mxu1 %v12624_v55  ;;  %3342 = vmatmul.mubr.f32.gmra.mrb[52].mxu0 %v18436_v24  ;;  %v18442_v55 = vld [vmem:[#allocation315_spill] sm:$0xff] }
 0x464   : > { %5937 = vmatprep.mubr.f32.mxu1 %v18435_v37  ;;  %3348 = vmatprep.mubr.f32.mxu0 %v18437_v3  ;;  %v18443_v37 = vld [vmem:[#allocation248_spill] sm:$0xff] }
 0x465   : > { %v18444_v3 = vld [vmem:[#allocation312_spill] sm:$0xff] }
 0x467   : > { %5940 = vmatmul.mubr.f32.gmra.mrb[52].mxu1 %v18438_v44  ;;  %3351 = vmatmul.mubr.f32.gmra.mrb[54].mxu0 %v18440_v9  ;;  %v18445_v44 = vld [vmem:[#allocation251_spill] sm:$0xff] }
 0x468   : > { %5946 = vmatprep.mubr.f32.mxu1 %v18439_v50  ;;  %3357 = vmatprep.mubr.f32.mxu0 %v13730_v52  ;;  %v18446_v52 = vld [vmem:[#allocation249_spill] sm:$0xff] }
 0x46b   : > { %5949 = vmatmul.mubr.f32.gmra.mrb[54].mxu1 %v13674_v20  ;;  %3360 = vmatmul.mubr.f32.gmra.mrb[56].mxu0 %v13715_v54 }
 0x46c   : > { %5955 = vmatprep.mubr.f32.mxu1 %v18441_v2  ;;  %3366 = vmatprep.mubr.f32.mxu0 %v18442_v55 }
 0x46f   : > { %5958 = vmatmul.mubr.f32.gmra.mrb[56].mxu1 %v18443_v37  ;;  %3369 = vmatmul.mubr.f32.gmra.mrb[58].mxu0 %v18444_v3  ;;  %v18451_v3 = vld [vmem:[#allocation18_spill] sm:$0xff] }
 0x470   : > { %5964 = vmatprep.mubr.f32.mxu1 %v13803_v34  ;;  %3375 = vmatprep.mubr.f32.mxu0 %v18445_v44  ;;  %v18447_v34 = vand.u32 4294901760, %v18318_v23  ;;  %v18448_v44 = vand.u32 4294901760, %v18321_v29  ;;  %v18455_v23 = vand.u32 4294901760, %v18325_v47  ;;  %v18456_v29 = vand.u32 4294901760, %v18326_v35  ;;  %v18465_v35 = vld [vmem:[#allocation29_spill] sm:$0xff] }
 0x471   : > { %v18463_v47 = vand.u32 4294901760, %v18330_v38  ;;  %v18470_v38 = vand.u32 4294901760, %v18334_v21  ;;  %v18479_v21 = vand.u32 4294901760, %v18340_v28  ;;  %v18486_v28 = vand.u32 4294901760, %v18344_v14 }
 0x472   : > { %v18495_v14 = vand.u32 4294901760, %v18350_v4  ;;  %v18503_v4 = vand.u32 4294901760, %v18355_v17  ;;  %v18510_v17 = vand.u32 4294901760, %v18359_v53  ;;  %v18518_v53 = vld [vmem:[#allocation166_spill] sm:$0xff] }
 0x473   : > { %5967 = vmatmul.mubr.f32.gmra.mrb[58].mxu1 %v13787_v5  ;;  %3378 = vmatmul.mubr.f32.gmra.mrb[60].mxu0 %v18446_v52  ;;  %v18449_v5 = vld [vmem:[#allocation14_spill] sm:$0xff]  ;;  %v18452_v52 = vand.u32 4294901760, %v18451_v3 }
 0x474   : > { %5973 = vmatprep.mubr.f32.mxu1 %v13856_v26  ;;  %3384 = vmatprep.mubr.f32.mxu0 %v13878_v10  ;;  %v18450_v26 = vand.u32 4294901760, %v18449_v5  ;;  %v18453_v10 = vand.u32 4294901760, %v18322_v48  ;;  %v18457_v5 = vld [vmem:[#allocation20_spill] sm:$0xff]  ;;  %v18459_v3 = vld [vmem:[#allocation26_spill] sm:$0xff]  ;;  %v18461_v48 = vand.u32 4294901760, %v18327_v22  ;;  %v18469_v22 = vand.u32 4294901760, %v18332_v18 }
 0x475   : > { %v18477_v18 = vand.u32 4294901760, %v18337_v25  ;;  %v18485_v25 = vand.u32 4294901760, %v18342_v62  ;;  %v18493_v62 = vand.u32 4294901760, %v18347_v61  ;;  %v18501_v61 = vand.u32 4294901760, %v18352_v46 }
 0x476   : > { %v8567_v37 = vpack.c.bf16 %v18452_v52, %v18450_v26  ;;  %v18460_v52 = vand.u32 4294901760, %v18459_v3  ;;  %v18509_v46 = vand.u32 4294901760, %v18357_v63  ;;  %v18517_v63 = vand.u32 4294901760, %v18362_v57  ;;  %v18528_v57 = vld [vmem:[#allocation173_spill] sm:$0xff] }
 0x477   : > { %5976 = vmatmul.mubr.f32.gmra.mrb[60].mxu1 %v13827_v32  ;;  %3387 = vmatmul.mubr.f32.gmra.mrb[62].mxu0 %v13868_v58 }
 0x478   : > { %5982 = vmatprep.mubr.f32.mxu1 %v13141_v39  ;;  %3491 = vmatprep.mubr.f32.mxu0 %v18447_v34  ;;  %v18454_v39 = vand.u32 4294901760, %v18324_v30  ;;  %v18458_v34 = vand.u32 4294901760, %v18457_v5  ;;  %v18464_v30 = vand.u32 4294901760, %v18331_v33  ;;  %v18472_v33 = vand.u32 4294901760, %v18336_v43 }
 0x479   : > { %v18480_v43 = vand.u32 4294901760, %v18341_v60  ;;  %v18488_v60 = vand.u32 4294901760, %v18346_v13  ;;  %v18496_v13 = vand.u32 4294901760, %v18351_v42  ;;  %v18504_v42 = vand.u32 4294901760, %v18356_v40 }
 0x47a   : > { %v8570_v26 = vpack.c.bf16 %v18460_v52, %v18458_v34  ;;  %v18475_v34 = vld [vmem:[#allocation30_spill] sm:$0xff]  ;;  %v18512_v40 = vand.u32 4294901760, %v18361_v8  ;;  %v18522_v8 = vld [vmem:[#allocation171_spill] sm:$0xff] }
 0x47b   : > { %5985 = vmatmul.mubr.f32.gmra.mrb[62].mxu1 %v13062_v0  ;;  %3495 = vmatmul.mubr.f32.vlgmr.msra.gmra.mrb[0].mxu0 %v18453_v10  ;;  %v18466_v10 = vand.u32 4294901760, %v18465_v35  ;;  %v18476_v3 = vand.u32 4294901760, %v18475_v34  ;;  %v18489_v35 = vld [vmem:[#allocation61_spill] sm:$0xff] }
 0x47c   : > { %6089 = vmatprep.mubr.f32.mxu1 %v18448_v44  ;;  %8568 = vmatpush1.bf16.msra.mxu0 %v8567_v37 }
 0x47d   : > { %3502 = vmatprep.mubr.f32.mxu0 %v18454_v39  ;;  %8569 = vmatprep.subr.bf16.mxu0 %v18092_v45  ;;  %v18462_v39 = vand.u32 4294901760, %v18329_v19  ;;  %v18471_v19 = vand.u32 4294901760, %v18335_v11  ;;  %v18478_v11 = vand.u32 4294901760, %v18339_v12  ;;  %v18487_v12 = vand.u32 4294901760, %v18345_v27 }
 0x47e   : > { %v18494_v27 = vand.u32 4294901760, %v18349_v15  ;;  %v18502_v15 = vand.u32 4294901760, %v18354_v6  ;;  %v18511_v6 = vand.u32 4294901760, %v18360_v41  ;;  %v18519_v41 = vand.u32 4294901760, %v18518_v53 }
 0x47f   : > { %6093 = vmatmul.mubr.f32.vlgmr.msra.gmra.mrb[0].mxu1 %v18455_v23  ;;  %3506 = vmatmul.mubr.f32.gmra.mrb[2].mxu0 %v18461_v48 }
 0x480   : > { %8856 = vmatpush1.bf16.msra.mxu1 %v8567_v37  ;;  %6100 = vmatprep.mubr.f32.mxu1 %v18456_v29  ;;  %v18467_v37 = vld [vmem:[#allocation23_spill] sm:$0xff]  ;;  %v18473_v29 = vld [vmem:[#allocation38_spill] sm:$0xff] }
 0x481   : > { %8857 = vmatprep.subr.bf16.mxu1 %v18092_v45  ;;  %8571 = vmatpush1.bf16.msra.mxu0 %v8570_v26  ;;  %v18468_v44 = vand.u32 4294901760, %v18467_v37  ;;  %v18474_v5 = vand.u32 4294901760, %v18473_v29  ;;  %v18491_v37 = vld [vmem:[#allocation59_spill] sm:$0xff] }
 0x482   : > { %3513 = vmatprep.mubr.f32.mxu0 %v18462_v39  ;;  %8572 = vmatprep.subr.bf16.mxu0 %v18092_v45  ;;  %v18483_v39 = vld [vmem:[#allocation39_spill] sm:$0xff] }
 0x483   : > { %6104 = vmatmul.mubr.f32.gmra.mrb[2].mxu1 %v18463_v47  ;;  %v8573_v23 = vpack.c.bf16 %v18468_v44, %v18466_v10  ;;  %3517 = vmatmul.mubr.f32.gmra.mrb[4].mxu0 %v18469_v22  ;;  %v8576_v52 = vpack.c.bf16 %v18476_v3, %v18474_v5  ;;  %v18484_v47 = vand.u32 4294901760, %v18483_v39  ;;  %v18490_v10 = vand.u32 4294901760, %v18489_v35  ;;  %v18497_v22 = vld [vmem:[#allocation67_spill] sm:$0xff]  ;;  %v18505_v5 = vld [vmem:[#allocation74_spill] sm:$0xff]  ;;  %v18507_v3 = vld [vmem:[#allocation73_spill] sm:$0xff] }
 0x484   : > { %8859 = vmatpush1.bf16.msra.mxu1 %v8570_v26  ;;  %6111 = vmatprep.mubr.f32.mxu1 %v18464_v30  ;;  %v18481_v26 = vld [vmem:[#allocation45_spill] sm:$0xff]  ;;  %v18492_v44 = vand.u32 4294901760, %v18491_v37  ;;  %v18506_v34 = vand.u32 4294901760, %v18505_v5  ;;  %v18530_v37 = vld [vmem:[#allocation62_spill] sm:$0xff] }
 0x485   : > { %8860 = vmatprep.subr.bf16.mxu1 %v18092_v45  ;;  %8574 = vmatpush1.bf16.msra.mxu0 %v8573_v23  ;;  %v18482_v48 = vand.u32 4294901760, %v18481_v26  ;;  %v18520_v39 = vld [vmem:[#allocation165_spill] sm:$0xff] }
 0x486   : > { %3524 = vmatprep.mubr.f32.mxu0 %v18470_v38  ;;  %8575 = vmatprep.subr.bf16.mxu0 %v18092_v45  ;;  %v18498_v38 = vand.u32 4294901760, %v18497_v22 }
 0x487   : > { %6115 = vmatmul.mubr.f32.gmra.mrb[4].mxu1 %v18471_v19  ;;  %3528 = vmatmul.mubr.f32.gmra.mrb[6].mxu0 %v18477_v18  ;;  %v8579_v30 = vpack.c.bf16 %v18484_v47, %v18482_v48  ;;  %v18499_v19 = vld [vmem:[#allocation65_spill] sm:$0xff]  ;;  %v18521_v47 = vand.u32 4294901760, %v18520_v39 }
 0x488   : > { %8862 = vmatpush1.bf16.msra.mxu1 %v8573_v23  ;;  %6122 = vmatprep.mubr.f32.mxu1 %v18472_v33  ;;  %v8582_v23 = vpack.c.bf16 %v18492_v44, %v18490_v10  ;;  %v18500_v33 = vand.u32 4294901760, %v18499_v19  ;;  %v18529_v10 = vand.u32 4294901760, %v18528_v57  ;;  %v18531_v44 = vand.u32 4294901760, %v18530_v37 }
 0x489   : > { %8863 = vmatprep.subr.bf16.mxu1 %v18092_v45  ;;  %8577 = vmatpush1.bf16.msra.mxu0 %v8576_v52 }
 0x48a   : > { %3535 = vmatprep.mubr.f32.mxu0 %v18478_v11  ;;  %8578 = vmatprep.subr.bf16.mxu0 %v18092_v45  ;;  %v8585_v29 = vpack.c.bf16 %v18500_v33, %v18498_v38  ;;  %v18513_v11 = vld [vmem:[#allocation11_spill] sm:$0xff]  ;;  %v18538_v38 = vld [vmem:[#allocation32_spill] sm:$0xff] }
 0x48b   : > { %6126 = vmatmul.mubr.f32.gmra.mrb[6].mxu1 %v18479_v21  ;;  %3539 = vmatmul.mubr.f32.gmra.mrb[8].mxu0 %v18485_v25  ;;  %v18514_v21 = vand.u32 4294901760, %v18513_v11  ;;  %v18524_v25 = vld [vmem:[#allocation22_spill] sm:$0xff]  ;;  %v18539_v19 = vand.u32 4294901760, %v18538_v38  ;;  %v18578_v38 = vld [vmem:[#allocation229_spill] sm:$0xff] }
 0x48c   : > { %8865 = vmatpush1.bf16.msra.mxu1 %v8576_v52  ;;  %6133 = vmatprep.mubr.f32.mxu1 %v18480_v43  ;;  %v18508_v52 = vand.u32 4294901760, %v18507_v3  ;;  %v18515_v43 = vld [vmem:[#allocation12_spill] sm:$0xff] }
 0x48d   : > { %8866 = vmatprep.subr.bf16.mxu1 %v18092_v45  ;;  %8580 = vmatpush1.bf16.msra.mxu0 %v8579_v30  ;;  %v18516_v26 = vand.u32 4294901760, %v18515_v43 }
 0x48e   : > { %3546 = vmatprep.mubr.f32.mxu0 %v18486_v28  ;;  %8581 = vmatprep.subr.bf16.mxu0 %v18092_v45  ;;  %v8588_v18 = vpack.c.bf16 %v18508_v52, %v18506_v34  ;;  %v18525_v28 = vand.u32 4294901760, %v18524_v25  ;;  %v18546_v34 = vld [vmem:[#allocation201_spill] sm:$0xff]  ;;  %v18564_v25 = vld [vmem:[#allocation200_spill] sm:$0xff] }
 0x48f   : > { %6137 = vmatmul.mubr.f32.gmra.mrb[8].mxu1 %v18487_v12  ;;  %3550 = vmatmul.mubr.f32.gmra.mrb[10].mxu0 %v18493_v62  ;;  %v8591_v48 = vpack.c.bf16 %v18516_v26, %v18514_v21  ;;  %v18526_v12 = vld [vmem:[#allocation21_spill] sm:$0xff]  ;;  %v18547_v3 = vand.u32 4294901760, %v18546_v34  ;;  %v18554_v21 = vld [vmem:[#allocation196_spill] sm:$0xff] }
 0x490   : > { %8868 = vmatpush1.bf16.msra.mxu1 %v8579_v30  ;;  %6144 = vmatprep.mubr.f32.mxu1 %v18488_v60  ;;  %v18523_v30 = vand.u32 4294901760, %v18522_v8  ;;  %v18527_v60 = vand.u32 4294901760, %v18526_v12  ;;  %v18548_v52 = vld [vmem:[#allocation41_spill] sm:$0xff]  ;;  %v18555_v43 = vand.u32 4294901760, %v18554_v21  ;;  %v18556_v26 = vld [vmem:[#allocation204_spill] sm:$0xff] }
 0x491   : > { %8869 = vmatprep.subr.bf16.mxu1 %v18092_v45  ;;  %8583 = vmatpush1.bf16.msra.mxu0 %v8582_v23  ;;  %v18566_v12 = vld [vmem:[#allocation220_spill] sm:$0xff] }
 0x492   : > { %3557 = vmatprep.mubr.f32.mxu0 %v18494_v27  ;;  %8584 = vmatprep.subr.bf16.mxu0 %v18092_v45  ;;  %v8594_v35 = vpack.c.bf16 %v18527_v60, %v18525_v28  ;;  %v18534_v27 = vld [vmem:[#allocation176_spill] sm:$0xff]  ;;  %v18565_v28 = vand.u32 4294901760, %v18564_v25  ;;  %v18567_v60 = vand.u32 4294901760, %v18566_v12 }
 0x493   : > { %6148 = vmatmul.mubr.f32.gmra.mrb[10].mxu1 %v18495_v14  ;;  %3561 = vmatmul.mubr.f32.gmra.mrb[12].mxu0 %v18501_v61  ;;  %v18535_v14 = vand.u32 4294901760, %v18534_v27 }
 0x494   : > { %8871 = vmatpush1.bf16.msra.mxu1 %v8582_v23  ;;  %6155 = vmatprep.mubr.f32.mxu1 %v18496_v13  ;;  %v18532_v23 = vld [vmem:[#allocation174_spill] sm:$0xff]  ;;  %v18536_v13 = vld [vmem:[#allocation33_spill] sm:$0xff] }
 0x495   : > { %8872 = vmatprep.subr.bf16.mxu1 %v18092_v45  ;;  %8586 = vmatpush1.bf16.msra.mxu0 %v8585_v29  ;;  %v18533_v62 = vand.u32 4294901760, %v18532_v23  ;;  %v18537_v22 = vand.u32 4294901760, %v18536_v13  ;;  %v18576_v13 = vld [vmem:[#allocation224_spill] sm:$0xff] }
 0x496   : > { %3568 = vmatprep.mubr.f32.mxu0 %v18502_v15  ;;  %8587 = vmatprep.subr.bf16.mxu0 %v18092_v45  ;;  %v18542_v15 = vld [vmem:[#allocation190_spill] sm:$0xff] }
 0x497   : > { %6159 = vmatmul.mubr.f32.gmra.mrb[12].mxu1 %v18503_v4  ;;  %3572 = vmatmul.mubr.f32.gmra.mrb[14].mxu0 %v18509_v46  ;;  %v8597_v33 = vpack.c.bf16 %v18539_v19, %v18537_v22  ;;  %v18543_v4 = vand.u32 4294901760, %v18542_v15  ;;  %v18550_v46 = vld [vmem:[#allocation42_spill] sm:$0xff]  ;;  %v18577_v22 = vand.u32 4294901760, %v18576_v13  ;;  %v18579_v19 = vand.u32 4294901760, %v18578_v38  ;;  %v18618_v13 = vld [vmem:[#allocation193_spill] sm:$0xff] }
 0x498   : > { %8874 = vmatpush1.bf16.msra.mxu1 %v8585_v29  ;;  %6166 = vmatprep.mubr.f32.mxu1 %v18504_v42  ;;  %v18540_v29 = vld [vmem:[#allocation185_spill] sm:$0xff]  ;;  %v18544_v42 = vld [vmem:[#allocation184_spill] sm:$0xff] }
 0x499   : > { %8875 = vmatprep.subr.bf16.mxu1 %v18092_v45  ;;  %8589 = vmatpush1.bf16.msra.mxu0 %v8588_v18  ;;  %v18541_v61 = vand.u32 4294901760, %v18540_v29  ;;  %v18545_v5 = vand.u32 4294901760, %v18544_v42  ;;  %v18620_v38 = vld [vmem:[#allocation277_spill] sm:$0xff] }
 0x49a   : > { %3579 = vmatprep.mubr.f32.mxu0 %v18510_v17  ;;  %8590 = vmatprep.subr.bf16.mxu0 %v18092_v45  ;;  %v18551_v17 = vand.u32 4294901760, %v18550_v46  ;;  %v18590_v46 = vld [vmem:[#allocation233_spill] sm:$0xff] }
 0x49b   : > { %6170 = vmatmul.mubr.f32.gmra.mrb[14].mxu1 %v18511_v6  ;;  %3583 = vmatmul.mubr.f32.gmra.mrb[16].mxu0 %v18517_v63  ;;  %v18558_v63 = vld [vmem:[#allocation99_spill] sm:$0xff] }
 0x49c   : > { %8877 = vmatpush1.bf16.msra.mxu1 %v8588_v18  ;;  %6177 = vmatprep.mubr.f32.mxu1 %v18512_v40  ;;  %v18549_v18 = vand.u32 4294901760, %v18548_v52  ;;  %v18552_v40 = vld [vmem:[#allocation192_spill] sm:$0xff]  ;;  %v18559_v53 = vand.u32 4294901760, %v18558_v63 }
 0x49d   : > { %8878 = vmatprep.subr.bf16.mxu1 %v18092_v45  ;;  %8592 = vmatpush1.bf16.msra.mxu0 %v8591_v48  ;;  %v18553_v11 = vand.u32 4294901760, %v18552_v40  ;;  %v18588_v52 = vld [vmem:[#allocation232_spill] sm:$0xff] }
 0x49e   : > { %3590 = vmatprep.mubr.f32.mxu0 %v18519_v41  ;;  %8593 = vmatprep.subr.bf16.mxu0 %v18092_v45  ;;  %v8600_v6 = vpack.c.bf16 %v18551_v17, %v18549_v18  ;;  %v18560_v41 = vld [vmem:[#allocation50_spill] sm:$0xff]  ;;  %v18589_v18 = vand.u32 4294901760, %v18588_v52  ;;  %v18591_v17 = vand.u32 4294901760, %v18590_v46 }
 0x49f   : > { %6181 = vmatmul.mubr.f32.gmra.mrb[16].mxu1 %v18521_v47  ;;  %3594 = vmatmul.mubr.f32.gmra.mrb[18].mxu0 %v18529_v10  ;;  %v18561_v39 = vand.u32 4294901760, %v18560_v41  ;;  %v18562_v47 = vld [vmem:[#allocation51_spill] sm:$0xff]  ;;  %v18570_v10 = vld [vmem:[#allocation213_spill] sm:$0xff]  ;;  %v18631_v52 = vld [vmem:[#allocation270_spill] sm:$0xff] }
 0x4a0   : > { %8880 = vmatpush1.bf16.msra.mxu1 %v8591_v48  ;;  %6188 = vmatprep.mubr.f32.mxu1 %v18523_v30  ;;  %v18557_v48 = vand.u32 4294901760, %v18556_v26  ;;  %v18563_v8 = vand.u32 4294901760, %v18562_v47  ;;  %v18571_v37 = vand.u32 4294901760, %v18570_v10  ;;  %v18600_v41 = vld [vmem:[#allocation239_spill] sm:$0xff]  ;;  %v18602_v47 = vld [vmem:[#allocation246_spill] sm:$0xff] }
 0x4a1   : > { %8881 = vmatprep.subr.bf16.mxu1 %v18092_v45  ;;  %8595 = vmatpush1.bf16.msra.mxu0 %v8594_v35 }
 0x4a2   : > { %3601 = vmatprep.mubr.f32.mxu0 %v18531_v44  ;;  %8596 = vmatprep.subr.bf16.mxu0 %v18092_v45  ;;  %v8603_v30 = vpack.c.bf16 %v18563_v8, %v18561_v39  ;;  %v18572_v44 = vld [vmem:[#allocation87_spill] sm:$0xff]  ;;  %v18601_v39 = vand.u32 4294901760, %v18600_v41  ;;  %v18603_v8 = vand.u32 4294901760, %v18602_v47  ;;  %v18647_v41 = vld [vmem:[#allocation278_spill] sm:$0xff]  ;;  %v18649_v47 = vand.u32 4294901760, %v13278_v7 }
 0x4a3   : > { %6192 = vmatmul.mubr.f32.gmra.mrb[18].mxu1 %v18533_v62  ;;  %3605 = vmatmul.mubr.f32.gmra.mrb[20].mxu0 %v18541_v61  ;;  %v18573_v23 = vand.u32 4294901760, %v18572_v44  ;;  %v18574_v62 = vld [vmem:[#allocation85_spill] sm:$0xff]  ;;  %v18660_v7 = vld [vmem:[#allocation223_spill] sm:$0xff] }
 0x4a4   : > { %8883 = vmatpush1.bf16.msra.mxu1 %v8594_v35  ;;  %6199 = vmatprep.mubr.f32.mxu1 %v18535_v14  ;;  %v18568_v35 = vld [vmem:[#allocation212_spill] sm:$0xff]  ;;  %v18575_v27 = vand.u32 4294901760, %v18574_v62  ;;  %v18582_v61 = vld [vmem:[#allocation241_spill] sm:$0xff] }
 0x4a5   : > { %8884 = vmatprep.subr.bf16.mxu1 %v18092_v45  ;;  %8598 = vmatpush1.bf16.msra.mxu0 %v8597_v33  ;;  %v18569_v57 = vand.u32 4294901760, %v18568_v35  ;;  %v18583_v15 = vand.u32 4294901760, %v18582_v61  ;;  %v18624_v61 = vld [vmem:[#allocation261_spill] sm:$0xff] }
 0x4a6   : > { %3612 = vmatprep.mubr.f32.mxu0 %v18543_v4  ;;  %8599 = vmatprep.subr.bf16.mxu0 %v18092_v45  ;;  %v8606_v14 = vpack.c.bf16 %v18575_v27, %v18573_v23  ;;  %v18584_v4 = vld [vmem:[#allocation103_spill] sm:$0xff]  ;;  %v18614_v23 = vld [vmem:[#allocation273_spill] sm:$0xff] }
 0x4a7   : > { %6203 = vmatmul.mubr.f32.gmra.mrb[20].mxu1 %v18545_v5  ;;  %3616 = vmatmul.mubr.f32.gmra.mrb[22].mxu0 %v18553_v11  ;;  %v18585_v42 = vand.u32 4294901760, %v18584_v4  ;;  %v18586_v5 = vld [vmem:[#allocation117_spill] sm:$0xff]  ;;  %v18594_v11 = vld [vmem:[#allocation264_spill] sm:$0xff]  ;;  %v18615_v62 = vand.u32 4294901760, %v18614_v23  ;;  %v18616_v27 = vld [vmem:[#allocation255_spill] sm:$0xff] }
 0x4a8   : > { %8886 = vmatpush1.bf16.msra.mxu1 %v8597_v33  ;;  %6210 = vmatprep.mubr.f32.mxu1 %v18547_v3  ;;  %v18580_v33 = vld [vmem:[#allocation221_spill] sm:$0xff]  ;;  %v18587_v34 = vand.u32 4294901760, %v18586_v5  ;;  %v18595_v21 = vand.u32 4294901760, %v18594_v11  ;;  %v18626_v4 = vld [vmem:[#allocation284_spill] sm:$0xff]  ;;  %v18628_v5 = vand.u32 4294901760, %v18413_v51  ;;  %v18639_v11 = vld [vmem:[#allocation198_spill] sm:$0xff] }
 0x4a9   : > { %8887 = vmatprep.subr.bf16.mxu1 %v18092_v45  ;;  %8601 = vmatpush1.bf16.msra.mxu0 %v8600_v6  ;;  %v18581_v29 = vand.u32 4294901760, %v18580_v33  ;;  %v18622_v33 = vand.u32 4294901760, %v18409_v36  ;;  %v18633_v36 = vld [vmem:[#allocation169_spill] sm:$0xff]  ;;  %v18641_v51 = vld [vmem:[#allocation294_spill] sm:$0xff]  ;;  %v18662_v23 = vld [vmem:[#allocation287_spill] sm:$0xff] }
 0x4aa   : > { %3623 = vmatprep.mubr.f32.mxu0 %v18555_v43  ;;  %8602 = vmatprep.subr.bf16.mxu0 %v18092_v45  ;;  %v8609_v3 = vpack.c.bf16 %v18587_v34, %v18585_v42  ;;  %v18596_v43 = vld [vmem:[#allocation107_spill] sm:$0xff]  ;;  %v18627_v42 = vand.u32 4294901760, %v18626_v4  ;;  %v18629_v34 = vld [vmem:[#allocation262_spill] sm:$0xff]  ;;  %v18634_v46 = vand.u32 4294901760, %v18633_v36 }
 0x4ab   : > { %6214 = vmatmul.mubr.f32.gmra.mrb[22].mxu1 %v18557_v48  ;;  %3627 = vmatmul.mubr.f32.gmra.mrb[24].mxu0 %v18565_v28  ;;  %v18597_v26 = vand.u32 4294901760, %v18596_v43  ;;  %v18598_v48 = vld [vmem:[#allocation110_spill] sm:$0xff]  ;;  %v18606_v28 = vld [vmem:[#allocation160_spill] sm:$0xff]  ;;  %v18642_v43 = vand.u32 4294901760, %v18641_v51  ;;  %v18686_v36 = vld [vmem:[#allocation311_spill] sm:$0xff] }
 0x4ac   : > { %8889 = vmatpush1.bf16.msra.mxu1 %v8600_v6  ;;  %6221 = vmatprep.mubr.f32.mxu1 %v18559_v53  ;;  %v18592_v6 = vld [vmem:[#allocation243_spill] sm:$0xff]  ;;  %v18599_v63 = vand.u32 4294901760, %v18598_v48  ;;  %v18607_v12 = vand.u32 4294901760, %v18606_v28 }
 0x4ad   : > { %8890 = vmatprep.subr.bf16.mxu1 %v18092_v45  ;;  %8604 = vmatpush1.bf16.msra.mxu0 %v8603_v30  ;;  %v18593_v40 = vand.u32 4294901760, %v18592_v6  ;;  %v18637_v6 = vld [vmem:[#allocation274_spill] sm:$0xff] }
 0x4ae   : > { %3634 = vmatprep.mubr.f32.mxu0 %v18567_v60  ;;  %8605 = vmatprep.subr.bf16.mxu0 %v18092_v45  ;;  %v8612_v53 = vpack.c.bf16 %v18599_v63, %v18597_v26  ;;  %v18608_v60 = vld [vmem:[#allocation252_spill] sm:$0xff]  ;;  %v18643_v26 = vld [vmem:[#allocation269_spill] sm:$0xff]  ;;  %v18645_v63 = vld [vmem:[#allocation194_spill] sm:$0xff] }
 0x4af   : > { %6225 = vmatmul.mubr.f32.gmra.mrb[24].mxu1 %v18569_v57  ;;  %3638 = vmatmul.mubr.f32.gmra.mrb[26].mxu0 %v18577_v22  ;;  %v18609_v35 = vand.u32 4294901760, %v18608_v60  ;;  %v18610_v57 = vld [vmem:[#allocation254_spill] sm:$0xff]  ;;  %v18619_v22 = vand.u32 4294901760, %v18618_v13  ;;  %v18644_v48 = vand.u32 4294901760, %v18643_v26 }
 0x4b0   : > { %8892 = vmatpush1.bf16.msra.mxu1 %v8603_v30  ;;  %6232 = vmatprep.mubr.f32.mxu1 %v18571_v37  ;;  %v18604_v30 = vld [vmem:[#allocation265_spill] sm:$0xff]  ;;  %v18611_v10 = vand.u32 4294901760, %v18610_v57  ;;  %v18612_v37 = vld [vmem:[#allocation156_spill] sm:$0xff]  ;;  %v18657_v57 = vand.u32 4294901760, %v18426_v1  ;;  %v18666_v13 = vld [vmem:[#allocation90_spill] sm:$0xff]  ;;  %v18670_v1 = vand.u32 4294901760, %v18432_v59 }
 0x4b1   : > { %8893 = vmatprep.subr.bf16.mxu1 %v18092_v45  ;;  %8607 = vmatpush1.bf16.msra.mxu0 %v8606_v14  ;;  %v18605_v25 = vand.u32 4294901760, %v18604_v30  ;;  %v18613_v44 = vand.u32 4294901760, %v18612_v37  ;;  %v18680_v59 = vld [vmem:[#allocation8_spill] sm:$0xff] }
 0x4b2   : > { %3645 = vmatprep.mubr.f32.mxu0 %v18579_v19  ;;  %8608 = vmatprep.subr.bf16.mxu0 %v18092_v45  ;;  %v18621_v19 = vand.u32 4294901760, %v18620_v38 }
 0x4b3   : > { %6236 = vmatmul.mubr.f32.gmra.mrb[26].mxu1 %v18581_v29  ;;  %3649 = vmatmul.mubr.f32.gmra.mrb[28].mxu0 %v18589_v18  ;;  %v18623_v29 = vand.u32 4294901760, %v18410_v16  ;;  %v18632_v18 = vand.u32 4294901760, %v18631_v52  ;;  %v18635_v16 = vld [vmem:[#allocation289_spill] sm:$0xff] }
 0x4b4   : > { %8895 = vmatpush1.bf16.msra.mxu1 %v8606_v14  ;;  %6243 = vmatprep.mubr.f32.mxu1 %v18583_v15  ;;  %v18617_v14 = vand.u32 4294901760, %v18616_v27  ;;  %v18625_v15 = vand.u32 4294901760, %v18624_v61  ;;  %v18664_v27 = vld [vmem:[#allocation295_spill] sm:$0xff]  ;;  %v18674_v61 = vand.u32 4294901760, %v13625_v31  ;;  %v18685_v31 = vand.u32 4294901760, %v18440_v9  ;;  %v18694_v9 = vld [vmem:[#allocation318_spill] sm:$0xff] }
 0x4b5   : > { %8896 = vmatprep.subr.bf16.mxu1 %v18092_v45  ;;  %8610 = vmatpush1.bf16.msra.mxu0 %v8609_v3 }
 0x4b6   : > { %3656 = vmatprep.mubr.f32.mxu0 %v18591_v17  ;;  %8611 = vmatprep.subr.bf16.mxu0 %v18092_v45  ;;  %v18636_v17 = vand.u32 4294901760, %v18635_v16  ;;  %v18688_v16 = vand.u32 4294901760, %v13674_v20  ;;  %v18698_v20 = vld [vmem:[#allocation251_spill] sm:$0xff] }
 0x4b7   : > { %6247 = vmatmul.mubr.f32.gmra.mrb[28].mxu1 %v18593_v40  ;;  %3660 = vmatmul.mubr.f32.gmra.mrb[30].mxu0 %v18601_v39  ;;  %v18638_v40 = vand.u32 4294901760, %v18637_v6  ;;  %v18648_v39 = vand.u32 4294901760, %v18647_v41  ;;  %v18691_v6 = vand.u32 4294901760, %v18442_v55  ;;  %v18704_v55 = vld [vmem:[#allocation249_spill] sm:$0xff] }
 0x4b8   : > { %8898 = vmatpush1.bf16.msra.mxu1 %v8609_v3  ;;  %6254 = vmatprep.mubr.f32.mxu1 %v18595_v21  ;;  %v18630_v3 = vand.u32 4294901760, %v18629_v34  ;;  %v18640_v21 = vand.u32 4294901760, %v18639_v11  ;;  %v18679_v34 = vand.u32 4294901760, %v18436_v24  ;;  %v18689_v24 = vand.u32 4294901760, %v18441_v2  ;;  %v18700_v2 = vld [vmem:[#allocation316_spill] sm:$0xff] }
 0x4b9   : > { %8899 = vmatprep.subr.bf16.mxu1 %v18092_v45  ;;  %8613 = vmatpush1.bf16.msra.mxu0 %v8612_v53  ;;  %v18695_v11 = vand.u32 4294901760, %v18694_v9  ;;  %v18701_v26 = vand.u32 4294901760, %v18700_v2  ;;  %v18787_v9 = vld [vmem:[#allocation55_spill] sm:$0xff]  ;;  %v18797_v2 = vld [vmem:[#allocation178_spill] sm:$0xff] }
 0x4ba   : > { %3667 = vmatprep.mubr.f32.mxu0 %v18603_v8  ;;  %8614 = vmatprep.subr.bf16.mxu0 %v18092_v45  ;;  %v18650_v8 = vld [vmem:[#allocation207_spill] sm:$0xff] }
 0x4bb   : > { %6258 = vmatmul.mubr.f32.gmra.mrb[30].mxu1 %v18605_v25  ;;  %3671 = vmatmul.mubr.f32.gmra.mrb[32].mxu0 %v18609_v35  ;;  %v18651_v30 = vand.u32 4294901760, %v18650_v8  ;;  %v18652_v25 = vld [vmem:[#allocation275_spill] sm:$0xff]  ;;  %v18656_v35 = vand.u32 4294901760, %v18425_v56 }
 0x4bc   : > { %8901 = vmatpush1.bf16.msra.mxu1 %v8612_v53  ;;  %6265 = vmatprep.mubr.f32.mxu1 %v18607_v12  ;;  %v18646_v53 = vand.u32 4294901760, %v18645_v63  ;;  %v18653_v28 = vand.u32 4294901760, %v18652_v25  ;;  %v18654_v12 = vld [vmem:[#allocation286_spill] sm:$0xff]  ;;  %v18668_v56 = vld [vmem:[#allocation299_spill] sm:$0xff]  ;;  %v18705_v63 = vand.u32 4294901760, %v18704_v55  ;;  %v18712_v25 = vmov 1.0  }
 0x4bd   : > { %8902 = vmatprep.subr.bf16.mxu1 %v18092_v45  ;;  %3678 = vmatprep.mubr.f32.mxu0 %v18611_v10  ;;  %v18655_v60 = vand.u32 4294901760, %v18654_v12  ;;  %v18658_v10 = vld [vmem:[#allocation282_spill] sm:$0xff]  ;;  %v18669_v38 = vand.u32 4294901760, %v18668_v56  ;;  %v18714_v12 = vand.u32 4294901760, %v13062_v0  ;;  %v18720_v0 = vld [vmem:[#allocation89_spill] sm:$0xff]  ;;  %v18805_v55 = vld [vmem:[#allocation76_spill] sm:$0xff] }
 0x4be   : > { %v18659_v37 = vand.u32 4294901760, %v18658_v10  ;;  %vm18721_vm10 = vnez %v18720_v0  ;;  %v18722_v10 = vld [vmem:[#allocation80_spill] sm:$0xff]  ;;  %v18740_v56 = vld [vmem:[#allocation114_spill] sm:$0xff] }
 0x4bf   : > { %6269 = vmatmul.mubr.f32.gmra.mrb[32].mxu1 %v18613_v44  ;;  %3682 = vmatmul.mubr.f32.gmra.mrb[34].mxu0 %v18617_v14  ;;  %v18661_v44 = vand.u32 4294901760, %v18660_v7  ;;  %v18665_v14 = vand.u32 4294901760, %v18664_v27  ;;  %vm18723_vm4 = vnez %v18722_v10  ;;  %v18725_v7 = vld [vmem:[#allocation96_spill] sm:$0xff] }
 0x4c0   : > { %6276 = vmatprep.mubr.f32.mxu1 %v18615_v62  ;;  %3689 = vmatprep.mubr.f32.mxu0 %v18619_v22  ;;  %v18663_v62 = vand.u32 4294901760, %v18662_v23  ;;  %v18667_v22 = vand.u32 4294901760, %v18666_v13  ;;  %vm18726_vm7 = vnez %v18725_v7  ;;  %v18729_v23 = vld [vmem:[#allocation97_spill] sm:$0xff]  ;;  %v18733_v27 = vld [vmem:[#allocation28_spill] sm:$0xff] }
 0x4c1   : > { %v18736_v13 = vld [vmem:[#allocation112_spill] sm:$0xff] }
 0x4c3   : > { %6280 = vmatmul.mubr.f32.gmra.mrb[34].mxu1 %v18621_v19  ;;  %3693 = vmatmul.mubr.f32.gmra.mrb[36].mxu0 %v18623_v29  ;;  %v18671_v19 = vand.u32 4294901760, %v18433_v49  ;;  %v18682_v49 = vld [vmem:[#allocation305_spill] sm:$0xff] }
 0x4c4   : > { %6287 = vmatprep.mubr.f32.mxu1 %v18622_v33  ;;  %3700 = vmatprep.mubr.f32.mxu0 %v18625_v15  ;;  %v18672_v33 = vld [vmem:[#allocation298_spill] sm:$0xff]  ;;  %v18675_v15 = vld [vmem:[#allocation211_spill] sm:$0xff]  ;;  %v18683_v52 = vand.u32 4294901760, %v18682_v49 }
 0x4c5   : > { %v18673_v29 = vand.u32 4294901760, %v18672_v33  ;;  %v18676_v4 = vand.u32 4294901760, %v18675_v15  ;;  %v18747_v33 = vld [vmem:[#allocation127_spill] sm:$0xff] }
 0x4c6   : > { %v18752_v15 = vld [vmem:[#allocation131_spill] sm:$0xff] }
 0x4c7   : > { %6291 = vmatmul.mubr.f32.gmra.mrb[36].mxu1 %v18627_v42  ;;  %3704 = vmatmul.mubr.f32.gmra.mrb[38].mxu0 %v18630_v3  ;;  %v18677_v42 = vld [vmem:[#allocation304_spill] sm:$0xff]  ;;  %v18681_v3 = vand.u32 4294901760, %v18680_v59  ;;  %v18761_v59 = vld [vmem:[#allocation135_spill] sm:$0xff] }
 0x4c8   : > { %6298 = vmatprep.mubr.f32.mxu1 %v18628_v5  ;;  %3711 = vmatprep.mubr.f32.mxu0 %v18632_v18  ;;  %v18678_v5 = vand.u32 4294901760, %v18677_v42  ;;  %v18684_v18 = vand.u32 4294901760, %v18439_v50  ;;  %v18692_v50 = vld [vmem:[#allocation248_spill] sm:$0xff]  ;;  %v18765_v49 = vld [vmem:[#allocation139_spill] sm:$0xff] }
 0x4c9   : > { %v18756_v42 = vld [vmem:[#allocation132_spill] sm:$0xff] }
 0x4cb   : > { %6302 = vmatmul.mubr.f32.gmra.mrb[38].mxu1 %v18634_v46  ;;  %3715 = vmatmul.mubr.f32.gmra.mrb[40].mxu0 %v18638_v40  ;;  %v18687_v46 = vand.u32 4294901760, %v18686_v36  ;;  %v18693_v40 = vand.u32 4294901760, %v18692_v50  ;;  %v18772_v36 = vld [vmem:[#allocation53_spill] sm:$0xff] }
 0x4cc   : > { %6309 = vmatprep.mubr.f32.mxu1 %v18636_v17  ;;  %3722 = vmatprep.mubr.f32.mxu0 %v18640_v21  ;;  %v18690_v17 = vand.u32 4294901760, %v13715_v54  ;;  %v18696_v21 = vld [vmem:[#allocation312_spill] sm:$0xff]  ;;  %v18702_v54 = vld [vmem:[#allocation321_spill] sm:$0xff] }
 0x4cd   : > { %v18697_v51 = vand.u32 4294901760, %v18696_v21  ;;  %v18783_v50 = vld [vmem:[#allocation157_spill] sm:$0xff]  ;;  %v18790_v21 = vld [vmem:[#allocation68_spill] sm:$0xff] }
 0x4cf   : > { %6313 = vmatmul.mubr.f32.gmra.mrb[40].mxu1 %v18642_v43  ;;  %3726 = vmatmul.mubr.f32.gmra.mrb[42].mxu0 %v18646_v53  ;;  %v18699_v43 = vand.u32 4294901760, %v18698_v20  ;;  %v18706_v53 = vld [vmem:[#allocation323_spill] sm:$0xff] }
 0x4d0   : > { %6320 = vmatprep.mubr.f32.mxu1 %v18644_v48  ;;  %3733 = vmatprep.mubr.f32.mxu0 %v18648_v39  ;;  %v18703_v48 = vand.u32 4294901760, %v18702_v54  ;;  %v18707_v41 = vand.u32 4294901760, %v18706_v53  ;;  %v18708_v39 = vand.u32 4294901760, %v13827_v32  ;;  %v18794_v20 = vld [vmem:[#allocation159_spill] sm:$0xff]  ;;  %v18808_v53 = vld [vmem:[#allocation172_spill] sm:$0xff]  ;;  %v19028_v32 = vld [vmem:[#allocation230_spill] sm:$0xff] }
 0x4d1   : > { %v18801_v54 = vld [vmem:[#allocation163_spill] sm:$0xff] }
 0x4d3   : > { %6324 = vmatmul.mubr.f32.gmra.mrb[42].mxu1 %v18649_v47  ;;  %3737 = vmatmul.mubr.f32.gmra.mrb[44].mxu0 %v18653_v28  ;;  %v18709_v47 = vld [vmem:[#allocation258_spill] sm:$0xff] }
 0x4d4   : > { %6331 = vmatprep.mubr.f32.mxu1 %v18651_v30  ;;  %3744 = vmatprep.mubr.f32.mxu0 %v18655_v60  ;;  %v18710_v8 = vand.u32 4294901760, %v18709_v47  ;;  %v18711_v30 = vand.u32 4294901760, %v13868_v58  ;;  %v18814_v47 = vld [vmem:[#allocation78_spill] sm:$0xff]  ;;  %v19026_v60 = vld [vmem:[#allocation95_spill] sm:$0xff] }
 0x4d5   : > { %v19024_v28 = vld [vmem:[#allocation226_spill] sm:$0xff] }
 0x4d6   : > { %v19030_v58 = vld [vmem:[#allocation222_spill] sm:$0xff] }
 0x4d7   : > { %6335 = vmatmul.mubr.f32.gmra.mrb[44].mxu1 %v18656_v35  ;;  %3748 = vmatmul.mubr.f32.gmra.mrb[46].mxu0 %v18659_v37  ;;  %v18717_v35 = vld [vmem:[#allocation17_spill] sm:$0xff] }
 0x4d8   : > { %6342 = vmatprep.mubr.f32.mxu1 %v18657_v57  ;;  %3755 = vmatprep.mubr.f32.mxu0 %v18661_v44  ;;  %v18719_v57 = vld [vmem:[#allocation94_spill] sm:$0xff]  ;;  %v18724_v37 = vld [vmem:[#allocation25_spill] sm:$0xff]  ;;  %v18727_v44 = vld [vmem:[#allocation91_spill] sm:$0xff] }
 0x4db   : > { %6346 = vmatmul.mubr.f32.gmra.mrb[46].mxu1 %v18663_v62  ;;  %3759 = vmatmul.mubr.f32.gmra.mrb[48].mxu0 %v18667_v22  ;;  %v18731_v62 = vld [vmem:[#allocation105_spill] sm:$0xff]  ;;  %v18738_v22 = vld [vmem:[#allocation119_spill] sm:$0xff] }
 0x4dc   : > { %6353 = vmatprep.mubr.f32.mxu1 %v18665_v14  ;;  %3766 = vmatprep.mubr.f32.mxu0 %v18669_v38  ;;  %v18734_v14 = vld [vmem:[#allocation109_spill] sm:$0xff] }
 0x4dd   : > { %v18742_v38 = vld [vmem:[#allocation37_spill] sm:$0xff] }
 0x4df   : > { %6357 = vmatmul.mubr.f32.gmra.mrb[48].mxu1 %v18670_v1  ;;  %3770 = vmatmul.mubr.f32.gmra.mrb[50].mxu0 %v18673_v29  ;;  %v18743_v1 = vld [vmem:[#allocation120_spill] sm:$0xff] }
 0x4e0   : > { %6364 = vmatprep.mubr.f32.mxu1 %v18671_v19  ;;  %3777 = vmatprep.mubr.f32.mxu0 %v18674_v61  ;;  %v18745_v19 = vld [vmem:[#allocation118_spill] sm:$0xff]  ;;  %v18749_v29 = vld [vmem:[#allocation128_spill] sm:$0xff] }
 0x4e1   : > { %v18751_v61 = vld [vmem:[#allocation44_spill] sm:$0xff] }
 0x4e3   : > { %6368 = vmatmul.mubr.f32.gmra.mrb[50].mxu1 %v18676_v4  ;;  %3781 = vmatmul.mubr.f32.gmra.mrb[52].mxu0 %v18679_v34  ;;  %v18754_v4 = vld [vmem:[#allocation130_spill] sm:$0xff]  ;;  %v18760_v34 = vld [vmem:[#allocation60_spill] sm:$0xff] }
 0x4e4   : > { %6375 = vmatprep.mubr.f32.mxu1 %v18678_v5  ;;  %3788 = vmatprep.mubr.f32.mxu0 %v18681_v3  ;;  %v18758_v5 = vld [vmem:[#allocation134_spill] sm:$0xff]  ;;  %v18763_v3 = vld [vmem:[#allocation136_spill] sm:$0xff] }
 0x4e7   : > { %6379 = vmatmul.mubr.f32.gmra.mrb[52].mxu1 %v18683_v52  ;;  %3792 = vmatmul.mubr.f32.gmra.mrb[54].mxu0 %v18685_v31  ;;  %v18767_v52 = vld [vmem:[#allocation63_spill] sm:$0xff]  ;;  %v18770_v31 = vld [vmem:[#allocation144_spill] sm:$0xff] }
 0x4e8   : > { %6386 = vmatprep.mubr.f32.mxu1 %v18684_v18  ;;  %3799 = vmatprep.mubr.f32.mxu0 %v18687_v46  ;;  %v18769_v18 = vld [vmem:[#allocation66_spill] sm:$0xff] }
 0x4e9   : > { %v18774_v46 = vld [vmem:[#allocation146_spill] sm:$0xff] }
 0x4eb   : > { %6390 = vmatmul.mubr.f32.gmra.mrb[54].mxu1 %v18688_v16  ;;  %3803 = vmatmul.mubr.f32.gmra.mrb[56].mxu0 %v18690_v17  ;;  %v18776_v16 = vld [vmem:[#allocation147_spill] sm:$0xff] }
 0x4ec   : > { %6397 = vmatprep.mubr.f32.mxu1 %v18689_v24  ;;  %3810 = vmatprep.mubr.f32.mxu0 %v18691_v6  ;;  %v18778_v24 = vld [vmem:[#allocation72_spill] sm:$0xff]  ;;  %v18779_v17 = vld [vmem:[#allocation155_spill] sm:$0xff]  ;;  %v18781_v6 = vld [vmem:[#allocation145_spill] sm:$0xff] }
 0x4ef   : > { %6401 = vmatmul.mubr.f32.gmra.mrb[56].mxu1 %v18693_v40  ;;  %3814 = vmatmul.mubr.f32.gmra.mrb[58].mxu0 %v18697_v51  ;;  %v18785_v40 = vld [vmem:[#allocation153_spill] sm:$0xff]  ;;  %v18792_v51 = vld [vmem:[#allocation75_spill] sm:$0xff] }
 0x4f0   : > { %6408 = vmatprep.mubr.f32.mxu1 %v18695_v11  ;;  %3821 = vmatprep.mubr.f32.mxu0 %v18699_v43  ;;  %v18788_v11 = vld [vmem:[#allocation161_spill] sm:$0xff]  ;;  %v18796_v43 = vld [vmem:[#allocation71_spill] sm:$0xff] }
 0x4f3   : > { %6412 = vmatmul.mubr.f32.gmra.mrb[58].mxu1 %v18701_v26  ;;  %3825 = vmatmul.mubr.f32.gmra.mrb[60].mxu0 %v18705_v63  ;;  %v18799_v26 = vld [vmem:[#allocation168_spill] sm:$0xff]  ;;  %v18806_v63 = vld [vmem:[#allocation181_spill] sm:$0xff] }
 0x4f4   : > { %6419 = vmatprep.mubr.f32.mxu1 %v18703_v48  ;;  %3832 = vmatprep.mubr.f32.mxu0 %v18707_v41  ;;  %v18803_v48 = vld [vmem:[#allocation175_spill] sm:$0xff]  ;;  %v18810_v41 = vld [vmem:[#allocation84_spill] sm:$0xff] }
 0x4f7   : > { %6423 = vmatmul.mubr.f32.gmra.mrb[60].mxu1 %v18708_v39  ;;  %3836 = vmatmul.mubr.f32.gmra.mrb[62].mxu0 %v18711_v30  ;;  %v18812_v39 = vld [vmem:[#allocation188_spill] sm:$0xff]  ;;  %v18816_v30 = vld [vmem:[#allocation69_spill] sm:$0xff] }
 0x4f8   : > { %6430 = vmatprep.mubr.f32.mxu1 %v18710_v8  ;;  %8049 = vmatprep.mubr.msk.f32.mxu0 %vm10123_vm6, %v18712_v25  ;;  %v18815_v8 = vld [vmem:[#allocation187_spill] sm:$0xff] }
 0x4fb   : > { %6434 = vmatmul.mubr.f32.gmra.mrb[62].mxu1 %v18714_v12  ;;  %8050 = vmatmul.mubr.msk.f32.vlgmr.msra.gmra.mrb[0].mxu0 %vm10345_vm11, %v18712_v25  ;;  %v18818_v12 = vld [vmem:[#allocation202_spill] sm:$0xff] }
 0x4fc   : > { %8241 = vmatprep.mubr.msk.f32.mxu1 %vm10905_vm15, %v18712_v25  ;;  %8616 = vmatpush1.bf16.msra.mxu0 %v18717_v35 }
 0x4fd   : > { %8051 = vmatprep.mubr.msk.f32.mxu0 %vm10698_vm8, %v18712_v25  ;;  %8617 = vmatprep.subr.bf16.mxu0 %v18092_v45 }
 0x4ff   : > { %8242 = vmatmul.mubr.msk.f32.vlgmr.msra.gmra.mrb[0].mxu1 %vm18091_vm0, %v18712_v25  ;;  %8052 = vmatmul.mubr.msk.f32.gmra.mrb[2].mxu0 %vm18723_vm4, %v18712_v25  ;;  %vm18728_vm0 = vnez %v18727_v44  ;;  %vm18732_vm4 = vnez %v18731_v62 }
 0x500   : > { %8904 = vmatpush1.bf16.msra.mxu1 %v18717_v35  ;;  %8243 = vmatprep.mubr.msk.f32.mxu1 %vm18721_vm10, %v18712_v25  ;;  %vm18730_vm10 = vnez %v18729_v23  ;;  %v18820_v35 = vld [vmem:[#allocation189_spill] sm:$0xff] }
 0x501   : > { %8905 = vmatprep.subr.bf16.mxu1 %v18092_v45  ;;  %8619 = vmatpush1.bf16.msra.mxu0 %v18724_v37 }
 0x502   : > { %8053 = vmatprep.mubr.msk.f32.mxu0 %vm18726_vm7, %v18712_v25  ;;  %8620 = vmatprep.subr.bf16.mxu0 %v18092_v45  ;;  %vm18735_vm7 = vnez %v18734_v14 }
 0x503   : > { %8244 = vmatmul.mubr.msk.f32.gmra.mrb[2].mxu1 %vm18728_vm0, %v18712_v25  ;;  %8054 = vmatmul.mubr.msk.f32.gmra.mrb[4].mxu0 %vm18732_vm4, %v18712_v25  ;;  %vm18737_vm0 = vnez %v18736_v13  ;;  %vm18741_vm4 = vnez %v18740_v56 }
 0x504   : > { %8907 = vmatpush1.bf16.msra.mxu1 %v18724_v37  ;;  %8245 = vmatprep.mubr.msk.f32.mxu1 %vm18730_vm10, %v18712_v25  ;;  %vm18739_vm10 = vnez %v18738_v22  ;;  %v18822_v37 = vld [vmem:[#allocation81_spill] sm:$0xff] }
 0x505   : > { %8908 = vmatprep.subr.bf16.mxu1 %v18092_v45  ;;  %8622 = vmatpush1.bf16.msra.mxu0 %v18733_v27 }
 0x506   : > { %8055 = vmatprep.mubr.msk.f32.mxu0 %vm18735_vm7, %v18712_v25  ;;  %8623 = vmatprep.subr.bf16.mxu0 %v18092_v45  ;;  %vm18744_vm7 = vnez %v18743_v1 }
 0x507   : > { %8246 = vmatmul.mubr.msk.f32.gmra.mrb[4].mxu1 %vm18737_vm0, %v18712_v25  ;;  %8056 = vmatmul.mubr.msk.f32.gmra.mrb[6].mxu0 %vm18741_vm4, %v18712_v25  ;;  %vm18746_vm0 = vnez %v18745_v19  ;;  %vm18750_vm4 = vnez %v18749_v29 }
 0x508   : > { %8910 = vmatpush1.bf16.msra.mxu1 %v18733_v27  ;;  %8247 = vmatprep.mubr.msk.f32.mxu1 %vm18739_vm10, %v18712_v25  ;;  %vm18748_vm10 = vnez %v18747_v33  ;;  %v18823_v27 = vld [vmem:[#allocation217_spill] sm:$0xff] }
 0x509   : > { %8911 = vmatprep.subr.bf16.mxu1 %v18092_v45  ;;  %8625 = vmatpush1.bf16.msra.mxu0 %v18742_v38 }
 0x50a   : > { %8057 = vmatprep.mubr.msk.f32.mxu0 %vm18744_vm7, %v18712_v25  ;;  %8626 = vmatprep.subr.bf16.mxu0 %v18092_v45  ;;  %vm18753_vm7 = vnez %v18752_v15 }
 0x50b   : > { %8248 = vmatmul.mubr.msk.f32.gmra.mrb[6].mxu1 %vm18746_vm0, %v18712_v25  ;;  %8058 = vmatmul.mubr.msk.f32.gmra.mrb[8].mxu0 %vm18750_vm4, %v18712_v25  ;;  %vm18755_vm0 = vnez %v18754_v4  ;;  %vm18759_vm4 = vnez %v18758_v5 }
 0x50c   : > { %8913 = vmatpush1.bf16.msra.mxu1 %v18742_v38  ;;  %8249 = vmatprep.mubr.msk.f32.mxu1 %vm18748_vm10, %v18712_v25  ;;  %vm18757_vm10 = vnez %v18756_v42  ;;  %v18825_v38 = vld [vmem:[#allocation208_spill] sm:$0xff] }
 0x50d   : > { %8914 = vmatprep.subr.bf16.mxu1 %v18092_v45  ;;  %8628 = vmatpush1.bf16.msra.mxu0 %v18751_v61 }
 0x50e   : > { %8059 = vmatprep.mubr.msk.f32.mxu0 %vm18753_vm7, %v18712_v25  ;;  %8629 = vmatprep.subr.bf16.mxu0 %v18092_v45  ;;  %vm18762_vm7 = vnez %v18761_v59 }
 0x50f   : > { %8250 = vmatmul.mubr.msk.f32.gmra.mrb[8].mxu1 %vm18755_vm0, %v18712_v25  ;;  %8060 = vmatmul.mubr.msk.f32.gmra.mrb[10].mxu0 %vm18759_vm4, %v18712_v25  ;;  %vm18764_vm0 = vnez %v18763_v3  ;;  %vm18768_vm4 = vnez %v18767_v52 }
 0x510   : > { %8916 = vmatpush1.bf16.msra.mxu1 %v18751_v61  ;;  %8251 = vmatprep.mubr.msk.f32.mxu1 %vm18757_vm10, %v18712_v25  ;;  %vm18766_vm10 = vnez %v18765_v49  ;;  %v18827_v61 = vld [vmem:[#allocation206_spill] sm:$0xff] }
 0x511   : > { %8917 = vmatprep.subr.bf16.mxu1 %v18092_v45  ;;  %8631 = vmatpush1.bf16.msra.mxu0 %v18760_v34 }
 0x512   : > { %8061 = vmatprep.mubr.msk.f32.mxu0 %vm18762_vm7, %v18712_v25  ;;  %8632 = vmatprep.subr.bf16.mxu0 %v18092_v45  ;;  %vm18771_vm7 = vnez %v18770_v31 }
 0x513   : > { %8252 = vmatmul.mubr.msk.f32.gmra.mrb[10].mxu1 %vm18764_vm0, %v18712_v25  ;;  %8062 = vmatmul.mubr.msk.f32.gmra.mrb[12].mxu0 %vm18768_vm4, %v18712_v25  ;;  %vm18773_vm0 = vnez %v18772_v36  ;;  %vm18777_vm4 = vnez %v18776_v16 }
 0x514   : > { %8919 = vmatpush1.bf16.msra.mxu1 %v18760_v34  ;;  %8253 = vmatprep.mubr.msk.f32.mxu1 %vm18766_vm10, %v18712_v25  ;;  %vm18775_vm10 = vnez %v18774_v46  ;;  %v18828_v34 = vld [vmem:[#allocation210_spill] sm:$0xff] }
 0x515   : > { %8920 = vmatprep.subr.bf16.mxu1 %v18092_v45  ;;  %8634 = vmatpush1.bf16.msra.mxu0 %v18769_v18 }
 0x516   : > { %8063 = vmatprep.mubr.msk.f32.mxu0 %vm18771_vm7, %v18712_v25  ;;  %8635 = vmatprep.subr.bf16.mxu0 %v18092_v45  ;;  %vm18780_vm7 = vnez %v18779_v17 }
 0x517   : > { %8254 = vmatmul.mubr.msk.f32.gmra.mrb[12].mxu1 %vm18773_vm0, %v18712_v25  ;;  %8064 = vmatmul.mubr.msk.f32.gmra.mrb[14].mxu0 %vm18777_vm4, %v18712_v25  ;;  %vm18782_vm0 = vnez %v18781_v6  ;;  %vm18786_vm4 = vnez %v18785_v40 }
 0x518   : > { %8922 = vmatpush1.bf16.msra.mxu1 %v18769_v18  ;;  %8255 = vmatprep.mubr.msk.f32.mxu1 %vm18775_vm10, %v18712_v25  ;;  %vm18784_vm10 = vnez %v18783_v50  ;;  %v18830_v18 = vld [vmem:[#allocation92_spill] sm:$0xff] }
 0x519   : > { %8923 = vmatprep.subr.bf16.mxu1 %v18092_v45  ;;  %8637 = vmatpush1.bf16.msra.mxu0 %v18778_v24 }
 0x51a   : > { %8065 = vmatprep.mubr.msk.f32.mxu0 %vm18780_vm7, %v18712_v25  ;;  %8638 = vmatprep.subr.bf16.mxu0 %v18092_v45  ;;  %vm18789_vm7 = vnez %v18788_v11 }
 0x51b   : > { %8256 = vmatmul.mubr.msk.f32.gmra.mrb[14].mxu1 %vm18782_vm0, %v18712_v25  ;;  %8066 = vmatmul.mubr.msk.f32.gmra.mrb[16].mxu0 %vm18786_vm4, %v18712_v25  ;;  %vm18791_vm0 = vnez %v18790_v21  ;;  %vm18795_vm4 = vnez %v18794_v20 }
 0x51c   : > { %8925 = vmatpush1.bf16.msra.mxu1 %v18778_v24  ;;  %8257 = vmatprep.mubr.msk.f32.mxu1 %vm18784_vm10, %v18712_v25  ;;  %vm18793_vm10 = vnez %v18792_v51  ;;  %v18860_v24 = vld [vmem:[#allocation48_spill] sm:$0xff] }
 0x51d   : > { %8926 = vmatprep.subr.bf16.mxu1 %v18092_v45  ;;  %8640 = vmatpush1.bf16.msra.mxu0 %v18787_v9 }
 0x51e   : > { %8067 = vmatprep.mubr.msk.f32.mxu0 %vm18789_vm7, %v18712_v25  ;;  %8641 = vmatprep.subr.bf16.mxu0 %v18092_v45  ;;  %vm18798_vm7 = vnez %v18797_v2 }
 0x51f   : > { %8258 = vmatmul.mubr.msk.f32.gmra.mrb[16].mxu1 %vm18791_vm0, %v18712_v25  ;;  %8068 = vmatmul.mubr.msk.f32.gmra.mrb[18].mxu0 %vm18795_vm4, %v18712_v25  ;;  %vm18800_vm0 = vnez %v18799_v26  ;;  %vm18804_vm4 = vnez %v18803_v48 }
 0x520   : > { %8928 = vmatpush1.bf16.msra.mxu1 %v18787_v9  ;;  %8259 = vmatprep.mubr.msk.f32.mxu1 %vm18793_vm10, %v18712_v25  ;;  %vm18802_vm10 = vnez %v18801_v54  ;;  %v18832_v9 = vld [vmem:[#allocation95_spill] sm:$0xff] }
 0x521   : > { %8929 = vmatprep.subr.bf16.mxu1 %v18092_v45  ;;  %8643 = vmatpush1.bf16.msra.mxu0 %v18796_v43 }
 0x522   : > { %8069 = vmatprep.mubr.msk.f32.mxu0 %vm18798_vm7, %v18712_v25  ;;  %8644 = vmatprep.subr.bf16.mxu0 %v18092_v45  ;;  %vm18807_vm7 = vnez %v18806_v63  ;;  %v19109_v63 = vld [vmem:[#allocation297_spill] sm:$0xff] }
 0x523   : > { %8260 = vmatmul.mubr.msk.f32.gmra.mrb[18].mxu1 %vm18800_vm0, %v18712_v25  ;;  %8070 = vmatmul.mubr.msk.f32.gmra.mrb[20].mxu0 %vm18804_vm4, %v18712_v25  ;;  %vm18809_vm0 = vnez %v18808_v53  ;;  %vm18813_vm4 = vnez %v18812_v39 }
 0x524   : > { %8931 = vmatpush1.bf16.msra.mxu1 %v18796_v43  ;;  %8261 = vmatprep.mubr.msk.f32.mxu1 %vm18802_vm10, %v18712_v25  ;;  %vm18811_vm10 = vnez %v18810_v41  ;;  %v18834_v43 = vld [vmem:[#allocation230_spill] sm:$0xff] }
 0x525   : > { %8932 = vmatprep.subr.bf16.mxu1 %v18092_v45  ;;  %8646 = vmatpush1.bf16.msra.mxu0 %v18805_v55 }
 0x526   : > { %8071 = vmatprep.mubr.msk.f32.mxu0 %vm18807_vm7, %v18712_v25  ;;  %8647 = vmatprep.subr.bf16.mxu0 %v18092_v45 }
 0x527   : > { %8262 = vmatmul.mubr.msk.f32.gmra.mrb[20].mxu1 %vm18809_vm0, %v18712_v25  ;;  %8072 = vmatmul.mubr.msk.f32.gmra.mrb[22].mxu0 %vm18813_vm4, %v18712_v25  ;;  %vm18817_vm0 = vnez %v18816_v30  ;;  %vm18821_vm4 = vnez %v18820_v35 }
 0x528   : > { %8934 = vmatpush1.bf16.msra.mxu1 %v18805_v55  ;;  %8263 = vmatprep.mubr.msk.f32.mxu1 %vm18811_vm10, %v18712_v25  ;;  %vm18819_vm10 = vnez %v18818_v12  ;;  %v18836_v55 = vld [vmem:[#allocation222_spill] sm:$0xff]  ;;  %v19121_v12 = vld [vmem:[#allocation303_spill] sm:$0xff] }
 0x529   : > { %8935 = vmatprep.subr.bf16.mxu1 %v18092_v45  ;;  %8649 = vmatpush1.bf16.msra.mxu0 %v18814_v47 }
 0x52a   : > { %8073 = vmatprep.mubr.msk.f32.mxu0 %vm18189_vm1, %v18712_v25  ;;  %8650 = vmatprep.subr.bf16.mxu0 %v18092_v45  ;;  %vm18824_vm1 = vnez %v18823_v27 }
 0x52b   : > { %8264 = vmatmul.mubr.msk.f32.gmra.mrb[22].mxu1 %vm18817_vm0, %v18712_v25  ;;  %8074 = vmatmul.mubr.msk.f32.gmra.mrb[24].mxu0 %vm18821_vm4, %v18712_v25  ;;  %vm18826_vm0 = vnez %v18825_v38  ;;  %vm18829_vm4 = vnez %v18828_v34 }
 0x52c   : > { %8937 = vmatpush1.bf16.msra.mxu1 %v18814_v47  ;;  %8265 = vmatprep.mubr.msk.f32.mxu1 %vm18819_vm10, %v18712_v25  ;;  %v18838_v47 = vld [vmem:[#allocation106_spill] sm:$0xff] }
 0x52d   : > { %8938 = vmatprep.subr.bf16.mxu1 %v18092_v45  ;;  %8652 = vmatpush1.bf16.msra.mxu0 %v18822_v37 }
 0x52e   : > { %8075 = vmatprep.mubr.msk.f32.mxu0 %vm18824_vm1, %v18712_v25  ;;  %8653 = vmatprep.subr.bf16.mxu0 %v18092_v45 }
 0x52f   : > { %8266 = vmatmul.mubr.msk.f32.gmra.mrb[24].mxu1 %vm18826_vm0, %v18712_v25  ;;  %8076 = vmatmul.mubr.msk.f32.gmra.mrb[26].mxu0 %vm18829_vm4, %v18712_v25  ;;  %vm18833_vm0 = vnez %v18832_v9  ;;  %vm18837_vm4 = vnez %v18836_v55  ;;  %v18841_v9 = vld [vmem:[#allocation235_spill] sm:$0xff]  ;;  %v18845_v55 = vld [vmem:[#allocation228_spill] sm:$0xff] }
 0x530   : > { %8940 = vmatpush1.bf16.msra.mxu1 %v18822_v37  ;;  %8267 = vmatprep.mubr.msk.f32.mxu1 %vm18201_vm2, %v18712_v25  ;;  %vm18835_vm2 = vnez %v18834_v43  ;;  %v18839_v37 = vld [vmem:[#allocation218_spill] sm:$0xff] }
 0x531   : > { %8941 = vmatprep.subr.bf16.mxu1 %v18092_v45  ;;  %8655 = vmatpush1.bf16.msra.mxu0 %v18830_v18  ;;  %v18848_v43 = vld [vmem:[#allocation238_spill] sm:$0xff] }
 0x532   : > { %8077 = vmatprep.mubr.msk.f32.mxu0 %vm18207_vm12, %v18712_v25  ;;  %8656 = vmatprep.subr.bf16.mxu0 %v18092_v45  ;;  %vm18840_vm12 = vnez %v18839_v37  ;;  %v18847_v37 = vld [vmem:[#allocation115_spill] sm:$0xff] }
 0x533   : > { %8268 = vmatmul.mubr.msk.f32.gmra.mrb[26].mxu1 %vm18833_vm0, %v18712_v25  ;;  %8078 = vmatmul.mubr.msk.f32.gmra.mrb[28].mxu0 %vm18837_vm4, %v18712_v25  ;;  %vm18842_vm0 = vnez %v18841_v9  ;;  %vm18846_vm4 = vnez %v18845_v55  ;;  %v18850_v9 = vld [vmem:[#allocation259_spill] sm:$0xff] }
 0x534   : > { %8943 = vmatpush1.bf16.msra.mxu1 %v18830_v18  ;;  %8269 = vmatprep.mubr.msk.f32.mxu1 %vm18835_vm2, %v18712_v25  ;;  %v18843_v18 = vld [vmem:[#allocation260_spill] sm:$0xff]  ;;  %v18855_v55 = vld [vmem:[#allocation35_spill] sm:$0xff] }
 0x535   : > { %8944 = vmatprep.subr.bf16.mxu1 %v18092_v45  ;;  %8658 = vmatpush1.bf16.msra.mxu0 %v18838_v47  ;;  %vm18844_vm2 = vnez %v18843_v18  ;;  %v18857_v18 = vld [vmem:[#allocation245_spill] sm:$0xff] }
 0x536   : > { %8079 = vmatprep.mubr.msk.f32.mxu0 %vm18840_vm12, %v18712_v25  ;;  %8659 = vmatprep.subr.bf16.mxu0 %v18092_v45  ;;  %vm18849_vm12 = vnez %v18848_v43  ;;  %vm18858_vm1 = vnez %v18857_v18  ;;  %v18859_v43 = vld [vmem:[#allocation52_spill] sm:$0xff]  ;;  %v18868_v18 = vld [vmem:[#allocation199_spill] sm:$0xff] }
 0x537   : > { %8270 = vmatmul.mubr.msk.f32.gmra.mrb[28].mxu1 %vm18842_vm0, %v18712_v25  ;;  %8080 = vmatmul.mubr.msk.f32.gmra.mrb[30].mxu0 %vm18846_vm4, %v18712_v25  ;;  %vm18851_vm0 = vnez %v18850_v9 }
 0x538   : > { %8946 = vmatpush1.bf16.msra.mxu1 %v18838_v47  ;;  %8271 = vmatprep.mubr.msk.f32.mxu1 %vm18844_vm2, %v18712_v25  ;;  %v18852_v47 = vld [vmem:[#allocation151_spill] sm:$0xff] }
 0x539   : > { %8947 = vmatprep.subr.bf16.mxu1 %v18092_v45  ;;  %8661 = vmatpush1.bf16.msra.mxu0 %v18847_v37  ;;  %vm18853_vm2 = vnez %v18852_v47  ;;  %v18854_v45 = vld [vmem:[#allocation79_spill] sm:$0xff] }
 0x53a   : > { %8081 = vmatprep.mubr.msk.f32.mxu0 %vm18849_vm12, %v18712_v25  ;;  %vm18856_vm4 = vcmp.gt.f32.partialorder %v18854_v45, %v18855_v55  ;;  %vm18861_vm12 = vcmp.gt.f32.partialorder %v18859_v43, %v18860_v24  ;;  %v18864_v47 = vld [vmem:[#allocation191_spill] sm:$0xff]  ;;  %v18866_v45 = vld [vmem:[#allocation180_spill] sm:$0xff] }
 0x53b   : > { %8272 = vmatmul.mubr.msk.f32.gmra.mrb[30].mxu1 %vm18851_vm0, %v18712_v25  ;;  %8082 = vmatmul.mubr.msk.f32.gmra.mrb[32].mxu0 %vm18856_vm4, %v18712_v25  ;;  %vm18867_vm4 = vnez %v18866_v45  ;;  %v18870_v43 = vld [vmem:[#allocation272_spill] sm:$0xff] }
 0x53c   : > { %8949 = vmatpush1.bf16.msra.mxu1 %v18847_v37  ;;  %8273 = vmatprep.mubr.msk.f32.mxu1 %vm18853_vm2, %v18712_v25  ;;  %v18862_v37 = vld [vmem:[#allocation268_spill] sm:$0xff]  ;;  %vm18865_vm2 = vcmp.gt.f32.partialorder %v18864_v47, %v18855_v55 }
 0x53d   : > { %8083 = vmatprep.mubr.msk.f32.mxu0 %vm18858_vm1, %v18712_v25  ;;  %vm18863_vm0 = vnez %v18862_v37  ;;  %vm18869_vm1 = vcmp.gt.f32.partialorder %v18868_v18, %v18860_v24  ;;  %v18872_v37 = vld [vmem:[#allocation167_spill] sm:$0xff]  ;;  %v18874_v47 = vld [vmem:[#allocation256_spill] sm:$0xff] }
 0x53e   : > { %v18876_v45 = vld [vmem:[#allocation88_spill] sm:$0xff]  ;;  %v18887_v18 = vld [vmem:[#allocation227_spill] sm:$0xff] }
 0x53f   : > { %8274 = vmatmul.mubr.msk.f32.gmra.mrb[32].mxu1 %vm18861_vm12, %v18712_v25  ;;  %8084 = vmatmul.mubr.msk.f32.gmra.mrb[34].mxu0 %vm18865_vm2, %v18712_v25  ;;  %vm18871_vm12 = vnez %v18870_v43  ;;  %vm18875_vm2 = vnez %v18874_v47  ;;  %v18879_v43 = vld [vmem:[#allocation209_spill] sm:$0xff]  ;;  %v18883_v47 = vld [vmem:[#allocation158_spill] sm:$0xff] }
 0x540   : > { %8275 = vmatprep.mubr.msk.f32.mxu1 %vm18863_vm0, %v18712_v25  ;;  %8085 = vmatprep.mubr.msk.f32.mxu0 %vm18867_vm4, %v18712_v25  ;;  %vm18873_vm0 = vcmp.gt.f32.partialorder %v18872_v37, %v18855_v55  ;;  %vm18877_vm4 = vcmp.gt.f32.partialorder %v18876_v45, %v18860_v24  ;;  %v18881_v37 = vld [vmem:[#allocation263_spill] sm:$0xff]  ;;  %v18885_v45 = vld [vmem:[#allocation281_spill] sm:$0xff] }
 0x543   : > { %8276 = vmatmul.mubr.msk.f32.gmra.mrb[34].mxu1 %vm18869_vm1, %v18712_v25  ;;  %8086 = vmatmul.mubr.msk.f32.gmra.mrb[36].mxu0 %vm18873_vm0, %v18712_v25  ;;  %vm18880_vm1 = vcmp.gt.f32.partialorder %v18879_v43, %v18855_v55  ;;  %vm18882_vm0 = vnez %v18881_v37  ;;  %v18889_v43 = vld [vmem:[#allocation183_spill] sm:$0xff]  ;;  %v18891_v37 = vld [vmem:[#allocation236_spill] sm:$0xff] }
 0x544   : > { %8277 = vmatprep.mubr.msk.f32.mxu1 %vm18871_vm12, %v18712_v25  ;;  %8087 = vmatprep.mubr.msk.f32.mxu0 %vm18875_vm2, %v18712_v25  ;;  %vm18884_vm2 = vcmp.gt.f32.partialorder %v18883_v47, %v18860_v24  ;;  %v18893_v47 = vld [vmem:[#allocation267_spill] sm:$0xff] }
 0x547   : > { %8278 = vmatmul.mubr.msk.f32.gmra.mrb[36].mxu1 %vm18877_vm4, %v18712_v25  ;;  %8088 = vmatmul.mubr.msk.f32.gmra.mrb[38].mxu0 %vm18880_vm1, %v18712_v25  ;;  %vm18886_vm4 = vnez %v18885_v45  ;;  %vm18890_vm1 = vnez %v18889_v43  ;;  %v18895_v45 = vld [vmem:[#allocation177_spill] sm:$0xff]  ;;  %v18898_v43 = vld [vmem:[#allocation244_spill] sm:$0xff] }
 0x548   : > { %8279 = vmatprep.mubr.msk.f32.mxu1 %vm18243_vm14, %v18712_v25  ;;  %8089 = vmatprep.mubr.msk.f32.mxu0 %vm18882_vm0, %v18712_v25  ;;  %vm18888_vm14 = vcmp.gt.f32.partialorder %v18887_v18, %v18855_v55  ;;  %vm18892_vm0 = vcmp.gt.f32.partialorder %v18891_v37, %v18860_v24  ;;  %v18900_v37 = vld [vmem:[#allocation195_spill] sm:$0xff]  ;;  %v18906_v18 = vld [vmem:[#allocation186_spill] sm:$0xff] }
 0x54b   : > { %8280 = vmatmul.mubr.msk.f32.gmra.mrb[38].mxu1 %vm18884_vm2, %v18712_v25  ;;  %8090 = vmatmul.mubr.msk.f32.gmra.mrb[40].mxu0 %vm18888_vm14, %v18712_v25  ;;  %vm18894_vm2 = vnez %v18893_v47  ;;  %vm18899_vm14 = vcmp.gt.f32.partialorder %v18898_v43, %v18860_v24  ;;  %v18902_v47 = vld [vmem:[#allocation253_spill] sm:$0xff]  ;;  %v18908_v43 = vld [vmem:[#allocation288_spill] sm:$0xff] }
 0x54c   : > { %8281 = vmatprep.mubr.msk.f32.mxu1 %vm18886_vm4, %v18712_v25  ;;  %8091 = vmatprep.mubr.msk.f32.mxu0 %vm18890_vm1, %v18712_v25  ;;  %vm18896_vm4 = vcmp.gt.f32.partialorder %v18895_v45, %v18855_v55  ;;  %v18904_v45 = vld [vmem:[#allocation283_spill] sm:$0xff] }
 0x54f   : > { %8282 = vmatmul.mubr.msk.f32.gmra.mrb[40].mxu1 %vm18892_vm0, %v18712_v25  ;;  %8092 = vmatmul.mubr.msk.f32.gmra.mrb[42].mxu0 %vm18896_vm4, %v18712_v25  ;;  %vm18901_vm0 = vnez %v18900_v37  ;;  %vm18905_vm4 = vnez %v18904_v45  ;;  %v18910_v37 = vld [vmem:[#allocation257_spill] sm:$0xff]  ;;  %v18914_v45 = vld [vmem:[#allocation266_spill] sm:$0xff] }
 0x550   : > { %8283 = vmatprep.mubr.msk.f32.mxu1 %vm18894_vm2, %v18712_v25  ;;  %8093 = vmatprep.mubr.msk.f32.mxu0 %vm18260_vm5, %v18712_v25  ;;  %vm18903_vm2 = vcmp.gt.f32.partialorder %v18902_v47, %v18855_v55  ;;  %vm18907_vm5 = vcmp.gt.f32.partialorder %v18906_v18, %v18860_v24  ;;  %v18912_v47 = vld [vmem:[#allocation216_spill] sm:$0xff]  ;;  %v18916_v18 = vld [vmem:[#allocation293_spill] sm:$0xff] }
 0x553   : > { %8284 = vmatmul.mubr.msk.f32.gmra.mrb[42].mxu1 %vm18899_vm14, %v18712_v25  ;;  %8094 = vmatmul.mubr.msk.f32.gmra.mrb[44].mxu0 %vm18903_vm2, %v18712_v25  ;;  %vm18909_vm14 = vnez %v18908_v43  ;;  %vm18913_vm2 = vnez %v18912_v47  ;;  %v18918_v43 = vld [vmem:[#allocation82_spill] sm:$0xff]  ;;  %v18922_v47 = vld [vmem:[#allocation271_spill] sm:$0xff] }
 0x554   : > { %8285 = vmatprep.mubr.msk.f32.mxu1 %vm18901_vm0, %v18712_v25  ;;  %8095 = vmatprep.mubr.msk.f32.mxu0 %vm18905_vm4, %v18712_v25  ;;  %vm18911_vm0 = vcmp.gt.f32.partialorder %v18910_v37, %v18855_v55  ;;  %vm18915_vm4 = vcmp.gt.f32.partialorder %v18914_v45, %v18860_v24  ;;  %v18920_v37 = vld [vmem:[#allocation297_spill] sm:$0xff] }
 0x555   : > { %v18924_v45 = vld [vmem:[#allocation205_spill] sm:$0xff] }
 0x557   : > { %8286 = vmatmul.mubr.msk.f32.gmra.mrb[44].mxu1 %vm18907_vm5, %v18712_v25  ;;  %8096 = vmatmul.mubr.msk.f32.gmra.mrb[46].mxu0 %vm18911_vm0, %v18712_v25  ;;  %vm18917_vm5 = vnez %v18916_v18  ;;  %vm18921_vm0 = vnez %v18920_v37  ;;  %v18926_v18 = vld [vmem:[#allocation280_spill] sm:$0xff]  ;;  %v18930_v37 = vld [vmem:[#allocation197_spill] sm:$0xff] }
 0x558   : > { %8287 = vmatprep.mubr.msk.f32.mxu1 %vm18909_vm14, %v18712_v25  ;;  %8097 = vmatprep.mubr.msk.f32.mxu0 %vm18913_vm2, %v18712_v25  ;;  %vm18919_vm14 = vcmp.gt.f32.partialorder %v18918_v43, %v18855_v55  ;;  %vm18923_vm2 = vcmp.gt.f32.partialorder %v18922_v47, %v18860_v24  ;;  %v18928_v43 = vld [vmem:[#allocation302_spill] sm:$0xff]  ;;  %v18932_v47 = vld [vmem:[#allocation303_spill] sm:$0xff] }
 0x55b   : > { %8288 = vmatmul.mubr.msk.f32.gmra.mrb[46].mxu1 %vm18915_vm4, %v18712_v25  ;;  %8098 = vmatmul.mubr.msk.f32.gmra.mrb[48].mxu0 %vm18919_vm14, %v18712_v25  ;;  %vm18925_vm4 = vnez %v18924_v45  ;;  %vm18929_vm14 = vnez %v18928_v43  ;;  %v18934_v45 = vld [vmem:[#allocation285_spill] sm:$0xff]  ;;  %v18938_v43 = vld [vmem:[#allocation292_spill] sm:$0xff] }
 0x55c   : > { %8289 = vmatprep.mubr.msk.f32.mxu1 %vm18917_vm5, %v18712_v25  ;;  %8099 = vmatprep.mubr.msk.f32.mxu0 %vm18921_vm0, %v18712_v25  ;;  %vm18927_vm5 = vcmp.gt.f32.partialorder %v18926_v18, %v18855_v55  ;;  %vm18931_vm0 = vcmp.gt.f32.partialorder %v18930_v37, %v18860_v24  ;;  %v18936_v18 = vld [vmem:[#allocation219_spill] sm:$0xff] }
 0x55d   : > { %v18940_v37 = vld [vmem:[#allocation307_spill] sm:$0xff] }
 0x55f   : > { %8290 = vmatmul.mubr.msk.f32.gmra.mrb[48].mxu1 %vm18923_vm2, %v18712_v25  ;;  %8100 = vmatmul.mubr.msk.f32.gmra.mrb[50].mxu0 %vm18927_vm5, %v18712_v25  ;;  %vm18933_vm2 = vnez %v18932_v47  ;;  %vm18937_vm5 = vnez %v18936_v18  ;;  %v18942_v47 = vld [vmem:[#allocation214_spill] sm:$0xff]  ;;  %v18946_v18 = vld [vmem:[#allocation296_spill] sm:$0xff] }
 0x560   : > { %8291 = vmatprep.mubr.msk.f32.mxu1 %vm18925_vm4, %v18712_v25  ;;  %8101 = vmatprep.mubr.msk.f32.mxu0 %vm18929_vm14, %v18712_v25  ;;  %vm18935_vm4 = vcmp.gt.f32.partialorder %v18934_v45, %v18855_v55  ;;  %vm18939_vm14 = vcmp.gt.f32.partialorder %v18938_v43, %v18860_v24  ;;  %v18944_v45 = vld [vmem:[#allocation310_spill] sm:$0xff]  ;;  %v18948_v43 = vld [vmem:[#allocation237_spill] sm:$0xff] }
 0x563   : > { %8292 = vmatmul.mubr.msk.f32.gmra.mrb[50].mxu1 %vm18931_vm0, %v18712_v25  ;;  %8102 = vmatmul.mubr.msk.f32.gmra.mrb[52].mxu0 %vm18935_vm4, %v18712_v25  ;;  %vm18941_vm0 = vnez %v18940_v37  ;;  %vm18945_vm4 = vnez %v18944_v45  ;;  %v18950_v37 = vld [vmem:[#allocation300_spill] sm:$0xff]  ;;  %v18954_v45 = vld [vmem:[#allocation225_spill] sm:$0xff] }
 0x564   : > { %8293 = vmatprep.mubr.msk.f32.mxu1 %vm18933_vm2, %v18712_v25  ;;  %8103 = vmatprep.mubr.msk.f32.mxu0 %vm18937_vm5, %v18712_v25  ;;  %vm18943_vm2 = vcmp.gt.f32.partialorder %v18942_v47, %v18855_v55  ;;  %vm18947_vm5 = vcmp.gt.f32.partialorder %v18946_v18, %v18860_v24  ;;  %v18952_v47 = vld [vmem:[#allocation314_spill] sm:$0xff]  ;;  %v18956_v18 = vld [vmem:[#allocation317_spill] sm:$0xff] }
 0x567   : > { %8294 = vmatmul.mubr.msk.f32.gmra.mrb[52].mxu1 %vm18939_vm14, %v18712_v25  ;;  %8104 = vmatmul.mubr.msk.f32.gmra.mrb[54].mxu0 %vm18943_vm2, %v18712_v25  ;;  %vm18949_vm14 = vnez %v18948_v43  ;;  %vm18953_vm2 = vnez %v18952_v47  ;;  %v18958_v43 = vld [vmem:[#allocation306_spill] sm:$0xff]  ;;  %v18961_v47 = vld [vmem:[#allocation309_spill] sm:$0xff] }
 0x568   : > { %8295 = vmatprep.mubr.msk.f32.mxu1 %vm18941_vm0, %v18712_v25  ;;  %8105 = vmatprep.mubr.msk.f32.mxu0 %vm18945_vm4, %v18712_v25  ;;  %vm18951_vm0 = vcmp.gt.f32.partialorder %v18950_v37, %v18855_v55  ;;  %vm18955_vm4 = vcmp.gt.f32.partialorder %v18954_v45, %v18860_v24  ;;  %v18963_v45 = vld [vmem:[#allocation320_spill] sm:$0xff]  ;;  %v18968_v37 = vld [vmem:[#allocation313_spill] sm:$0xff] }
 0x56b   : > { %8296 = vmatmul.mubr.msk.f32.gmra.mrb[54].mxu1 %vm18947_vm5, %v18712_v25  ;;  %8106 = vmatmul.mubr.msk.f32.gmra.mrb[56].mxu0 %vm18951_vm0, %v18712_v25  ;;  %vm18957_vm5 = vnez %v18956_v18  ;;  %vm18962_vm0 = vcmp.gt.f32.partialorder %v18961_v47, %v18860_v24  ;;  %v18965_v18 = vld [vmem:[#allocation234_spill] sm:$0xff] }
 0x56c   : > { %8297 = vmatprep.mubr.msk.f32.mxu1 %vm18949_vm14, %v18712_v25  ;;  %8107 = vmatprep.mubr.msk.f32.mxu0 %vm18953_vm2, %v18712_v25  ;;  %vm18959_vm14 = vcmp.gt.f32.partialorder %v18958_v43, %v18855_v55  ;;  %v18973_v43 = vld [vmem:[#allocation240_spill] sm:$0xff] }
 0x56f   : > { %8298 = vmatmul.mubr.msk.f32.gmra.mrb[56].mxu1 %vm18955_vm4, %v18712_v25  ;;  %8108 = vmatmul.mubr.msk.f32.gmra.mrb[58].mxu0 %vm18959_vm14, %v18712_v25  ;;  %vm18964_vm4 = vnez %v18963_v45  ;;  %vm18969_vm14 = vcmp.gt.f32.partialorder %v18968_v37, %v18860_v24  ;;  %v18971_v45 = vld [vmem:[#allocation319_spill] sm:$0xff] }
 0x570   : > { %8299 = vmatprep.mubr.msk.f32.mxu1 %vm18957_vm5, %v18712_v25  ;;  %8109 = vmatprep.mubr.msk.f32.mxu0 %vm18309_vm3, %v18712_v25  ;;  %vm18966_vm5 = vcmp.gt.f32.partialorder %v18965_v18, %v18855_v55 }
 0x573   : > { %8300 = vmatmul.mubr.msk.f32.gmra.mrb[58].mxu1 %vm18962_vm0, %v18712_v25  ;;  %8110 = vmatmul.mubr.msk.f32.gmra.mrb[60].mxu0 %vm18966_vm5, %v18712_v25  ;;  %vm18972_vm0 = vcmp.gt.f32.partialorder %v18971_v45, %v18855_v55  ;;  %vm18974_vm5 = vcmp.gt.f32.partialorder %v18973_v43, %v18860_v24 }
 0x574   : > { %8301 = vmatprep.mubr.msk.f32.mxu1 %vm18964_vm4, %v18712_v25  ;;  %8111 = vmatprep.mubr.msk.f32.mxu0 %vm13864_vm13, %v18712_v25 }
 0x577   : > { %8302 = vmatmul.mubr.msk.f32.gmra.mrb[60].mxu1 %vm18969_vm14, %v18712_v25  ;;  %8112 = vmatmul.mubr.msk.f32.gmra.mrb[62].mxu0 %vm18972_vm0, %v18712_v25  ;;  %vm18976_vm14 = vnez %v18720_v0  ;;  %vm18977_vm0 = vnez %v18722_v10  ;;  %v19034_v0 = vld [vmem:[#allocation235_spill] sm:$0xff]  ;;  %v19036_v10 = vld [vmem:[#allocation260_spill] sm:$0xff] }
 0x578   : > { %8303 = vmatprep.mubr.msk.f32.mxu1 %vm18316_vm9, %v18712_v25  ;;  %8113 = vmatprep.mubr.msk.f32.mxu0 %vm10123_vm6, %v18712_v25  ;;  %vm18975_vm6 = vnez %v18719_v57  ;;  %v19032_v57 = vld [vmem:[#allocation218_spill] sm:$0xff] }
 0x57b   : > { %8304 = vmatmul.mubr.msk.f32.gmra.mrb[62].mxu1 %vm18974_vm5, %v18712_v25  ;;  %8114 = vmatmul.mubr.msk.f32.vlgmr.msra.gmra.mrb[0].mxu0 %vm10345_vm11, %v18712_v25  ;;  %vm18979_vm11 = vnez %v18727_v44  ;;  %vm18981_vm5 = vnez %v18731_v62  ;;  %v19040_v44 = vld [vmem:[#allocation238_spill] sm:$0xff]  ;;  %v19045_v62 = vld [vmem:[#allocation79_spill] sm:$0xff] }
 0x57c   : > { %8305 = vmatprep.mubr.msk.f32.mxu1 %vm10905_vm15, %v18712_v25  ;;  %8115 = vmatprep.mubr.msk.f32.mxu0 %vm10698_vm8, %v18712_v25  ;;  %vm18978_vm15 = vnez %v18725_v7  ;;  %vm18980_vm8 = vnez %v18729_v23  ;;  %v19038_v7 = vld [vmem:[#allocation228_spill] sm:$0xff]  ;;  %v19043_v23 = vld [vmem:[#allocation151_spill] sm:$0xff] }
 0x57f   : > { %8306 = vmatmul.mubr.msk.f32.vlgmr.msra.gmra.mrb[0].mxu1 %vm18975_vm6, %v18712_v25  ;;  %8116 = vmatmul.mubr.msk.f32.gmra.mrb[2].mxu0 %vm18977_vm0, %v18712_v25  ;;  %vm18982_vm6 = vnez %v18734_v14  ;;  %vm18984_vm0 = vnez %v18738_v22  ;;  %v19047_v14 = vld [vmem:[#allocation245_spill] sm:$0xff]  ;;  %v19051_v22 = vld [vmem:[#allocation268_spill] sm:$0xff] }
 0x580   : > { %8307 = vmatprep.mubr.msk.f32.mxu1 %vm18976_vm14, %v18712_v25  ;;  %8117 = vmatprep.mubr.msk.f32.mxu0 %vm18978_vm15, %v18712_v25  ;;  %vm18983_vm14 = vnez %v18736_v13  ;;  %vm18985_vm15 = vnez %v18740_v56  ;;  %v19049_v13 = vld [vmem:[#allocation52_spill] sm:$0xff]  ;;  %v19053_v56 = vld [vmem:[#allocation191_spill] sm:$0xff] }
 0x583   : > { %8308 = vmatmul.mubr.msk.f32.gmra.mrb[2].mxu1 %vm18979_vm11, %v18712_v25  ;;  %8118 = vmatmul.mubr.msk.f32.gmra.mrb[4].mxu0 %vm18981_vm5, %v18712_v25  ;;  %vm18986_vm11 = vnez %v18743_v1  ;;  %vm18988_vm5 = vnez %v18747_v33  ;;  %v19055_v1 = vld [vmem:[#allocation180_spill] sm:$0xff] }
 0x584   : > { %8309 = vmatprep.mubr.msk.f32.mxu1 %vm18980_vm8, %v18712_v25  ;;  %8119 = vmatprep.mubr.msk.f32.mxu0 %vm18982_vm6, %v18712_v25  ;;  %vm18987_vm8 = vnez %v18745_v19  ;;  %vm18989_vm6 = vnez %v18749_v29  ;;  %v19057_v19 = vld [vmem:[#allocation199_spill] sm:$0xff] }
 0x585   : > { %v19060_v29 = vld [vmem:[#allocation167_spill] sm:$0xff] }
 0x587   : > { %8310 = vmatmul.mubr.msk.f32.gmra.mrb[4].mxu1 %vm18983_vm14, %v18712_v25  ;;  %8120 = vmatmul.mubr.msk.f32.gmra.mrb[6].mxu0 %vm18985_vm15, %v18712_v25  ;;  %vm18990_vm14 = vnez %v18752_v15  ;;  %vm18992_vm15 = vnez %v18756_v42  ;;  %v19062_v15 = vld [vmem:[#allocation256_spill] sm:$0xff]  ;;  %v19066_v42 = vld [vmem:[#allocation170_spill] sm:$0xff] }
 0x588   : > { %8311 = vmatprep.mubr.msk.f32.mxu1 %vm18984_vm0, %v18712_v25  ;;  %8121 = vmatprep.mubr.msk.f32.mxu0 %vm18986_vm11, %v18712_v25  ;;  %vm18991_vm0 = vnez %v18754_v4  ;;  %vm18993_vm11 = vnez %v18758_v5  ;;  %v19064_v4 = vld [vmem:[#allocation88_spill] sm:$0xff]  ;;  %v19068_v5 = vld [vmem:[#allocation209_spill] sm:$0xff] }
 0x58b   : > { %8312 = vmatmul.mubr.msk.f32.gmra.mrb[6].mxu1 %vm18987_vm8, %v18712_v25  ;;  %8122 = vmatmul.mubr.msk.f32.gmra.mrb[8].mxu0 %vm18989_vm6, %v18712_v25  ;;  %vm18994_vm8 = vnez %v18761_v59  ;;  %vm18996_vm6 = vnez %v18765_v49  ;;  %v19070_v59 = vld [vmem:[#allocation263_spill] sm:$0xff]  ;;  %v19074_v49 = vld [vmem:[#allocation281_spill] sm:$0xff] }
 0x58c   : > { %8313 = vmatprep.mubr.msk.f32.mxu1 %vm18988_vm5, %v18712_v25  ;;  %8123 = vmatprep.mubr.msk.f32.mxu0 %vm18990_vm14, %v18712_v25  ;;  %vm18995_vm5 = vnez %v18763_v3  ;;  %vm18997_vm14 = vnez %v18767_v52  ;;  %v19072_v3 = vld [vmem:[#allocation158_spill] sm:$0xff]  ;;  %v19076_v52 = vld [vmem:[#allocation227_spill] sm:$0xff] }
 0x58f   : > { %8314 = vmatmul.mubr.msk.f32.gmra.mrb[8].mxu1 %vm18991_vm0, %v18712_v25  ;;  %8124 = vmatmul.mubr.msk.f32.gmra.mrb[10].mxu0 %vm18993_vm11, %v18712_v25  ;;  %vm18998_vm0 = vnez %v18770_v31  ;;  %vm19000_vm11 = vnez %v18774_v46  ;;  %v19081_v46 = vld [vmem:[#allocation267_spill] sm:$0xff] }
 0x590   : > { %8315 = vmatprep.mubr.msk.f32.mxu1 %vm18992_vm15, %v18712_v25  ;;  %8125 = vmatprep.mubr.msk.f32.mxu0 %vm18994_vm8, %v18712_v25  ;;  %vm18999_vm15 = vnez %v18772_v36  ;;  %vm19001_vm8 = vnez %v18776_v16  ;;  %v19079_v36 = vld [vmem:[#allocation236_spill] sm:$0xff]  ;;  %v19083_v16 = vld [vmem:[#allocation177_spill] sm:$0xff] }
 0x593   : > { %8316 = vmatmul.mubr.msk.f32.gmra.mrb[10].mxu1 %vm18995_vm5, %v18712_v25  ;;  %8126 = vmatmul.mubr.msk.f32.gmra.mrb[12].mxu0 %vm18997_vm14, %v18712_v25  ;;  %vm19002_vm5 = vnez %v18779_v17  ;;  %vm19004_vm14 = vnez %v18783_v50  ;;  %v19085_v17 = vld [vmem:[#allocation276_spill] sm:$0xff]  ;;  %v19089_v50 = vld [vmem:[#allocation195_spill] sm:$0xff] }
 0x594   : > { %8317 = vmatprep.mubr.msk.f32.mxu1 %vm18996_vm6, %v18712_v25  ;;  %8127 = vmatprep.mubr.msk.f32.mxu0 %vm18998_vm0, %v18712_v25  ;;  %vm19003_vm6 = vnez %v18781_v6  ;;  %vm19005_vm0 = vnez %v18785_v40  ;;  %v19087_v6 = vld [vmem:[#allocation244_spill] sm:$0xff]  ;;  %v19091_v40 = vld [vmem:[#allocation253_spill] sm:$0xff] }
 0x597   : > { %8318 = vmatmul.mubr.msk.f32.gmra.mrb[12].mxu1 %vm18999_vm15, %v18712_v25  ;;  %8128 = vmatmul.mubr.msk.f32.gmra.mrb[14].mxu0 %vm19001_vm8, %v18712_v25  ;;  %vm19006_vm15 = vnez %v18788_v11  ;;  %vm19008_vm8 = vnez %v18792_v51  ;;  %v19093_v11 = vld [vmem:[#allocation283_spill] sm:$0xff]  ;;  %v19097_v51 = vld [vmem:[#allocation288_spill] sm:$0xff] }
 0x598   : > { %8319 = vmatprep.mubr.msk.f32.mxu1 %vm19000_vm11, %v18712_v25  ;;  %8129 = vmatprep.mubr.msk.f32.mxu0 %vm19002_vm5, %v18712_v25  ;;  %vm19007_vm11 = vnez %v18790_v21  ;;  %vm19009_vm5 = vnez %v18794_v20  ;;  %v19095_v21 = vld [vmem:[#allocation186_spill] sm:$0xff]  ;;  %v19099_v20 = vld [vmem:[#allocation257_spill] sm:$0xff] }
 0x59b   : > { %8320 = vmatmul.mubr.msk.f32.gmra.mrb[14].mxu1 %vm19003_vm6, %v18712_v25  ;;  %8130 = vmatmul.mubr.msk.f32.gmra.mrb[16].mxu0 %vm19005_vm0, %v18712_v25  ;;  %vm19010_vm6 = vnez %v18797_v2  ;;  %vm19012_vm0 = vnez %v18801_v54  ;;  %v19101_v2 = vld [vmem:[#allocation216_spill] sm:$0xff]  ;;  %v19105_v54 = vld [vmem:[#allocation293_spill] sm:$0xff] }
 0x59c   : > { %8321 = vmatprep.mubr.msk.f32.mxu1 %vm19004_vm14, %v18712_v25  ;;  %8131 = vmatprep.mubr.msk.f32.mxu0 %vm19006_vm15, %v18712_v25  ;;  %vm19011_vm14 = vnez %v18799_v26  ;;  %vm19013_vm15 = vnez %v18803_v48  ;;  %v19103_v26 = vld [vmem:[#allocation266_spill] sm:$0xff] }
 0x59d   : > { %v19107_v48 = vld [vmem:[#allocation82_spill] sm:$0xff] }
 0x59f   : > { %8322 = vmatmul.mubr.msk.f32.gmra.mrb[16].mxu1 %vm19007_vm11, %v18712_v25  ;;  %8132 = vmatmul.mubr.msk.f32.gmra.mrb[18].mxu0 %vm19009_vm5, %v18712_v25  ;;  %vm19014_vm11 = vnez %v18808_v53  ;;  %vm19016_vm5 = vnez %v18812_v39  ;;  %v19111_v53 = vld [vmem:[#allocation271_spill] sm:$0xff]  ;;  %v19115_v39 = vld [vmem:[#allocation280_spill] sm:$0xff] }
 0x5a0   : > { %8323 = vmatprep.mubr.msk.f32.mxu1 %vm19008_vm8, %v18712_v25  ;;  %8133 = vmatprep.mubr.msk.f32.mxu0 %vm19010_vm6, %v18712_v25  ;;  %vm19015_vm8 = vnez %v18810_v41  ;;  %vm19017_vm6 = vnez %v18815_v8  ;;  %v19113_v41 = vld [vmem:[#allocation205_spill] sm:$0xff]  ;;  %v19117_v8 = vld [vmem:[#allocation302_spill] sm:$0xff] }
 0x5a3   : > { %8324 = vmatmul.mubr.msk.f32.gmra.mrb[18].mxu1 %vm19011_vm14, %v18712_v25  ;;  %8134 = vmatmul.mubr.msk.f32.gmra.mrb[20].mxu0 %vm19013_vm15, %v18712_v25  ;;  %vm19018_vm14 = vnez %v18816_v30  ;;  %vm19021_vm15 = vnez %v18825_v38  ;;  %v19119_v30 = vld [vmem:[#allocation197_spill] sm:$0xff]  ;;  %v19127_v38 = vld [vmem:[#allocation292_spill] sm:$0xff] }
 0x5a4   : > { %8325 = vmatprep.mubr.msk.f32.mxu1 %vm19012_vm0, %v18712_v25  ;;  %8135 = vmatprep.mubr.msk.f32.mxu0 %vm18807_vm7, %v18712_v25  ;;  %vm19019_vm7 = vnez %v18820_v35  ;;  %vm19020_vm0 = vnez %v18823_v27  ;;  %v19123_v35 = vld [vmem:[#allocation285_spill] sm:$0xff]  ;;  %v19125_v27 = vld [vmem:[#allocation219_spill] sm:$0xff] }
 0x5a7   : > { %8326 = vmatmul.mubr.msk.f32.gmra.mrb[20].mxu1 %vm19014_vm11, %v18712_v25  ;;  %8136 = vmatmul.mubr.msk.f32.gmra.mrb[22].mxu0 %vm19016_vm5, %v18712_v25  ;;  %vm19022_vm11 = vnez %v18827_v61  ;;  %vm19027_vm5 = vnez %v19026_v60  ;;  %v19129_v61 = vld [vmem:[#allocation307_spill] sm:$0xff]  ;;  %v19137_v60 = vld [vmem:[#allocation237_spill] sm:$0xff] }
 0x5a8   : > { %8327 = vmatprep.mubr.msk.f32.mxu1 %vm19015_vm8, %v18712_v25  ;;  %8137 = vmatprep.mubr.msk.f32.mxu0 %vm19017_vm6, %v18712_v25  ;;  %vm19023_vm8 = vnez %v18828_v34  ;;  %vm19029_vm6 = vnez %v19028_v32  ;;  %v19131_v34 = vld [vmem:[#allocation214_spill] sm:$0xff]  ;;  %v19139_v32 = vld [vmem:[#allocation300_spill] sm:$0xff] }
 0x5ab   : > { %8328 = vmatmul.mubr.msk.f32.gmra.mrb[22].mxu1 %vm19018_vm14, %v18712_v25  ;;  %8138 = vmatmul.mubr.msk.f32.gmra.mrb[24].mxu0 %vm19019_vm7, %v18712_v25  ;;  %vm19031_vm14 = vnez %v19030_v58  ;;  %vm19033_vm7 = vnez %v19032_v57  ;;  %v19142_v57 = vld [vmem:[#allocation225_spill] sm:$0xff] }
 0x5ac   : > { %8329 = vmatprep.mubr.msk.f32.mxu1 %vm18819_vm10, %v18712_v25  ;;  %8139 = vmatprep.mubr.msk.f32.mxu0 %vm19020_vm0, %v18712_v25  ;;  %vm19025_vm10 = vnez %v19024_v28  ;;  %vm19035_vm0 = vnez %v19034_v0  ;;  %v19135_v28 = vld [vmem:[#allocation296_spill] sm:$0xff]  ;;  %v19144_v0 = vld [vmem:[#allocation317_spill] sm:$0xff] }
 0x5af   : > { %8330 = vmatmul.mubr.msk.f32.gmra.mrb[24].mxu1 %vm19021_vm15, %v18712_v25  ;;  %8140 = vmatmul.mubr.msk.f32.gmra.mrb[26].mxu0 %vm19023_vm8, %v18712_v25  ;;  %vm19037_vm15 = vnez %v19036_v10  ;;  %vm19041_vm8 = vnez %v19040_v44  ;;  %v19146_v10 = vld [vmem:[#allocation306_spill] sm:$0xff]  ;;  %v19149_v44 = vld [vmem:[#allocation309_spill] sm:$0xff] }
 0x5b0   : > { %8331 = vmatprep.mubr.msk.f32.mxu1 %vm19022_vm11, %v18712_v25  ;;  %8141 = vmatprep.mubr.msk.f32.mxu0 %vm19025_vm10, %v18712_v25  ;;  %vm19039_vm11 = vnez %v19038_v7  ;;  %vm19042_vm10 = vnez %v18850_v9  ;;  %v19133_v9 = vld [vmem:[#allocation310_spill] sm:$0xff] }
 0x5b3   : > { %8332 = vmatmul.mubr.msk.f32.gmra.mrb[26].mxu1 %vm19027_vm5, %v18712_v25  ;;  %8142 = vmatmul.mubr.msk.f32.gmra.mrb[28].mxu0 %vm19031_vm14, %v18712_v25  ;;  %vm19044_vm5 = vnez %v19043_v23  ;;  %vm19048_vm14 = vnez %v19047_v14  ;;  %v19157_v14 = vld [vmem:[#allocation36_spill] sm:$0xff] }
 0x5b4   : > { %8333 = vmatprep.mubr.msk.f32.mxu1 %vm19029_vm6, %v18712_v25  ;;  %8143 = vmatprep.mubr.msk.f32.mxu0 %vm19033_vm7, %v18712_v25  ;;  %vm19046_vm6 = vcmp.gt.f32.partialorder %v19045_v62, %v18855_v55  ;;  %vm19050_vm7 = vcmp.gt.f32.partialorder %v19049_v13, %v18860_v24 }
 0x5b7   : > { %8334 = vmatmul.mubr.msk.f32.gmra.mrb[28].mxu1 %vm19035_vm0, %v18712_v25  ;;  %8144 = vmatmul.mubr.msk.f32.gmra.mrb[30].mxu0 %vm19039_vm11, %v18712_v25  ;;  %vm19052_vm0 = vnez %v19051_v22  ;;  %vm19056_vm11 = vnez %v19055_v1 }
 0x5b8   : > { %8335 = vmatprep.mubr.msk.f32.mxu1 %vm19037_vm15, %v18712_v25  ;;  %8145 = vmatprep.mubr.msk.f32.mxu0 %vm19041_vm8, %v18712_v25  ;;  %vm19054_vm15 = vcmp.gt.f32.partialorder %v19053_v56, %v18855_v55  ;;  %vm19058_vm8 = vcmp.gt.f32.partialorder %v19057_v19, %v18860_v24 }
 0x5bb   : > { %8336 = vmatmul.mubr.msk.f32.gmra.mrb[30].mxu1 %vm19042_vm10, %v18712_v25  ;;  %8146 = vmatmul.mubr.msk.f32.gmra.mrb[32].mxu0 %vm19046_vm6, %v18712_v25  ;;  %vm19061_vm10 = vcmp.gt.f32.partialorder %v19060_v29, %v18855_v55  ;;  %vm19065_vm6 = vcmp.gt.f32.partialorder %v19064_v4, %v18860_v24 }
 0x5bc   : > { %8337 = vmatprep.mubr.msk.f32.mxu1 %vm19044_vm5, %v18712_v25  ;;  %8147 = vmatprep.mubr.msk.f32.mxu0 %vm19048_vm14, %v18712_v25  ;;  %vm19063_vm5 = vnez %v19062_v15  ;;  %vm19067_vm14 = vnez %v19066_v42 }
 0x5bf   : > { %8338 = vmatmul.mubr.msk.f32.gmra.mrb[32].mxu1 %vm19050_vm7, %v18712_v25  ;;  %8148 = vmatmul.mubr.msk.f32.gmra.mrb[34].mxu0 %vm19054_vm15, %v18712_v25  ;;  %vm19071_vm7 = vnez %v19070_v59  ;;  %vm19075_vm15 = vnez %v19074_v49 }
 0x5c0   : > { %8339 = vmatprep.mubr.msk.f32.mxu1 %vm19052_vm0, %v18712_v25  ;;  %8149 = vmatprep.mubr.msk.f32.mxu0 %vm19056_vm11, %v18712_v25  ;;  %vm19073_vm0 = vcmp.gt.f32.partialorder %v19072_v3, %v18860_v24  ;;  %vm19077_vm11 = vcmp.gt.f32.partialorder %v19076_v52, %v18855_v55 }
 0x5c3   : > { %8340 = vmatmul.mubr.msk.f32.gmra.mrb[34].mxu1 %vm19058_vm8, %v18712_v25  ;;  %8150 = vmatmul.mubr.msk.f32.gmra.mrb[36].mxu0 %vm19061_vm10, %v18712_v25  ;;  %vm19080_vm8 = vcmp.gt.f32.partialorder %v19079_v36, %v18860_v24  ;;  %vm19082_vm10 = vnez %v19081_v46 }
 0x5c4   : > { %8341 = vmatprep.mubr.msk.f32.mxu1 %vm18871_vm12, %v18712_v25  ;;  %8151 = vmatprep.mubr.msk.f32.mxu0 %vm19063_vm5, %v18712_v25  ;;  %vm19069_vm12 = vcmp.gt.f32.partialorder %v19068_v5, %v18855_v55  ;;  %vm19084_vm5 = vcmp.gt.f32.partialorder %v19083_v16, %v18855_v55 }
 0x5c7   : > { %8342 = vmatmul.mubr.msk.f32.gmra.mrb[36].mxu1 %vm19065_vm6, %v18712_v25  ;;  %8152 = vmatmul.mubr.msk.f32.gmra.mrb[38].mxu0 %vm19069_vm12, %v18712_v25  ;;  %vm19086_vm6 = vnez %v19085_v17  ;;  %vm19092_vm12 = vcmp.gt.f32.partialorder %v19091_v40, %v18855_v55 }
 0x5c8   : > { %8343 = vmatprep.mubr.msk.f32.mxu1 %vm19067_vm14, %v18712_v25  ;;  %8153 = vmatprep.mubr.msk.f32.mxu0 %vm19071_vm7, %v18712_v25  ;;  %vm19090_vm14 = vnez %v19089_v50  ;;  %vm19094_vm7 = vnez %v19093_v11 }
 0x5cb   : > { %8344 = vmatmul.mubr.msk.f32.gmra.mrb[38].mxu1 %vm19073_vm0, %v18712_v25  ;;  %8154 = vmatmul.mubr.msk.f32.gmra.mrb[40].mxu0 %vm19077_vm11, %v18712_v25  ;;  %vm19096_vm0 = vcmp.gt.f32.partialorder %v19095_v21, %v18860_v24  ;;  %vm19100_vm11 = vcmp.gt.f32.partialorder %v19099_v20, %v18855_v55 }
 0x5cc   : > { %8345 = vmatprep.mubr.msk.f32.mxu1 %vm19075_vm15, %v18712_v25  ;;  %8155 = vmatprep.mubr.msk.f32.mxu0 %vm18890_vm1, %v18712_v25  ;;  %vm19088_vm1 = vcmp.gt.f32.partialorder %v19087_v6, %v18860_v24  ;;  %vm19098_vm15 = vnez %v19097_v51 }
 0x5cf   : > { %8346 = vmatmul.mubr.msk.f32.gmra.mrb[40].mxu1 %vm19080_vm8, %v18712_v25  ;;  %8156 = vmatmul.mubr.msk.f32.gmra.mrb[42].mxu0 %vm19084_vm5, %v18712_v25  ;;  %vm19102_vm8 = vnez %v19101_v2  ;;  %vm19106_vm5 = vnez %v19105_v54 }
 0x5d0   : > { %8347 = vmatprep.mubr.msk.f32.mxu1 %vm19082_vm10, %v18712_v25  ;;  %8157 = vmatprep.mubr.msk.f32.mxu0 %vm19086_vm6, %v18712_v25  ;;  %vm19104_vm10 = vcmp.gt.f32.partialorder %v19103_v26, %v18860_v24  ;;  %vm19108_vm6 = vcmp.gt.f32.partialorder %v19107_v48, %v18855_v55 }
 0x5d3   : > { %8348 = vmatmul.mubr.msk.f32.gmra.mrb[42].mxu1 %vm19088_vm1, %v18712_v25  ;;  %8158 = vmatmul.mubr.msk.f32.gmra.mrb[44].mxu0 %vm19092_vm12, %v18712_v25  ;;  %vm19110_vm1 = vnez %v19109_v63  ;;  %vm19114_vm12 = vnez %v19113_v41 }
 0x5d4   : > { %8349 = vmatprep.mubr.msk.f32.mxu1 %vm19090_vm14, %v18712_v25  ;;  %8159 = vmatprep.mubr.msk.f32.mxu0 %vm19094_vm7, %v18712_v25  ;;  %vm19112_vm14 = vcmp.gt.f32.partialorder %v19111_v53, %v18860_v24  ;;  %vm19116_vm7 = vcmp.gt.f32.partialorder %v19115_v39, %v18855_v55 }
 0x5d7   : > { %8350 = vmatmul.mubr.msk.f32.gmra.mrb[44].mxu1 %vm19096_vm0, %v18712_v25  ;;  %8160 = vmatmul.mubr.msk.f32.gmra.mrb[46].mxu0 %vm19100_vm11, %v18712_v25  ;;  %vm19118_vm0 = vnez %v19117_v8  ;;  %vm19122_vm11 = vnez %v19121_v12 }
 0x5d8   : > { %8351 = vmatprep.mubr.msk.f32.mxu1 %vm19098_vm15, %v18712_v25  ;;  %8161 = vmatprep.mubr.msk.f32.mxu0 %vm19102_vm8, %v18712_v25  ;;  %vm19120_vm15 = vcmp.gt.f32.partialorder %v19119_v30, %v18860_v24  ;;  %vm19124_vm8 = vcmp.gt.f32.partialorder %v19123_v35, %v18855_v55 }
 0x5db   : > { %8352 = vmatmul.mubr.msk.f32.gmra.mrb[46].mxu1 %vm19104_vm10, %v18712_v25  ;;  %8162 = vmatmul.mubr.msk.f32.gmra.mrb[48].mxu0 %vm19108_vm6, %v18712_v25  ;;  %vm19126_vm10 = vnez %v19125_v27  ;;  %vm19130_vm6 = vnez %v19129_v61 }
 0x5dc   : > { %8353 = vmatprep.mubr.msk.f32.mxu1 %vm19106_vm5, %v18712_v25  ;;  %8163 = vmatprep.mubr.msk.f32.mxu0 %vm19110_vm1, %v18712_v25  ;;  %vm19128_vm5 = vcmp.gt.f32.partialorder %v19127_v38, %v18860_v24  ;;  %vm19132_vm1 = vcmp.gt.f32.partialorder %v19131_v34, %v18855_v55 }
 0x5df   : > { %8354 = vmatmul.mubr.msk.f32.gmra.mrb[48].mxu1 %vm19112_vm14, %v18712_v25  ;;  %8164 = vmatmul.mubr.msk.f32.gmra.mrb[50].mxu0 %vm19116_vm7, %v18712_v25  ;;  %vm19134_vm14 = vnez %v19133_v9  ;;  %vm19138_vm7 = vnez %v19137_v60 }
 0x5e0   : > { %8355 = vmatprep.mubr.msk.f32.mxu1 %vm19114_vm12, %v18712_v25  ;;  %8165 = vmatprep.mubr.msk.f32.mxu0 %vm19118_vm0, %v18712_v25  ;;  %vm19136_vm12 = vcmp.gt.f32.partialorder %v19135_v28, %v18860_v24  ;;  %vm19140_vm0 = vcmp.gt.f32.partialorder %v19139_v32, %v18855_v55 }
 0x5e3   : > { %8356 = vmatmul.mubr.msk.f32.gmra.mrb[50].mxu1 %vm19120_vm15, %v18712_v25  ;;  %8166 = vmatmul.mubr.msk.f32.gmra.mrb[52].mxu0 %vm19124_vm8, %v18712_v25  ;;  %vm19143_vm15 = vcmp.gt.f32.partialorder %v19142_v57, %v18860_v24  ;;  %vm19147_vm8 = vcmp.gt.f32.partialorder %v19146_v10, %v18855_v55 }
 0x5e4   : > { %8357 = vmatprep.mubr.msk.f32.mxu1 %vm19122_vm11, %v18712_v25  ;;  %8167 = vmatprep.mubr.msk.f32.mxu0 %vm19126_vm10, %v18712_v25  ;;  %vm19145_vm11 = vnez %v19144_v0  ;;  %vm19152_vm10 = vcmp.gt.f32.partialorder %v18965_v18, %v18855_v55 }
 0x5e7   : > { %8358 = vmatmul.mubr.msk.f32.gmra.mrb[52].mxu1 %vm19128_vm5, %v18712_v25  ;;  %8168 = vmatmul.mubr.msk.f32.gmra.mrb[54].mxu0 %vm19132_vm1, %v18712_v25  ;;  %vm19156_vm5 = vcmp.gt.f32.partialorder %v18973_v43, %v18860_v24 }
 0x5e8   : > { %8359 = vmatprep.mubr.msk.f32.mxu1 %vm19130_vm6, %v18712_v25  ;;  %8169 = vmatprep.mubr.msk.f32.mxu0 %vm19134_vm14, %v18712_v25 }
 0x5eb   : > { %8360 = vmatmul.mubr.msk.f32.gmra.mrb[54].mxu1 %vm19136_vm12, %v18712_v25  ;;  %8170 = vmatmul.mubr.msk.f32.gmra.mrb[56].mxu0 %vm19140_vm0, %v18712_v25 }
 0x5ec   : > { %8361 = vmatprep.mubr.msk.f32.mxu1 %vm19138_vm7, %v18712_v25  ;;  %8171 = vmatprep.mubr.msk.f32.mxu0 %vm18953_vm2, %v18712_v25  ;;  %vm19150_vm2 = vcmp.gt.f32.partialorder %v19149_v44, %v18860_v24  ;;  %vm19161_vm7 = vcmask 1040384  }
 0x5ed   : > { %vm19162_vm0 = vmmov %vm19161_vm7 }
 0x5ef   : > { %8362 = vmatmul.mubr.msk.f32.gmra.mrb[56].mxu1 %vm19143_vm15, %v18712_v25  ;;  %8172 = vmatmul.mubr.msk.f32.gmra.mrb[58].mxu0 %vm19147_vm8, %v18712_v25 }
 0x5f0   : > { %8363 = vmatprep.mubr.msk.f32.mxu1 %vm19145_vm11, %v18712_v25  ;;  %8173 = vmatprep.mubr.msk.f32.mxu0 %vm18309_vm3, %v18712_v25  ;;  %vm19154_vm3 = vcmp.gt.f32.partialorder %v18968_v37, %v18860_v24 }
 0x5f3   : > { %8364 = vmatmul.mubr.msk.f32.gmra.mrb[58].mxu1 %vm19150_vm2, %v18712_v25  ;;  %8174 = vmatmul.mubr.msk.f32.gmra.mrb[60].mxu0 %vm19152_vm10, %v18712_v25 }
 0x5f4   : > { %8365 = vmatprep.mubr.msk.f32.mxu1 %vm18964_vm4, %v18712_v25  ;;  %8175 = vmatprep.mubr.msk.f32.mxu0 %vm13864_vm13, %v18712_v25  ;;  %vm19155_vm4 = vcmp.gt.f32.partialorder %v18971_v45, %v18855_v55  ;;  %vm7145_vm13 = vcmp.eq.s32.totalorder %v19157_v14, 0 }
 0x5f7   : > { %8366 = vmatmul.mubr.msk.f32.gmra.mrb[60].mxu1 %vm19154_vm3, %v18712_v25  ;;  %8176 = vmatmul.mubr.msk.f32.gmra.mrb[62].mxu0 %vm19155_vm4, %v18712_v25 }
 0x5f8   : > { %8367 = vmatprep.mubr.msk.f32.mxu1 %vm18316_vm9, %v18712_v25  ;;  %vm508_vm9 = vcmask 15360  }
 0x5fb   : > { %8368 = vmatmul.mubr.msk.f32.gmra.mrb[62].mxu1 %vm19156_vm5, %v18712_v25 }
 0x64e   : > { %v4326_v18 = vpop.f32.mrb[0].mxu0 }
 0x64f   : > { %v4328_v13 = vpop.f32.mrb[1].mxu0 }
 0x652   : > { %v6924_v37 = vpop.f32.mrb[0].mxu1  ;;  %v4333_v55 = vpop.f32.mrb[2].mxu0 }
 0x653   : > { %v15836_v22 = vsel %vm7145_vm13, %v4326_v18, %v6924_v37  ;;  %v6926_v47 = vpop.f32.mrb[1].mxu1  ;;  %v4335_v45 = vpop.f32.mrb[3].mxu0 }
 0x654   : > { %7242 = vrot.lane.b32.xlu1 %v15836_v22, %s9758_s17  ;;  %vm7178_vm6 = vcmp.gt.f32.partialorder %v15836_v22, 0.0  ;;  %v7631_v22 = vld [vmem:[#allocation2 + $0x2] ss:$8 sm:$0x3] }
 0x656   : > { %v6931_v56 = vpop.f32.mrb[2].mxu1  ;;  %v4340_v43 = vpop.f32.mrb[4].mxu0 }
 0x657   : > { %v15842_v25 = vsel %vm7145_vm13, %v4333_v55, %v6931_v56  ;;  %v6933_v24 = vpop.f32.mrb[3].mxu1  ;;  %v4342_v1 = vpop.f32.mrb[5].mxu0 }
 0x658   : > { %7244 = vrot.lane.b32.xlu1 %v15842_v25, %s9758_s17  ;;  %vm7179_vm1 = vcmp.gt.f32.partialorder %v15842_v25, 0.0 }
 0x65a   : > { %v6938_v19 = vpop.f32.mrb[4].mxu1  ;;  %v4347_v15 = vpop.f32.mrb[6].mxu0 }
 0x65b   : > { %v15848_v33 = vsel %vm7145_vm13, %v4340_v43, %v6938_v19  ;;  %v6940_v29 = vpop.f32.mrb[5].mxu1  ;;  %v4349_v4 = vpop.f32.mrb[7].mxu0 }
 0x65c   : > { %7246 = vrot.lane.b32.xlu0 %v15848_v33, %s9758_s17  ;;  %vm7180_vm14 = vcmp.gt.f32.partialorder %v15848_v33, 0.0 }
 0x65e   : > { %v6945_v42 = vpop.f32.mrb[6].mxu1  ;;  %v4354_v3 = vpop.f32.mrb[8].mxu0 }
 0x65f   : > { %v15854_v5 = vsel %vm7145_vm13, %v4347_v15, %v6945_v42  ;;  %v6947_v59 = vpop.f32.mrb[7].mxu1  ;;  %v4356_v49 = vpop.f32.mrb[9].mxu0 }
 0x660   : > { %7248 = vrot.lane.b32.xlu1 %v15854_v5, %s9758_s17  ;;  %vm7181_vm12 = vcmp.gt.f32.partialorder %v15854_v5, 0.0 }
 0x662   : > { %v6952_v52 = vpop.f32.mrb[8].mxu1  ;;  %v4361_v46 = vpop.f32.mrb[10].mxu0 }
 0x663   : > { %v15860_v31 = vsel %vm7145_vm13, %v4354_v3, %v6952_v52  ;;  %v6954_v36 = vpop.f32.mrb[9].mxu1  ;;  %v4363_v16 = vpop.f32.mrb[11].mxu0 }
 0x664   : > { %7250 = vrot.lane.b32.xlu0 %v15860_v31, %s9758_s17  ;;  %vm7182_vm15 = vcmp.gt.f32.partialorder %v15860_v31, 0.0 }
 0x666   : > { %v6959_v17 = vpop.f32.mrb[10].mxu1  ;;  %v4368_v40 = vpop.f32.mrb[12].mxu0 }
 0x667   : > { %v15866_v6 = vsel %vm7145_vm13, %v4361_v46, %v6959_v17  ;;  %v6961_v50 = vpop.f32.mrb[11].mxu1  ;;  %v4370_v11 = vpop.f32.mrb[13].mxu0 }
 0x668   : > { %7252 = vrot.lane.b32.xlu1 %v15866_v6, %s9758_s17  ;;  %vm7183_vm11 = vcmp.gt.f32.partialorder %v15866_v6, 0.0 }
 0x66a   : > { %v6966_v21 = vpop.f32.mrb[12].mxu1  ;;  %v4375_v2 = vpop.f32.mrb[14].mxu0 }
 0x66b   : > { %v15872_v51 = vsel %vm7145_vm13, %v4368_v40, %v6966_v21  ;;  %v6968_v20 = vpop.f32.mrb[13].mxu1  ;;  %v4377_v26 = vpop.f32.mrb[15].mxu0 }
 0x66c   : > { %7254 = vrot.lane.b32.xlu0 %v15872_v51, %s9758_s17  ;;  %vm7184_vm8 = vcmp.gt.f32.partialorder %v15872_v51, 0.0 }
 0x66e   : > { %v6973_v54 = vpop.f32.mrb[14].mxu1  ;;  %v4382_v53 = vpop.f32.mrb[16].mxu0 }
 0x66f   : > { %v15878_v48 = vsel %vm7145_vm13, %v4375_v2, %v6973_v54  ;;  %v6975_v63 = vpop.f32.mrb[15].mxu1  ;;  %v4384_v41 = vpop.f32.mrb[17].mxu0 }
 0x670   : > { %7256 = vrot.lane.b32.xlu1 %v15878_v48, %s9758_s17  ;;  %vm7185_vm2 = vcmp.gt.f32.partialorder %v15878_v48, 0.0 }
 0x672   : > { %v6980_v39 = vpop.f32.mrb[16].mxu1  ;;  %v4389_v12 = vpop.f32.mrb[18].mxu0 }
 0x673   : > { %v15884_v8 = vsel %vm7145_vm13, %v4382_v53, %v6980_v39  ;;  %v6982_v30 = vpop.f32.mrb[17].mxu1  ;;  %v4391_v35 = vpop.f32.mrb[19].mxu0 }
 0x674   : > { %7258 = vrot.lane.b32.xlu0 %v15884_v8, %s9758_s17  ;;  %vm7186_vm10 = vcmp.gt.f32.partialorder %v15884_v8, 0.0 }
 0x676   : > { %v6987_v27 = vpop.f32.mrb[18].mxu1  ;;  %v4396_v34 = vpop.f32.mrb[20].mxu0 }
 0x677   : > { %v15890_v38 = vsel %vm7145_vm13, %v4389_v12, %v6987_v27  ;;  %v6989_v61 = vpop.f32.mrb[19].mxu1  ;;  %v4398_v9 = vpop.f32.mrb[21].mxu0 }
 0x678   : > { %7260 = vrot.lane.b32.xlu1 %v15890_v38, %s9758_s17  ;;  %vm7187_vm3 = vcmp.gt.f32.partialorder %v15890_v38, 0.0 }
 0x67a   : > { %v6994_v28 = vpop.f32.mrb[20].mxu1  ;;  %v4403_v58 = vpop.f32.mrb[22].mxu0 }
 0x67b   : > { %v15896_v60 = vsel %vm7145_vm13, %v4396_v34, %v6994_v28  ;;  %v6996_v32 = vpop.f32.mrb[21].mxu1  ;;  %v4405_v57 = vpop.f32.mrb[23].mxu0 }
 0x67c   : > { %7262 = vrot.lane.b32.xlu0 %v15896_v60, %s9758_s17  ;;  %vm7188_vm4 = vcmp.gt.f32.partialorder %v15896_v60, 0.0 }
 0x67e   : > { %v7001_v0 = vpop.f32.mrb[22].mxu1  ;;  %v4410_v44 = vpop.f32.mrb[24].mxu0 }
 0x67f   : > { %v15902_v10 = vsel %vm7145_vm13, %v4403_v58, %v7001_v0  ;;  %v7003_v7 = vpop.f32.mrb[23].mxu1  ;;  %v4412_v23 = vpop.f32.mrb[25].mxu0 }
 0x680   : > { %7264 = vrot.lane.b32.xlu1 %v15902_v10, %s9758_s17  ;;  %vm7189_vm5 = vcmp.gt.f32.partialorder %v15902_v10, 0.0 }
 0x682   : > { %v7008_v62 = vpop.f32.mrb[24].mxu1  ;;  %v4417_v37 = vpop.f32.mrb[26].mxu0 }
 0x683   : > { %v15908_v18 = vsel %vm7145_vm13, %v4410_v44, %v7008_v62  ;;  %v7010_v13 = vpop.f32.mrb[25].mxu1  ;;  %v4419_v47 = vpop.f32.mrb[27].mxu0 }
 0x684   : > { %7266 = vrot.lane.b32.xlu0 %v15908_v18, %s9758_s17 }
 0x686   : > { %v7015_v55 = vpop.f32.mrb[26].mxu1  ;;  %v4424_v24 = vpop.f32.mrb[28].mxu0 }
 0x687   : > { %v15914_v45 = vsel %vm7145_vm13, %v4417_v37, %v7015_v55  ;;  %v7017_v56 = vpop.f32.mrb[27].mxu1  ;;  %v4426_v43 = vpop.f32.mrb[29].mxu0 }
 0x688   : > { %7268 = vrot.lane.b32.xlu1 %v15914_v45, %s9758_s17 }
 0x68a   : > { %v7022_v1 = vpop.f32.mrb[28].mxu1  ;;  %v4431_v15 = vpop.f32.mrb[30].mxu0 }
 0x68b   : > { %v15920_v19 = vsel %vm7145_vm13, %v4424_v24, %v7022_v1  ;;  %v7024_v29 = vpop.f32.mrb[29].mxu1  ;;  %v4433_v4 = vpop.f32.mrb[31].mxu0 }
 0x68c   : > { %7270 = vrot.lane.b32.xlu0 %v15920_v19, %s9758_s17 }
 0x68e   : > { %v7029_v42 = vpop.f32.mrb[30].mxu1  ;;  %v4438_v49 = vpop.f32.mrb[32].mxu0 }
 0x68f   : > { %v15926_v59 = vsel %vm7145_vm13, %v4431_v15, %v7029_v42  ;;  %v7031_v3 = vpop.f32.mrb[31].mxu1  ;;  %v4440_v52 = vpop.f32.mrb[33].mxu0 }
 0x690   : > { %7272 = vrot.lane.b32.xlu1 %v15926_v59, %s9758_s17 }
 0x692   : > { %v7036_v36 = vpop.f32.mrb[32].mxu1  ;;  %v4445_v17 = vpop.f32.mrb[34].mxu0 }
 0x693   : > { %v15932_v46 = vsel %vm7145_vm13, %v4438_v49, %v7036_v36  ;;  %v7038_v16 = vpop.f32.mrb[33].mxu1  ;;  %v4447_v50 = vpop.f32.mrb[35].mxu0 }
 0x694   : > { %7274 = vrot.lane.b32.xlu0 %v15932_v46, %s9758_s17 }
 0x696   : > { %v7043_v40 = vpop.f32.mrb[34].mxu1  ;;  %v4452_v20 = vpop.f32.mrb[36].mxu0 }
 0x697   : > { %v15938_v11 = vsel %vm7145_vm13, %v4445_v17, %v7043_v40  ;;  %v7045_v21 = vpop.f32.mrb[35].mxu1  ;;  %v4454_v2 = vpop.f32.mrb[37].mxu0 }
 0x698   : > { %7276 = vrot.lane.b32.xlu1 %v15938_v11, %s9758_s17  ;;  %v19158_v2 = vmov 0.0  }
 0x699   : > { %509 = vst.msk [vmem:[#allocation4] sm:$0xff] %vm508_vm9, %v19158_v2  ;;  %510 = vst.msk [vmem:[#allocation4 + $0x8] sm:$0xff] %vm508_vm9, %v19158_v2 }
 0x69a   : > { %v7050_v26 = vpop.f32.mrb[36].mxu1  ;;  %v4459_v53 = vpop.f32.mrb[38].mxu0  ;;  %511 = vst.msk [vmem:[#allocation4 + $0x10] sm:$0xff] %vm508_vm9, %v19158_v2  ;;  %512 = vst.msk [vmem:[#allocation4 + $0x18] sm:$0xff] %vm508_vm9, %v19158_v2 }
 0x69b   : > { %v15944_v54 = vsel %vm7145_vm13, %v4452_v20, %v7050_v26  ;;  %v7052_v63 = vpop.f32.mrb[37].mxu1  ;;  %v4461_v41 = vpop.f32.mrb[39].mxu0  ;;  %513 = vst.msk [vmem:[#allocation4 + $0x20] sm:$0xff] %vm508_vm9, %v19158_v2  ;;  %514 = vst.msk [vmem:[#allocation4 + $0x28] sm:$0xff] %vm508_vm9, %v19158_v2 }
 0x69c   : > { %7278 = vrot.lane.b32.xlu0 %v15944_v54, %s9758_s17  ;;  %515 = vst.msk [vmem:[#allocation4 + $0x30] sm:$0xff] %vm508_vm9, %v19158_v2  ;;  %516 = vst.msk [vmem:[#allocation4 + $0x38] sm:$0xff] %vm508_vm9, %v19158_v2 }
 0x69d   : > { %517 = vst.msk [vmem:[#allocation4 + $0x40] sm:$0xff] %vm508_vm9, %v19158_v2  ;;  %518 = vst.msk [vmem:[#allocation4 + $0x48] sm:$0xff] %vm508_vm9, %v19158_v2 }
 0x69e   : > { %v7057_v39 = vpop.f32.mrb[38].mxu1  ;;  %v4466_v35 = vpop.f32.mrb[40].mxu0  ;;  %519 = vst.msk [vmem:[#allocation4 + $0x50] sm:$0xff] %vm508_vm9, %v19158_v2  ;;  %520 = vst.msk [vmem:[#allocation4 + $0x58] sm:$0xff] %vm508_vm9, %v19158_v2 }
 0x69f   : > { %v15950_v30 = vsel %vm7145_vm13, %v4459_v53, %v7057_v39  ;;  %v7059_v12 = vpop.f32.mrb[39].mxu1  ;;  %v4468_v27 = vpop.f32.mrb[41].mxu0  ;;  %521 = vst.msk [vmem:[#allocation4 + $0x60] sm:$0xff] %vm508_vm9, %v19158_v2  ;;  %522 = vst.msk [vmem:[#allocation4 + $0x68] sm:$0xff] %vm508_vm9, %v19158_v2 }
 0x6a0   : > { %7280 = vrot.lane.b32.xlu1 %v15950_v30, %s9758_s17  ;;  %523 = vst.msk [vmem:[#allocation4 + $0x70] sm:$0xff] %vm508_vm9, %v19158_v2  ;;  %524 = vst.msk [vmem:[#allocation4 + $0x78] sm:$0xff] %vm508_vm9, %v19158_v2 }
 0x6a1   : > { %525 = vst.msk [vmem:[#allocation4 + $0x80] sm:$0xff] %vm508_vm9, %v19158_v2  ;;  %526 = vst.msk [vmem:[#allocation4 + $0x88] sm:$0xff] %vm508_vm9, %v19158_v2 }
 0x6a2   : > { %v7064_v61 = vpop.f32.mrb[40].mxu1  ;;  %v4473_v28 = vpop.f32.mrb[42].mxu0  ;;  %527 = vst.msk [vmem:[#allocation4 + $0x90] sm:$0xff] %vm508_vm9, %v19158_v2  ;;  %528 = vst.msk [vmem:[#allocation4 + $0x98] sm:$0xff] %vm508_vm9, %v19158_v2 }
 0x6a3   : > { %v15956_v34 = vsel %vm7145_vm13, %v4466_v35, %v7064_v61  ;;  %v7066_v9 = vpop.f32.mrb[41].mxu1  ;;  %v4475_v32 = vpop.f32.mrb[43].mxu0  ;;  %529 = vst.msk [vmem:[#allocation4 + $0xa0] sm:$0xff] %vm508_vm9, %v19158_v2  ;;  %530 = vst.msk [vmem:[#allocation4 + $0xa8] sm:$0xff] %vm508_vm9, %v19158_v2 }
 0x6a4   : > { %7282 = vrot.lane.b32.xlu0 %v15956_v34, %s9758_s17  ;;  %531 = vst.msk [vmem:[#allocation4 + $0xb0] sm:$0xff] %vm508_vm9, %v19158_v2  ;;  %532 = vst.msk [vmem:[#allocation4 + $0xb8] sm:$0xff] %vm508_vm9, %v19158_v2  ;;  %v7539_v51 = vld [vmem:[#allocation4 + $0x48] sm:$0xff] }
 0x6a5   : > { %533 = vst.msk [vmem:[#allocation4 + $0xc0] sm:$0xff] %vm508_vm9, %v19158_v2  ;;  %534 = vst.msk [vmem:[#allocation4 + $0xc8] sm:$0xff] %vm508_vm9, %v19158_v2  ;;  %v7540_v48 = vld [vmem:[#allocation4 + $0x50] sm:$0xff]  ;;  %v7541_v8 = vld [vmem:[#allocation4 + $0x58] sm:$0xff] }
 0x6a6   : > { %v7071_v58 = vpop.f32.mrb[42].mxu1  ;;  %v4480_v7 = vpop.f32.mrb[44].mxu0  ;;  %535 = vst.msk [vmem:[#allocation4 + $0xd0] sm:$0xff] %vm508_vm9, %v19158_v2  ;;  %536 = vst.msk [vmem:[#allocation4 + $0xd8] sm:$0xff] %vm508_vm9, %v19158_v2  ;;  %v7542_v38 = vld [vmem:[#allocation4 + $0x60] sm:$0xff]  ;;  %v7543_v60 = vld [vmem:[#allocation4 + $0x68] sm:$0xff] }
 0x6a7   : > { %v15962_v57 = vsel %vm7145_vm13, %v4473_v28, %v7071_v58  ;;  %v7073_v0 = vpop.f32.mrb[43].mxu1  ;;  %v4482_v44 = vpop.f32.mrb[45].mxu0  ;;  %537 = vst.msk [vmem:[#allocation4 + $0xe0] sm:$0xff] %vm508_vm9, %v19158_v2  ;;  %538 = vst.msk [vmem:[#allocation4 + $0xe8] sm:$0xff] %vm508_vm9, %v19158_v2  ;;  %v7544_v10 = vld [vmem:[#allocation4 + $0x70] sm:$0xff] }
 0x6a8   : > { %7284 = vrot.lane.b32.xlu1 %v15962_v57, %s9758_s17  ;;  %539 = vst.msk [vmem:[#allocation4 + $0xf0] sm:$0xff] %vm508_vm9, %v19158_v2  ;;  %540 = vst.msk [vmem:[#allocation4 + $0xf8] sm:$0xff] %vm508_vm9, %v19158_v2 }
 0x6aa   : > { %v7078_v23 = vpop.f32.mrb[44].mxu1  ;;  %v4487_v37 = vpop.f32.mrb[46].mxu0 }
 0x6ab   : > { %v15968_v62 = vsel %vm7145_vm13, %v4480_v7, %v7078_v23  ;;  %v7080_v13 = vpop.f32.mrb[45].mxu1  ;;  %v4489_v47 = vpop.f32.mrb[47].mxu0  ;;  %v9680_v7 = vld [vmem:[#allocation3] sm:$0xff] }
 0x6ac   : > { %7286 = vrot.lane.b32.xlu0 %v15968_v62, %s9758_s17 }
 0x6ae   : > { %v7085_v55 = vpop.f32.mrb[46].mxu1  ;;  %v4494_v43 = vpop.f32.mrb[48].mxu0 }
 0x6af   : > { %v15974_v56 = vsel %vm7145_vm13, %v4487_v37, %v7085_v55  ;;  %v7087_v24 = vpop.f32.mrb[47].mxu1  ;;  %v4496_v1 = vpop.f32.mrb[49].mxu0 }
 0x6b0   : > { %7288 = vrot.lane.b32.xlu1 %v15974_v56, %s9758_s17 }
 0x6b2   : > { %v7092_v29 = vpop.f32.mrb[48].mxu1  ;;  %v4501_v42 = vpop.f32.mrb[50].mxu0 }
 0x6b3   : > { %v15980_v15 = vsel %vm7145_vm13, %v4494_v43, %v7092_v29  ;;  %v7094_v4 = vpop.f32.mrb[49].mxu1  ;;  %v4503_v3 = vpop.f32.mrb[51].mxu0  ;;  %v9681_v43 = vld [vmem:[#allocation3 + $0x8] sm:$0xff] }
 0x6b4   : > { %7290 = vrot.lane.b32.xlu0 %v15980_v15, %s9758_s17 }
 0x6b6   : > { %v7099_v49 = vpop.f32.mrb[50].mxu1  ;;  %v4508_v16 = vpop.f32.mrb[52].mxu0 }
 0x6b7   : > { %v15986_v52 = vsel %vm7145_vm13, %v4501_v42, %v7099_v49  ;;  %v7101_v36 = vpop.f32.mrb[51].mxu1  ;;  %v4510_v17 = vpop.f32.mrb[53].mxu0 }
 0x6b8   : > { %7292 = vrot.lane.b32.xlu1 %v15986_v52, %s9758_s17 }
 0x6ba   : > { %v7106_v50 = vpop.f32.mrb[52].mxu1  ;;  %v4515_v20 = vpop.f32.mrb[54].mxu0 }
 0x6bb   : > { %v15992_v40 = vsel %vm7145_vm13, %v4508_v16, %v7106_v50  ;;  %v7108_v21 = vpop.f32.mrb[53].mxu1  ;;  %v4517_v26 = vpop.f32.mrb[55].mxu0  ;;  %v9682_v16 = vld [vmem:[#allocation3 + $0x10] sm:$0xff] }
 0x6bc   : > { %7294 = vrot.lane.b32.xlu0 %v15992_v40, %s9758_s17 }
 0x6be   : > { %v7113_v63 = vpop.f32.mrb[54].mxu1  ;;  %v4522_v39 = vpop.f32.mrb[56].mxu0 }
 0x6bf   : > { %v16062_v53 = vsel %vm7145_vm13, %v4515_v20, %v7113_v63  ;;  %v7115_v41 = vpop.f32.mrb[55].mxu1  ;;  %v4524_v12 = vpop.f32.mrb[57].mxu0  ;;  %v9683_v20 = vld [vmem:[#allocation3 + $0x18] sm:$0xff] }
 0x6c0   : > { %7296 = vrot.lane.b32.xlu1 %v16062_v53, %s9758_s17  ;;  %v9684_v41 = vld [vmem:[#allocation3 + $0x20] sm:$0xff] }
 0x6c2   : > { %v7120_v35 = vpop.f32.mrb[56].mxu1  ;;  %v4529_v9 = vpop.f32.mrb[58].mxu0 }
 0x6c3   : > { %v16068_v27 = vsel %vm7145_vm13, %v4522_v39, %v7120_v35  ;;  %v7122_v61 = vpop.f32.mrb[57].mxu1  ;;  %v4531_v28 = vpop.f32.mrb[59].mxu0  ;;  %v9685_v35 = vld [vmem:[#allocation3 + $0x28] sm:$0xff] }
 0x6c4   : > { %7298 = vrot.lane.b32.xlu0 %v16068_v27, %s9758_s17 }
 0x6c6   : > { %v7127_v32 = vpop.f32.mrb[58].mxu1  ;;  %v7243_v58 = vpop.permute.xlu1 %7242 }
 0x6c7   : > { %v7129_v0 = vpop.f32.mrb[59].mxu1  ;;  %v7338_v44 = vmul.f32 %v9680_v7, %v7243_v58  ;;  %v16074_v23 = vsel %vm7145_vm13, %v4529_v9, %v7127_v32  ;;  %v4536_v13 = vpop.f32.mrb[60].mxu0  ;;  %v9686_v9 = vld [vmem:[#allocation3 + $0x30] sm:$0xff]  ;;  %v9687_v58 = vld [vmem:[#allocation3 + $0x38] sm:$0xff] }
 0x6c8   : > { %7300 = vrot.lane.b32.xlu1 %v16074_v23, %s9758_s17  ;;  %v4538_v37 = vpop.f32.mrb[61].mxu0 }
 0x6c9   : > { %7402 = vrot.lane.b32.xlu0 %v7338_v44, %s9759_s18  ;;  %v9688_v44 = vld [vmem:[#allocation3 + $0x40] sm:$0xff] }
 0x6ca   : > { %v7134_v47 = vpop.f32.mrb[60].mxu1  ;;  %v7245_v55 = vpop.permute.xlu1 %7244 }
 0x6cb   : > { %v7136_v24 = vpop.f32.mrb[61].mxu1  ;;  %v7339_v1 = vmul.f32 %v9681_v43, %v7245_v55  ;;  %v16081_v29 = vsel %vm7145_vm13, %v4536_v13, %v7134_v47  ;;  %v4543_v4 = vpop.f32.mrb[62].mxu0  ;;  %v9689_v47 = vld [vmem:[#allocation3 + $0x48] sm:$0xff]  ;;  %v9690_v43 = vld [vmem:[#allocation3 + $0x50] sm:$0xff] }
 0x6cc   : > { %v4545_v42 = vpop.f32.mrb[63].mxu0 }
 0x6cd   : > { %7404 = vrot.lane.b32.xlu1 %v7339_v1, %s9759_s18  ;;  %7302 = vrot.lane.b32.xlu0 %v16081_v29, %s9758_s17  ;;  %v9691_v42 = vld [vmem:[#allocation3 + $0x58] sm:$0xff] }
 0x6ce   : > { %v7141_v3 = vpop.f32.mrb[62].mxu1  ;;  %v7247_v49 = vpop.permute.xlu0 %7246 }
 0x6cf   : > { %v7143_v36 = vpop.f32.mrb[63].mxu1  ;;  %v7340_v17 = vmul.f32 %v9682_v16, %v7247_v49  ;;  %v16088_v50 = vsel %vm7145_vm13, %v4543_v4, %v7141_v3  ;;  %vm7190_vm13 = vcmp.gt.f32.partialorder %v15908_v18, 0.0  ;;  %v7545_v18 = vld [vmem:[#allocation4 + $0x78] sm:$0xff] }
 0x6d0   : > { %v9692_v36 = vld [vmem:[#allocation3 + $0x60] sm:$0xff] }
 0x6d1   : > { %7406 = vrot.lane.b32.xlu0 %v7340_v17, %s9759_s18  ;;  %7304 = vrot.lane.b32.xlu1 %v16088_v50, %s9758_s17 }
 0x6d2   : > { %v7249_v21 = vpop.permute.xlu1 %7248 }
 0x6d3   : > { %v7341_v26 = vmul.f32 %v9683_v20, %v7249_v21  ;;  %v9693_v21 = vld [vmem:[#allocation3 + $0x68] sm:$0xff] }
 0x6d5   : > { %7408 = vrot.lane.b32.xlu1 %v7341_v26, %s9759_s18 }
 0x6d6   : > { %v7251_v63 = vpop.permute.xlu0 %7250 }
 0x6d7   : > { %v7342_v39 = vmul.f32 %v9684_v41, %v7251_v63  ;;  %v9694_v63 = vld [vmem:[#allocation3 + $0x70] sm:$0xff] }
 0x6d9   : > { %7410 = vrot.lane.b32.xlu0 %v7342_v39, %s9759_s18 }
 0x6da   : > { %v7253_v12 = vpop.permute.xlu1 %7252 }
 0x6db   : > { %v7343_v14 = vmul.f32 %v9685_v35, %v7253_v12  ;;  %v9695_v12 = vld [vmem:[#allocation3 + $0x78] sm:$0xff] }
 0x6dd   : > { %7412 = vrot.lane.b32.xlu1 %v7343_v14, %s9759_s18 }
 0x6de   : > { %v7255_v61 = vpop.permute.xlu0 %7254 }
 0x6df   : > { %v7344_v28 = vmul.f32 %v9686_v9, %v7255_v61  ;;  %v9696_v61 = vld [vmem:[#allocation3 + $0x80] sm:$0xff] }
 0x6e1   : > { %7414 = vrot.lane.b32.xlu0 %v7344_v28, %s9759_s18 }
 0x6e2   : > { %v7257_v32 = vpop.permute.xlu1 %7256 }
 0x6e3   : > { %v7345_v0 = vmul.f32 %v9687_v58, %v7257_v32  ;;  %v9697_v32 = vld [vmem:[#allocation3 + $0x88] sm:$0xff] }
 0x6e5   : > { %7416 = vrot.lane.b32.xlu1 %v7345_v0, %s9759_s18 }
 0x6e6   : > { %v7259_v7 = vpop.permute.xlu0 %7258 }
 0x6e7   : > { %v7346_v13 = vmul.f32 %v9688_v44, %v7259_v7  ;;  %v9698_v7 = vld [vmem:[#allocation3 + $0x90] sm:$0xff] }
 0x6e9   : > { %7418 = vrot.lane.b32.xlu0 %v7346_v13, %s9759_s18 }
 0x6ea   : > { %v7261_v37 = vpop.permute.xlu1 %7260 }
 0x6eb   : > { %v7347_v55 = vmul.f32 %v9689_v47, %v7261_v37  ;;  %v9699_v37 = vld [vmem:[#allocation3 + $0x98] sm:$0xff] }
 0x6ed   : > { %7420 = vrot.lane.b32.xlu1 %v7347_v55, %s9759_s18 }
 0x6ee   : > { %v7263_v24 = vpop.permute.xlu0 %7262 }
 0x6ef   : > { %v7348_v1 = vmul.f32 %v9690_v43, %v7263_v24  ;;  %v9700_v24 = vld [vmem:[#allocation3 + $0xa0] sm:$0xff] }
 0x6f1   : > { %7422 = vrot.lane.b32.xlu0 %v7348_v1, %s9759_s18 }
 0x6f2   : > { %v7265_v4 = vpop.permute.xlu1 %7264 }
 0x6f3   : > { %v7349_v3 = vmul.f32 %v9691_v42, %v7265_v4  ;;  %v9701_v4 = vld [vmem:[#allocation3 + $0xa8] sm:$0xff] }
 0x6f5   : > { %7424 = vrot.lane.b32.xlu1 %v7349_v3, %s9759_s18 }
 0x6f6   : > { %v7267_v49 = vpop.permute.xlu0 %7266 }
 0x6f7   : > { %v7350_v16 = vmul.f32 %v9692_v36, %v7267_v49  ;;  %v9702_v49 = vld [vmem:[#allocation3 + $0xb0] sm:$0xff] }
 0x6f9   : > { %7426 = vrot.lane.b32.xlu0 %v7350_v16, %s9759_s18 }
 0x6fa   : > { %v7269_v17 = vpop.permute.xlu1 %7268 }
 0x6fb   : > { %v7351_v20 = vmul.f32 %v9693_v21, %v7269_v17  ;;  %v9703_v17 = vld [vmem:[#allocation3 + $0xb8] sm:$0xff] }
 0x6fd   : > { %7428 = vrot.lane.b32.xlu1 %v7351_v20, %s9759_s18 }
 0x6fe   : > { %v7271_v26 = vpop.permute.xlu0 %7270 }
 0x6ff   : > { %v7352_v41 = vmul.f32 %v9694_v63, %v7271_v26  ;;  %v9704_v26 = vld [vmem:[#allocation3 + $0xc0] sm:$0xff] }
 0x701   : > { %7430 = vrot.lane.b32.xlu0 %v7352_v41, %s9759_s18 }
 0x702   : > { %v7273_v39 = vpop.permute.xlu1 %7272 }
 0x703   : > { %v7353_v35 = vmul.f32 %v9695_v12, %v7273_v39  ;;  %v9705_v39 = vld [vmem:[#allocation3 + $0xc8] sm:$0xff] }
 0x705   : > { %7432 = vrot.lane.b32.xlu1 %v7353_v35, %s9759_s18 }
 0x706   : > { %v7275_v14 = vpop.permute.xlu0 %7274 }
 0x707   : > { %v7354_v9 = vmul.f32 %v9696_v61, %v7275_v14  ;;  %v9706_v14 = vld [vmem:[#allocation3 + $0xd0] sm:$0xff] }
 0x709   : > { %7434 = vrot.lane.b32.xlu0 %v7354_v9, %s9759_s18 }
 0x70a   : > { %v7277_v28 = vpop.permute.xlu1 %7276 }
 0x70b   : > { %v7355_v58 = vmul.f32 %v9697_v32, %v7277_v28  ;;  %v9707_v28 = vld [vmem:[#allocation3 + $0xd8] sm:$0xff] }
 0x70d   : > { %7436 = vrot.lane.b32.xlu1 %v7355_v58, %s9759_s18 }
 0x70e   : > { %v7279_v0 = vpop.permute.xlu0 %7278 }
 0x70f   : > { %v7356_v44 = vmul.f32 %v9698_v7, %v7279_v0  ;;  %v9708_v0 = vld [vmem:[#allocation3 + $0xe0] sm:$0xff] }
 0x711   : > { %7438 = vrot.lane.b32.xlu0 %v7356_v44, %s9759_s18 }
 0x712   : > { %v7281_v13 = vpop.permute.xlu1 %7280 }
 0x713   : > { %v7357_v47 = vmul.f32 %v9699_v37, %v7281_v13  ;;  %v7530_v13 = vld [vmem:[#allocation4] sm:$0xff]  ;;  %v9709_v37 = vld [vmem:[#allocation3 + $0xe8] sm:$0xff] }
 0x715   : > { %7440 = vrot.lane.b32.xlu1 %v7357_v47, %s9759_s18 }
 0x716   : > { %v7283_v55 = vpop.permute.xlu0 %7282 }
 0x717   : > { %v7358_v43 = vmul.f32 %v9700_v24, %v7283_v55 }
 0x719   : > { %7442 = vrot.lane.b32.xlu0 %v7358_v43, %s9759_s18 }
 0x71a   : > { %v7285_v1 = vpop.permute.xlu1 %7284 }
 0x71b   : > { %v7359_v42 = vmul.f32 %v9701_v4, %v7285_v1  ;;  %v7531_v1 = vld [vmem:[#allocation4 + $0x8] sm:$0xff] }
 0x71d   : > { %7444 = vrot.lane.b32.xlu1 %v7359_v42, %s9759_s18 }
 0x71e   : > { %v7287_v3 = vpop.permute.xlu0 %7286 }
 0x71f   : > { %v7360_v36 = vmul.f32 %v9702_v49, %v7287_v3  ;;  %v9710_v49 = vld [vmem:[#allocation3 + $0xf0] sm:$0xff] }
 0x721   : > { %7446 = vrot.lane.b32.xlu0 %v7360_v36, %s9759_s18 }
 0x722   : > { %v7289_v16 = vpop.permute.xlu1 %7288 }
 0x723   : > { %v7361_v21 = vmul.f32 %v9703_v17, %v7289_v16  ;;  %v7532_v17 = vld [vmem:[#allocation4 + $0x10] sm:$0xff] }
 0x725   : > { %7448 = vrot.lane.b32.xlu1 %v7361_v21, %s9759_s18 }
 0x726   : > { %v7291_v20 = vpop.permute.xlu0 %7290 }
 0x727   : > { %v7362_v63 = vmul.f32 %v9704_v26, %v7291_v20 }
 0x729   : > { %7450 = vrot.lane.b32.xlu0 %v7362_v63, %s9759_s18  ;;  %v9711_v63 = vld [vmem:[#allocation3 + $0xf8] sm:$0xff] }
 0x72a   : > { %v7293_v41 = vpop.permute.xlu1 %7292 }
 0x72b   : > { %v7363_v12 = vmul.f32 %v9705_v39, %v7293_v41  ;;  %v19159_v39 = vld [vmem:[#allocation9_spill] sm:$0xff] }
 0x72d   : > { %7452 = vrot.lane.b32.xlu1 %v7363_v12, %s9759_s18  ;;  %v7636_v12 = vrot.slane %v7631_v22, %v19159_v39 }
 0x72e   : > { %v7295_v35 = vpop.permute.xlu0 %7294 }
 0x72f   : > { %v7364_v61 = vmul.f32 %v9706_v14, %v7295_v35  ;;  %v19160_v35 = vld [vmem:[#allocation10_spill] sm:$0xff] }
 0x730   : > { %v7640_v14 = vrot.slane %v7631_v22, %v19160_v35 }
 0x731   : > { %7454 = vrot.lane.b32.xlu0 %v7364_v61, %s9759_s18  ;;  %v7533_v61 = vld [vmem:[#allocation4 + $0x18] sm:$0xff] }
 0x732   : > { %v7297_v9 = vpop.permute.xlu1 %7296 }
 0x733   : > { %v7365_v32 = vmul.f32 %v9707_v28, %v7297_v9 }
 0x735   : > { %7456 = vrot.lane.b32.xlu1 %v7365_v32, %s9759_s18  ;;  %v7644_v32 = vsel %vm19161_vm7, %v7636_v12, 0.0  ;;  %vm7195_vm7 = vcmp.gt.f32.partialorder %v15938_v11, 0.0  ;;  %v7550_v11 = vld [vmem:[#allocation4 + $0xa0] sm:$0xff] }
 0x736   : > { %v7299_v58 = vpop.permute.xlu0 %7298 }
 0x737   : > { %v7366_v7 = vmul.f32 %v9708_v0, %v7299_v58  ;;  %v7645_v58 = vsel %vm19162_vm0, %v7640_v14, 0.0  ;;  %v7534_v0 = vld [vmem:[#allocation4 + $0x20] sm:$0xff]  ;;  %vm7196_vm0 = vcmp.gt.f32.partialorder %v15944_v54, 0.0  ;;  %v7551_v54 = vld [vmem:[#allocation4 + $0xa8] sm:$0xff] }
 0x739   : > { %7458 = vrot.lane.b32.xlu1 %v7366_v7, %s9759_s18 }
 0x73a   : > { %v7301_v44 = vpop.permute.xlu1 %7300 }
 0x73b   : > { %v7367_v47 = vmul.f32 %v9709_v37, %v7301_v44  ;;  %v7403_v55 = vpop.permute.xlu0 %7402 }
 0x73c   : > { %v7498_v24 = vsel %vm7178_vm6, %v7403_v55, 0.0  ;;  %vm7191_vm6 = vcmp.gt.f32.partialorder %v15914_v45, 0.0  ;;  %v7546_v45 = vld [vmem:[#allocation4 + $0x80] sm:$0xff] }
 0x73d   : > { %v7562_v43 = vadd.f32 %v7530_v13, %v7498_v24  ;;  %7460 = vrot.lane.b32.xlu1 %v7367_v47, %s9759_s18  ;;  %v7646_v13 = vadd.f32 %v7645_v58, %v7644_v32  ;;  %v7535_v47 = vld [vmem:[#allocation4 + $0x28] sm:$0xff] }
 0x73f   : > { %7595 = vst.msk [vmem:[#allocation4] sm:$0xff] %vm508_vm9, %v7562_v43  ;;  %v7405_v4 = vpop.permute.xlu1 %7404  ;;  %v7303_v42 = vpop.permute.xlu0 %7302  ;;  %v7536_v43 = vld [vmem:[#allocation4 + $0x30] sm:$0xff] }
 0x740   : > { %v7499_v3 = vsel %vm7179_vm1, %v7405_v4, 0.0  ;;  %v7368_v36 = vmul.f32 %v9710_v49, %v7303_v42  ;;  %v7537_v42 = vld [vmem:[#allocation4 + $0x38] sm:$0xff]  ;;  %vm7192_vm1 = vcmp.gt.f32.partialorder %v15920_v19, 0.0  ;;  %v7547_v19 = vld [vmem:[#allocation4 + $0x88] sm:$0xff] }
 0x741   : > { %v7563_v16 = vadd.f32 %v7531_v1, %v7499_v3 }
 0x742   : > { %7462 = vrot.lane.b32.xlu1 %v7368_v36, %s9759_s18  ;;  %v7538_v36 = vld [vmem:[#allocation4 + $0x40] sm:$0xff] }
 0x743   : > { %7596 = vst.msk [vmem:[#allocation4 + $0x8] sm:$0xff] %vm508_vm9, %v7563_v16  ;;  %v7407_v21 = vpop.permute.xlu0 %7406  ;;  %v7305_v20 = vpop.permute.xlu1 %7304 }
 0x744   : > { %v7500_v26 = vsel %vm7180_vm14, %v7407_v21, 0.0  ;;  %v7369_v41 = vmul.f32 %v9711_v63, %v7305_v20  ;;  %vm7193_vm14 = vcmp.gt.f32.partialorder %v15926_v59, 0.0  ;;  %v7548_v59 = vld [vmem:[#allocation4 + $0x90] sm:$0xff] }
 0x745   : > { %v7564_v25 = vadd.f32 %v7532_v17, %v7500_v26 }
 0x746   : > { %7464 = vrot.lane.b32.xlu1 %v7369_v41, %s9759_s18 }
 0x747   : > { %7597 = vst.msk [vmem:[#allocation4 + $0x10] sm:$0xff] %vm508_vm9, %v7564_v25  ;;  %v7409_v9 = vpop.permute.xlu1 %7408 }
 0x748   : > { %v7501_v28 = vsel %vm7181_vm12, %v7409_v9, 0.0  ;;  %vm7194_vm12 = vcmp.gt.f32.partialorder %v15932_v46, 0.0  ;;  %v7549_v46 = vld [vmem:[#allocation4 + $0x98] sm:$0xff] }
 0x749   : > { %v7565_v33 = vadd.f32 %v7533_v61, %v7501_v28 }
 0x74b   : > { %7598 = vst.msk [vmem:[#allocation4 + $0x18] sm:$0xff] %vm508_vm9, %v7565_v33  ;;  %v7411_v7 = vpop.permute.xlu0 %7410 }
 0x74c   : > { %v7502_v44 = vsel %vm7182_vm15, %v7411_v7, 0.0  ;;  %vm7197_vm15 = vcmp.gt.f32.partialorder %v15950_v30, 0.0  ;;  %v7552_v30 = vld [vmem:[#allocation4 + $0xb0] sm:$0xff] }
 0x74d   : > { %v7566_v37 = vadd.f32 %v7534_v0, %v7502_v44 }
 0x74f   : > { %7599 = vst.msk [vmem:[#allocation4 + $0x20] sm:$0xff] %vm508_vm9, %v7566_v37  ;;  %v7413_v5 = vpop.permute.xlu1 %7412 }
 0x750   : > { %v7503_v55 = vsel %vm7183_vm11, %v7413_v5, 0.0  ;;  %7647 = vadd.xlane.f32.xlu0 %v7646_v13  ;;  %vm7198_vm11 = vcmp.gt.f32.partialorder %v15956_v34, 0.0 }
 0x751   : > { %v7567_v24 = vadd.f32 %v7535_v47, %v7503_v55 }
 0x753   : > { %7600 = vst.msk [vmem:[#allocation4 + $0x28] sm:$0xff] %vm508_vm9, %v7567_v24  ;;  %v7415_v1 = vpop.permute.xlu0 %7414 }
 0x754   : > { %v7504_v31 = vsel %vm7184_vm8, %v7415_v1, 0.0  ;;  %vm7199_vm8 = vcmp.gt.f32.partialorder %v15962_v57, 0.0 }
 0x755   : > { %v7568_v4 = vadd.f32 %v7536_v43, %v7504_v31 }
 0x757   : > { %7601 = vst.msk [vmem:[#allocation4 + $0x30] sm:$0xff] %vm508_vm9, %v7568_v4  ;;  %v7417_v3 = vpop.permute.xlu1 %7416 }
 0x758   : > { %v7505_v49 = vsel %vm7185_vm2, %v7417_v3, 0.0  ;;  %vm7200_vm2 = vcmp.gt.f32.partialorder %v15968_v62, 0.0 }
 0x759   : > { %v7569_v6 = vadd.f32 %v7537_v42, %v7505_v49 }
 0x75b   : > { %7602 = vst.msk [vmem:[#allocation4 + $0x38] sm:$0xff] %vm508_vm9, %v7569_v6  ;;  %v7419_v16 = vpop.permute.xlu0 %7418 }
 0x75c   : > { %v7506_v17 = vsel %vm7186_vm10, %v7419_v16, 0.0  ;;  %vm7201_vm10 = vcmp.gt.f32.partialorder %v15974_v56, 0.0 }
 0x75d   : > { %v7570_v22 = vadd.f32 %v7538_v36, %v7506_v17 }
 0x75f   : > { %7603 = vst.msk [vmem:[#allocation4 + $0x40] sm:$0xff] %vm508_vm9, %v7570_v22  ;;  %v7421_v21 = vpop.permute.xlu1 %7420 }
 0x760   : > { %v7507_v20 = vsel %vm7187_vm3, %v7421_v21, 0.0  ;;  %vm7202_vm3 = vcmp.gt.f32.partialorder %v15980_v15, 0.0 }
 0x761   : > { %v7571_v26 = vadd.f32 %v7539_v51, %v7507_v20 }
 0x763   : > { %7604 = vst.msk [vmem:[#allocation4 + $0x48] sm:$0xff] %vm508_vm9, %v7571_v26  ;;  %v7423_v63 = vpop.permute.xlu0 %7422 }
 0x764   : > { %v7508_v41 = vsel %vm7188_vm4, %v7423_v63, 0.0  ;;  %v7553_v63 = vld [vmem:[#allocation4 + $0xb8] sm:$0xff]  ;;  %vm7203_vm4 = vcmp.gt.f32.partialorder %v15986_v52, 0.0 }
 0x765   : > { %v7572_v25 = vadd.f32 %v7540_v48, %v7508_v41  ;;  %v7654_v48 = vld [vmem:[#allocation4 + $0x8] sm:$0xff]  ;;  %v7653_v41 = vld [vmem:[#allocation4] sm:$0xff] }
 0x767   : > { %7605 = vst.msk [vmem:[#allocation4 + $0x50] sm:$0xff] %vm508_vm9, %v7572_v25  ;;  %v7425_v39 = vpop.permute.xlu1 %7424  ;;  %v7655_v25 = vld [vmem:[#allocation4 + $0x10] sm:$0xff] }
 0x768   : > { %v7509_v12 = vsel %vm7189_vm5, %v7425_v39, 0.0  ;;  %v7688_v62 = vsel %vm508_vm9, %v7655_v25, 0.0  ;;  %vm7204_vm5 = vcmp.gt.f32.partialorder %v15992_v40, 0.0 }
 0x769   : > { %v7573_v35 = vadd.f32 %v7541_v8, %v7509_v12  ;;  %v7686_v8 = vsel %vm508_vm9, %v7654_v48, 0.0  ;;  %v7656_v12 = vld [vmem:[#allocation4 + $0x18] sm:$0xff] }
 0x76a   : > { %v7690_v56 = vsel %vm508_vm9, %v7656_v12, 0.0 }
 0x76b   : > { %7606 = vst.msk [vmem:[#allocation4 + $0x58] sm:$0xff] %vm508_vm9, %v7573_v35  ;;  %v7427_v14 = vpop.permute.xlu0 %7426 }
 0x76c   : > { %v7510_v61 = vsel %vm7190_vm13, %v7427_v14, 0.0  ;;  %v7554_v14 = vld [vmem:[#allocation4 + $0xc0] sm:$0xff]  ;;  %vm7205_vm13 = vcmp.gt.f32.partialorder %v16062_v53, 0.0 }
 0x76d   : > { %v7574_v9 = vadd.f32 %v7542_v38, %v7510_v61  ;;  %v7685_v38 = vsel %vm508_vm9, %v7653_v41, 0.0  ;;  %v7559_v41 = vld [vmem:[#allocation4 + $0xe8] sm:$0xff] }
 0x76e   : > { %v7687_v61 = vadd.f32 %v7686_v8, %v7685_v38 }
 0x76f   : > { %7607 = vst.msk [vmem:[#allocation4 + $0x60] sm:$0xff] %vm508_vm9, %v7574_v9  ;;  %v7429_v28 = vpop.permute.xlu1 %7428  ;;  %v7657_v9 = vld [vmem:[#allocation4 + $0x20] sm:$0xff] }
 0x770   : > { %v7511_v33 = vsel %vm7191_vm6, %v7429_v28, 0.0  ;;  %vm7206_vm6 = vcmp.gt.f32.partialorder %v16068_v27, 0.0 }
 0x771   : > { %v7575_v32 = vadd.f32 %v7543_v60, %v7511_v33  ;;  %v7689_v33 = vadd.f32 %v7688_v62, %v7687_v61 }
 0x773   : > { %7608 = vst.msk [vmem:[#allocation4 + $0x68] sm:$0xff] %vm508_vm9, %v7575_v32  ;;  %v7431_v58 = vpop.permute.xlu0 %7430  ;;  %v7658_v32 = vld [vmem:[#allocation4 + $0x28] sm:$0xff] }
 0x774   : > { %v7512_v0 = vsel %vm7192_vm1, %v7431_v58, 0.0  ;;  %v7692_v58 = vsel %vm508_vm9, %v7657_v9, 0.0  ;;  %vm7207_vm1 = vcmp.gt.f32.partialorder %v16074_v23, 0.0  ;;  %v7560_v9 = vld [vmem:[#allocation4 + $0xf0] sm:$0xff] }
 0x775   : > { %v7576_v7 = vadd.f32 %v7544_v10, %v7512_v0  ;;  %v7555_v0 = vld [vmem:[#allocation4 + $0xc8] sm:$0xff] }
 0x777   : > { %7609 = vst.msk [vmem:[#allocation4 + $0x70] sm:$0xff] %vm508_vm9, %v7576_v7  ;;  %v7433_v44 = vpop.permute.xlu1 %7432  ;;  %v7691_v7 = vadd.f32 %v7690_v56, %v7689_v33 }
 0x778   : > { %v7513_v13 = vsel %vm7193_vm14, %v7433_v44, 0.0  ;;  %vm7208_vm14 = vcmp.gt.f32.partialorder %v16081_v29, 0.0 }
 0x779   : > { %v7577_v37 = vadd.f32 %v7545_v18, %v7513_v13  ;;  %v7659_v18 = vld [vmem:[#allocation4 + $0x30] sm:$0xff]  ;;  %v7694_v13 = vsel %vm508_vm9, %v7658_v32, 0.0 }
 0x77a   : > { %v7666_v48 = vld [vmem:[#allocation4 + $0x68] sm:$0xff] }
 0x77b   : > { %7610 = vst.msk [vmem:[#allocation4 + $0x78] sm:$0xff] %vm508_vm9, %v7577_v37  ;;  %v7435_v47 = vpop.permute.xlu0 %7434  ;;  %v7693_v37 = vadd.f32 %v7692_v58, %v7691_v7  ;;  %v7561_v7 = vld [vmem:[#allocation4 + $0xf8] sm:$0xff] }
 0x77c   : > { %v7514_v5 = vsel %vm7194_vm12, %v7435_v47, 0.0  ;;  %vm7209_vm12 = vcmp.gt.f32.partialorder %v16088_v50, 0.0 }
 0x77d   : > { %v7578_v55 = vadd.f32 %v7546_v45, %v7514_v5  ;;  %v7660_v45 = vld [vmem:[#allocation4 + $0x38] sm:$0xff]  ;;  %v7696_v5 = vsel %vm508_vm9, %v7659_v18, 0.0 }
 0x77f   : > { %7611 = vst.msk [vmem:[#allocation4 + $0x80] sm:$0xff] %vm508_vm9, %v7578_v55  ;;  %v7437_v24 = vpop.permute.xlu1 %7436  ;;  %v7556_v55 = vld [vmem:[#allocation4 + $0xd0] sm:$0xff] }
 0x780   : > { %v7515_v43 = vsel %vm7195_vm7, %v7437_v24, 0.0  ;;  %v7661_v24 = vld [vmem:[#allocation4 + $0x40] sm:$0xff] }
 0x781   : > { %v7579_v1 = vadd.f32 %v7547_v19, %v7515_v43  ;;  %v7695_v19 = vadd.f32 %v7694_v13, %v7693_v37 }
 0x783   : > { %7612 = vst.msk [vmem:[#allocation4 + $0x88] sm:$0xff] %vm508_vm9, %v7579_v1  ;;  %v7439_v31 = vpop.permute.xlu0 %7438  ;;  %v7698_v1 = vsel %vm508_vm9, %v7660_v45, 0.0 }
 0x784   : > { %v7516_v4 = vsel %vm7196_vm0, %v7439_v31, 0.0  ;;  %v7662_v31 = vld [vmem:[#allocation4 + $0x48] sm:$0xff]  ;;  %vm7761_vm0 = vcmask 16400  }
 0x785   : > { %v7580_v42 = vadd.f32 %v7548_v59, %v7516_v4  ;;  %v7697_v59 = vadd.f32 %v7696_v5, %v7695_v19 }
 0x786   : > { %v7669_v61 = vld [vmem:[#allocation4 + $0x80] sm:$0xff] }
 0x787   : > { %7613 = vst.msk [vmem:[#allocation4 + $0x90] sm:$0xff] %vm508_vm9, %v7580_v42  ;;  %v7441_v3 = vpop.permute.xlu1 %7440  ;;  %v7700_v42 = vsel %vm508_vm9, %v7661_v24, 0.0  ;;  %v7716_v32 = vsel %vm508_vm9, %v7669_v61, 0.0 }
 0x788   : > { %v7517_v49 = vsel %vm7197_vm15, %v7441_v3, 0.0  ;;  %v7699_v3 = vadd.f32 %v7698_v1, %v7697_v59 }
 0x789   : > { %v7581_v6 = vadd.f32 %v7549_v46, %v7517_v49  ;;  %v7557_v46 = vld [vmem:[#allocation4 + $0xd8] sm:$0xff]  ;;  %v7663_v49 = vld [vmem:[#allocation4 + $0x50] sm:$0xff] }
 0x78b   : > { %7614 = vst.msk [vmem:[#allocation4 + $0x98] sm:$0xff] %vm508_vm9, %v7581_v6  ;;  %v7443_v36 = vpop.permute.xlu0 %7442 }
 0x78c   : > { %v7518_v16 = vsel %vm7198_vm11, %v7443_v36, 0.0  ;;  %v7701_v36 = vadd.f32 %v7700_v42, %v7699_v3 }
 0x78d   : > { %v7582_v17 = vadd.f32 %v7550_v11, %v7518_v16  ;;  %v7702_v11 = vsel %vm508_vm9, %v7662_v31, 0.0  ;;  %v7664_v16 = vld [vmem:[#allocation4 + $0x58] sm:$0xff] }
 0x78f   : > { %7615 = vst.msk [vmem:[#allocation4 + $0xa0] sm:$0xff] %vm508_vm9, %v7582_v17  ;;  %v7445_v22 = vpop.permute.xlu1 %7444 }
 0x790   : > { %v7519_v51 = vsel %vm7199_vm8, %v7445_v22, 0.0  ;;  %v7558_v22 = vld [vmem:[#allocation4 + $0xe0] sm:$0xff] }
 0x791   : > { %v7583_v21 = vadd.f32 %v7551_v54, %v7519_v51  ;;  %v7704_v54 = vsel %vm508_vm9, %v7663_v49, 0.0  ;;  %v7703_v51 = vadd.f32 %v7702_v11, %v7701_v36 }
 0x793   : > { %7616 = vst.msk [vmem:[#allocation4 + $0xa8] sm:$0xff] %vm508_vm9, %v7583_v21  ;;  %v7447_v20 = vpop.permute.xlu0 %7446  ;;  %v7665_v21 = vld [vmem:[#allocation4 + $0x60] sm:$0xff] }
 0x794   : > { %v7520_v26 = vsel %vm7200_vm2, %v7447_v20, 0.0  ;;  %v7706_v20 = vsel %vm508_vm9, %v7664_v16, 0.0 }
 0x795   : > { %v7584_v34 = vadd.f32 %v7552_v30, %v7520_v26  ;;  %v7705_v26 = vadd.f32 %v7704_v54, %v7703_v51 }
 0x796   : > { %v7673_v5 = vld [vmem:[#allocation4 + $0xa0] sm:$0xff] }
 0x797   : > { %7617 = vst.msk [vmem:[#allocation4 + $0xb0] sm:$0xff] %vm508_vm9, %v7584_v34  ;;  %v7449_v57 = vpop.permute.xlu1 %7448  ;;  %v7707_v25 = vadd.f32 %v7706_v20, %v7705_v26 }
 0x798   : > { %v7521_v39 = vsel %vm7201_vm10, %v7449_v57, 0.0  ;;  %v7667_v57 = vld [vmem:[#allocation4 + $0x70] sm:$0xff] }
 0x799   : > { %v7585_v35 = vadd.f32 %v7553_v63, %v7521_v39  ;;  %v7708_v63 = vsel %vm508_vm9, %v7665_v21, 0.0  ;;  %v7710_v39 = vsel %vm508_vm9, %v7666_v48, 0.0  ;;  %v7712_v62 = vsel %vm508_vm9, %v7667_v57, 0.0 }
 0x79a   : > { %v7709_v12 = vadd.f32 %v7708_v63, %v7707_v25  ;;  %v7674_v24 = vld [vmem:[#allocation4 + $0xa8] sm:$0xff] }
 0x79b   : > { %7618 = vst.msk [vmem:[#allocation4 + $0xb8] sm:$0xff] %vm508_vm9, %v7585_v35  ;;  %v7451_v60 = vpop.permute.xlu0 %7450  ;;  %v7668_v35 = vld [vmem:[#allocation4 + $0x78] sm:$0xff]  ;;  %v7726_v50 = vsel %vm508_vm9, %v7674_v24, 0.0 }
 0x79c   : > { %v7522_v28 = vsel %vm7202_vm3, %v7451_v60, 0.0  ;;  %v7714_v60 = vsel %vm508_vm9, %v7668_v35, 0.0 }
 0x79d   : > { %v7586_v10 = vadd.f32 %v7554_v14, %v7522_v28  ;;  %v7711_v14 = vadd.f32 %v7710_v39, %v7709_v12  ;;  %v7670_v28 = vld [vmem:[#allocation4 + $0x88] sm:$0xff] }
 0x79e   : > { %v7718_v18 = vsel %vm508_vm9, %v7670_v28, 0.0 }
 0x79f   : > { %7619 = vst.msk [vmem:[#allocation4 + $0xc0] sm:$0xff] %vm508_vm9, %v7586_v10  ;;  %v7453_v44 = vpop.permute.xlu1 %7452  ;;  %v7713_v23 = vadd.f32 %v7712_v62, %v7711_v14 }
 0x7a0   : > { %v7523_v15 = vsel %vm7203_vm4, %v7453_v44, 0.0 }
 0x7a1   : > { %v7587_v47 = vadd.f32 %v7555_v0, %v7523_v15  ;;  %v7715_v58 = vadd.f32 %v7714_v60, %v7713_v23  ;;  %v7671_v0 = vld [vmem:[#allocation4 + $0x90] sm:$0xff]  ;;  %v7672_v15 = vld [vmem:[#allocation4 + $0x98] sm:$0xff] }
 0x7a2   : > { %v7720_v37 = vsel %vm508_vm9, %v7671_v0, 0.0  ;;  %v7676_v31 = vld [vmem:[#allocation4 + $0xb8] sm:$0xff] }
 0x7a3   : > { %7620 = vst.msk [vmem:[#allocation4 + $0xc8] sm:$0xff] %vm508_vm9, %v7587_v47  ;;  %v7455_v43 = vpop.permute.xlu0 %7454  ;;  %v7717_v13 = vadd.f32 %v7716_v32, %v7715_v58  ;;  %v7730_v3 = vsel %vm508_vm9, %v7676_v31, 0.0 }
 0x7a4   : > { %v7524_v52 = vsel %vm7204_vm5, %v7455_v43, 0.0  ;;  %v7724_v43 = vsel %vm508_vm9, %v7673_v5, 0.0 }
 0x7a5   : > { %v7588_v4 = vadd.f32 %v7556_v55, %v7524_v52  ;;  %v7719_v47 = vadd.f32 %v7718_v18, %v7717_v13  ;;  %v7722_v55 = vsel %vm508_vm9, %v7672_v15, 0.0  ;;  %v7675_v52 = vld [vmem:[#allocation4 + $0xb0] sm:$0xff] }
 0x7a7   : > { %7621 = vst.msk [vmem:[#allocation4 + $0xd0] sm:$0xff] %vm508_vm9, %v7588_v4  ;;  %v7457_v6 = vpop.permute.xlu1 %7456  ;;  %v7721_v19 = vadd.f32 %v7720_v37, %v7719_v47  ;;  %v7728_v4 = vsel %vm508_vm9, %v7675_v52, 0.0 }
 0x7a8   : > { %v7525_v40 = vsel %vm7205_vm13, %v7457_v6, 0.0 }
 0x7a9   : > { %v7589_v17 = vadd.f32 %v7557_v46, %v7525_v40  ;;  %v7723_v1 = vadd.f32 %v7722_v55, %v7721_v19  ;;  %v7677_v46 = vld [vmem:[#allocation4 + $0xc0] sm:$0xff] }
 0x7aa   : > { %v7678_v49 = vld [vmem:[#allocation4 + $0xc8] sm:$0xff]  ;;  %v7732_v11 = vsel %vm508_vm9, %v7677_v46, 0.0 }
 0x7ab   : > { %7622 = vst.msk [vmem:[#allocation4 + $0xd8] sm:$0xff] %vm508_vm9, %v7589_v17  ;;  %v7459_v30 = vpop.permute.xlu1 %7458  ;;  %v7725_v59 = vadd.f32 %v7724_v43, %v7723_v1  ;;  %v7734_v16 = vsel %vm508_vm9, %v7678_v49, 0.0 }
 0x7ac   : > { %v7526_v53 = vsel %vm7206_vm6, %v7459_v30, 0.0 }
 0x7ad   : > { %v7590_v34 = vadd.f32 %v7558_v22, %v7526_v53  ;;  %v7727_v42 = vadd.f32 %v7726_v50, %v7725_v59 }
 0x7ae   : > { %v7679_v40 = vld [vmem:[#allocation4 + $0xd0] sm:$0xff] }
 0x7af   : > { %7623 = vst.msk [vmem:[#allocation4 + $0xe0] sm:$0xff] %vm508_vm9, %v7590_v34  ;;  %v7461_v8 = vpop.permute.xlu1 %7460  ;;  %v7729_v6 = vadd.f32 %v7728_v4, %v7727_v42  ;;  %v7736_v22 = vsel %vm508_vm9, %v7679_v40, 0.0 }
 0x7b0   : > { %v7527_v27 = vsel %vm7207_vm1, %v7461_v8, 0.0 }
 0x7b1   : > { %v7591_v38 = vadd.f32 %v7559_v41, %v7527_v27  ;;  %v7731_v36 = vadd.f32 %v7730_v3, %v7729_v6 }
 0x7b2   : > { %v7680_v17 = vld [vmem:[#allocation4 + $0xd8] sm:$0xff] }
 0x7b3   : > { %7624 = vst.msk [vmem:[#allocation4 + $0xe8] sm:$0xff] %vm508_vm9, %v7591_v38  ;;  %v7733_v54 = vadd.f32 %v7732_v11, %v7731_v36  ;;  %v7738_v30 = vsel %vm508_vm9, %v7680_v17, 0.0 }
 0x7b4   : > { %v7463_v56 = vpop.permute.xlu1 %7462 }
 0x7b5   : > { %v7528_v33 = vsel %vm7208_vm14, %v7463_v56, 0.0  ;;  %v7735_v21 = vadd.f32 %v7734_v16, %v7733_v54 }
 0x7b6   : > { %v7592_v10 = vadd.f32 %v7560_v9, %v7528_v33  ;;  %v7681_v51 = vld [vmem:[#allocation4 + $0xe0] sm:$0xff] }
 0x7b7   : > { %v7737_v53 = vadd.f32 %v7736_v22, %v7735_v21  ;;  %v7740_v26 = vsel %vm508_vm9, %v7681_v51, 0.0 }
 0x7b8   : > { %7625 = vst.msk [vmem:[#allocation4 + $0xf0] sm:$0xff] %vm508_vm9, %v7592_v10  ;;  %v7465_v44 = vpop.permute.xlu1 %7464 }
 0x7b9   : > { %v7529_v29 = vsel %vm7209_vm12, %v7465_v44, 0.0  ;;  %v7739_v34 = vadd.f32 %v7738_v30, %v7737_v53 }
 0x7ba   : > { %v7593_v45 = vadd.f32 %v7561_v7, %v7529_v29  ;;  %v7682_v20 = vld [vmem:[#allocation4 + $0xe8] sm:$0xff] }
 0x7bb   : > { %v7742_v63 = vsel %vm508_vm9, %v7682_v20, 0.0  ;;  %v7741_v25 = vadd.f32 %v7740_v26, %v7739_v34 }
 0x7bc   : > { %7626 = vst.msk [vmem:[#allocation4 + $0xf8] sm:$0xff] %vm508_vm9, %v7593_v45 }
 0x7bd   : > { %v7743_v8 = vadd.f32 %v7742_v63, %v7741_v25 }
 0x7bf   : > { %v7683_v48 = vld [vmem:[#allocation4 + $0xf0] sm:$0xff] }
 0x7c0   : > { %v7744_v57 = vsel %vm508_vm9, %v7683_v48, 0.0 }
 0x7c1   : > { %v7745_v27 = vadd.f32 %v7744_v57, %v7743_v8 }
 0x7c3   : > { %v7684_v41 = vld [vmem:[#allocation4 + $0xf8] sm:$0xff] }
 0x7c4   : > { %v7746_v39 = vsel %vm508_vm9, %v7684_v41, 0.0  ;;  %vm7756_vm9 = vcmask 8192  }
 0x7c5   : > { %v7747_v12 = vadd.f32 %v7746_v39, %v7745_v27 }
 0x7c7   : > { %v7748_v35 = vrot.slane %v7747_v12, 4 }
 0x7c9   : > { %v7749_v14 = vadd.f32 %v7748_v35, %v7747_v12 }
 0x7cb   : > { %v7750_v60 = vrot.slane %v7749_v14, 2 }
 0x7cd   : > { %v7751_v23 = vadd.f32 %v7750_v60, %v7749_v14 }
 0x7cf   : > { %v7752_v28 = vrot.slane %v7751_v23, 1 }
 0x7d1   : > { %v7753_v33 = vadd.f32 %v7752_v28, %v7751_v23 }
 0x7dd   : > { %v7648_v38 = vpop.xlane.xlu0 %7647 }
 0x7de   : > { %v8369_v62 = vadd.f32 -1.0, %v7648_v38  ;;  %vm7758_vm7 = vcmp.ge.f32.partialorder %v7648_v38, 2.0 }
 0x7df   : > { %v8370_v58 = vsel %vm7758_vm7, 1.0, %v19158_v2 }
 0x7e0   : > { %v7650_v61 = vmul.f32 %v8369_v62, %v7648_v38 }
 0x7e2   : > { %v7651_v9 = vmul.f32 0.5, %v7650_v61 }
 0x7e4   : > { %v7652_v56 = vmax.f32 %v7651_v9, 1.0 }
 0x7e6   : > { %9673 = vrcp.f32 %v7652_v56 }
 0x7f0   : > { %v9674_v32 = vpop.eup %9673 }
 0x7f1   : > { %v7755_v10 = vmul.f32 %v9674_v32, %v7753_v33 }
 0x7f3   : > { %7757 = vst.msk [vmem:[%s219_s24] sm:$0x1] %vm7756_vm9, %v7755_v10 }
 0x7f4   : > { %7762 = vst.msk [vmem:[%s219_s24] sm:$0x1] %vm7761_vm0, %v8370_v58 }
 0x7f5 PF: > { %s20_s22 = sadd.s32 1, %s9748_s22   ;;  %s19163_s20 = smov %s9744_s21 }
 0x7f6   : > { %p17_p10 = scmp.ge.s32.totalorder %s20_s22, 4   ;;  %s19164_s21 = smov %s19166_s0 }
 0x7f8   :  { %19 = sbr.rel (!%p17_p10) target bundleno = 17 (0x11), region = 86 }

</bundles_post_ra>
